<compile_context>
chip_gen: v6e
topology: v6e:2x2x1
jax: 0.10.0
libtpu: 0.0.40
codegen_flags: <defaults>
</compile_context>

<pallas_src>
import jax
import jax.numpy as jnp
from jax import lax
from jax.experimental import pallas as pl
from jax.experimental.pallas import tpu as pltpu


def _argmax_last(x, m=None, keepdims=False):
    # First-occurrence argmax along the last axis via (max + iota); `m` lets the
    # caller pass an already-computed max so the XLU reduce is not repeated.
    if m is None:
        m = jnp.max(x, axis=-1, keepdims=True)
    elif m.ndim == x.ndim - 1:
        m = m[..., None]
    idx = lax.broadcasted_iota(jnp.int32, x.shape, x.ndim - 1)
    cand = jnp.where(x == m, idx, jnp.iinfo(jnp.int32).max)
    return jnp.min(cand, axis=-1, keepdims=keepdims).astype(jnp.int32)


# ----------------------------------------------------------------------------
# Fused kernel: FC + log-softmax focal loss + CRF forward + Viterbi decode.
# One grid step processes TILE_B batch elements over all S time steps.
# ----------------------------------------------------------------------------
def fused_kernel(x_ref, w_ref, b_ref, tag_ref, mask_ref, transT_ref,
                 stats_ref, path_ref, bp_ref):
    f32 = jnp.float32
    TB, S = path_ref.shape                     # static tile sizes
    C = w_ref.shape[1]

    # ----------------- FC: bf16 MXU matmul, f32 accumulation ----------------
    logits = jnp.dot(x_ref[...], w_ref[...],
                     preferred_element_type=f32) + b_ref[...]      # (S*TB, C)

    # Per-token softmax log-partition (log-softmax path: no probs, no recip).
    mx = jnp.max(logits, axis=-1, keepdims=True)
    logZ_tok = mx + jnp.log(jnp.sum(jnp.exp(logits - mx), axis=-1, keepdims=True))

    idx_c = lax.broadcasted_iota(jnp.int32, (TB, C), 1)
    transT = transT_ref[...]                                       # (C, C) [to, from]
    transT_b = jnp.broadcast_to(transT, (TB, C, C))                # hoisted broadcast

    def step_inputs(t):
        sl = slice(t * TB, (t + 1) * TB)                           # static, aligned
        e_t = logits[sl, :]                                        # (TB, C)
        lz_t = logZ_tok[sl, :]                                     # (TB, 1)
        tag_t = tag_ref[:, t:t + 1]                                # (TB, 1) int32
        m_t = mask_ref[:, t:t + 1]                                 # (TB, 1) f32
        oh_t = (tag_t == idx_c).astype(f32)                        # (TB, C)
        return e_t, lz_t, m_t, oh_t

    def focal_cost(gold_logit, lz_t):
        p = jnp.exp(gold_logit - lz_t)                             # softmax prob of gold tag
        q = 1.0 - jnp.clip(p, 0.01, 0.99)
        return -(q * q) * jnp.log(p + 1e-8)

    # ------------------------------ t = 0 -----------------------------------
    e_p, lz_p, m_p, oh_p = step_inputs(0)
    gold_p = jnp.sum(e_p * oh_p, axis=-1, keepdims=True)           # (TB, 1)
    f_num = focal_cost(gold_p, lz_p) * m_p
    f_den = m_p
    num = gold_p * m_p                                             # gold-path score
    alpha = e_p                                                    # log-partition state
    vit = e_p                                                      # Viterbi state

    # ---- t = 1 .. S-1: focal + gold path + forward + Viterbi, interleaved ---
    for t in range(1, S):
        e_t, lz_t, m_t, oh_t = step_inputs(t)
        gold_t = jnp.sum(e_t * oh_t, axis=-1, keepdims=True)

        # focal (fc_nll) accumulation
        f_num = f_num + focal_cost(gold_t, lz_t) * m_t
        f_den = f_den + m_t

        # gold transition via one-hot VPU select (no MXU dot on the crit path)
        sel = jnp.sum(transT[None, :, :] * oh_p[:, None, :], axis=-1)   # (TB, C_to)
        trans_gold = jnp.sum(sel * oh_t, axis=-1, keepdims=True)
        num = num + (gold_t + trans_gold) * m_t

        valid = m_t > 0.0

        # log-partition recursion (reduce over 'from' on the lane axis)
        sa = alpha[:, None, :] + transT_b                          # (TB, Cto, Cfrom)
        m2 = jnp.max(sa, axis=-1)
        lse = m2 + jnp.log(jnp.sum(jnp.exp(sa - m2[:, :, None]), axis=-1))
        alpha = jnp.where(valid, lse + e_t, alpha)

        # Viterbi recursion (reuse `best` for the argmax -> one XLU reduce only)
        sv = vit[:, None, :] + transT_b
        best = jnp.max(sv, axis=-1)                                # (TB, C)
        bp = _argmax_last(sv, m=best)                              # (TB, C) int32
        vit = jnp.where(valid, best + e_t, vit)
        bp_ref[t - 1, :, :] = jnp.where(valid, bp, idx_c)          # identity if padded

        oh_p = oh_t

    # ------------------------- per-batch outputs ----------------------------
    ma = jnp.max(alpha, axis=-1, keepdims=True)
    logZ = ma + jnp.log(jnp.sum(jnp.exp(alpha - ma), axis=-1, keepdims=True))
    llh = num - logZ                                               # (TB, 1)
    focal_b = f_num / jnp.maximum(f_den, 1e-9)                     # guard all-padded column

    vscore = jnp.max(vit, axis=-1, keepdims=True)                  # (TB, 1)
    cur = _argmax_last(vit, m=vscore, keepdims=True)               # (TB, 1)

    # Viterbi backtrack; one bulk (TB, S) path store.
    iota_s = lax.broadcasted_iota(jnp.int32, (TB, S), 1)
    path = jnp.where(iota_s == (S - 1), cur, jnp.zeros((TB, S), jnp.int32))
    for t in range(S - 1, 0, -1):
        bp_t = bp_ref[t - 1, :, :]
        prev = jnp.sum(jnp.where(idx_c == cur, bp_t, 0), axis=-1, keepdims=True)
        path = jnp.where(iota_s == (t - 1), prev, path)
        cur = prev
    path_ref[...] = path

    # Packed per-batch stats: [focal_cost, log-likelihood, viterbi score].
    iota3 = lax.broadcasted_iota(jnp.int32, (TB, 3), 1)
    stats_ref[...] = jnp.where(iota3 == 0, focal_b,
                               jnp.where(iota3 == 1, llh, vscore))


def fused_forward(x2, w, b, tag_bm, mask_bm, transT, *, S, B, tile_b):
    num_tiles = B // tile_b
    E = x2.shape[-1]
    C = w.shape[1]
    return pl.pallas_call(
        fused_kernel,
        out_shape=(jax.ShapeDtypeStruct((B, 3), jnp.float32),   # [focal_b, llh_b, vscore_b]
                   jax.ShapeDtypeStruct((B, S), jnp.int32)),    # decoded path (batch-first)
        grid_spec=pltpu.PrefetchScalarGridSpec(
            num_scalar_prefetch=0,
            grid=(num_tiles,),
            in_specs=[pl.BlockSpec((S * tile_b, E), lambda i: (i, 0)),   # x tile (double-buffered)
                      pl.BlockSpec((E, C), lambda i: (0, 0)),            # resident weights
                      pl.BlockSpec((1, C), lambda i: (0, 0)),            # resident bias
                      pl.BlockSpec((tile_b, S), lambda i: (i, 0)),       # tags (batch-major)
                      pl.BlockSpec((tile_b, S), lambda i: (i, 0)),       # mask (batch-major)
                      pl.BlockSpec((C, C), lambda i: (0, 0))],           # resident transitions^T
            out_specs=(pl.BlockSpec((tile_b, 3), lambda i: (i, 0)),
                       pl.BlockSpec((tile_b, S), lambda i: (i, 0))),
            scratch_shapes=[pltpu.VMEM((S - 1, tile_b, C), jnp.int32)]), # backpointers
        compiler_params=pltpu.CompilerParams(
            dimension_semantics=("parallel",)),                         # v7x megacore sharding
    )(x2, w, b, tag_bm, mask_bm, transT)


# ----------------------------------------------------------------------------
# Model wrapper (parameters initialised deterministically in-script).
# ----------------------------------------------------------------------------
class MyModelPallas:
    def __init__(self, num_class, embedding_size, key):
        self.num_class = num_class
        self.embedding_size = embedding_size
        k1, k2 = jax.random.split(key, 2)
        self.fc_w = (0.1 * jax.random.normal(k1, (embedding_size, num_class))).astype(jnp.float32)
        self.fc_b = jnp.zeros((1, num_class), jnp.float32)
        self.transitions = (0.1 * jax.random.normal(k2, (num_class, num_class))).astype(jnp.float32)

    def forward(self, seq_repr, tag_matrix, mask_matrix):
        # seq_repr:    (S, B, E) float32  -- stand-in for bert_model.work(data)[0]
        # tag_matrix:  (S, B)    int32    -- in_tag_matrix.t_()
        # mask_matrix: (S, B)    float32  -- in_mask_matrix.t_()
        # TODO(synk): F.dropout applied as identity (eval mode); no RNG parity with torch.
        S, B, E = seq_repr.shape
        assert S >= 2
        tile_b = min(B, 8)
        assert B % tile_b == 0
        num_tiles = B // tile_b

        # Layout plumbing (wrapper-side, outside the kernel): batch tiles are
        # contiguous, time-major inside each tile; matmul inputs cast to bf16.
        x2 = seq_repr.reshape(S, num_tiles, tile_b, E).transpose(1, 0, 2, 3)
        x2 = x2.reshape(num_tiles * S * tile_b, E).astype(jnp.bfloat16)
        w_bf16 = self.fc_w.astype(jnp.bfloat16)
        tag_bm = jnp.transpose(tag_matrix).astype(jnp.int32)      # (B, S)
        mask_bm = jnp.transpose(mask_matrix).astype(jnp.float32)  # (B, S)
        transT = jnp.transpose(self.transitions)                  # [to, from]

        stats, path = fused_forward(x2, w_bf16, self.fc_b, tag_bm, mask_bm,
                                    transT, S=S, B=B, tile_b=tile_b)

        focal_b = stats[:, 0]                                     # (B,)
        llh_b = stats[:, 1]                                       # (B,)
        decode_scores = stats[:, 2]                               # (B,)

        loss_ft_fc = jnp.mean(focal_b)
        total_mask = jnp.maximum(jnp.sum(mask_bm), 1.0)
        loss_crf_fc = -(jnp.sum(llh_b) / total_mask)              # CRF 'token_mean'
        loss = loss_ft_fc + loss_crf_fc
        decode_result = path                                      # (B, S) batch-first
        return decode_result, decode_scores, loss, loss_crf_fc, loss_ft_fc


if __name__ == "__main__":
    B, max_len, E, C = 16, 7, 32, 8
    S = max_len + 1                                   # seq_len = max_len + 1

    key = jax.random.PRNGKey(0)
    kx, kt, kp = jax.random.split(key, 3)

    # Stand-in for the (external) BERT encoder output, time-major (S, B, E).
    seq_repr = jax.random.normal(kx, (S, B, E), dtype=jnp.float32)

    # Contiguous-prefix masks (first position always valid), tags in [0, C).
    lengths = jnp.array([S, 6, 4, S, 3, S, 5, 2, 7, 1, S, 4, 6, 3, 5, S], dtype=jnp.int32)
    mask_matrix = (jnp.arange(S)[:, None] < lengths[None, :]).astype(jnp.float32)   # (S, B)
    tag_matrix = jax.random.randint(kt, (S, B), 0, C, dtype=jnp.int32)              # (S, B)

    # Placeholder for batchify(text_data, vocab) (external vocab/tokenisation).
    input_data = jax.random.randint(kp, (max_len + 2, B), 0, 100, dtype=jnp.int32)

    model = MyModelPallas(num_class=C, embedding_size=E, key=jax.random.PRNGKey(42))
    decode_result, decode_scores, loss, loss_crf, loss_ft = model.forward(
        seq_repr, tag_matrix, mask_matrix)

    jax.block_until_ready((decode_result, decode_scores, loss, loss_crf, loss_ft))
    print("KERNEL_OK")
</pallas_src>

<mosaic_0001>
module attributes {stable_mosaic.version = 11 : i64} {
  func.func @fused_kernel(%arg0: i32, %arg1: memref<64x32xbf16, #tpu.memory_space<vmem>>, %arg2: memref<32x8xbf16, #tpu.memory_space<vmem>>, %arg3: memref<1x8xf32, #tpu.memory_space<vmem>>, %arg4: memref<8x8xi32, #tpu.memory_space<vmem>>, %arg5: memref<8x8xf32, #tpu.memory_space<vmem>>, %arg6: memref<8x8xf32, #tpu.memory_space<vmem>>, %arg7: memref<8x3xf32, #tpu.memory_space<vmem>>, %arg8: memref<8x8xi32, #tpu.memory_space<vmem>>, %arg9: memref<7x8x8xi32, #tpu.memory_space<vmem>>) attributes {dimension_semantics = [#tpu.dimension_semantics<parallel>], iteration_bounds = array<i64: 2>, scalar_prefetch = 0 : i64, scratch_operands = 1 : i64, tpu.core_type = #tpu.core_type<tc>, window_params = [{transform_indices = @transform_0, window_bounds = array<i64: 64, 32>}, {pipeline_mode = #tpu.pipeline_mode<synchronous>, transform_indices = @transform_1, window_bounds = array<i64: 32, 8>}, {pipeline_mode = #tpu.pipeline_mode<synchronous>, transform_indices = @transform_2, window_bounds = array<i64: 1, 8>}, {transform_indices = @transform_3, window_bounds = array<i64: 8, 8>}, {transform_indices = @transform_4, window_bounds = array<i64: 8, 8>}, {pipeline_mode = #tpu.pipeline_mode<synchronous>, transform_indices = @transform_5, window_bounds = array<i64: 8, 8>}, {transform_indices = @transform_6, window_bounds = array<i64: 8, 3>}, {transform_indices = @transform_7, window_bounds = array<i64: 8, 8>}]} {
    %c0 = arith.constant 0 : index
    %c0_0 = arith.constant 0 : index
    %0 = vector.load %arg1[%c0, %c0_0] : memref<64x32xbf16, #tpu.memory_space<vmem>>, vector<64x32xbf16>
    %c0_1 = arith.constant 0 : index
    %c0_2 = arith.constant 0 : index
    %1 = vector.load %arg2[%c0_1, %c0_2] : memref<32x8xbf16, #tpu.memory_space<vmem>>, vector<32x8xbf16>
    %cst = arith.constant dense<0.000000e+00> : vector<64x8xf32>
    %2 = tpu.matmul %0, %1, %cst {dimension_numbers = #tpu.dot_dimension_numbers<[1], [0], [0], [1], [0, 0, 1, 1], [], []>} : vector<64x32xbf16>, vector<32x8xbf16>, vector<64x8xf32> -> vector<64x8xf32>
    %c0_3 = arith.constant 0 : index
    %c0_4 = arith.constant 0 : index
    %3 = vector.load %arg3[%c0_3, %c0_4] : memref<1x8xf32, #tpu.memory_space<vmem>>, vector<1x8xf32>
    %4 = vector.broadcast %3 : vector<1x8xf32> to vector<64x8xf32>
    %5 = arith.addf %2, %4 : vector<64x8xf32>
    %cst_5 = arith.constant dense<0xFF800000> : vector<64xf32>
    %6 = vector.multi_reduction <maximumf>, %5, %cst_5 [1] : vector<64x8xf32> to vector<64xf32>
    %7 = vector.shape_cast %6 : vector<64xf32> to vector<64x1xf32>
    %8 = vector.broadcast %7 : vector<64x1xf32> to vector<64x8xf32>
    %9 = arith.subf %5, %8 : vector<64x8xf32>
    %10 = math.exp %9 : vector<64x8xf32>
    %cst_6 = arith.constant dense<0.000000e+00> : vector<64xf32>
    %11 = vector.multi_reduction <add>, %10, %cst_6 [1] : vector<64x8xf32> to vector<64xf32>
    %12 = vector.shape_cast %11 : vector<64xf32> to vector<64x1xf32>
    %13 = math.log %12 : vector<64x1xf32>
    %14 = arith.addf %7, %13 : vector<64x1xf32>
    %15 = tpu.iota {dimensions = array<i32: 1>} : vector<8x8xi32>
    %c0_7 = arith.constant 0 : index
    %c0_8 = arith.constant 0 : index
    %16 = vector.load %arg6[%c0_7, %c0_8] : memref<8x8xf32, #tpu.memory_space<vmem>>, vector<8x8xf32>
    %17 = vector.shape_cast %16 : vector<8x8xf32> to vector<1x8x8xf32>
    %18 = vector.broadcast %17 : vector<1x8x8xf32> to vector<8x8x8xf32>
    %19 = vector.extract_strided_slice %5 {offsets = [0, 0], sizes = [8, 8], strides = [1, 1]} : vector<64x8xf32> to vector<8x8xf32>
    %20 = vector.extract_strided_slice %14 {offsets = [0, 0], sizes = [8, 1], strides = [1, 1]} : vector<64x1xf32> to vector<8x1xf32>
    %c0_9 = arith.constant 0 : index
    %c0_10 = arith.constant 0 : index
    %21 = vector.load %arg4[%c0_9, %c0_10] : memref<8x8xi32, #tpu.memory_space<vmem>>, vector<8x1xi32>
    %c0_11 = arith.constant 0 : index
    %c0_12 = arith.constant 0 : index
    %22 = vector.load %arg5[%c0_11, %c0_12] : memref<8x8xf32, #tpu.memory_space<vmem>>, vector<8x1xf32>
    %23 = vector.broadcast %21 : vector<8x1xi32> to vector<8x8xi32>
    %24 = arith.cmpi eq, %23, %15 : vector<8x8xi32>
    %25 = arith.extui %24 : vector<8x8xi1> to vector<8x8xi32>
    %26 = arith.sitofp %25 : vector<8x8xi32> to vector<8x8xf32>
    %27 = arith.mulf %19, %26 : vector<8x8xf32>
    %cst_13 = arith.constant dense<0.000000e+00> : vector<8xf32>
    %28 = vector.multi_reduction <add>, %27, %cst_13 [1] : vector<8x8xf32> to vector<8xf32>
    %29 = vector.shape_cast %28 : vector<8xf32> to vector<8x1xf32>
    %30 = arith.subf %29, %20 : vector<8x1xf32>
    %31 = math.exp %30 : vector<8x1xf32>
    %cst_14 = arith.constant 0.00999999977 : f32
    %cst_15 = arith.constant 9.900000e-01 : f32
    %32 = vector.broadcast %cst_14 : f32 to vector<8x1xf32>
    %33 = arith.maximumf %32, %31 : vector<8x1xf32>
    %34 = vector.broadcast %cst_15 : f32 to vector<8x1xf32>
    %35 = arith.minimumf %34, %33 : vector<8x1xf32>
    %cst_16 = arith.constant 1.000000e+00 : f32
    %36 = vector.broadcast %cst_16 : f32 to vector<8x1xf32>
    %37 = arith.subf %36, %35 : vector<8x1xf32>
    %38 = arith.mulf %37, %37 : vector<8x1xf32>
    %cst_17 = arith.constant 0.000000e+00 : f32
    %39 = vector.broadcast %cst_17 : f32 to vector<8x1xf32>
    %40 = arith.subf %39, %38 : vector<8x1xf32>
    %cst_18 = arith.constant 9.99999993E-9 : f32
    %41 = vector.broadcast %cst_18 : f32 to vector<8x1xf32>
    %42 = arith.addf %31, %41 : vector<8x1xf32>
    %43 = math.log %42 : vector<8x1xf32>
    %44 = arith.mulf %40, %43 : vector<8x1xf32>
    %45 = arith.mulf %44, %22 : vector<8x1xf32>
    %46 = arith.mulf %29, %22 : vector<8x1xf32>
    %47 = vector.extract_strided_slice %5 {offsets = [8, 0], sizes = [8, 8], strides = [1, 1]} : vector<64x8xf32> to vector<8x8xf32>
    %48 = vector.extract_strided_slice %14 {offsets = [8, 0], sizes = [8, 1], strides = [1, 1]} : vector<64x1xf32> to vector<8x1xf32>
    %c0_19 = arith.constant 0 : index
    %c1 = arith.constant 1 : index
    %49 = vector.load %arg4[%c0_19, %c1] : memref<8x8xi32, #tpu.memory_space<vmem>>, vector<8x1xi32>
    %c0_20 = arith.constant 0 : index
    %c1_21 = arith.constant 1 : index
    %50 = vector.load %arg5[%c0_20, %c1_21] : memref<8x8xf32, #tpu.memory_space<vmem>>, vector<8x1xf32>
    %51 = vector.broadcast %49 : vector<8x1xi32> to vector<8x8xi32>
    %52 = arith.cmpi eq, %51, %15 : vector<8x8xi32>
    %53 = arith.extui %52 : vector<8x8xi1> to vector<8x8xi32>
    %54 = arith.sitofp %53 : vector<8x8xi32> to vector<8x8xf32>
    %55 = arith.mulf %47, %54 : vector<8x8xf32>
    %cst_22 = arith.constant dense<0.000000e+00> : vector<8xf32>
    %56 = vector.multi_reduction <add>, %55, %cst_22 [1] : vector<8x8xf32> to vector<8xf32>
    %57 = vector.shape_cast %56 : vector<8xf32> to vector<8x1xf32>
    %58 = arith.subf %57, %48 : vector<8x1xf32>
    %59 = math.exp %58 : vector<8x1xf32>
    %cst_23 = arith.constant 0.00999999977 : f32
    %cst_24 = arith.constant 9.900000e-01 : f32
    %60 = vector.broadcast %cst_23 : f32 to vector<8x1xf32>
    %61 = arith.maximumf %60, %59 : vector<8x1xf32>
    %62 = vector.broadcast %cst_24 : f32 to vector<8x1xf32>
    %63 = arith.minimumf %62, %61 : vector<8x1xf32>
    %cst_25 = arith.constant 1.000000e+00 : f32
    %64 = vector.broadcast %cst_25 : f32 to vector<8x1xf32>
    %65 = arith.subf %64, %63 : vector<8x1xf32>
    %66 = arith.mulf %65, %65 : vector<8x1xf32>
    %cst_26 = arith.constant 0.000000e+00 : f32
    %67 = vector.broadcast %cst_26 : f32 to vector<8x1xf32>
    %68 = arith.subf %67, %66 : vector<8x1xf32>
    %cst_27 = arith.constant 9.99999993E-9 : f32
    %69 = vector.broadcast %cst_27 : f32 to vector<8x1xf32>
    %70 = arith.addf %59, %69 : vector<8x1xf32>
    %71 = math.log %70 : vector<8x1xf32>
    %72 = arith.mulf %68, %71 : vector<8x1xf32>
    %73 = arith.mulf %72, %50 : vector<8x1xf32>
    %74 = arith.addf %45, %73 : vector<8x1xf32>
    %75 = arith.addf %22, %50 : vector<8x1xf32>
    %76 = vector.shape_cast %16 : vector<8x8xf32> to vector<1x8x8xf32>
    %77 = vector.shape_cast %26 : vector<8x8xf32> to vector<8x1x8xf32>
    %78 = vector.broadcast %76 : vector<1x8x8xf32> to vector<8x8x8xf32>
    %79 = vector.broadcast %77 : vector<8x1x8xf32> to vector<8x8x8xf32>
    %80 = arith.mulf %78, %79 : vector<8x8x8xf32>
    %cst_28 = arith.constant dense<0.000000e+00> : vector<8x8xf32>
    %81 = vector.multi_reduction <add>, %80, %cst_28 [2] : vector<8x8x8xf32> to vector<8x8xf32>
    %82 = arith.mulf %81, %54 : vector<8x8xf32>
    %cst_29 = arith.constant dense<0.000000e+00> : vector<8xf32>
    %83 = vector.multi_reduction <add>, %82, %cst_29 [1] : vector<8x8xf32> to vector<8xf32>
    %84 = vector.shape_cast %83 : vector<8xf32> to vector<8x1xf32>
    %85 = arith.addf %57, %84 : vector<8x1xf32>
    %86 = arith.mulf %85, %50 : vector<8x1xf32>
    %87 = arith.addf %46, %86 : vector<8x1xf32>
    %cst_30 = arith.constant 0.000000e+00 : f32
    %88 = vector.broadcast %cst_30 : f32 to vector<8x1xf32>
    %89 = arith.cmpf ogt, %50, %88 : vector<8x1xf32>
    %90 = vector.shape_cast %19 : vector<8x8xf32> to vector<8x1x8xf32>
    %91 = vector.broadcast %90 : vector<8x1x8xf32> to vector<8x8x8xf32>
    %92 = arith.addf %91, %18 : vector<8x8x8xf32>
    %cst_31 = arith.constant dense<0xFF800000> : vector<8x8xf32>
    %93 = vector.multi_reduction <maximumf>, %92, %cst_31 [2] : vector<8x8x8xf32> to vector<8x8xf32>
    %94 = vector.shape_cast %93 : vector<8x8xf32> to vector<8x8x1xf32>
    %95 = vector.broadcast %94 : vector<8x8x1xf32> to vector<8x8x8xf32>
    %96 = arith.subf %92, %95 : vector<8x8x8xf32>
    %97 = math.exp %96 : vector<8x8x8xf32>
    %cst_32 = arith.constant dense<0.000000e+00> : vector<8x8xf32>
    %98 = vector.multi_reduction <add>, %97, %cst_32 [2] : vector<8x8x8xf32> to vector<8x8xf32>
    %99 = math.log %98 : vector<8x8xf32>
    %100 = arith.addf %93, %99 : vector<8x8xf32>
    %101 = arith.addf %100, %47 : vector<8x8xf32>
    %102 = vector.shape_cast %89 : vector<8x1xi1> to vector<8x1xi1>
    %103 = vector.broadcast %102 : vector<8x1xi1> to vector<8x8xi1>
    %104 = arith.select %103, %101, %19 : vector<8x8xi1>, vector<8x8xf32>
    %105 = vector.shape_cast %19 : vector<8x8xf32> to vector<8x1x8xf32>
    %106 = vector.broadcast %105 : vector<8x1x8xf32> to vector<8x8x8xf32>
    %107 = arith.addf %106, %18 : vector<8x8x8xf32>
    %cst_33 = arith.constant dense<0xFF800000> : vector<8x8xf32>
    %108 = vector.multi_reduction <maximumf>, %107, %cst_33 [2] : vector<8x8x8xf32> to vector<8x8xf32>
    %109 = vector.shape_cast %108 : vector<8x8xf32> to vector<8x8x1xf32>
    %110 = tpu.iota {dimensions = array<i32: 2>} : vector<8x8x8xi32>
    %111 = vector.broadcast %109 : vector<8x8x1xf32> to vector<8x8x8xf32>
    %112 = arith.cmpf oeq, %107, %111 : vector<8x8x8xf32>
    %c2147483647_i32 = arith.constant 2147483647 : i32
    %113 = vector.broadcast %c2147483647_i32 : i32 to vector<8x8x8xi32>
    %114 = arith.select %112, %110, %113 : vector<8x8x8xi1>, vector<8x8x8xi32>
    %cst_34 = arith.constant dense<2147483647> : vector<8x8xi32>
    %115 = vector.multi_reduction <minsi>, %114, %cst_34 [2] : vector<8x8x8xi32> to vector<8x8xi32>
    %116 = arith.addf %108, %47 : vector<8x8xf32>
    %117 = vector.shape_cast %89 : vector<8x1xi1> to vector<8x1xi1>
    %118 = vector.broadcast %117 : vector<8x1xi1> to vector<8x8xi1>
    %119 = arith.select %118, %116, %19 : vector<8x8xi1>, vector<8x8xf32>
    %120 = vector.shape_cast %89 : vector<8x1xi1> to vector<8x1xi1>
    %121 = vector.broadcast %120 : vector<8x1xi1> to vector<8x8xi1>
    %122 = arith.select %121, %115, %15 : vector<8x8xi1>, vector<8x8xi32>
    %c0_35 = arith.constant 0 : index
    %c0_36 = arith.constant 0 : index
    %c0_37 = arith.constant 0 : index
    %123 = vector.load %arg9[%c0_35, %c0_36, %c0_37] : memref<7x8x8xi32, #tpu.memory_space<vmem>>, vector<1x8x8xi32>
    %124 = vector.shape_cast %123 : vector<1x8x8xi32> to vector<8x8xi32>
    %125 = vector.shape_cast %122 : vector<8x8xi32> to vector<1x8x8xi32>
    tpu.vector_store %arg9[%c0_35, %c0_36, %c0_37], %125 {strides = array<i32>} : memref<7x8x8xi32, #tpu.memory_space<vmem>>, vector<1x8x8xi32>,
    %126 = vector.extract_strided_slice %5 {offsets = [16, 0], sizes = [8, 8], strides = [1, 1]} : vector<64x8xf32> to vector<8x8xf32>
    %127 = vector.extract_strided_slice %14 {offsets = [16, 0], sizes = [8, 1], strides = [1, 1]} : vector<64x1xf32> to vector<8x1xf32>
    %c0_38 = arith.constant 0 : index
    %c2 = arith.constant 2 : index
    %128 = vector.load %arg4[%c0_38, %c2] : memref<8x8xi32, #tpu.memory_space<vmem>>, vector<8x1xi32>
    %c0_39 = arith.constant 0 : index
    %c2_40 = arith.constant 2 : index
    %129 = vector.load %arg5[%c0_39, %c2_40] : memref<8x8xf32, #tpu.memory_space<vmem>>, vector<8x1xf32>
    %130 = vector.broadcast %128 : vector<8x1xi32> to vector<8x8xi32>
    %131 = arith.cmpi eq, %130, %15 : vector<8x8xi32>
    %132 = arith.extui %131 : vector<8x8xi1> to vector<8x8xi32>
    %133 = arith.sitofp %132 : vector<8x8xi32> to vector<8x8xf32>
    %134 = arith.mulf %126, %133 : vector<8x8xf32>
    %cst_41 = arith.constant dense<0.000000e+00> : vector<8xf32>
    %135 = vector.multi_reduction <add>, %134, %cst_41 [1] : vector<8x8xf32> to vector<8xf32>
    %136 = vector.shape_cast %135 : vector<8xf32> to vector<8x1xf32>
    %137 = arith.subf %136, %127 : vector<8x1xf32>
    %138 = math.exp %137 : vector<8x1xf32>
    %cst_42 = arith.constant 0.00999999977 : f32
    %cst_43 = arith.constant 9.900000e-01 : f32
    %139 = vector.broadcast %cst_42 : f32 to vector<8x1xf32>
    %140 = arith.maximumf %139, %138 : vector<8x1xf32>
    %141 = vector.broadcast %cst_43 : f32 to vector<8x1xf32>
    %142 = arith.minimumf %141, %140 : vector<8x1xf32>
    %cst_44 = arith.constant 1.000000e+00 : f32
    %143 = vector.broadcast %cst_44 : f32 to vector<8x1xf32>
    %144 = arith.subf %143, %142 : vector<8x1xf32>
    %145 = arith.mulf %144, %144 : vector<8x1xf32>
    %cst_45 = arith.constant 0.000000e+00 : f32
    %146 = vector.broadcast %cst_45 : f32 to vector<8x1xf32>
    %147 = arith.subf %146, %145 : vector<8x1xf32>
    %cst_46 = arith.constant 9.99999993E-9 : f32
    %148 = vector.broadcast %cst_46 : f32 to vector<8x1xf32>
    %149 = arith.addf %138, %148 : vector<8x1xf32>
    %150 = math.log %149 : vector<8x1xf32>
    %151 = arith.mulf %147, %150 : vector<8x1xf32>
    %152 = arith.mulf %151, %129 : vector<8x1xf32>
    %153 = arith.addf %74, %152 : vector<8x1xf32>
    %154 = arith.addf %75, %129 : vector<8x1xf32>
    %155 = vector.shape_cast %16 : vector<8x8xf32> to vector<1x8x8xf32>
    %156 = vector.shape_cast %54 : vector<8x8xf32> to vector<8x1x8xf32>
    %157 = vector.broadcast %155 : vector<1x8x8xf32> to vector<8x8x8xf32>
    %158 = vector.broadcast %156 : vector<8x1x8xf32> to vector<8x8x8xf32>
    %159 = arith.mulf %157, %158 : vector<8x8x8xf32>
    %cst_47 = arith.constant dense<0.000000e+00> : vector<8x8xf32>
    %160 = vector.multi_reduction <add>, %159, %cst_47 [2] : vector<8x8x8xf32> to vector<8x8xf32>
    %161 = arith.mulf %160, %133 : vector<8x8xf32>
    %cst_48 = arith.constant dense<0.000000e+00> : vector<8xf32>
    %162 = vector.multi_reduction <add>, %161, %cst_48 [1] : vector<8x8xf32> to vector<8xf32>
    %163 = vector.shape_cast %162 : vector<8xf32> to vector<8x1xf32>
    %164 = arith.addf %136, %163 : vector<8x1xf32>
    %165 = arith.mulf %164, %129 : vector<8x1xf32>
    %166 = arith.addf %87, %165 : vector<8x1xf32>
    %cst_49 = arith.constant 0.000000e+00 : f32
    %167 = vector.broadcast %cst_49 : f32 to vector<8x1xf32>
    %168 = arith.cmpf ogt, %129, %167 : vector<8x1xf32>
    %169 = vector.shape_cast %104 : vector<8x8xf32> to vector<8x1x8xf32>
    %170 = vector.broadcast %169 : vector<8x1x8xf32> to vector<8x8x8xf32>
    %171 = arith.addf %170, %18 : vector<8x8x8xf32>
    %cst_50 = arith.constant dense<0xFF800000> : vector<8x8xf32>
    %172 = vector.multi_reduction <maximumf>, %171, %cst_50 [2] : vector<8x8x8xf32> to vector<8x8xf32>
    %173 = vector.shape_cast %172 : vector<8x8xf32> to vector<8x8x1xf32>
    %174 = vector.broadcast %173 : vector<8x8x1xf32> to vector<8x8x8xf32>
    %175 = arith.subf %171, %174 : vector<8x8x8xf32>
    %176 = math.exp %175 : vector<8x8x8xf32>
    %cst_51 = arith.constant dense<0.000000e+00> : vector<8x8xf32>
    %177 = vector.multi_reduction <add>, %176, %cst_51 [2] : vector<8x8x8xf32> to vector<8x8xf32>
    %178 = math.log %177 : vector<8x8xf32>
    %179 = arith.addf %172, %178 : vector<8x8xf32>
    %180 = arith.addf %179, %126 : vector<8x8xf32>
    %181 = vector.shape_cast %168 : vector<8x1xi1> to vector<8x1xi1>
    %182 = vector.broadcast %181 : vector<8x1xi1> to vector<8x8xi1>
    %183 = arith.select %182, %180, %104 : vector<8x8xi1>, vector<8x8xf32>
    %184 = vector.shape_cast %119 : vector<8x8xf32> to vector<8x1x8xf32>
    %185 = vector.broadcast %184 : vector<8x1x8xf32> to vector<8x8x8xf32>
    %186 = arith.addf %185, %18 : vector<8x8x8xf32>
    %cst_52 = arith.constant dense<0xFF800000> : vector<8x8xf32>
    %187 = vector.multi_reduction <maximumf>, %186, %cst_52 [2] : vector<8x8x8xf32> to vector<8x8xf32>
    %188 = vector.shape_cast %187 : vector<8x8xf32> to vector<8x8x1xf32>
    %189 = tpu.iota {dimensions = array<i32: 2>} : vector<8x8x8xi32>
    %190 = vector.broadcast %188 : vector<8x8x1xf32> to vector<8x8x8xf32>
    %191 = arith.cmpf oeq, %186, %190 : vector<8x8x8xf32>
    %c2147483647_i32_53 = arith.constant 2147483647 : i32
    %192 = vector.broadcast %c2147483647_i32_53 : i32 to vector<8x8x8xi32>
    %193 = arith.select %191, %189, %192 : vector<8x8x8xi1>, vector<8x8x8xi32>
    %cst_54 = arith.constant dense<2147483647> : vector<8x8xi32>
    %194 = vector.multi_reduction <minsi>, %193, %cst_54 [2] : vector<8x8x8xi32> to vector<8x8xi32>
    %195 = arith.addf %187, %126 : vector<8x8xf32>
    %196 = vector.shape_cast %168 : vector<8x1xi1> to vector<8x1xi1>
    %197 = vector.broadcast %196 : vector<8x1xi1> to vector<8x8xi1>
    %198 = arith.select %197, %195, %119 : vector<8x8xi1>, vector<8x8xf32>
    %199 = vector.shape_cast %168 : vector<8x1xi1> to vector<8x1xi1>
    %200 = vector.broadcast %199 : vector<8x1xi1> to vector<8x8xi1>
    %201 = arith.select %200, %194, %15 : vector<8x8xi1>, vector<8x8xi32>
    %c1_55 = arith.constant 1 : index
    %c0_56 = arith.constant 0 : index
    %c0_57 = arith.constant 0 : index
    %202 = vector.load %arg9[%c1_55, %c0_56, %c0_57] : memref<7x8x8xi32, #tpu.memory_space<vmem>>, vector<1x8x8xi32>
    %203 = vector.shape_cast %202 : vector<1x8x8xi32> to vector<8x8xi32>
    %204 = vector.shape_cast %201 : vector<8x8xi32> to vector<1x8x8xi32>
    tpu.vector_store %arg9[%c1_55, %c0_56, %c0_57], %204 {strides = array<i32>} : memref<7x8x8xi32, #tpu.memory_space<vmem>>, vector<1x8x8xi32>,
    %205 = vector.extract_strided_slice %5 {offsets = [24, 0], sizes = [8, 8], strides = [1, 1]} : vector<64x8xf32> to vector<8x8xf32>
    %206 = vector.extract_strided_slice %14 {offsets = [24, 0], sizes = [8, 1], strides = [1, 1]} : vector<64x1xf32> to vector<8x1xf32>
    %c0_58 = arith.constant 0 : index
    %c3 = arith.constant 3 : index
    %207 = vector.load %arg4[%c0_58, %c3] : memref<8x8xi32, #tpu.memory_space<vmem>>, vector<8x1xi32>
    %c0_59 = arith.constant 0 : index
    %c3_60 = arith.constant 3 : index
    %208 = vector.load %arg5[%c0_59, %c3_60] : memref<8x8xf32, #tpu.memory_space<vmem>>, vector<8x1xf32>
    %209 = vector.broadcast %207 : vector<8x1xi32> to vector<8x8xi32>
    %210 = arith.cmpi eq, %209, %15 : vector<8x8xi32>
    %211 = arith.extui %210 : vector<8x8xi1> to vector<8x8xi32>
    %212 = arith.sitofp %211 : vector<8x8xi32> to vector<8x8xf32>
    %213 = arith.mulf %205, %212 : vector<8x8xf32>
    %cst_61 = arith.constant dense<0.000000e+00> : vector<8xf32>
    %214 = vector.multi_reduction <add>, %213, %cst_61 [1] : vector<8x8xf32> to vector<8xf32>
    %215 = vector.shape_cast %214 : vector<8xf32> to vector<8x1xf32>
    %216 = arith.subf %215, %206 : vector<8x1xf32>
    %217 = math.exp %216 : vector<8x1xf32>
    %cst_62 = arith.constant 0.00999999977 : f32
    %cst_63 = arith.constant 9.900000e-01 : f32
    %218 = vector.broadcast %cst_62 : f32 to vector<8x1xf32>
    %219 = arith.maximumf %218, %217 : vector<8x1xf32>
    %220 = vector.broadcast %cst_63 : f32 to vector<8x1xf32>
    %221 = arith.minimumf %220, %219 : vector<8x1xf32>
    %cst_64 = arith.constant 1.000000e+00 : f32
    %222 = vector.broadcast %cst_64 : f32 to vector<8x1xf32>
    %223 = arith.subf %222, %221 : vector<8x1xf32>
    %224 = arith.mulf %223, %223 : vector<8x1xf32>
    %cst_65 = arith.constant 0.000000e+00 : f32
    %225 = vector.broadcast %cst_65 : f32 to vector<8x1xf32>
    %226 = arith.subf %225, %224 : vector<8x1xf32>
    %cst_66 = arith.constant 9.99999993E-9 : f32
    %227 = vector.broadcast %cst_66 : f32 to vector<8x1xf32>
    %228 = arith.addf %217, %227 : vector<8x1xf32>
    %229 = math.log %228 : vector<8x1xf32>
    %230 = arith.mulf %226, %229 : vector<8x1xf32>
    %231 = arith.mulf %230, %208 : vector<8x1xf32>
    %232 = arith.addf %153, %231 : vector<8x1xf32>
    %233 = arith.addf %154, %208 : vector<8x1xf32>
    %234 = vector.shape_cast %16 : vector<8x8xf32> to vector<1x8x8xf32>
    %235 = vector.shape_cast %133 : vector<8x8xf32> to vector<8x1x8xf32>
    %236 = vector.broadcast %234 : vector<1x8x8xf32> to vector<8x8x8xf32>
    %237 = vector.broadcast %235 : vector<8x1x8xf32> to vector<8x8x8xf32>
    %238 = arith.mulf %236, %237 : vector<8x8x8xf32>
    %cst_67 = arith.constant dense<0.000000e+00> : vector<8x8xf32>
    %239 = vector.multi_reduction <add>, %238, %cst_67 [2] : vector<8x8x8xf32> to vector<8x8xf32>
    %240 = arith.mulf %239, %212 : vector<8x8xf32>
    %cst_68 = arith.constant dense<0.000000e+00> : vector<8xf32>
    %241 = vector.multi_reduction <add>, %240, %cst_68 [1] : vector<8x8xf32> to vector<8xf32>
    %242 = vector.shape_cast %241 : vector<8xf32> to vector<8x1xf32>
    %243 = arith.addf %215, %242 : vector<8x1xf32>
    %244 = arith.mulf %243, %208 : vector<8x1xf32>
    %245 = arith.addf %166, %244 : vector<8x1xf32>
    %cst_69 = arith.constant 0.000000e+00 : f32
    %246 = vector.broadcast %cst_69 : f32 to vector<8x1xf32>
    %247 = arith.cmpf ogt, %208, %246 : vector<8x1xf32>
    %248 = vector.shape_cast %183 : vector<8x8xf32> to vector<8x1x8xf32>
    %249 = vector.broadcast %248 : vector<8x1x8xf32> to vector<8x8x8xf32>
    %250 = arith.addf %249, %18 : vector<8x8x8xf32>
    %cst_70 = arith.constant dense<0xFF800000> : vector<8x8xf32>
    %251 = vector.multi_reduction <maximumf>, %250, %cst_70 [2] : vector<8x8x8xf32> to vector<8x8xf32>
    %252 = vector.shape_cast %251 : vector<8x8xf32> to vector<8x8x1xf32>
    %253 = vector.broadcast %252 : vector<8x8x1xf32> to vector<8x8x8xf32>
    %254 = arith.subf %250, %253 : vector<8x8x8xf32>
    %255 = math.exp %254 : vector<8x8x8xf32>
    %cst_71 = arith.constant dense<0.000000e+00> : vector<8x8xf32>
    %256 = vector.multi_reduction <add>, %255, %cst_71 [2] : vector<8x8x8xf32> to vector<8x8xf32>
    %257 = math.log %256 : vector<8x8xf32>
    %258 = arith.addf %251, %257 : vector<8x8xf32>
    %259 = arith.addf %258, %205 : vector<8x8xf32>
    %260 = vector.shape_cast %247 : vector<8x1xi1> to vector<8x1xi1>
    %261 = vector.broadcast %260 : vector<8x1xi1> to vector<8x8xi1>
    %262 = arith.select %261, %259, %183 : vector<8x8xi1>, vector<8x8xf32>
    %263 = vector.shape_cast %198 : vector<8x8xf32> to vector<8x1x8xf32>
    %264 = vector.broadcast %263 : vector<8x1x8xf32> to vector<8x8x8xf32>
    %265 = arith.addf %264, %18 : vector<8x8x8xf32>
    %cst_72 = arith.constant dense<0xFF800000> : vector<8x8xf32>
    %266 = vector.multi_reduction <maximumf>, %265, %cst_72 [2] : vector<8x8x8xf32> to vector<8x8xf32>
    %267 = vector.shape_cast %266 : vector<8x8xf32> to vector<8x8x1xf32>
    %268 = tpu.iota {dimensions = array<i32: 2>} : vector<8x8x8xi32>
    %269 = vector.broadcast %267 : vector<8x8x1xf32> to vector<8x8x8xf32>
    %270 = arith.cmpf oeq, %265, %269 : vector<8x8x8xf32>
    %c2147483647_i32_73 = arith.constant 2147483647 : i32
    %271 = vector.broadcast %c2147483647_i32_73 : i32 to vector<8x8x8xi32>
    %272 = arith.select %270, %268, %271 : vector<8x8x8xi1>, vector<8x8x8xi32>
    %cst_74 = arith.constant dense<2147483647> : vector<8x8xi32>
    %273 = vector.multi_reduction <minsi>, %272, %cst_74 [2] : vector<8x8x8xi32> to vector<8x8xi32>
    %274 = arith.addf %266, %205 : vector<8x8xf32>
    %275 = vector.shape_cast %247 : vector<8x1xi1> to vector<8x1xi1>
    %276 = vector.broadcast %275 : vector<8x1xi1> to vector<8x8xi1>
    %277 = arith.select %276, %274, %198 : vector<8x8xi1>, vector<8x8xf32>
    %278 = vector.shape_cast %247 : vector<8x1xi1> to vector<8x1xi1>
    %279 = vector.broadcast %278 : vector<8x1xi1> to vector<8x8xi1>
    %280 = arith.select %279, %273, %15 : vector<8x8xi1>, vector<8x8xi32>
    %c2_75 = arith.constant 2 : index
    %c0_76 = arith.constant 0 : index
    %c0_77 = arith.constant 0 : index
    %281 = vector.load %arg9[%c2_75, %c0_76, %c0_77] : memref<7x8x8xi32, #tpu.memory_space<vmem>>, vector<1x8x8xi32>
    %282 = vector.shape_cast %281 : vector<1x8x8xi32> to vector<8x8xi32>
    %283 = vector.shape_cast %280 : vector<8x8xi32> to vector<1x8x8xi32>
    tpu.vector_store %arg9[%c2_75, %c0_76, %c0_77], %283 {strides = array<i32>} : memref<7x8x8xi32, #tpu.memory_space<vmem>>, vector<1x8x8xi32>,
    %284 = vector.extract_strided_slice %5 {offsets = [32, 0], sizes = [8, 8], strides = [1, 1]} : vector<64x8xf32> to vector<8x8xf32>
    %285 = vector.extract_strided_slice %14 {offsets = [32, 0], sizes = [8, 1], strides = [1, 1]} : vector<64x1xf32> to vector<8x1xf32>
    %c0_78 = arith.constant 0 : index
    %c4 = arith.constant 4 : index
    %286 = vector.load %arg4[%c0_78, %c4] : memref<8x8xi32, #tpu.memory_space<vmem>>, vector<8x1xi32>
    %c0_79 = arith.constant 0 : index
    %c4_80 = arith.constant 4 : index
    %287 = vector.load %arg5[%c0_79, %c4_80] : memref<8x8xf32, #tpu.memory_space<vmem>>, vector<8x1xf32>
    %288 = vector.broadcast %286 : vector<8x1xi32> to vector<8x8xi32>
    %289 = arith.cmpi eq, %288, %15 : vector<8x8xi32>
    %290 = arith.extui %289 : vector<8x8xi1> to vector<8x8xi32>
    %291 = arith.sitofp %290 : vector<8x8xi32> to vector<8x8xf32>
    %292 = arith.mulf %284, %291 : vector<8x8xf32>
    %cst_81 = arith.constant dense<0.000000e+00> : vector<8xf32>
    %293 = vector.multi_reduction <add>, %292, %cst_81 [1] : vector<8x8xf32> to vector<8xf32>
    %294 = vector.shape_cast %293 : vector<8xf32> to vector<8x1xf32>
    %295 = arith.subf %294, %285 : vector<8x1xf32>
    %296 = math.exp %295 : vector<8x1xf32>
    %cst_82 = arith.constant 0.00999999977 : f32
    %cst_83 = arith.constant 9.900000e-01 : f32
    %297 = vector.broadcast %cst_82 : f32 to vector<8x1xf32>
    %298 = arith.maximumf %297, %296 : vector<8x1xf32>
    %299 = vector.broadcast %cst_83 : f32 to vector<8x1xf32>
    %300 = arith.minimumf %299, %298 : vector<8x1xf32>
    %cst_84 = arith.constant 1.000000e+00 : f32
    %301 = vector.broadcast %cst_84 : f32 to vector<8x1xf32>
    %302 = arith.subf %301, %300 : vector<8x1xf32>
    %303 = arith.mulf %302, %302 : vector<8x1xf32>
    %cst_85 = arith.constant 0.000000e+00 : f32
    %304 = vector.broadcast %cst_85 : f32 to vector<8x1xf32>
    %305 = arith.subf %304, %303 : vector<8x1xf32>
    %cst_86 = arith.constant 9.99999993E-9 : f32
    %306 = vector.broadcast %cst_86 : f32 to vector<8x1xf32>
    %307 = arith.addf %296, %306 : vector<8x1xf32>
    %308 = math.log %307 : vector<8x1xf32>
    %309 = arith.mulf %305, %308 : vector<8x1xf32>
    %310 = arith.mulf %309, %287 : vector<8x1xf32>
    %311 = arith.addf %232, %310 : vector<8x1xf32>
    %312 = arith.addf %233, %287 : vector<8x1xf32>
    %313 = vector.shape_cast %16 : vector<8x8xf32> to vector<1x8x8xf32>
    %314 = vector.shape_cast %212 : vector<8x8xf32> to vector<8x1x8xf32>
    %315 = vector.broadcast %313 : vector<1x8x8xf32> to vector<8x8x8xf32>
    %316 = vector.broadcast %314 : vector<8x1x8xf32> to vector<8x8x8xf32>
    %317 = arith.mulf %315, %316 : vector<8x8x8xf32>
    %cst_87 = arith.constant dense<0.000000e+00> : vector<8x8xf32>
    %318 = vector.multi_reduction <add>, %317, %cst_87 [2] : vector<8x8x8xf32> to vector<8x8xf32>
    %319 = arith.mulf %318, %291 : vector<8x8xf32>
    %cst_88 = arith.constant dense<0.000000e+00> : vector<8xf32>
    %320 = vector.multi_reduction <add>, %319, %cst_88 [1] : vector<8x8xf32> to vector<8xf32>
    %321 = vector.shape_cast %320 : vector<8xf32> to vector<8x1xf32>
    %322 = arith.addf %294, %321 : vector<8x1xf32>
    %323 = arith.mulf %322, %287 : vector<8x1xf32>
    %324 = arith.addf %245, %323 : vector<8x1xf32>
    %cst_89 = arith.constant 0.000000e+00 : f32
    %325 = vector.broadcast %cst_89 : f32 to vector<8x1xf32>
    %326 = arith.cmpf ogt, %287, %325 : vector<8x1xf32>
    %327 = vector.shape_cast %262 : vector<8x8xf32> to vector<8x1x8xf32>
    %328 = vector.broadcast %327 : vector<8x1x8xf32> to vector<8x8x8xf32>
    %329 = arith.addf %328, %18 : vector<8x8x8xf32>
    %cst_90 = arith.constant dense<0xFF800000> : vector<8x8xf32>
    %330 = vector.multi_reduction <maximumf>, %329, %cst_90 [2] : vector<8x8x8xf32> to vector<8x8xf32>
    %331 = vector.shape_cast %330 : vector<8x8xf32> to vector<8x8x1xf32>
    %332 = vector.broadcast %331 : vector<8x8x1xf32> to vector<8x8x8xf32>
    %333 = arith.subf %329, %332 : vector<8x8x8xf32>
    %334 = math.exp %333 : vector<8x8x8xf32>
    %cst_91 = arith.constant dense<0.000000e+00> : vector<8x8xf32>
    %335 = vector.multi_reduction <add>, %334, %cst_91 [2] : vector<8x8x8xf32> to vector<8x8xf32>
    %336 = math.log %335 : vector<8x8xf32>
    %337 = arith.addf %330, %336 : vector<8x8xf32>
    %338 = arith.addf %337, %284 : vector<8x8xf32>
    %339 = vector.shape_cast %326 : vector<8x1xi1> to vector<8x1xi1>
    %340 = vector.broadcast %339 : vector<8x1xi1> to vector<8x8xi1>
    %341 = arith.select %340, %338, %262 : vector<8x8xi1>, vector<8x8xf32>
    %342 = vector.shape_cast %277 : vector<8x8xf32> to vector<8x1x8xf32>
    %343 = vector.broadcast %342 : vector<8x1x8xf32> to vector<8x8x8xf32>
    %344 = arith.addf %343, %18 : vector<8x8x8xf32>
    %cst_92 = arith.constant dense<0xFF800000> : vector<8x8xf32>
    %345 = vector.multi_reduction <maximumf>, %344, %cst_92 [2] : vector<8x8x8xf32> to vector<8x8xf32>
    %346 = vector.shape_cast %345 : vector<8x8xf32> to vector<8x8x1xf32>
    %347 = tpu.iota {dimensions = array<i32: 2>} : vector<8x8x8xi32>
    %348 = vector.broadcast %346 : vector<8x8x1xf32> to vector<8x8x8xf32>
    %349 = arith.cmpf oeq, %344, %348 : vector<8x8x8xf32>
    %c2147483647_i32_93 = arith.constant 2147483647 : i32
    %350 = vector.broadcast %c2147483647_i32_93 : i32 to vector<8x8x8xi32>
    %351 = arith.select %349, %347, %350 : vector<8x8x8xi1>, vector<8x8x8xi32>
    %cst_94 = arith.constant dense<2147483647> : vector<8x8xi32>
    %352 = vector.multi_reduction <minsi>, %351, %cst_94 [2] : vector<8x8x8xi32> to vector<8x8xi32>
    %353 = arith.addf %345, %284 : vector<8x8xf32>
    %354 = vector.shape_cast %326 : vector<8x1xi1> to vector<8x1xi1>
    %355 = vector.broadcast %354 : vector<8x1xi1> to vector<8x8xi1>
    %356 = arith.select %355, %353, %277 : vector<8x8xi1>, vector<8x8xf32>
    %357 = vector.shape_cast %326 : vector<8x1xi1> to vector<8x1xi1>
    %358 = vector.broadcast %357 : vector<8x1xi1> to vector<8x8xi1>
    %359 = arith.select %358, %352, %15 : vector<8x8xi1>, vector<8x8xi32>
    %c3_95 = arith.constant 3 : index
    %c0_96 = arith.constant 0 : index
    %c0_97 = arith.constant 0 : index
    %360 = vector.load %arg9[%c3_95, %c0_96, %c0_97] : memref<7x8x8xi32, #tpu.memory_space<vmem>>, vector<1x8x8xi32>
    %361 = vector.shape_cast %360 : vector<1x8x8xi32> to vector<8x8xi32>
    %362 = vector.shape_cast %359 : vector<8x8xi32> to vector<1x8x8xi32>
    tpu.vector_store %arg9[%c3_95, %c0_96, %c0_97], %362 {strides = array<i32>} : memref<7x8x8xi32, #tpu.memory_space<vmem>>, vector<1x8x8xi32>,
    %363 = vector.extract_strided_slice %5 {offsets = [40, 0], sizes = [8, 8], strides = [1, 1]} : vector<64x8xf32> to vector<8x8xf32>
    %364 = vector.extract_strided_slice %14 {offsets = [40, 0], sizes = [8, 1], strides = [1, 1]} : vector<64x1xf32> to vector<8x1xf32>
    %c0_98 = arith.constant 0 : index
    %c5 = arith.constant 5 : index
    %365 = vector.load %arg4[%c0_98, %c5] : memref<8x8xi32, #tpu.memory_space<vmem>>, vector<8x1xi32>
    %c0_99 = arith.constant 0 : index
    %c5_100 = arith.constant 5 : index
    %366 = vector.load %arg5[%c0_99, %c5_100] : memref<8x8xf32, #tpu.memory_space<vmem>>, vector<8x1xf32>
    %367 = vector.broadcast %365 : vector<8x1xi32> to vector<8x8xi32>
    %368 = arith.cmpi eq, %367, %15 : vector<8x8xi32>
    %369 = arith.extui %368 : vector<8x8xi1> to vector<8x8xi32>
    %370 = arith.sitofp %369 : vector<8x8xi32> to vector<8x8xf32>
    %371 = arith.mulf %363, %370 : vector<8x8xf32>
    %cst_101 = arith.constant dense<0.000000e+00> : vector<8xf32>
    %372 = vector.multi_reduction <add>, %371, %cst_101 [1] : vector<8x8xf32> to vector<8xf32>
    %373 = vector.shape_cast %372 : vector<8xf32> to vector<8x1xf32>
    %374 = arith.subf %373, %364 : vector<8x1xf32>
    %375 = math.exp %374 : vector<8x1xf32>
    %cst_102 = arith.constant 0.00999999977 : f32
    %cst_103 = arith.constant 9.900000e-01 : f32
    %376 = vector.broadcast %cst_102 : f32 to vector<8x1xf32>
    %377 = arith.maximumf %376, %375 : vector<8x1xf32>
    %378 = vector.broadcast %cst_103 : f32 to vector<8x1xf32>
    %379 = arith.minimumf %378, %377 : vector<8x1xf32>
    %cst_104 = arith.constant 1.000000e+00 : f32
    %380 = vector.broadcast %cst_104 : f32 to vector<8x1xf32>
    %381 = arith.subf %380, %379 : vector<8x1xf32>
    %382 = arith.mulf %381, %381 : vector<8x1xf32>
    %cst_105 = arith.constant 0.000000e+00 : f32
    %383 = vector.broadcast %cst_105 : f32 to vector<8x1xf32>
    %384 = arith.subf %383, %382 : vector<8x1xf32>
    %cst_106 = arith.constant 9.99999993E-9 : f32
    %385 = vector.broadcast %cst_106 : f32 to vector<8x1xf32>
    %386 = arith.addf %375, %385 : vector<8x1xf32>
    %387 = math.log %386 : vector<8x1xf32>
    %388 = arith.mulf %384, %387 : vector<8x1xf32>
    %389 = arith.mulf %388, %366 : vector<8x1xf32>
    %390 = arith.addf %311, %389 : vector<8x1xf32>
    %391 = arith.addf %312, %366 : vector<8x1xf32>
    %392 = vector.shape_cast %16 : vector<8x8xf32> to vector<1x8x8xf32>
    %393 = vector.shape_cast %291 : vector<8x8xf32> to vector<8x1x8xf32>
    %394 = vector.broadcast %392 : vector<1x8x8xf32> to vector<8x8x8xf32>
    %395 = vector.broadcast %393 : vector<8x1x8xf32> to vector<8x8x8xf32>
    %396 = arith.mulf %394, %395 : vector<8x8x8xf32>
    %cst_107 = arith.constant dense<0.000000e+00> : vector<8x8xf32>
    %397 = vector.multi_reduction <add>, %396, %cst_107 [2] : vector<8x8x8xf32> to vector<8x8xf32>
    %398 = arith.mulf %397, %370 : vector<8x8xf32>
    %cst_108 = arith.constant dense<0.000000e+00> : vector<8xf32>
    %399 = vector.multi_reduction <add>, %398, %cst_108 [1] : vector<8x8xf32> to vector<8xf32>
    %400 = vector.shape_cast %399 : vector<8xf32> to vector<8x1xf32>
    %401 = arith.addf %373, %400 : vector<8x1xf32>
    %402 = arith.mulf %401, %366 : vector<8x1xf32>
    %403 = arith.addf %324, %402 : vector<8x1xf32>
    %cst_109 = arith.constant 0.000000e+00 : f32
    %404 = vector.broadcast %cst_109 : f32 to vector<8x1xf32>
    %405 = arith.cmpf ogt, %366, %404 : vector<8x1xf32>
    %406 = vector.shape_cast %341 : vector<8x8xf32> to vector<8x1x8xf32>
    %407 = vector.broadcast %406 : vector<8x1x8xf32> to vector<8x8x8xf32>
    %408 = arith.addf %407, %18 : vector<8x8x8xf32>
    %cst_110 = arith.constant dense<0xFF800000> : vector<8x8xf32>
    %409 = vector.multi_reduction <maximumf>, %408, %cst_110 [2] : vector<8x8x8xf32> to vector<8x8xf32>
    %410 = vector.shape_cast %409 : vector<8x8xf32> to vector<8x8x1xf32>
    %411 = vector.broadcast %410 : vector<8x8x1xf32> to vector<8x8x8xf32>
    %412 = arith.subf %408, %411 : vector<8x8x8xf32>
    %413 = math.exp %412 : vector<8x8x8xf32>
    %cst_111 = arith.constant dense<0.000000e+00> : vector<8x8xf32>
    %414 = vector.multi_reduction <add>, %413, %cst_111 [2] : vector<8x8x8xf32> to vector<8x8xf32>
    %415 = math.log %414 : vector<8x8xf32>
    %416 = arith.addf %409, %415 : vector<8x8xf32>
    %417 = arith.addf %416, %363 : vector<8x8xf32>
    %418 = vector.shape_cast %405 : vector<8x1xi1> to vector<8x1xi1>
    %419 = vector.broadcast %418 : vector<8x1xi1> to vector<8x8xi1>
    %420 = arith.select %419, %417, %341 : vector<8x8xi1>, vector<8x8xf32>
    %421 = vector.shape_cast %356 : vector<8x8xf32> to vector<8x1x8xf32>
    %422 = vector.broadcast %421 : vector<8x1x8xf32> to vector<8x8x8xf32>
    %423 = arith.addf %422, %18 : vector<8x8x8xf32>
    %cst_112 = arith.constant dense<0xFF800000> : vector<8x8xf32>
    %424 = vector.multi_reduction <maximumf>, %423, %cst_112 [2] : vector<8x8x8xf32> to vector<8x8xf32>
    %425 = vector.shape_cast %424 : vector<8x8xf32> to vector<8x8x1xf32>
    %426 = tpu.iota {dimensions = array<i32: 2>} : vector<8x8x8xi32>
    %427 = vector.broadcast %425 : vector<8x8x1xf32> to vector<8x8x8xf32>
    %428 = arith.cmpf oeq, %423, %427 : vector<8x8x8xf32>
    %c2147483647_i32_113 = arith.constant 2147483647 : i32
    %429 = vector.broadcast %c2147483647_i32_113 : i32 to vector<8x8x8xi32>
    %430 = arith.select %428, %426, %429 : vector<8x8x8xi1>, vector<8x8x8xi32>
    %cst_114 = arith.constant dense<2147483647> : vector<8x8xi32>
    %431 = vector.multi_reduction <minsi>, %430, %cst_114 [2] : vector<8x8x8xi32> to vector<8x8xi32>
    %432 = arith.addf %424, %363 : vector<8x8xf32>
    %433 = vector.shape_cast %405 : vector<8x1xi1> to vector<8x1xi1>
    %434 = vector.broadcast %433 : vector<8x1xi1> to vector<8x8xi1>
    %435 = arith.select %434, %432, %356 : vector<8x8xi1>, vector<8x8xf32>
    %436 = vector.shape_cast %405 : vector<8x1xi1> to vector<8x1xi1>
    %437 = vector.broadcast %436 : vector<8x1xi1> to vector<8x8xi1>
    %438 = arith.select %437, %431, %15 : vector<8x8xi1>, vector<8x8xi32>
    %c4_115 = arith.constant 4 : index
    %c0_116 = arith.constant 0 : index
    %c0_117 = arith.constant 0 : index
    %439 = vector.load %arg9[%c4_115, %c0_116, %c0_117] : memref<7x8x8xi32, #tpu.memory_space<vmem>>, vector<1x8x8xi32>
    %440 = vector.shape_cast %439 : vector<1x8x8xi32> to vector<8x8xi32>
    %441 = vector.shape_cast %438 : vector<8x8xi32> to vector<1x8x8xi32>
    tpu.vector_store %arg9[%c4_115, %c0_116, %c0_117], %441 {strides = array<i32>} : memref<7x8x8xi32, #tpu.memory_space<vmem>>, vector<1x8x8xi32>,
    %442 = vector.extract_strided_slice %5 {offsets = [48, 0], sizes = [8, 8], strides = [1, 1]} : vector<64x8xf32> to vector<8x8xf32>
    %443 = vector.extract_strided_slice %14 {offsets = [48, 0], sizes = [8, 1], strides = [1, 1]} : vector<64x1xf32> to vector<8x1xf32>
    %c0_118 = arith.constant 0 : index
    %c6 = arith.constant 6 : index
    %444 = vector.load %arg4[%c0_118, %c6] : memref<8x8xi32, #tpu.memory_space<vmem>>, vector<8x1xi32>
    %c0_119 = arith.constant 0 : index
    %c6_120 = arith.constant 6 : index
    %445 = vector.load %arg5[%c0_119, %c6_120] : memref<8x8xf32, #tpu.memory_space<vmem>>, vector<8x1xf32>
    %446 = vector.broadcast %444 : vector<8x1xi32> to vector<8x8xi32>
    %447 = arith.cmpi eq, %446, %15 : vector<8x8xi32>
    %448 = arith.extui %447 : vector<8x8xi1> to vector<8x8xi32>
    %449 = arith.sitofp %448 : vector<8x8xi32> to vector<8x8xf32>
    %450 = arith.mulf %442, %449 : vector<8x8xf32>
    %cst_121 = arith.constant dense<0.000000e+00> : vector<8xf32>
    %451 = vector.multi_reduction <add>, %450, %cst_121 [1] : vector<8x8xf32> to vector<8xf32>
    %452 = vector.shape_cast %451 : vector<8xf32> to vector<8x1xf32>
    %453 = arith.subf %452, %443 : vector<8x1xf32>
    %454 = math.exp %453 : vector<8x1xf32>
    %cst_122 = arith.constant 0.00999999977 : f32
    %cst_123 = arith.constant 9.900000e-01 : f32
    %455 = vector.broadcast %cst_122 : f32 to vector<8x1xf32>
    %456 = arith.maximumf %455, %454 : vector<8x1xf32>
    %457 = vector.broadcast %cst_123 : f32 to vector<8x1xf32>
    %458 = arith.minimumf %457, %456 : vector<8x1xf32>
    %cst_124 = arith.constant 1.000000e+00 : f32
    %459 = vector.broadcast %cst_124 : f32 to vector<8x1xf32>
    %460 = arith.subf %459, %458 : vector<8x1xf32>
    %461 = arith.mulf %460, %460 : vector<8x1xf32>
    %cst_125 = arith.constant 0.000000e+00 : f32
    %462 = vector.broadcast %cst_125 : f32 to vector<8x1xf32>
    %463 = arith.subf %462, %461 : vector<8x1xf32>
    %cst_126 = arith.constant 9.99999993E-9 : f32
    %464 = vector.broadcast %cst_126 : f32 to vector<8x1xf32>
    %465 = arith.addf %454, %464 : vector<8x1xf32>
    %466 = math.log %465 : vector<8x1xf32>
    %467 = arith.mulf %463, %466 : vector<8x1xf32>
    %468 = arith.mulf %467, %445 : vector<8x1xf32>
    %469 = arith.addf %390, %468 : vector<8x1xf32>
    %470 = arith.addf %391, %445 : vector<8x1xf32>
    %471 = vector.shape_cast %16 : vector<8x8xf32> to vector<1x8x8xf32>
    %472 = vector.shape_cast %370 : vector<8x8xf32> to vector<8x1x8xf32>
    %473 = vector.broadcast %471 : vector<1x8x8xf32> to vector<8x8x8xf32>
    %474 = vector.broadcast %472 : vector<8x1x8xf32> to vector<8x8x8xf32>
    %475 = arith.mulf %473, %474 : vector<8x8x8xf32>
    %cst_127 = arith.constant dense<0.000000e+00> : vector<8x8xf32>
    %476 = vector.multi_reduction <add>, %475, %cst_127 [2] : vector<8x8x8xf32> to vector<8x8xf32>
    %477 = arith.mulf %476, %449 : vector<8x8xf32>
    %cst_128 = arith.constant dense<0.000000e+00> : vector<8xf32>
    %478 = vector.multi_reduction <add>, %477, %cst_128 [1] : vector<8x8xf32> to vector<8xf32>
    %479 = vector.shape_cast %478 : vector<8xf32> to vector<8x1xf32>
    %480 = arith.addf %452, %479 : vector<8x1xf32>
    %481 = arith.mulf %480, %445 : vector<8x1xf32>
    %482 = arith.addf %403, %481 : vector<8x1xf32>
    %cst_129 = arith.constant 0.000000e+00 : f32
    %483 = vector.broadcast %cst_129 : f32 to vector<8x1xf32>
    %484 = arith.cmpf ogt, %445, %483 : vector<8x1xf32>
    %485 = vector.shape_cast %420 : vector<8x8xf32> to vector<8x1x8xf32>
    %486 = vector.broadcast %485 : vector<8x1x8xf32> to vector<8x8x8xf32>
    %487 = arith.addf %486, %18 : vector<8x8x8xf32>
    %cst_130 = arith.constant dense<0xFF800000> : vector<8x8xf32>
    %488 = vector.multi_reduction <maximumf>, %487, %cst_130 [2] : vector<8x8x8xf32> to vector<8x8xf32>
    %489 = vector.shape_cast %488 : vector<8x8xf32> to vector<8x8x1xf32>
    %490 = vector.broadcast %489 : vector<8x8x1xf32> to vector<8x8x8xf32>
    %491 = arith.subf %487, %490 : vector<8x8x8xf32>
    %492 = math.exp %491 : vector<8x8x8xf32>
    %cst_131 = arith.constant dense<0.000000e+00> : vector<8x8xf32>
    %493 = vector.multi_reduction <add>, %492, %cst_131 [2] : vector<8x8x8xf32> to vector<8x8xf32>
    %494 = math.log %493 : vector<8x8xf32>
    %495 = arith.addf %488, %494 : vector<8x8xf32>
    %496 = arith.addf %495, %442 : vector<8x8xf32>
    %497 = vector.shape_cast %484 : vector<8x1xi1> to vector<8x1xi1>
    %498 = vector.broadcast %497 : vector<8x1xi1> to vector<8x8xi1>
    %499 = arith.select %498, %496, %420 : vector<8x8xi1>, vector<8x8xf32>
    %500 = vector.shape_cast %435 : vector<8x8xf32> to vector<8x1x8xf32>
    %501 = vector.broadcast %500 : vector<8x1x8xf32> to vector<8x8x8xf32>
    %502 = arith.addf %501, %18 : vector<8x8x8xf32>
    %cst_132 = arith.constant dense<0xFF800000> : vector<8x8xf32>
    %503 = vector.multi_reduction <maximumf>, %502, %cst_132 [2] : vector<8x8x8xf32> to vector<8x8xf32>
    %504 = vector.shape_cast %503 : vector<8x8xf32> to vector<8x8x1xf32>
    %505 = tpu.iota {dimensions = array<i32: 2>} : vector<8x8x8xi32>
    %506 = vector.broadcast %504 : vector<8x8x1xf32> to vector<8x8x8xf32>
    %507 = arith.cmpf oeq, %502, %506 : vector<8x8x8xf32>
    %c2147483647_i32_133 = arith.constant 2147483647 : i32
    %508 = vector.broadcast %c2147483647_i32_133 : i32 to vector<8x8x8xi32>
    %509 = arith.select %507, %505, %508 : vector<8x8x8xi1>, vector<8x8x8xi32>
    %cst_134 = arith.constant dense<2147483647> : vector<8x8xi32>
    %510 = vector.multi_reduction <minsi>, %509, %cst_134 [2] : vector<8x8x8xi32> to vector<8x8xi32>
    %511 = arith.addf %503, %442 : vector<8x8xf32>
    %512 = vector.shape_cast %484 : vector<8x1xi1> to vector<8x1xi1>
    %513 = vector.broadcast %512 : vector<8x1xi1> to vector<8x8xi1>
    %514 = arith.select %513, %511, %435 : vector<8x8xi1>, vector<8x8xf32>
    %515 = vector.shape_cast %484 : vector<8x1xi1> to vector<8x1xi1>
    %516 = vector.broadcast %515 : vector<8x1xi1> to vector<8x8xi1>
    %517 = arith.select %516, %510, %15 : vector<8x8xi1>, vector<8x8xi32>
    %c5_135 = arith.constant 5 : index
    %c0_136 = arith.constant 0 : index
    %c0_137 = arith.constant 0 : index
    %518 = vector.load %arg9[%c5_135, %c0_136, %c0_137] : memref<7x8x8xi32, #tpu.memory_space<vmem>>, vector<1x8x8xi32>
    %519 = vector.shape_cast %518 : vector<1x8x8xi32> to vector<8x8xi32>
    %520 = vector.shape_cast %517 : vector<8x8xi32> to vector<1x8x8xi32>
    tpu.vector_store %arg9[%c5_135, %c0_136, %c0_137], %520 {strides = array<i32>} : memref<7x8x8xi32, #tpu.memory_space<vmem>>, vector<1x8x8xi32>,
    %521 = vector.extract_strided_slice %5 {offsets = [56, 0], sizes = [8, 8], strides = [1, 1]} : vector<64x8xf32> to vector<8x8xf32>
    %522 = vector.extract_strided_slice %14 {offsets = [56, 0], sizes = [8, 1], strides = [1, 1]} : vector<64x1xf32> to vector<8x1xf32>
    %c0_138 = arith.constant 0 : index
    %c7 = arith.constant 7 : index
    %523 = vector.load %arg4[%c0_138, %c7] : memref<8x8xi32, #tpu.memory_space<vmem>>, vector<8x1xi32>
    %c0_139 = arith.constant 0 : index
    %c7_140 = arith.constant 7 : index
    %524 = vector.load %arg5[%c0_139, %c7_140] : memref<8x8xf32, #tpu.memory_space<vmem>>, vector<8x1xf32>
    %525 = vector.broadcast %523 : vector<8x1xi32> to vector<8x8xi32>
    %526 = arith.cmpi eq, %525, %15 : vector<8x8xi32>
    %527 = arith.extui %526 : vector<8x8xi1> to vector<8x8xi32>
    %528 = arith.sitofp %527 : vector<8x8xi32> to vector<8x8xf32>
    %529 = arith.mulf %521, %528 : vector<8x8xf32>
    %cst_141 = arith.constant dense<0.000000e+00> : vector<8xf32>
    %530 = vector.multi_reduction <add>, %529, %cst_141 [1] : vector<8x8xf32> to vector<8xf32>
    %531 = vector.shape_cast %530 : vector<8xf32> to vector<8x1xf32>
    %532 = arith.subf %531, %522 : vector<8x1xf32>
    %533 = math.exp %532 : vector<8x1xf32>
    %cst_142 = arith.constant 0.00999999977 : f32
    %cst_143 = arith.constant 9.900000e-01 : f32
    %534 = vector.broadcast %cst_142 : f32 to vector<8x1xf32>
    %535 = arith.maximumf %534, %533 : vector<8x1xf32>
    %536 = vector.broadcast %cst_143 : f32 to vector<8x1xf32>
    %537 = arith.minimumf %536, %535 : vector<8x1xf32>
    %cst_144 = arith.constant 1.000000e+00 : f32
    %538 = vector.broadcast %cst_144 : f32 to vector<8x1xf32>
    %539 = arith.subf %538, %537 : vector<8x1xf32>
    %540 = arith.mulf %539, %539 : vector<8x1xf32>
    %cst_145 = arith.constant 0.000000e+00 : f32
    %541 = vector.broadcast %cst_145 : f32 to vector<8x1xf32>
    %542 = arith.subf %541, %540 : vector<8x1xf32>
    %cst_146 = arith.constant 9.99999993E-9 : f32
    %543 = vector.broadcast %cst_146 : f32 to vector<8x1xf32>
    %544 = arith.addf %533, %543 : vector<8x1xf32>
    %545 = math.log %544 : vector<8x1xf32>
    %546 = arith.mulf %542, %545 : vector<8x1xf32>
    %547 = arith.mulf %546, %524 : vector<8x1xf32>
    %548 = arith.addf %469, %547 : vector<8x1xf32>
    %549 = arith.addf %470, %524 : vector<8x1xf32>
    %550 = vector.shape_cast %16 : vector<8x8xf32> to vector<1x8x8xf32>
    %551 = vector.shape_cast %449 : vector<8x8xf32> to vector<8x1x8xf32>
    %552 = vector.broadcast %550 : vector<1x8x8xf32> to vector<8x8x8xf32>
    %553 = vector.broadcast %551 : vector<8x1x8xf32> to vector<8x8x8xf32>
    %554 = arith.mulf %552, %553 : vector<8x8x8xf32>
    %cst_147 = arith.constant dense<0.000000e+00> : vector<8x8xf32>
    %555 = vector.multi_reduction <add>, %554, %cst_147 [2] : vector<8x8x8xf32> to vector<8x8xf32>
    %556 = arith.mulf %555, %528 : vector<8x8xf32>
    %cst_148 = arith.constant dense<0.000000e+00> : vector<8xf32>
    %557 = vector.multi_reduction <add>, %556, %cst_148 [1] : vector<8x8xf32> to vector<8xf32>
    %558 = vector.shape_cast %557 : vector<8xf32> to vector<8x1xf32>
    %559 = arith.addf %531, %558 : vector<8x1xf32>
    %560 = arith.mulf %559, %524 : vector<8x1xf32>
    %561 = arith.addf %482, %560 : vector<8x1xf32>
    %cst_149 = arith.constant 0.000000e+00 : f32
    %562 = vector.broadcast %cst_149 : f32 to vector<8x1xf32>
    %563 = arith.cmpf ogt, %524, %562 : vector<8x1xf32>
    %564 = vector.shape_cast %499 : vector<8x8xf32> to vector<8x1x8xf32>
    %565 = vector.broadcast %564 : vector<8x1x8xf32> to vector<8x8x8xf32>
    %566 = arith.addf %565, %18 : vector<8x8x8xf32>
    %cst_150 = arith.constant dense<0xFF800000> : vector<8x8xf32>
    %567 = vector.multi_reduction <maximumf>, %566, %cst_150 [2] : vector<8x8x8xf32> to vector<8x8xf32>
    %568 = vector.shape_cast %567 : vector<8x8xf32> to vector<8x8x1xf32>
    %569 = vector.broadcast %568 : vector<8x8x1xf32> to vector<8x8x8xf32>
    %570 = arith.subf %566, %569 : vector<8x8x8xf32>
    %571 = math.exp %570 : vector<8x8x8xf32>
    %cst_151 = arith.constant dense<0.000000e+00> : vector<8x8xf32>
    %572 = vector.multi_reduction <add>, %571, %cst_151 [2] : vector<8x8x8xf32> to vector<8x8xf32>
    %573 = math.log %572 : vector<8x8xf32>
    %574 = arith.addf %567, %573 : vector<8x8xf32>
    %575 = arith.addf %574, %521 : vector<8x8xf32>
    %576 = vector.shape_cast %563 : vector<8x1xi1> to vector<8x1xi1>
    %577 = vector.broadcast %576 : vector<8x1xi1> to vector<8x8xi1>
    %578 = arith.select %577, %575, %499 : vector<8x8xi1>, vector<8x8xf32>
    %579 = vector.shape_cast %514 : vector<8x8xf32> to vector<8x1x8xf32>
    %580 = vector.broadcast %579 : vector<8x1x8xf32> to vector<8x8x8xf32>
    %581 = arith.addf %580, %18 : vector<8x8x8xf32>
    %cst_152 = arith.constant dense<0xFF800000> : vector<8x8xf32>
    %582 = vector.multi_reduction <maximumf>, %581, %cst_152 [2] : vector<8x8x8xf32> to vector<8x8xf32>
    %583 = vector.shape_cast %582 : vector<8x8xf32> to vector<8x8x1xf32>
    %584 = tpu.iota {dimensions = array<i32: 2>} : vector<8x8x8xi32>
    %585 = vector.broadcast %583 : vector<8x8x1xf32> to vector<8x8x8xf32>
    %586 = arith.cmpf oeq, %581, %585 : vector<8x8x8xf32>
    %c2147483647_i32_153 = arith.constant 2147483647 : i32
    %587 = vector.broadcast %c2147483647_i32_153 : i32 to vector<8x8x8xi32>
    %588 = arith.select %586, %584, %587 : vector<8x8x8xi1>, vector<8x8x8xi32>
    %cst_154 = arith.constant dense<2147483647> : vector<8x8xi32>
    %589 = vector.multi_reduction <minsi>, %588, %cst_154 [2] : vector<8x8x8xi32> to vector<8x8xi32>
    %590 = arith.addf %582, %521 : vector<8x8xf32>
    %591 = vector.shape_cast %563 : vector<8x1xi1> to vector<8x1xi1>
    %592 = vector.broadcast %591 : vector<8x1xi1> to vector<8x8xi1>
    %593 = arith.select %592, %590, %514 : vector<8x8xi1>, vector<8x8xf32>
    %594 = vector.shape_cast %563 : vector<8x1xi1> to vector<8x1xi1>
    %595 = vector.broadcast %594 : vector<8x1xi1> to vector<8x8xi1>
    %596 = arith.select %595, %589, %15 : vector<8x8xi1>, vector<8x8xi32>
    %c6_155 = arith.constant 6 : index
    %c0_156 = arith.constant 0 : index
    %c0_157 = arith.constant 0 : index
    %597 = vector.load %arg9[%c6_155, %c0_156, %c0_157] : memref<7x8x8xi32, #tpu.memory_space<vmem>>, vector<1x8x8xi32>
    %598 = vector.shape_cast %597 : vector<1x8x8xi32> to vector<8x8xi32>
    %599 = vector.shape_cast %596 : vector<8x8xi32> to vector<1x8x8xi32>
    tpu.vector_store %arg9[%c6_155, %c0_156, %c0_157], %599 {strides = array<i32>} : memref<7x8x8xi32, #tpu.memory_space<vmem>>, vector<1x8x8xi32>,
    %cst_158 = arith.constant dense<0xFF800000> : vector<8xf32>
    %600 = vector.multi_reduction <maximumf>, %578, %cst_158 [1] : vector<8x8xf32> to vector<8xf32>
    %601 = vector.shape_cast %600 : vector<8xf32> to vector<8x1xf32>
    %602 = vector.broadcast %601 : vector<8x1xf32> to vector<8x8xf32>
    %603 = arith.subf %578, %602 : vector<8x8xf32>
    %604 = math.exp %603 : vector<8x8xf32>
    %cst_159 = arith.constant dense<0.000000e+00> : vector<8xf32>
    %605 = vector.multi_reduction <add>, %604, %cst_159 [1] : vector<8x8xf32> to vector<8xf32>
    %606 = vector.shape_cast %605 : vector<8xf32> to vector<8x1xf32>
    %607 = math.log %606 : vector<8x1xf32>
    %608 = arith.addf %601, %607 : vector<8x1xf32>
    %609 = arith.subf %561, %608 : vector<8x1xf32>
    %cst_160 = arith.constant 9.99999971E-10 : f32
    %610 = vector.broadcast %cst_160 : f32 to vector<8x1xf32>
    %611 = arith.maximumf %549, %610 : vector<8x1xf32>
    %612 = arith.divf %548, %611 : vector<8x1xf32>
    %cst_161 = arith.constant dense<0xFF800000> : vector<8xf32>
    %613 = vector.multi_reduction <maximumf>, %593, %cst_161 [1] : vector<8x8xf32> to vector<8xf32>
    %614 = vector.shape_cast %613 : vector<8xf32> to vector<8x1xf32>
    %615 = tpu.iota {dimensions = array<i32: 1>} : vector<8x8xi32>
    %616 = vector.broadcast %614 : vector<8x1xf32> to vector<8x8xf32>
    %617 = arith.cmpf oeq, %593, %616 : vector<8x8xf32>
    %c2147483647_i32_162 = arith.constant 2147483647 : i32
    %618 = vector.broadcast %c2147483647_i32_162 : i32 to vector<8x8xi32>
    %619 = arith.select %617, %615, %618 : vector<8x8xi1>, vector<8x8xi32>
    %cst_163 = arith.constant dense<2147483647> : vector<8xi32>
    %620 = vector.multi_reduction <minsi>, %619, %cst_163 [1] : vector<8x8xi32> to vector<8xi32>
    %621 = vector.shape_cast %620 : vector<8xi32> to vector<8x1xi32>
    %622 = tpu.iota {dimensions = array<i32: 1>} : vector<8x8xi32>
    %c7_i32 = arith.constant 7 : i32
    %623 = vector.broadcast %c7_i32 : i32 to vector<8x8xi32>
    %624 = arith.cmpi eq, %622, %623 : vector<8x8xi32>
    %c0_i32 = arith.constant 0 : i32
    %625 = vector.broadcast %c0_i32 : i32 to vector<8x8xi32>
    %626 = vector.shape_cast %621 : vector<8x1xi32> to vector<8x1xi32>
    %627 = vector.broadcast %626 : vector<8x1xi32> to vector<8x8xi32>
    %628 = arith.select %624, %627, %625 : vector<8x8xi1>, vector<8x8xi32>
    %c6_164 = arith.constant 6 : index
    %c0_165 = arith.constant 0 : index
    %c0_166 = arith.constant 0 : index
    %629 = vector.load %arg9[%c6_164, %c0_165, %c0_166] : memref<7x8x8xi32, #tpu.memory_space<vmem>>, vector<1x8x8xi32>
    %630 = vector.shape_cast %629 : vector<1x8x8xi32> to vector<8x8xi32>
    %631 = vector.broadcast %621 : vector<8x1xi32> to vector<8x8xi32>
    %632 = arith.cmpi eq, %15, %631 : vector<8x8xi32>
    %c0_i32_167 = arith.constant 0 : i32
    %633 = vector.broadcast %c0_i32_167 : i32 to vector<8x8xi32>
    %634 = arith.select %632, %630, %633 : vector<8x8xi1>, vector<8x8xi32>
    %cst_168 = arith.constant dense<0> : vector<8xi32>
    %635 = vector.multi_reduction <add>, %634, %cst_168 [1] : vector<8x8xi32> to vector<8xi32>
    %636 = vector.shape_cast %635 : vector<8xi32> to vector<8x1xi32>
    %c6_i32 = arith.constant 6 : i32
    %637 = vector.broadcast %c6_i32 : i32 to vector<8x8xi32>
    %638 = arith.cmpi eq, %622, %637 : vector<8x8xi32>
    %639 = vector.shape_cast %636 : vector<8x1xi32> to vector<8x1xi32>
    %640 = vector.broadcast %639 : vector<8x1xi32> to vector<8x8xi32>
    %641 = arith.select %638, %640, %628 : vector<8x8xi1>, vector<8x8xi32>
    %c5_169 = arith.constant 5 : index
    %c0_170 = arith.constant 0 : index
    %c0_171 = arith.constant 0 : index
    %642 = vector.load %arg9[%c5_169, %c0_170, %c0_171] : memref<7x8x8xi32, #tpu.memory_space<vmem>>, vector<1x8x8xi32>
    %643 = vector.shape_cast %642 : vector<1x8x8xi32> to vector<8x8xi32>
    %644 = vector.broadcast %636 : vector<8x1xi32> to vector<8x8xi32>
    %645 = arith.cmpi eq, %15, %644 : vector<8x8xi32>
    %c0_i32_172 = arith.constant 0 : i32
    %646 = vector.broadcast %c0_i32_172 : i32 to vector<8x8xi32>
    %647 = arith.select %645, %643, %646 : vector<8x8xi1>, vector<8x8xi32>
    %cst_173 = arith.constant dense<0> : vector<8xi32>
    %648 = vector.multi_reduction <add>, %647, %cst_173 [1] : vector<8x8xi32> to vector<8xi32>
    %649 = vector.shape_cast %648 : vector<8xi32> to vector<8x1xi32>
    %c5_i32 = arith.constant 5 : i32
    %650 = vector.broadcast %c5_i32 : i32 to vector<8x8xi32>
    %651 = arith.cmpi eq, %622, %650 : vector<8x8xi32>
    %652 = vector.shape_cast %649 : vector<8x1xi32> to vector<8x1xi32>
    %653 = vector.broadcast %652 : vector<8x1xi32> to vector<8x8xi32>
    %654 = arith.select %651, %653, %641 : vector<8x8xi1>, vector<8x8xi32>
    %c4_174 = arith.constant 4 : index
    %c0_175 = arith.constant 0 : index
    %c0_176 = arith.constant 0 : index
    %655 = vector.load %arg9[%c4_174, %c0_175, %c0_176] : memref<7x8x8xi32, #tpu.memory_space<vmem>>, vector<1x8x8xi32>
    %656 = vector.shape_cast %655 : vector<1x8x8xi32> to vector<8x8xi32>
    %657 = vector.broadcast %649 : vector<8x1xi32> to vector<8x8xi32>
    %658 = arith.cmpi eq, %15, %657 : vector<8x8xi32>
    %c0_i32_177 = arith.constant 0 : i32
    %659 = vector.broadcast %c0_i32_177 : i32 to vector<8x8xi32>
    %660 = arith.select %658, %656, %659 : vector<8x8xi1>, vector<8x8xi32>
    %cst_178 = arith.constant dense<0> : vector<8xi32>
    %661 = vector.multi_reduction <add>, %660, %cst_178 [1] : vector<8x8xi32> to vector<8xi32>
    %662 = vector.shape_cast %661 : vector<8xi32> to vector<8x1xi32>
    %c4_i32 = arith.constant 4 : i32
    %663 = vector.broadcast %c4_i32 : i32 to vector<8x8xi32>
    %664 = arith.cmpi eq, %622, %663 : vector<8x8xi32>
    %665 = vector.shape_cast %662 : vector<8x1xi32> to vector<8x1xi32>
    %666 = vector.broadcast %665 : vector<8x1xi32> to vector<8x8xi32>
    %667 = arith.select %664, %666, %654 : vector<8x8xi1>, vector<8x8xi32>
    %c3_179 = arith.constant 3 : index
    %c0_180 = arith.constant 0 : index
    %c0_181 = arith.constant 0 : index
    %668 = vector.load %arg9[%c3_179, %c0_180, %c0_181] : memref<7x8x8xi32, #tpu.memory_space<vmem>>, vector<1x8x8xi32>
    %669 = vector.shape_cast %668 : vector<1x8x8xi32> to vector<8x8xi32>
    %670 = vector.broadcast %662 : vector<8x1xi32> to vector<8x8xi32>
    %671 = arith.cmpi eq, %15, %670 : vector<8x8xi32>
    %c0_i32_182 = arith.constant 0 : i32
    %672 = vector.broadcast %c0_i32_182 : i32 to vector<8x8xi32>
    %673 = arith.select %671, %669, %672 : vector<8x8xi1>, vector<8x8xi32>
    %cst_183 = arith.constant dense<0> : vector<8xi32>
    %674 = vector.multi_reduction <add>, %673, %cst_183 [1] : vector<8x8xi32> to vector<8xi32>
    %675 = vector.shape_cast %674 : vector<8xi32> to vector<8x1xi32>
    %c3_i32 = arith.constant 3 : i32
    %676 = vector.broadcast %c3_i32 : i32 to vector<8x8xi32>
    %677 = arith.cmpi eq, %622, %676 : vector<8x8xi32>
    %678 = vector.shape_cast %675 : vector<8x1xi32> to vector<8x1xi32>
    %679 = vector.broadcast %678 : vector<8x1xi32> to vector<8x8xi32>
    %680 = arith.select %677, %679, %667 : vector<8x8xi1>, vector<8x8xi32>
    %c2_184 = arith.constant 2 : index
    %c0_185 = arith.constant 0 : index
    %c0_186 = arith.constant 0 : index
    %681 = vector.load %arg9[%c2_184, %c0_185, %c0_186] : memref<7x8x8xi32, #tpu.memory_space<vmem>>, vector<1x8x8xi32>
    %682 = vector.shape_cast %681 : vector<1x8x8xi32> to vector<8x8xi32>
    %683 = vector.broadcast %675 : vector<8x1xi32> to vector<8x8xi32>
    %684 = arith.cmpi eq, %15, %683 : vector<8x8xi32>
    %c0_i32_187 = arith.constant 0 : i32
    %685 = vector.broadcast %c0_i32_187 : i32 to vector<8x8xi32>
    %686 = arith.select %684, %682, %685 : vector<8x8xi1>, vector<8x8xi32>
    %cst_188 = arith.constant dense<0> : vector<8xi32>
    %687 = vector.multi_reduction <add>, %686, %cst_188 [1] : vector<8x8xi32> to vector<8xi32>
    %688 = vector.shape_cast %687 : vector<8xi32> to vector<8x1xi32>
    %c2_i32 = arith.constant 2 : i32
    %689 = vector.broadcast %c2_i32 : i32 to vector<8x8xi32>
    %690 = arith.cmpi eq, %622, %689 : vector<8x8xi32>
    %691 = vector.shape_cast %688 : vector<8x1xi32> to vector<8x1xi32>
    %692 = vector.broadcast %691 : vector<8x1xi32> to vector<8x8xi32>
    %693 = arith.select %690, %692, %680 : vector<8x8xi1>, vector<8x8xi32>
    %c1_189 = arith.constant 1 : index
    %c0_190 = arith.constant 0 : index
    %c0_191 = arith.constant 0 : index
    %694 = vector.load %arg9[%c1_189, %c0_190, %c0_191] : memref<7x8x8xi32, #tpu.memory_space<vmem>>, vector<1x8x8xi32>
    %695 = vector.shape_cast %694 : vector<1x8x8xi32> to vector<8x8xi32>
    %696 = vector.broadcast %688 : vector<8x1xi32> to vector<8x8xi32>
    %697 = arith.cmpi eq, %15, %696 : vector<8x8xi32>
    %c0_i32_192 = arith.constant 0 : i32
    %698 = vector.broadcast %c0_i32_192 : i32 to vector<8x8xi32>
    %699 = arith.select %697, %695, %698 : vector<8x8xi1>, vector<8x8xi32>
    %cst_193 = arith.constant dense<0> : vector<8xi32>
    %700 = vector.multi_reduction <add>, %699, %cst_193 [1] : vector<8x8xi32> to vector<8xi32>
    %701 = vector.shape_cast %700 : vector<8xi32> to vector<8x1xi32>
    %c1_i32 = arith.constant 1 : i32
    %702 = vector.broadcast %c1_i32 : i32 to vector<8x8xi32>
    %703 = arith.cmpi eq, %622, %702 : vector<8x8xi32>
    %704 = vector.shape_cast %701 : vector<8x1xi32> to vector<8x1xi32>
    %705 = vector.broadcast %704 : vector<8x1xi32> to vector<8x8xi32>
    %706 = arith.select %703, %705, %693 : vector<8x8xi1>, vector<8x8xi32>
    %c0_194 = arith.constant 0 : index
    %c0_195 = arith.constant 0 : index
    %c0_196 = arith.constant 0 : index
    %707 = vector.load %arg9[%c0_194, %c0_195, %c0_196] : memref<7x8x8xi32, #tpu.memory_space<vmem>>, vector<1x8x8xi32>
    %708 = vector.shape_cast %707 : vector<1x8x8xi32> to vector<8x8xi32>
    %709 = vector.broadcast %701 : vector<8x1xi32> to vector<8x8xi32>
    %710 = arith.cmpi eq, %15, %709 : vector<8x8xi32>
    %c0_i32_197 = arith.constant 0 : i32
    %711 = vector.broadcast %c0_i32_197 : i32 to vector<8x8xi32>
    %712 = arith.select %710, %708, %711 : vector<8x8xi1>, vector<8x8xi32>
    %cst_198 = arith.constant dense<0> : vector<8xi32>
    %713 = vector.multi_reduction <add>, %712, %cst_198 [1] : vector<8x8xi32> to vector<8xi32>
    %714 = vector.shape_cast %713 : vector<8xi32> to vector<8x1xi32>
    %c0_i32_199 = arith.constant 0 : i32
    %715 = vector.broadcast %c0_i32_199 : i32 to vector<8x8xi32>
    %716 = arith.cmpi eq, %622, %715 : vector<8x8xi32>
    %717 = vector.shape_cast %714 : vector<8x1xi32> to vector<8x1xi32>
    %718 = vector.broadcast %717 : vector<8x1xi32> to vector<8x8xi32>
    %719 = arith.select %716, %718, %706 : vector<8x8xi1>, vector<8x8xi32>
    %c0_200 = arith.constant 0 : index
    %c0_201 = arith.constant 0 : index
    %720 = vector.load %arg8[%c0_200, %c0_201] : memref<8x8xi32, #tpu.memory_space<vmem>>, vector<8x8xi32>
    tpu.vector_store %arg8[%c0_200, %c0_201], %719 {strides = array<i32>} : memref<8x8xi32, #tpu.memory_space<vmem>>, vector<8x8xi32>,
    %721 = tpu.iota {dimensions = array<i32: 1>} : vector<8x3xi32>
    %c0_i32_202 = arith.constant 0 : i32
    %722 = vector.broadcast %c0_i32_202 : i32 to vector<8x3xi32>
    %723 = arith.cmpi eq, %721, %722 : vector<8x3xi32>
    %c1_i32_203 = arith.constant 1 : i32
    %724 = vector.broadcast %c1_i32_203 : i32 to vector<8x3xi32>
    %725 = arith.cmpi eq, %721, %724 : vector<8x3xi32>
    %726 = vector.shape_cast %609 : vector<8x1xf32> to vector<8x1xf32>
    %727 = vector.broadcast %726 : vector<8x1xf32> to vector<8x3xf32>
    %728 = vector.shape_cast %614 : vector<8x1xf32> to vector<8x1xf32>
    %729 = vector.broadcast %728 : vector<8x1xf32> to vector<8x3xf32>
    %730 = arith.select %725, %727, %729 : vector<8x3xi1>, vector<8x3xf32>
    %731 = vector.shape_cast %612 : vector<8x1xf32> to vector<8x1xf32>
    %732 = vector.broadcast %731 : vector<8x1xf32> to vector<8x3xf32>
    %733 = arith.select %723, %732, %730 : vector<8x3xi1>, vector<8x3xf32>
    %c0_204 = arith.constant 0 : index
    %c0_205 = arith.constant 0 : index
    %734 = vector.load %arg7[%c0_204, %c0_205] : memref<8x3xf32, #tpu.memory_space<vmem>>, vector<8x3xf32>
    tpu.vector_store %arg7[%c0_204, %c0_205], %733 {strides = array<i32>} : memref<8x3xf32, #tpu.memory_space<vmem>>, vector<8x3xf32>,
    return
  }
  func.func @transform_0(%arg0: i32) -> (i32, i32) {
    %c0_i32 = arith.constant 0 : i32
    %c0_i32_0 = arith.constant 0 : i32
    return %arg0, %c0_i32 : i32, i32
  }
  func.func @transform_1(%arg0: i32) -> (i32, i32) {
    %c0_i32 = arith.constant 0 : i32
    %c0_i32_0 = arith.constant 0 : i32
    %c0_i32_1 = arith.constant 0 : i32
    return %c0_i32, %c0_i32_0 : i32, i32
  }
  func.func @transform_2(%arg0: i32) -> (i32, i32) {
    %c0_i32 = arith.constant 0 : i32
    %c0_i32_0 = arith.constant 0 : i32
    %c0_i32_1 = arith.constant 0 : i32
    return %c0_i32, %c0_i32_0 : i32, i32
  }
  func.func @transform_3(%arg0: i32) -> (i32, i32) {
    %c0_i32 = arith.constant 0 : i32
    %c0_i32_0 = arith.constant 0 : i32
    return %arg0, %c0_i32 : i32, i32
  }
  func.func @transform_4(%arg0: i32) -> (i32, i32) {
    %c0_i32 = arith.constant 0 : i32
    %c0_i32_0 = arith.constant 0 : i32
    return %arg0, %c0_i32 : i32, i32
  }
  func.func @transform_5(%arg0: i32) -> (i32, i32) {
    %c0_i32 = arith.constant 0 : i32
    %c0_i32_0 = arith.constant 0 : i32
    %c0_i32_1 = arith.constant 0 : i32
    return %c0_i32, %c0_i32_0 : i32, i32
  }
  func.func @transform_6(%arg0: i32) -> (i32, i32) {
    %c0_i32 = arith.constant 0 : i32
    %c0_i32_0 = arith.constant 0 : i32
    return %arg0, %c0_i32 : i32, i32
  }
  func.func @transform_7(%arg0: i32) -> (i32, i32) {
    %c0_i32 = arith.constant 0 : i32
    %c0_i32_0 = arith.constant 0 : i32
    return %arg0, %c0_i32 : i32, i32
  }
}

</mosaic_0001>

<bundles_post_ra>
// kernel: tpu_custom_call.1
= control target key start
LH: loop header
LB: loop body
LE: loop exit
PB: predicated region body
PF: predicated region fallthrough
CT: control target
= control target key end

     0   :  { %s8494_s24 = smov 0   ;;  %s12765_s0 = inlined_call_operand.vmem [shape: bf16[128,32], index: 0, kind: input, shape index: {}]   ;;  %s12766_s1 = inlined_call_operand.vmem [shape: bf16[32,8], index: 1, kind: input, shape index: {}]   ;;  %s12767_s2 = inlined_call_operand.vmem [shape: f32[1,8], index: 2, kind: input, shape index: {}]   ;;  %s12768_s3 = inlined_call_operand.vmem [shape: s32[16,8], index: 3, kind: input, shape index: {}]   ;;  %s12769_s4 = inlined_call_operand.vmem [shape: f32[16,8], index: 4, kind: input, shape index: {}]   ;;  %s12770_s5 = inlined_call_operand.vmem [shape: f32[8,8], index: 5, kind: input, shape index: {}]   ;;  %s12771_s6 = inlined_call_operand.vmem [shape: f32[16,3], index: 6, kind: output, shape index: {0}]   ;;  %s12772_s7 = inlined_call_operand.vmem [shape: s32[16,8], index: 7, kind: output, shape index: {1}]  }
   0x1 LB: > { %s8016_s25 = sadd.s32 4294967295, %s8435_s24   ;;  %p8020_p0 = scmp.ge.s32.totalorder %s8435_s24, 1  ;;  %s8435_s24 = sphi %s8494_s24, %s18_s24  }
   0x2   : > { %p259_p1 = scmp.lt.s32.totalorder %s8435_s24, 3 }
   0x4   : > { %p260_p2 = pnand %p8020_p0, %p259_p1 }
   0x6   : > { %263 = sbr.rel (%p260_p2) target bundleno = 6463 (0x193f), region = 44 }
   0xb   : > { %v8119_v0 = vld [vmem:[%s12766_s1 + $0x8] sm:$0xff]   ;;  %v8437_v1 = vmov 1   ;;  %v8120_v2 = vld [vmem:[%s12766_s1] sm:$0xff]   ;;  %p308_p3 = scmp.lt.s32.totalorder %s8016_s25, 1  ;;  %s8021_s30 = sshll.u32 %s8016_s25, 3  ;;  %v12777_v3 = vmov 2   ;;  %v551_v12 = vlaneseq }
   0xc   : > { %8095 = vset.pattern.permute.xlu1 %v8437_v1  ;;  %8054 = vmatprep.subr.bf16.mxu0 %v8119_v0  ;;  %p303_p4 = scmp.lt.s32.totalorder %s8021_s30, 15  ;;  %s8439_s15 = smov 127   ;;  %v12775_v6 = vmov 0   ;;  %vm376_vm1 = vcmask 261120   ;;  %v12773_v18 = vmov 0.0   ;;  %v8602_v48 = vld [vmem:[%s12770_s5] sm:$0xff] }
   0xd   : > { %8066 = vmatprep.subr.bf16.mxu1 %v8119_v0  ;;  %8055 = vmatpush3.bf16.msra.mxu0 %v8119_v0  ;;  %s13414_s25 = smov (!%p308_p3, %s8016_s25), 1  ;;  %s8441_s20 = smov 126   ;;  %v8533_v13 = vshrl.u32 %v551_v12, 7  ;;  %v8535_v14 = vand.u32 127, %v551_v12  ;;  %v8443_v36 = vmov 1966171168  }
   0xe   : > { %8068 = vmatpush3.bf16.msra.mxu1 %v8119_v0  ;;  %8056 = vmatprep.subr.bf16.mxu0 %v8120_v2  ;;  %s8508_s8 = sshll.u32 %s13414_s25, 3  ;;  %s13416_s30 = smov (!%p303_p4, %s8021_s30), 15  ;;  %v616_v37 = vunpack.c.l.s4 %v8443_v36  ;;  %vm454_vm4 = vcmask 64512   ;;  %vm872_vm14 = vcmask 1041409   ;;  %vm874_vm15 = vcmask 1042434  }
   0xf   : > { %8067 = vmatprep.subr.bf16.mxu1 %v8120_v2  ;;  %8096 = vset.pattern.permute.xlu0 %v12777_v3  ;;  %s8515_s11 = scalar_lea.vmem %s12768_s3, %s8508_s8  ;;  %s8521_s14 = scalar_lea.vmem %s12769_s4, %s8508_s8  ;;  %12987 = vst [vmem:[#allocation3_spill] sm:$0xff] %v8535_v14  ;;  %v8538_v15 = vsub.s32 0, %v8533_v13  ;;  %v8541_v16 = vsub.s32 1, %v8533_v13  ;;  %v8552_v22 = vsub.s32 2, %v8533_v13  ;;  %v8555_v23 = vsub.s32 3, %v8533_v13 }
  0x10   : > { %v554_v4 = vld [vmem:[%s8515_s11] sm:$0xff]  ;;  %s8022_s16 = sshll.u32 %s13416_s30, 2  ;;  %v8562_v26 = vsub.s32 4, %v8533_v13  ;;  %v8565_v27 = vsub.s32 5, %v8533_v13  ;;  %v8574_v31 = vsub.s32 6, %v8533_v13  ;;  %v8577_v32 = vsub.s32 7, %v8533_v13  ;;  %s323_s23 = scalar_lea.vmem %s12772_s7, %s8508_s8 }
  0x11   : > { %8057 = vmatpush3.bf16.msra.mxu0 %v8120_v2  ;;  %v555_v5 = vld [vmem:[%s8521_s14] sm:$0xff]  ;;  %581 = vperm.xlu1 %8095, %v554_v4   ;;  %s306_s19 = scalar_lea.vmem %s12765_s0, %s8022_s16  ;;  %12988 = vst [vmem:[#allocation4_spill] sm:$0xff] %v8538_v15  ;;  %12989 = vst [vmem:[#allocation5_spill] sm:$0xff] %v8541_v16  ;;  %v617_v39 = vunpack.c.0.s8 %v616_v37  ;;  %s8445_s28 = smov 125  }
  0x12   : > { %8069 = vmatpush3.bf16.msra.mxu1 %v8120_v2  ;;  %vm897_vm0 = vcmp.gt.f32.partialorder %v555_v5, 0.0  ;;  %609 = vrot.lane.b32.xlu0 %v555_v5, %s8439_s15  ;;  %v8121_v8 = vld [vmem:[%s306_s19] sm:$0xff]   ;;  %v8122_v9 = vld [vmem:[%s306_s19 + $0x10] sm:$0xff]   ;;  %v8123_v10 = vld [vmem:[%s306_s19 + $0x8] sm:$0xff]   ;;  %12990 = vst [vmem:[#allocation6_spill] sm:$0xff] %v8552_v22  ;;  %s8447_s9 = smov 124   ;;  %s319_s27 = scalar_lea.vmem %s12771_s6, %s8508_s8 }
  0x13   : > { %v1165_v7 = vsel %vm897_vm0, 1, %v12775_v6  ;;  %8058 = vmatprep.mubr.msk.bf16.mxu0 %vm376_vm1, %v8121_v8  ;;  %8062 = vmatprep.mubr.msk.bf16.mxu1 %vm376_vm1, %v8122_v9  ;;  %v8124_v11 = vld [vmem:[%s306_s19 + $0x18] sm:$0xff]   ;;  %12991 = vst [vmem:[#allocation7_spill] sm:$0xff] %v8555_v23  ;;  %12992 = vst [vmem:[#allocation8_spill] sm:$0xff] %v8562_v26  ;;  %v8590_v41 = vsub.s32 %v617_v39, %v8533_v13  ;;  %vm876_vm0 = vcmask 1043459   ;;  %s8453_s21 = smov 122  }
  0x14   : > { %8059 = vmatmul.mubr.msk.bf16.vlgmr.msra.gmra.mxu0 %vm376_vm1, %v8123_v10  ;;  %12993 = vst [vmem:[#allocation9_spill] sm:$0xff] %v8565_v27  ;;  %12995 = vst [vmem:[#allocation11_spill] sm:$0xff] %v8574_v31 }
  0x15   : > { %1167 = vperm.xlu1 %8095, %v1165_v7   ;;  %8063 = vmatmul.mubr.msk.bf16.vlgmr.msra.gmra.mxu1 %vm376_vm1, %v8124_v11  ;;  %12996 = vst [vmem:[#allocation12_spill] sm:$0xff] %v8577_v32  ;;  %12997 = vst [vmem:[#allocation13_spill] sm:$0xff] %v8590_v41  ;;  %vm878_vm1 = vcmask 1044484  }
  0x16   : > { %1504 = vperm.xlu0 %8096, %v554_v4  }
  0x19   : > { %8098 = vset.pattern.permute.xlu1 %v12775_v6 }
  0x1a   : > { %8097 = vset.pattern.permute.xlu0 %v12775_v6 }
  0x1b   : > { %557 = vperm.xlu0 %8097, %v554_v4  }
  0x1f   : > { %1532 = vrot.lane.b32.xlu0 %v555_v5, %s8441_s20 }
  0x84   : > { %v8567_v28 = vpop.permute.xlu0 %609 }
  0x85   : > { %12994 = vst [vmem:[#allocation10_spill] sm:$0xff] %v8567_v28 }
  0x8c   : > { %v582_v17 = vpop.permute.xlu1 %581 }
  0x8d   : > { %vm583_vm2 = vcmp.eq.s32.totalorder %v582_v17, %v8535_v14 }
  0x8e   : > { %v8545_v19 = vsel %vm583_vm2, 1.0, %v12773_v18  ;;  %vm880_vm2 = vcmask 1045509  }
  0x8f   : > { %v746_v20 = vrot.slane %v8545_v19, %v8541_v16  ;;  %v739_v21 = vrot.slane %v8545_v19, %v8538_v15  ;;  %v753_v24 = vrot.slane %v8545_v19, %v8552_v22  ;;  %v760_v25 = vrot.slane %v8545_v19, %v8555_v23 }
  0x90   : > { %v767_v29 = vrot.slane %v8545_v19, %v8562_v26  ;;  %v774_v30 = vrot.slane %v8545_v19, %v8565_v27  ;;  %v781_v33 = vrot.slane %v8545_v19, %v8574_v31  ;;  %v788_v34 = vrot.slane %v8545_v19, %v8577_v32 }
  0x91   : > { %748 = vbcast.lane.b32.xlu1 %v746_v20, 256  ;;  %741 = vbcast.lane.b32.xlu0 %v739_v21, 256  ;;  %v8583_v35 = vpop.permute.xlu0 %1504 }
  0x92   : > { %vm1506_vm5 = vcmp.eq.s32.totalorder %v8583_v35, %v8535_v14 }
  0x95   : > { %755 = vbcast.lane.b32.xlu1 %v753_v24, 256  ;;  %762 = vbcast.lane.b32.xlu0 %v760_v25, 256  ;;  %v8027_v25 = vld [vmem:[%s12767_s2] ss:$0 sm:$0xff] }
  0x96   : > { %v558_v38 = vpop.permute.xlu0 %557 }
  0x97   : > { %vm559_vm3 = vcmp.eq.s32.totalorder %v558_v38, %v8535_v14  ;;  %v8640_v38 = vsel %vm1506_vm5, 1.0, %v12773_v18  ;;  %vm884_vm5 = vcmask 1047559  }
  0x98   : > { %v8587_v40 = vsel %vm559_vm3, 1.0, %v12773_v18  ;;  %12999 = vst [vmem:[#allocation15_spill] sm:$0xff] %v8640_v38  ;;  %vm882_vm3 = vcmask 1046534  }
  0x99   : > { %769 = vbcast.lane.b32.xlu1 %v767_v29, 256  ;;  %776 = vbcast.lane.b32.xlu0 %v774_v30, 256  ;;  %v621_v42 = vrot.slane %v8587_v40, %v8590_v41  ;;  %v614_v47 = vcombine.high %v8587_v40, %v8587_v40 }
  0x9b   : > { %v637_v43 = vrot.slane %v621_v42, %v8590_v41  ;;  %v629_v44 = vcombine.high %v621_v42, %v621_v42  ;;  %v628_v51 = vrot.slane %v614_v47, %v8590_v41 }
  0x9d   : > { %783 = vbcast.lane.b32.xlu1 %v781_v33, 256  ;;  %790 = vbcast.lane.b32.xlu0 %v788_v34, 256  ;;  %v666_v45 = vrot.slane %v637_v43, %v8538_v15  ;;  %v651_v46 = vrot.slane %v629_v44, %v8590_v41  ;;  %v659_v52 = vcombine.high %v637_v43, %v637_v43 }
  0x9e   : > { %v644_v56 = vrot.slane %v628_v51, %v8590_v41  ;;  %v630_v61 = vcombine.high %v628_v51, %v628_v51 }
  0x9f   : > { %v703_v49 = vmul.f32 %v666_v45, %v8602_v48  ;;  %v670_v50 = vrot.slane %v651_v46, %v8538_v15  ;;  %v674_v55 = vrot.slane %v659_v52, %v8538_v15  ;;  %v661_v60 = vcombine.high %v651_v46, %v651_v46 }
  0xa0   : > { %v682_v59 = vrot.slane %v644_v56, %v8538_v15  ;;  %v658_v1 = vrot.slane %v630_v61, %v8590_v41  ;;  %v660_v7 = vcombine.high %v644_v56, %v644_v56 }
  0xa1   : > { %v711_v53 = vsel %vm454_vm4, %v703_v49, 0.0  ;;  %v704_v54 = vmul.f32 %v670_v50, %v8602_v48  ;;  %v705_v58 = vmul.f32 %v674_v55, %v8602_v48  ;;  %v678_v0 = vrot.slane %v661_v60, %v8538_v15 }
  0xa2   : > { %v707_v63 = vmul.f32 %v682_v59, %v8602_v48  ;;  %v686_v5 = vrot.slane %v658_v1, %v8538_v15  ;;  %v690_v10 = vrot.slane %v660_v7, %v8538_v15  ;;  %v662_v11 = vcombine.high %v658_v1, %v658_v1 }
  0xa3   : > { %v714_v57 = vsel %vm454_vm4, %v704_v54, 0.0  ;;  %v717_v62 = vsel %vm454_vm4, %v705_v58, 0.0  ;;  %v706_v4 = vmul.f32 %v678_v0, %v8602_v48 }
  0xa4   : > { %v723_v2 = vsel %vm454_vm4, %v707_v63, 0.0  ;;  %v708_v9 = vmul.f32 %v686_v5, %v8602_v48  ;;  %v709_v17 = vmul.f32 %v690_v10, %v8602_v48  ;;  %v694_v20 = vrot.slane %v662_v11, %v8538_v15 }
  0xa5   : > { %v720_v8 = vsel %vm454_vm4, %v706_v4, 0.0 }
  0xa6   : > { %v726_v12 = vsel %vm454_vm4, %v708_v9, 0.0  ;;  %v729_v21 = vsel %vm454_vm4, %v709_v17, 0.0  ;;  %v710_v24 = vmul.f32 %v694_v20, %v8602_v48 }
  0xa8   : > { %v732_v30 = vsel %vm454_vm4, %v710_v24, 0.0 }
  0xbc   : > { %712 = vadd.xlane.f32.xlu0 %v711_v53 }
  0xc1   : > { %715 = vadd.xlane.f32.xlu1 %v714_v57 }
  0xc5   : > { %718 = vadd.xlane.f32.xlu1 %v717_v62 }
  0xc9   : > { %724 = vadd.xlane.f32.xlu1 %v723_v2 }
  0xcd   : > { %721 = vadd.xlane.f32.xlu1 %v720_v8 }
  0xd1   : > { %727 = vadd.xlane.f32.xlu1 %v726_v12 }
  0xd4   : > { %v8060_v29 = vpop.f32.mrf.mxu0 }
  0xd5   : > { %730 = vadd.xlane.f32.xlu1 %v729_v21  ;;  %v8635_v33 = vadd.f32 %v8060_v29, %v8027_v25  ;;  %v8064_v34 = vpop.f32.mrf.mxu1 }
  0xd6   : > { %v8637_v36 = vadd.f32 %v8064_v34, %v8027_v25  ;;  %v423_v37 = vpop.f32.mrf.mxu0 }
  0xd7   : > { %v439_v39 = vpop.f32.mrf.mxu1  ;;  %v461_v42 = vsel %vm454_vm4, %v8635_v33, -inf  ;;  %v8644_v43 = vadd.f32 %v8027_v25, %v423_v37  ;;  %v1509_v44 = vmul.f32 %v8640_v38, %v8635_v33  ;;  %v1536_v37 = vcombine.high %v8545_v19, %v8545_v19 }
  0xd8   : > { %12998 = vst [vmem:[#allocation14_spill] sm:$0xff] %v8637_v36  ;;  %v473_v35 = vsel %vm454_vm4, %v8637_v36, -inf  ;;  %v8061_v45 = vpop.f32.mrf.mxu0  ;;  %v8650_v46 = vadd.f32 %v8027_v25, %v439_v39 }
  0xd9   : > { %733 = vadd.xlane.f32.xlu1 %v732_v30  ;;  %474 = vmax.xlane.f32.xlu0 %v473_v35  ;;  %v455_v47 = vsel %vm454_vm4, %v8644_v43, -inf  ;;  %v8654_v49 = vadd.f32 %v8061_v45, %v8027_v25  ;;  %v1510_v50 = vsel %vm454_vm4, %v1509_v44, 0.0  ;;  %v8065_v53 = vpop.f32.mrf.mxu1  ;;  %v562_v59 = vmul.f32 %v8587_v40, %v8644_v43 }
  0xda   : > { %13000 = vst [vmem:[#allocation16_spill] sm:$0xff] %v8650_v46  ;;  %v426_v51 = vpop.f32.mrf.mxu0  ;;  %v467_v52 = vsel %vm454_vm4, %v8650_v46, -inf  ;;  %v8661_v55 = vadd.f32 %v8065_v53, %v8027_v25  ;;  %v906_v9 = vrot.slane %v8644_v43, %v8590_v41  ;;  %v899_v10 = vcombine.high %v8644_v43, %v8644_v43 }
  0xdb   : > { %13001 = vst [vmem:[#allocation17_spill] sm:$0xff] %v8654_v49  ;;  %v8659_v54 = vadd.f32 %v8027_v25, %v426_v51  ;;  %v464_v56 = vsel %vm454_vm4, %v8654_v49, -inf  ;;  %v442_v60 = vpop.f32.mrf.mxu1  ;;  %v563_v62 = vsel %vm454_vm4, %v562_v59, 0.0  ;;  %v1543_v30 = vrot.slane %v8545_v19, %v8590_v41 }
  0xdc   : > { %13002 = vst [vmem:[#allocation18_spill] sm:$0xff] %v8661_v55  ;;  %v476_v58 = vsel %vm454_vm4, %v8661_v55, -inf  ;;  %v8671_v61 = vadd.f32 %v8027_v25, %v442_v60  ;;  %v922_v11 = vrot.slane %v906_v9, %v8590_v41  ;;  %v913_v12 = vrot.slane %v899_v10, %v8590_v41  ;;  %v8726_v60 = vpop.permute.xlu1 %1167 }
  0xdd   : > { %462 = vmax.xlane.f32.xlu1 %v461_v42  ;;  %456 = vmax.xlane.f32.xlu0 %v455_v47  ;;  %v458_v57 = vsel %vm454_vm4, %v8659_v54, -inf  ;;  %v1096_v0 = vrot.slane %v8659_v54, %v8538_v15  ;;  %v1103_v1 = vrot.slane %v8659_v54, %v8541_v16  ;;  %v1117_v40 = vrot.slane %v8659_v54, %v8555_v23 }
  0xde   : > { %13003 = vst [vmem:[#allocation19_spill] sm:$0xff] %v8671_v61  ;;  %v470_v63 = vsel %vm454_vm4, %v8671_v61, -inf  ;;  %v1110_v2 = vrot.slane %v8659_v54, %v8552_v22  ;;  %v1131_v4 = vrot.slane %v8659_v54, %v8565_v27  ;;  %v1124_v5 = vrot.slane %v8659_v54, %v8562_v26 }
  0xdf   : > { %v1145_v7 = vrot.slane %v8659_v54, %v8577_v32  ;;  %v1138_v8 = vrot.slane %v8659_v54, %v8574_v31  ;;  %v951_v17 = vrot.slane %v922_v11, %v8538_v15  ;;  %v944_v20 = vcombine.high %v922_v11, %v922_v11 }
  0xe0   : > { %v929_v21 = vrot.slane %v913_v12, %v8590_v41  ;;  %v914_v29 = vcombine.high %v906_v9, %v906_v9  ;;  %v1559_v45 = vrot.slane %v1543_v30, %v8590_v41  ;;  %v1550_v51 = vrot.slane %v1536_v37, %v8590_v41 }
  0xe1   : > { %1511 = vadd.xlane.f32.xlu1 %v1510_v50  ;;  %468 = vmax.xlane.f32.xlu0 %v467_v52  ;;  %v8701_v24 = vadd.f32 %v951_v17, %v8602_v48  ;;  %v959_v25 = vrot.slane %v944_v20, %v8538_v15  ;;  %v586_v50 = vmul.f32 %v8545_v19, %v8659_v54 }
  0xe2   : > { %v967_v34 = vrot.slane %v929_v21, %v8538_v15  ;;  %v945_v35 = vcombine.high %v929_v21, %v929_v21  ;;  %v936_v44 = vrot.slane %v914_v29, %v8590_v41  ;;  %v915_v52 = vcombine.high %v913_v12, %v913_v12 }
  0xe3   : > { %v996_v39 = vsel %vm454_vm4, %v8701_v24, -inf  ;;  %v8712_v42 = vadd.f32 %v959_v25, %v8602_v48  ;;  %v1551_v59 = vcombine.high %v1543_v30, %v1543_v30  ;;  %v1566_v19 = vrot.slane %v1550_v51, %v8590_v41 }
  0xe4   : > { %v8717_v47 = vadd.f32 %v967_v34, %v8602_v48  ;;  %v1581_v29 = vcombine.high %v1559_v45, %v1559_v45 }
  0xe5   : > { %465 = vmax.xlane.f32.xlu1 %v464_v56  ;;  %459 = vmax.xlane.f32.xlu0 %v458_v57  ;;  %v1002_v53 = vsel %vm454_vm4, %v8712_v42, -inf  ;;  %v975_v56 = vrot.slane %v945_v35, %v8538_v15  ;;  %v955_v57 = vrot.slane %v936_v44, %v8538_v15  ;;  %v1582_v9 = vcombine.high %v1566_v19, %v1566_v19 }
  0xe6   : > { %v1573_v10 = vrot.slane %v1551_v59, %v8590_v41  ;;  %v1552_v59 = vcombine.high %v1550_v51, %v1550_v51  ;;  %v8779_v51 = vpop.permute.xlu0 %1532 }
  0xe7   : > { %13004 = vst [vmem:[#allocation20_spill] sm:$0xff] %v8779_v51 }
  0xe8   : > { %v1592_v25 = vrot.slane %v1573_v10, %v8538_v15 }
  0xe9   : > { %477 = vmax.xlane.f32.xlu1 %v476_v58  ;;  %v946_v58 = vcombine.high %v936_v44, %v936_v44  ;;  %v1596_v44 = vrot.slane %v1581_v29, %v8538_v15 }
  0xed   : > { %564 = vadd.xlane.f32.xlu1 %v563_v62  ;;  %v587_v62 = vsel %vm454_vm4, %v586_v50, 0.0  ;;  %v1583_v50 = vcombine.high %v1573_v10, %v1573_v10 }
  0xf1   : > { %471 = vmax.xlane.f32.xlu1 %v470_v63  ;;  %v1588_v63 = vrot.slane %v1559_v45, %v8538_v15 }
  0xfb   : > { %1098 = vbcast.lane.b32.xlu0 %v1096_v0, 256  ;;  %v943_v0 = vrot.slane %v915_v52, %v8590_v41 }
  0xfd   : > { %v971_v20 = vrot.slane %v943_v0, %v8538_v15 }
  0xff   : > { %1119 = vbcast.lane.b32.xlu0 %v1117_v40, 256  ;;  %v8735_v40 = vadd.f32 %v975_v56, %v8602_v48  ;;  %v8760_v37 = vadd.f32 %v971_v20, %v8602_v48  ;;  %v1626_v56 = vmul.f32 %v1592_v25, %v8602_v48 }
 0x101   : > { %v1014_v11 = vsel %vm454_vm4, %v8735_v40, -inf  ;;  %v1011_v45 = vsel %vm454_vm4, %v8760_v37, -inf }
 0x102   : > { %1105 = vbcast.lane.b32.xlu1 %v1103_v1, 256  ;;  %v1008_v1 = vsel %vm454_vm4, %v8717_v47, -inf }
 0x103   : > { %1133 = vbcast.lane.b32.xlu0 %v1131_v4, 256  ;;  %v963_v4 = vrot.slane %v946_v58, %v8538_v15  ;;  %v1627_v58 = vmul.f32 %v1596_v44, %v8602_v48  ;;  %v742_v25 = vpop.permute.xlu0 %741 }
 0x105   : > { %v8751_v17 = vadd.f32 %v963_v4, %v8602_v48  ;;  %v1639_v4 = vsel %vm454_vm4, %v1627_v58, 0.0 }
 0x106   : > { %1112 = vbcast.lane.b32.xlu1 %v1110_v2, 256  ;;  %v8738_v2 = vadd.f32 %v955_v57, %v8602_v48 }
 0x107   : > { %1147 = vbcast.lane.b32.xlu0 %v1145_v7, 256  ;;  %v1625_v7 = vmul.f32 %v1588_v63, %v8602_v48  ;;  %v1005_v30 = vsel %vm454_vm4, %v8751_v17, -inf  ;;  %v1636_v63 = vsel %vm454_vm4, %v1626_v56, 0.0 }
 0x108   : > { %v999_v12 = vsel %vm454_vm4, %v8738_v2, -inf }
 0x109   : > { %v1633_v21 = vsel %vm454_vm4, %v1625_v7, 0.0 }
 0x10a   : > { %1126 = vbcast.lane.b32.xlu1 %v1124_v5, 256  ;;  %v8741_v5 = vpop.permute.xlu1 %748 }
 0x10e   : > { %1140 = vbcast.lane.b32.xlu1 %v1138_v8, 256  ;;  %v1604_v8 = vrot.slane %v1566_v19, %v8538_v15  ;;  %v8763_v35 = vpop.permute.xlu1 %755  ;;  %v1600_v19 = vrot.slane %v1583_v50, %v8538_v15 }
 0x110   : > { %v1629_v34 = vmul.f32 %v1604_v8, %v8602_v48  ;;  %v1628_v7 = vmul.f32 %v1600_v19, %v8602_v48 }
 0x112   : > { %v1645_v52 = vsel %vm454_vm4, %v1629_v34, 0.0  ;;  %v770_v57 = vpop.permute.xlu1 %769 }
 0x116   : > { %v784_v10 = vpop.permute.xlu1 %783 }
 0x126   : > { %997 = vmax.xlane.f32.xlu0 %v996_v39  ;;  %v1612_v39 = vrot.slane %v1582_v9, %v8538_v15  ;;  %v1580_v9 = vrot.slane %v1552_v59, %v8590_v41 }
 0x128   : > { %v1584_v20 = vcombine.high %v1580_v9, %v1580_v9 }
 0x12a   : > { %1003 = vmax.xlane.f32.xlu0 %v1002_v53  ;;  %v1631_v53 = vmul.f32 %v1612_v39, %v8602_v48  ;;  %v1616_v34 = vrot.slane %v1584_v20, %v8538_v15 }
 0x12c   : > { %v1632_v50 = vmul.f32 %v1616_v34, %v8602_v48 }
 0x12e   : > { %1009 = vmax.xlane.f32.xlu0 %v1008_v1  ;;  %v947_v1 = vcombine.high %v943_v0, %v943_v0  ;;  %v1608_v0 = vrot.slane %v1580_v9, %v8538_v15 }
 0x130   : > { %v979_v8 = vrot.slane %v947_v1, %v8538_v15 }
 0x132   : > { %588 = vadd.xlane.f32.xlu1 %v587_v62  ;;  %1015 = vmax.xlane.f32.xlu0 %v1014_v11  ;;  %v1651_v62 = vsel %vm454_vm4, %v1631_v53, 0.0  ;;  %v1642_v11 = vsel %vm454_vm4, %v1628_v7, 0.0  ;;  %v1654_v53 = vsel %vm454_vm4, %v1632_v50, 0.0 }
 0x136   : > { %1000 = vmax.xlane.f32.xlu1 %v999_v12  ;;  %1634 = vadd.xlane.f32.xlu0 %v1633_v21  ;;  %v8783_v12 = vadd.f32 %v979_v8, %v8602_v48 }
 0x138   : > { %v1017_v29 = vsel %vm454_vm4, %v8783_v12, -inf }
 0x13a   : > { %1006 = vmax.xlane.f32.xlu1 %v1005_v30  ;;  %1646 = vadd.xlane.f32.xlu0 %v1645_v52  ;;  %v1630_v30 = vmul.f32 %v1608_v0, %v8602_v48  ;;  %v763_v52 = vpop.permute.xlu0 %762 }
 0x13c   : > { %v1648_v44 = vsel %vm454_vm4, %v1630_v30, 0.0 }
 0x13e   : > { %1012 = vmax.xlane.f32.xlu1 %v1011_v45  ;;  %1652 = vadd.xlane.f32.xlu0 %v1651_v62  ;;  %v777_v59 = vpop.permute.xlu0 %776 }
 0x142   : > { %1637 = vadd.xlane.f32.xlu1 %v1636_v63  ;;  %v791_v1 = vpop.permute.xlu0 %790 }
 0x146   : > { %1640 = vadd.xlane.f32.xlu1 %v1639_v4  ;;  %v713_v7 = vpop.xlane.xlu0 %712 }
 0x147   : > { %v800_v9 = vmul.f32 %v742_v25, %v713_v7 }
 0x14a   : > { %v716_v21 = vpop.xlane.xlu1 %715  ;;  %1643 = vadd.xlane.f32.xlu1 %v1642_v11 }
 0x14b   : > { %v801_v56 = vmul.f32 %v8741_v5, %v716_v21 }
 0x14e   : > { %v719_v39 = vpop.xlane.xlu1 %718  ;;  %1018 = vmax.xlane.f32.xlu1 %v1017_v29 }
 0x14f   : > { %v802_v11 = vmul.f32 %v8763_v35, %v719_v39 }
 0x152   : > { %v725_v45 = vpop.xlane.xlu1 %724  ;;  %1649 = vadd.xlane.f32.xlu1 %v1648_v44 }
 0x153   : > { %v804_v5 = vmul.f32 %v770_v57, %v725_v45 }
 0x154   : > { %820 = vperm.xlu0 %8097, %v801_v56  }
 0x156   : > { %v722_v58 = vpop.xlane.xlu1 %721  ;;  %1655 = vadd.xlane.f32.xlu1 %v1654_v53 }
 0x157   : > { %v803_v62 = vmul.f32 %v763_v52, %v722_v58 }
 0x159   : > { %826 = vperm.xlu0 %8097, %v803_v62  }
 0x15a   : > { %v728_v63 = vpop.xlane.xlu1 %727 }
 0x15b   : > { %v805_v19 = vmul.f32 %v777_v59, %v728_v63 }
 0x15d   : > { %832 = vperm.xlu0 %8097, %v805_v19  }
 0x15e   : > { %v731_v4 = vpop.xlane.xlu1 %730 }
 0x15f   : > { %v806_v0 = vmul.f32 %v784_v10, %v731_v4 }
 0x162   : > { %v734_v48 = vpop.xlane.xlu1 %733  ;;  %v8797_v21 = vpop.xlane.xlu0 %474 }
 0x163   : > { %v807_v8 = vmul.f32 %v791_v1, %v734_v48  ;;  %13006 = vst [vmem:[#allocation22_spill] sm:$0xff] %v8797_v21  ;;  %v485_v51 = vsub.f32 %v8637_v36, %v8797_v21 }
 0x165   : > { %838 = vperm.xlu0 %8097, %v807_v8  }
 0x166   : > { %v8795_v20 = vpop.xlane.xlu1 %462  ;;  %v8801_v30 = vpop.xlane.xlu0 %456 }
 0x167   : > { %817 = vperm.xlu1 %8098, %v800_v9   ;;  %13005 = vst [vmem:[#allocation21_spill] sm:$0xff] %v8795_v20  ;;  %13008 = vst [vmem:[#allocation24_spill] sm:$0xff] %v8801_v30 }
 0x16a   : > { %v8799_v29 = vpop.xlane.xlu1 %1511  ;;  %v8805_v25 = vpop.xlane.xlu0 %468 }
 0x16b   : > { %823 = vperm.xlu1 %8098, %v802_v11   ;;  %13007 = vst [vmem:[#allocation23_spill] sm:$0xff] %v8799_v29  ;;  %13010 = vst [vmem:[#allocation26_spill] sm:$0xff] %v8805_v25 }
 0x16e   : > { %v8803_v34 = vpop.xlane.xlu1 %465  ;;  %v8809_v35 = vpop.xlane.xlu0 %459 }
 0x16f   : > { %829 = vperm.xlu1 %8098, %v804_v5   ;;  %13009 = vst [vmem:[#allocation25_spill] sm:$0xff] %v8803_v34  ;;  %13012 = vst [vmem:[#allocation28_spill] sm:$0xff] %v8809_v35 }
 0x172   : > { %v8807_v44 = vpop.xlane.xlu1 %477  ;;  %v8813_v10 = vpop.permute.xlu0 %1098 }
 0x173   : > { %835 = vperm.xlu1 %8098, %v806_v0   ;;  %13011 = vst [vmem:[#allocation27_spill] sm:$0xff] %v8807_v44  ;;  %13014 = vst [vmem:[#allocation30_spill] sm:$0xff] %v8813_v10 }
 0x176   : > { %v8811_v57 = vpop.xlane.xlu1 %564  ;;  %v8817_v50 = vpop.permute.xlu0 %1119 }
 0x177   : > { %13013 = vst [vmem:[#allocation29_spill] sm:$0xff] %v8811_v57 }
 0x17a   : > { %v8815_v39 = vpop.xlane.xlu1 %471  ;;  %v8821_v45 = vpop.permute.xlu0 %1133 }
 0x17b   : > { %13015 = vst [vmem:[#allocation31_spill] sm:$0xff] %v8815_v39 }
 0x17e   : > { %v8819_v52 = vpop.permute.xlu1 %1105  ;;  %v8825_v56 = vpop.permute.xlu0 %1147 }
 0x182   : > { %v8823_v53 = vpop.permute.xlu1 %1112 }
 0x183   : > { %13016 = vst [vmem:[#allocation32_spill] sm:$0xff] %v8823_v53 }
 0x186   : > { %v8827_v58 = vpop.permute.xlu1 %1126 }
 0x187   : > { %13017 = vst [vmem:[#allocation33_spill] sm:$0xff] %v8827_v58 }
 0x18a   : > { %v8833_v63 = vpop.permute.xlu1 %1140 }
 0x18b   : > { %13019 = vst [vmem:[#allocation35_spill] sm:$0xff] %v8833_v63 }
 0x1af   : > { %v8829_v59 = vpop.xlane.xlu0 %997 }
 0x1b0   : > { %13018 = vst [vmem:[#allocation34_spill] sm:$0xff] %v8829_v59  ;;  %v1379_v62 = vadd.f32 %v8813_v10, %v8829_v59  ;;  %vm1243_vm6 = vcmp.eq.f32.partialorder %v8701_v24, %v8829_v59 }
 0x1b2   : > { %1396 = vperm.xlu1 %8098, %v1379_v62  }
 0x1b3   : > { %v8835_v19 = vpop.xlane.xlu0 %1003 }
 0x1b4   : > { %13020 = vst [vmem:[#allocation36_spill] sm:$0xff] %v8835_v19  ;;  %v1381_v1 = vadd.f32 %v8823_v53, %v8835_v19  ;;  %vm1245_vm8 = vcmp.eq.f32.partialorder %v8712_v42, %v8835_v19 }
 0x1b6   : > { %1402 = vperm.xlu1 %8098, %v1381_v1  }
 0x1b7   : > { %v8841_v7 = vpop.xlane.xlu0 %1009 }
 0x1b8   : > { %13022 = vst [vmem:[#allocation38_spill] sm:$0xff] %v8841_v7  ;;  %v1383_v5 = vadd.f32 %v8827_v58, %v8841_v7  ;;  %vm1247_vm9 = vcmp.eq.f32.partialorder %v8717_v47, %v8841_v7 }
 0x1bb   : > { %v8839_v4 = vpop.xlane.xlu1 %588  ;;  %v8853_v0 = vpop.xlane.xlu0 %1015 }
 0x1bc   : > { %13021 = vst [vmem:[#allocation37_spill] sm:$0xff] %v8839_v4  ;;  %13023 = vst [vmem:[#allocation39_spill] sm:$0xff] %v8853_v0  ;;  %vm1249_vm12 = vcmp.eq.f32.partialorder %v8735_v40, %v8853_v0 }
 0x1bf   : > { %v8843_v48 = vpop.xlane.xlu1 %1000 }
 0x1c0   : > { %v1380_v8 = vadd.f32 %v8819_v52, %v8843_v48  ;;  %vm1244_vm7 = vcmp.eq.f32.partialorder %v8738_v2, %v8843_v48 }
 0x1c2   : > { %1399 = vperm.xlu0 %8097, %v1380_v8   ;;  %v1385_v8 = vadd.f32 %v8833_v63, %v8853_v0  ;;  %v479_v63 = vsub.f32 %v8644_v43, %v8801_v30 }
 0x1c3   : > { %v8847_v9 = vpop.xlane.xlu1 %1006 }
 0x1c4   : > { %v1382_v11 = vadd.f32 %v8817_v50, %v8847_v9  ;;  %vm1246_vm10 = vcmp.eq.f32.partialorder %v8751_v17, %v8847_v9 }
 0x1c6   : > { %1405 = vperm.xlu1 %8098, %v1382_v11   ;;  %1408 = vperm.xlu0 %8097, %v1383_v5   ;;  %v481_v11 = vsub.f32 %v8635_v33, %v8795_v20 }
 0x1c7   : > { %v8855_v62 = vpop.xlane.xlu1 %1012 }
 0x1c8   : > { %v1384_v1 = vadd.f32 %v8821_v45, %v8855_v62  ;;  %v491_v28 = vmul.f32 1.442695, %v481_v11  ;;  %v483_v11 = vsub.f32 %v8650_v46, %v8805_v25  ;;  %vm1248_vm11 = vcmp.eq.f32.partialorder %v8760_v37, %v8855_v62 }
 0x1ca   : > { %1411 = vperm.xlu1 %8098, %v1384_v1   ;;  %1414 = vperm.xlu0 %8097, %v1385_v8   ;;  %v499_v1 = vmul.f32 1.442695, %v485_v51  ;;  %8125 = vpow2.f32 %v491_v28  ;;  %v1251_v8 = vsel %vm1243_vm6, %v8535_v14, 2147483647  ;;  %v495_v51 = vmul.f32 1.442695, %v483_v11 }
 0x1cb   : > { %v8861_v18 = vpop.xlane.xlu1 %1637  ;;  %v8881_v58 = vsel %vm454_vm4, %v1251_v8, 2147483647  ;;  %v1252_v8 = vsel %vm1244_vm7, %v8535_v14, 2147483647  ;;  %vm1169_vm7 = vcmp.eq.s32.totalorder %v8726_v60, 1 }
 0x1cc   : > { %8127 = vpow2.f32 %v499_v1  ;;  %v1261_v21 = vshra.s32 %v8881_v58, 16  ;;  %v1020_v1 = vsub.f32 %v8701_v24, %v8829_v59  ;;  %v8898_v11 = vsel %vm454_vm4, %v1252_v8, 2147483647 }
 0x1ce   : > { %v8888_v28 = vcvt.s32.f32 %v1261_v21  ;;  %v1028_v36 = vmul.f32 1.442695, %v1020_v1 }
 0x1cf   : > { %v8863_v6 = vpop.xlane.xlu1 %1640 }
 0x1d3   : > { %v8865_v3 = vpop.xlane.xlu1 %1643 }
 0x1d7   : > { %v8869_v5 = vpop.xlane.xlu1 %1018  ;;  %v8126_v30 = vpop.eup %8125 }
 0x1d8   : > { %v1386_v57 = vadd.f32 %v8825_v56, %v8869_v5  ;;  %v509_v25 = vsel %vm454_vm4, %v8126_v30, 0.0  ;;  %v1253_v30 = vsel %vm1245_vm8, %v8535_v14, 2147483647  ;;  %vm1250_vm13 = vcmp.eq.f32.partialorder %v8783_v12, %v8869_v5 }
 0x1d9   : > { %v8128_v21 = vpop.eup %8127  ;;  %v8915_v8 = vsel %vm454_vm4, %v1253_v30, 2147483647  ;;  %v1254_v30 = vsel %vm1246_vm10, %v8535_v14, 2147483647 }
 0x1da   : > { %1417 = vperm.xlu1 %8098, %v1386_v57   ;;  %v487_v57 = vmul.f32 1.442695, %v479_v63  ;;  %v1022_v63 = vsub.f32 %v8712_v42, %v8835_v19  ;;  %v521_v1 = vsel %vm454_vm4, %v8128_v21, 0.0  ;;  %v1026_v42 = vsub.f32 %v8735_v40, %v8853_v0  ;;  %13025 = vst [vmem:[#allocation41_spill] sm:$0xff] %v8915_v8 }
 0x1dc   : > { %8129 = vpow2.f32 %v487_v57  ;;  %v1276_v57 = vshra.s32 %v8898_v11, 16  ;;  %v1032_v24 = vmul.f32 1.442695, %v1022_v63  ;;  %v1255_v63 = vsel %vm1247_vm9, %v8535_v14, 2147483647 }
 0x1dd   : > { %8131 = vpow2.f32 %v495_v51  ;;  %v1024_v51 = vsub.f32 %v8717_v47, %v8841_v7 }
 0x1de   : > { %8133 = vpow2.f32 %v1028_v36  ;;  %v8907_v46 = vcvt.s32.f32 %v1276_v57  ;;  %v1040_v57 = vmul.f32 1.442695, %v1026_v42 }
 0x1df   : > { %8135 = vpow2.f32 %v1032_v24  ;;  %v1291_v24 = vshra.s32 %v8915_v8, 16 }
 0x1e0   : > { %13024 = vst [vmem:[#allocation40_spill] sm:$0xff] %v8907_v46 }
 0x1e1   : > { %v8931_v42 = vcvt.s32.f32 %v1291_v24 }
 0x1e3   : > { %13027 = vst [vmem:[#allocation43_spill] sm:$0xff] %v8931_v42 }
 0x1e9   : > { %1264 = vmin.xlane.f32.xlu0 %v8888_v28  ;;  %v8130_v36 = vpop.eup %8129 }
 0x1ea   : > { %v8132_v21 = vpop.eup %8131  ;;  %v503_v47 = vsel %vm454_vm4, %v8130_v36, 0.0 }
 0x1eb   : > { %v8134_v53 = vpop.eup %8133 }
 0x1ed   : > { %510 = vadd.xlane.f32.xlu0 %v509_v25  ;;  %v1036_v25 = vmul.f32 1.442695, %v1024_v51  ;;  %v482_v51 = vsub.f32 %v8654_v49, %v8803_v34  ;;  %v1256_v34 = vsel %vm1248_vm11, %v8535_v14, 2147483647  ;;  %v480_v49 = vsub.f32 %v8659_v54, %v8809_v35 }
 0x1ef   : > { %8137 = vpow2.f32 %v1036_v25  ;;  %v515_v25 = vsel %vm454_vm4, %v8132_v21, 0.0  ;;  %v493_v7 = vmul.f32 1.442695, %v482_v51  ;;  %v1044_v21 = vsel %vm454_vm4, %v8134_v53, 0.0  ;;  %v8136_v51 = vpop.eup %8135 }
 0x1f0   : > { %8139 = vpow2.f32 %v1040_v57  ;;  %v489_v0 = vmul.f32 1.442695, %v480_v49  ;;  %v1258_v49 = vsel %vm1250_vm13, %v8535_v14, 2147483647 }
 0x1f1   : > { %522 = vadd.xlane.f32.xlu0 %v521_v1  ;;  %v8925_v1 = vsel %vm454_vm4, %v1255_v63, 2147483647  ;;  %v8937_v63 = vsel %vm454_vm4, %v1254_v30, 2147483647  ;;  %8141 = vpow2.f32 %v493_v7  ;;  %v8948_v30 = vsel %vm454_vm4, %v1256_v34, 2147483647 }
 0x1f2   : > { %13026 = vst [vmem:[#allocation42_spill] sm:$0xff] %v8925_v1  ;;  %v1321_v36 = vshra.s32 %v8925_v1, 16  ;;  %13028 = vst [vmem:[#allocation44_spill] sm:$0xff] %v8937_v63  ;;  %v1306_v24 = vshra.s32 %v8937_v63, 16  ;;  %v1336_v53 = vshra.s32 %v8948_v30, 16  ;;  %v484_v34 = vsub.f32 %v8671_v61, %v8815_v39 }
 0x1f3   : > { %13030 = vst [vmem:[#allocation46_spill] sm:$0xff] %v8948_v30 }
 0x1f4   : > { %v8944_v57 = vcvt.s32.f32 %v1321_v36  ;;  %v8953_v40 = vcvt.s32.f32 %v1306_v24  ;;  %v497_v54 = vmul.f32 1.442695, %v484_v34 }
 0x1f5   : > { %1279 = vmin.xlane.f32.xlu0 %v8907_v46 }
 0x1f6   : > { %13029 = vst [vmem:[#allocation45_spill] sm:$0xff] %v8944_v57  ;;  %13031 = vst [vmem:[#allocation47_spill] sm:$0xff] %v8953_v40 }
 0x1f9   : > { %504 = vadd.xlane.f32.xlu0 %v503_v47  ;;  %v486_v47 = vsub.f32 %v8661_v55, %v8807_v44  ;;  %v1050_v55 = vsel %vm454_vm4, %v8136_v51, 0.0 }
 0x1fb   : > { %v501_v44 = vmul.f32 1.442695, %v486_v47 }
 0x1fc   : > { %v8138_v36 = vpop.eup %8137 }
 0x1fd   : > { %516 = vadd.xlane.f32.xlu0 %v515_v25  ;;  %v1257_v25 = vsel %vm1249_vm12, %v8535_v14, 2147483647  ;;  %8143 = vpow2.f32 %v501_v44  ;;  %v1056_v47 = vsel %vm454_vm4, %v8138_v36, 0.0  ;;  %v8140_v51 = vpop.eup %8139 }
 0x1fe   : > { %1294 = vmin.xlane.f32.xlu1 %v8931_v42  ;;  %v8959_v7 = vsel %vm454_vm4, %v1257_v25, 2147483647  ;;  %8145 = vpow2.f32 %v489_v0  ;;  %v1021_v25 = vsub.f32 %v8738_v2, %v8843_v48 }
 0x1ff   : > { %13032 = vst [vmem:[#allocation48_spill] sm:$0xff] %v8959_v7  ;;  %v1351_v24 = vshra.s32 %v8959_v7, 16  ;;  %8147 = vpow2.f32 %v497_v54 }
 0x200   : > { %v1030_v36 = vmul.f32 1.442695, %v1021_v25 }
 0x201   : > { %1045 = vadd.xlane.f32.xlu0 %v1044_v21  ;;  %v8965_v21 = vcvt.s32.f32 %v1336_v53  ;;  %v8972_v44 = vcvt.s32.f32 %v1351_v24  ;;  %v8142_v53 = vpop.eup %8141  ;;  %v8982_v24 = vsel %vm454_vm4, %v1258_v49, 2147483647 }
 0x202   : > { %1324 = vmin.xlane.f32.xlu1 %v8944_v57  ;;  %v512_v34 = vsel %vm454_vm4, %v8142_v53, 0.0  ;;  %13035 = vst [vmem:[#allocation51_spill] sm:$0xff] %v8982_v24  ;;  %v1366_v2 = vshra.s32 %v8982_v24, 16  ;;  %8149 = vpow2.f32 %v1030_v36 }
 0x203   : > { %13033 = vst [vmem:[#allocation49_spill] sm:$0xff] %v8965_v21  ;;  %13034 = vst [vmem:[#allocation50_spill] sm:$0xff] %v8972_v44 }
 0x204   : > { %v8988_v25 = vcvt.s32.f32 %v1366_v2  ;;  %v1682_v2 = vrot.slane %v8640_v38, %v8555_v23 }
 0x205   : > { %1051 = vadd.xlane.f32.xlu0 %v1050_v55  ;;  %v1062_v55 = vsel %vm454_vm4, %v8140_v51, 0.0 }
 0x206   : > { %1309 = vmin.xlane.f32.xlu1 %v8953_v40  ;;  %13036 = vst [vmem:[#allocation52_spill] sm:$0xff] %v8988_v25 }
 0x209   : > { %1057 = vadd.xlane.f32.xlu0 %v1056_v47  ;;  %v1023_v47 = vsub.f32 %v8751_v17, %v8847_v9 }
 0x20a   : > { %1339 = vmin.xlane.f32.xlu1 %v8965_v21  ;;  %v8144_v0 = vpop.eup %8143 }
 0x20b   : > { %v1034_v51 = vmul.f32 1.442695, %v1023_v47  ;;  %v524_v54 = vsel %vm454_vm4, %v8144_v0, 0.0  ;;  %v8146_v53 = vpop.eup %8145 }
 0x20c   : > { %v8148_v49 = vpop.eup %8147 }
 0x20d   : > { %1063 = vadd.xlane.f32.xlu0 %v1062_v55  ;;  %v1025_v55 = vsub.f32 %v8760_v37, %v8855_v62  ;;  %8151 = vpow2.f32 %v1034_v51  ;;  %v518_v36 = vsel %vm454_vm4, %v8148_v49, 0.0  ;;  %v1661_v37 = vrot.slane %v8640_v38, %v8538_v15 }
 0x20e   : > { %1354 = vmin.xlane.f32.xlu1 %v8972_v44  ;;  %v1710_v49 = vrot.slane %v8640_v38, %v8577_v32 }
 0x20f   : > { %v1038_v17 = vmul.f32 1.442695, %v1025_v55  ;;  %v8150_v47 = vpop.eup %8149 }
 0x210   : > { %v1047_v0 = vsel %vm454_vm4, %v8150_v47, 0.0  ;;  %v1689_v47 = vrot.slane %v8640_v38, %v8562_v26 }
 0x211   : > { %8153 = vpow2.f32 %v1038_v17 }
 0x212   : > { %513 = vadd.xlane.f32.xlu1 %v512_v34  ;;  %v506_v34 = vsel %vm454_vm4, %v8146_v53, 0.0 }
 0x216   : > { %525 = vadd.xlane.f32.xlu1 %v524_v54  ;;  %v1696_v54 = vrot.slane %v8640_v38, %v8565_v27 }
 0x21a   : > { %1369 = vmin.xlane.f32.xlu1 %v8988_v25  ;;  %v8152_v51 = vpop.eup %8151 }
 0x21b   : > { %v1053_v55 = vsel %vm454_vm4, %v8152_v51, 0.0 }
 0x21e   : > { %507 = vadd.xlane.f32.xlu1 %v506_v34  ;;  %v8154_v17 = vpop.eup %8153  ;;  %v1668_v34 = vrot.slane %v8640_v38, %v8541_v16 }
 0x21f   : > { %v1059_v53 = vsel %vm454_vm4, %v8154_v17, 0.0 }
 0x222   : > { %519 = vadd.xlane.f32.xlu1 %v518_v36  ;;  %v1635_v36 = vpop.xlane.xlu0 %1634 }
 0x223   : > { %1663 = vbcast.lane.b32.xlu0 %v1661_v37, 256  ;;  %v1675_v37 = vrot.slane %v8640_v38, %v8552_v22 }
 0x226   : > { %1048 = vadd.xlane.f32.xlu1 %v1047_v0  ;;  %v1647_v0 = vpop.xlane.xlu0 %1646 }
 0x227   : > { %1684 = vbcast.lane.b32.xlu0 %v1682_v2, 256  ;;  %v1703_v2 = vrot.slane %v8640_v38, %v8574_v31 }
 0x22a   : > { %1054 = vadd.xlane.f32.xlu1 %v1053_v55  ;;  %v1653_v51 = vpop.xlane.xlu0 %1652  ;;  %v9012_v55 = vpop.xlane.xlu1 %1649 }
 0x22b   : > { %1698 = vbcast.lane.b32.xlu0 %v1696_v54, 256 }
 0x22e   : > { %1060 = vadd.xlane.f32.xlu1 %v1059_v53  ;;  %v9014_v54 = vpop.permute.xlu0 %820  ;;  %v9016_v17 = vpop.xlane.xlu1 %1655 }
 0x22f   : > { %1712 = vbcast.lane.b32.xlu0 %v1710_v49, 256 }
 0x232   : > { %v9018_v53 = vpop.permute.xlu0 %826  ;;  %v9020_v49 = vpop.permute.xlu1 %817 }
 0x23f   : > { %1670 = vbcast.lane.b32.xlu1 %v1668_v34, 256  ;;  %v9022_v34 = vpop.permute.xlu0 %832 }
 0x243   : > { %1677 = vbcast.lane.b32.xlu1 %v1675_v37, 256  ;;  %v9024_v37 = vpop.permute.xlu0 %838 }
 0x247   : > { %1691 = vbcast.lane.b32.xlu1 %v1689_v47, 256  ;;  %v9026_v47 = vpop.permute.xlu1 %823  ;;  %v9028_v39 = vpop.permute.xlu0 %1399 }
 0x24b   : > { %1705 = vbcast.lane.b32.xlu1 %v1703_v2, 256  ;;  %v9030_v2 = vpop.permute.xlu1 %829  ;;  %v9032_v61 = vpop.permute.xlu0 %1408 }
 0x24f   : > { %v9034_v38 = vpop.permute.xlu1 %835  ;;  %v9036_v10 = vpop.permute.xlu0 %1414 }
 0x253   : > { %v9038_v19 = vpop.permute.xlu1 %1396 }
 0x257   : > { %v9042_v4 = vpop.permute.xlu1 %1402 }
 0x25b   : > { %v9046_v24 = vpop.permute.xlu1 %1405 }
 0x25f   : > { %v9052_v44 = vpop.permute.xlu1 %1411 }
 0x263   : > { %v9056_v7 = vpop.permute.xlu1 %1417 }
 0x272   : > { %v9040_v59 = vpop.xlane.xlu0 %1264 }
 0x273   : > { %vm1266_vm6 = vcmp.eq.f32.partialorder %v8888_v28, %v9040_v59 }
 0x276   : > { %v9044_v25 = vpop.xlane.xlu0 %510 }
 0x277   : > { %13037 = vst [vmem:[#allocation53_spill] sm:$0xff] %v9044_v25  ;;  %v13056_v25 = vmov 2  }
 0x27a   : > { %v9048_v35 = vpop.xlane.xlu0 %522 }
 0x27b   : > { %13038 = vst [vmem:[#allocation54_spill] sm:$0xff] %v9048_v35 }
 0x27e   : > { %v9050_v29 = vpop.xlane.xlu0 %1279 }
 0x27f   : > { %13039 = vst [vmem:[#allocation55_spill] sm:$0xff] %v9050_v29 }
 0x282   : > { %v9054_v20 = vpop.xlane.xlu0 %504 }
 0x283   : > { %13040 = vst [vmem:[#allocation56_spill] sm:$0xff] %v9054_v20 }
 0x286   : > { %v9058_v21 = vpop.xlane.xlu0 %516 }
 0x287   : > { %13041 = vst [vmem:[#allocation57_spill] sm:$0xff] %v9058_v21  ;;  %v9060_v30 = vpop.xlane.xlu1 %1294 }
 0x288   : > { %13042 = vst [vmem:[#allocation58_spill] sm:$0xff] %v9060_v30 }
 0x28a   : > { %v9062_v40 = vpop.xlane.xlu0 %1045 }
 0x28b   : > { %13043 = vst [vmem:[#allocation59_spill] sm:$0xff] %v9062_v40  ;;  %v9064_v63 = vpop.xlane.xlu1 %1324 }
 0x28c   : > { %13044 = vst [vmem:[#allocation60_spill] sm:$0xff] %v9064_v63 }
 0x28e   : > { %v9066_v57 = vpop.xlane.xlu0 %1051 }
 0x28f   : > { %13045 = vst [vmem:[#allocation61_spill] sm:$0xff] %v9066_v57  ;;  %v9068_v1 = vpop.xlane.xlu1 %1309 }
 0x290   : > { %13046 = vst [vmem:[#allocation62_spill] sm:$0xff] %v9068_v1 }
 0x292   : > { %v9070_v35 = vpop.xlane.xlu0 %1057 }
 0x293   : > { %13047 = vst [vmem:[#allocation63_spill] sm:$0xff] %v9070_v35  ;;  %v9072_v42 = vpop.xlane.xlu1 %1339 }
 0x294   : > { %13048 = vst [vmem:[#allocation64_spill] sm:$0xff] %v9072_v42 }
 0x296   : > { %v9074_v8 = vpop.xlane.xlu0 %1063 }
 0x297   : > { %13049 = vst [vmem:[#allocation65_spill] sm:$0xff] %v9074_v8  ;;  %v9076_v20 = vpop.xlane.xlu1 %1354 }
 0x298   : > { %13050 = vst [vmem:[#allocation66_spill] sm:$0xff] %v9076_v20 }
 0x29a   : > { %v1664_v46 = vpop.permute.xlu0 %1663 }
 0x29b   : > { %v1722_v21 = vmul.f32 %v1664_v46, %v1635_v36  ;;  %v9078_v29 = vpop.xlane.xlu1 %513 }
 0x29c   : > { %13051 = vst [vmem:[#allocation67_spill] sm:$0xff] %v9078_v29 }
 0x29d   : > { %1739 = vperm.xlu1 %8098, %v1722_v21  }
 0x29f   : > { %v9080_v40 = vpop.xlane.xlu1 %525 }
 0x2a0   : > { %13052 = vst [vmem:[#allocation68_spill] sm:$0xff] %v9080_v40  ;;  %v1685_v40 = vpop.permute.xlu0 %1684 }
 0x2a3   : > { %v9082_v63 = vpop.xlane.xlu1 %1369 }
 0x2a4   : > { %13053 = vst [vmem:[#allocation69_spill] sm:$0xff] %v9082_v63  ;;  %v1725_v63 = vmul.f32 %v1685_v40, %v8865_v3 }
 0x2a7   : > { %v9084_v57 = vpop.xlane.xlu1 %507 }
 0x2a8   : > { %13054 = vst [vmem:[#allocation70_spill] sm:$0xff] %v9084_v57 }
 0x2ab   : > { %v9086_v1 = vpop.xlane.xlu1 %519 }
 0x2ac   : > { %13055 = vst [vmem:[#allocation71_spill] sm:$0xff] %v9086_v1 }
 0x2af   : > { %v9088_v35 = vpop.xlane.xlu1 %1048 }
 0x2b3   : > { %v9090_v42 = vpop.xlane.xlu1 %1054 }
 0x2b7   : > { %v9092_v8 = vpop.xlane.xlu1 %1060 }
 0x2bb   : > { %v1671_v20 = vpop.permute.xlu1 %1670 }
 0x2bc   : > { %v1723_v46 = vmul.f32 %v1671_v20, %v8861_v18  ;;  %v1027_v18 = vsub.f32 %v8783_v12, %v8869_v5 }
 0x2be   : > { %1742 = vperm.xlu0 %8097, %v1723_v46   ;;  %v1042_v20 = vmul.f32 1.442695, %v1027_v18  ;;  %v2025_v18 = vrot.slane %v8635_v33, %v8552_v22 }
 0x2bf   : > { %v1678_v36 = vpop.permute.xlu1 %1677 }
 0x2c0   : > { %v1724_v21 = vmul.f32 %v1678_v36, %v8863_v6  ;;  %8155 = vpow2.f32 %v1042_v20  ;;  %v1699_v36 = vpop.permute.xlu0 %1698  ;;  %v2046_v20 = vrot.slane %v8635_v33, %v8565_v27 }
 0x2c1   : > { %v1727_v3 = vmul.f32 %v1699_v36, %v9012_v55  ;;  %8157 = vlog2.f32 %v9088_v35 }
 0x2c2   : > { %1745 = vperm.xlu1 %8098, %v1724_v21   ;;  %8159 = vlog2.f32 %v9090_v42 }
 0x2c3   : > { %v1692_v29 = vpop.permute.xlu1 %1691  ;;  %8161 = vlog2.f32 %v9092_v8 }
 0x2c4   : > { %v1726_v30 = vmul.f32 %v1692_v29, %v1647_v0  ;;  %v9104_v29 = vsub.s32 %v8535_v14, %v8533_v13  ;;  %v1713_v21 = vpop.permute.xlu0 %1712 }
 0x2c6   : > { %1751 = vperm.xlu0 %8097, %v1726_v30   ;;  %1748 = vperm.xlu1 %8098, %v1725_v63   ;;  %v851_v12 = vrot.slane %v9026_v47, %v9104_v29  ;;  %v847_v63 = vrot.slane %v9014_v54, %v9104_v29  ;;  %v859_v13 = vrot.slane %v9030_v2, %v9104_v29 }
 0x2c7   : > { %v1706_v1 = vpop.permute.xlu1 %1705  ;;  %v855_v40 = vrot.slane %v9018_v53, %v9104_v29  ;;  %v863_v55 = vrot.slane %v9022_v34, %v9104_v29  ;;  %v871_v53 = vrot.slane %v9024_v37, %v9104_v29  ;;  %v2011_v34 = vrot.slane %v8635_v33, %v8538_v15 }
 0x2c8   : > { %v1728_v57 = vmul.f32 %v1706_v1, %v1653_v51  ;;  %v843_v1 = vrot.slane %v9020_v49, %v9104_v29  ;;  %v867_v51 = vrot.slane %v9034_v38, %v9104_v29  ;;  %v1729_v38 = vmul.f32 %v1713_v21, %v9016_v17 }
 0x2c9   : > { %v2032_v37 = vrot.slane %v8635_v33, %v8555_v23  ;;  %v2060_v17 = vrot.slane %v8635_v33, %v8577_v32 }
 0x2ca   : > { %1757 = vperm.xlu0 %8097, %v1728_v57   ;;  %v873_v57 = vsel %vm872_vm14, %v847_v63, %v843_v1 }
 0x2cb   : > { %v875_v30 = vsel %vm874_vm15, %v851_v12, %v873_v57 }
 0x2cd   : > { %v8156_v46 = vpop.eup %8155 }
 0x2ce   : > { %8099 = vset.pattern.permute.xlu0 %v13056_v25  ;;  %v1065_v6 = vsel %vm454_vm4, %v8156_v46, 0.0  ;;  %v877_v25 = vsel %vm876_vm0, %v855_v40, %v875_v30  ;;  %v1260_v46 = vand.u32 65535, %v8881_v58  ;;  %v8158_v12 = vpop.eup %8157 }
 0x2cf   : > { %v879_v0 = vsel %vm878_vm1, %v859_v13, %v877_v25  ;;  %v1071_v63 = vmul.f32 0.6931472, %v8158_v12  ;;  %v8160_v30 = vpop.eup %8159 }
 0x2d0   : > { %v881_v54 = vsel %vm880_vm2, %v863_v55, %v879_v0  ;;  %v1262_v36 = vcvt.s32.f32 %v1260_v46  ;;  %v1075_v13 = vmul.f32 0.6931472, %v8160_v30  ;;  %v8162_v40 = vpop.eup %8161 }
 0x2d1   : > { %v883_v49 = vsel %vm882_vm3, %v867_v51, %v881_v54  ;;  %v1085_v35 = vadd.f32 %v1071_v63, %v8843_v48  ;;  %v1079_v28 = vmul.f32 0.6931472, %v8162_v40 }
 0x2d2   : > { %v885_v47 = vsel %vm884_vm5, %v871_v53, %v883_v49  ;;  %v1087_v42 = vadd.f32 %v1075_v13, %v8847_v9  ;;  %v1426_v49 = vrot.slane %v9028_v39, %v9104_v29 }
 0x2d3   : > { %v887_v2 = vsel %vm454_vm4, %v885_v47, 0.0  ;;  %v1158_v25 = vadd.f32 %v8819_v52, %v1085_v35  ;;  %v1089_v8 = vadd.f32 %v1079_v28, %v8855_v62  ;;  %v1422_v52 = vrot.slane %v9038_v19, %v9104_v29 }
 0x2d4   : > { %v1160_v0 = vadd.f32 %v8817_v50, %v1087_v42  ;;  %v1434_v50 = vrot.slane %v9046_v24, %v9104_v29  ;;  %v1446_v47 = vrot.slane %v9036_v10, %v9104_v29 }
 0x2d5   : > { %v1162_v51 = vadd.f32 %v8821_v45, %v1089_v8  ;;  %v1451_v62 = vsel %vm872_vm14, %v1426_v49, %v1422_v52  ;;  %v1430_v45 = vrot.slane %v9042_v4, %v9104_v29  ;;  %v1450_v4 = vrot.slane %v9056_v7, %v9104_v29  ;;  %v13059_v52 = vld [vmem:[#allocation55_spill] sm:$0xff] }
 0x2d6   : > { %v1275_v49 = vand.u32 65535, %v8898_v11  ;;  %v13066_v11 = vld [vmem:[#allocation60_spill] sm:$0xff] }
 0x2d7   : > { %v1452_v53 = vsel %vm874_vm15, %v1430_v45, %v1451_v62  ;;  %v13060_v62 = vld [vmem:[#allocation40_spill] sm:$0xff] }
 0x2d8   : > { %v1453_v39 = vsel %vm876_vm0, %v1434_v50, %v1452_v53  ;;  %vm1281_vm8 = vcmp.eq.f32.partialorder %v13060_v62, %v13059_v52  ;;  %v13061_v50 = vld [vmem:[#allocation41_spill] sm:$0xff]  ;;  %v13062_v53 = vld [vmem:[#allocation70_spill] sm:$0xff]  ;;  %v13080_v62 = vld [vmem:[#allocation51_spill] sm:$0xff] }
 0x2d9   : > { %v1290_v45 = vand.u32 65535, %v13061_v50  ;;  %v1365_v50 = vand.u32 65535, %v13080_v62 }
 0x2ea   : > { %1066 = vadd.xlane.f32.xlu1 %v1065_v6 }
 0x2fb   : > { %1754 = vperm.xlu1 %8098, %v1727_v3   ;;  %v1267_v3 = vsel %vm1266_vm6, %v1262_v36, inf }
 0x318   : > { %v1740_v6 = vpop.permute.xlu1 %1739 }
 0x31f   : > { %888 = vadd.xlane.f32.xlu1 %v887_v2 }
 0x330   : > { %1760 = vperm.xlu1 %8098, %v1729_v38  }
 0x334   : > { %2013 = vbcast.lane.b32.xlu1 %v2011_v34, 256 }
 0x338   : > { %2027 = vbcast.lane.b32.xlu1 %v2025_v18, 256  ;;  %v1765_v18 = vrot.slane %v1740_v6, %v9104_v29  ;;  %v9206_v6 = vld [vmem:[%s12770_s5] sm:$0xff] }
 0x339   : > { %v1743_v10 = vpop.permute.xlu0 %1742 }
 0x33a   : > { %v1769_v7 = vrot.slane %v1743_v10, %v9104_v29 }
 0x33c   : > { %2034 = vbcast.lane.b32.xlu1 %v2032_v37, 256  ;;  %v1794_v36 = vsel %vm872_vm14, %v1769_v7, %v1765_v18 }
 0x33d   : > { %v1746_v1 = vpop.permute.xlu1 %1745 }
 0x33e   : > { %v1773_v34 = vrot.slane %v1746_v1, %v9104_v29 }
 0x340   : > { %2048 = vbcast.lane.b32.xlu1 %v2046_v20, 256 }
 0x341   : > { %v1749_v57 = vpop.permute.xlu1 %1748  ;;  %v1752_v20 = vpop.permute.xlu0 %1751 }
 0x342   : > { %v1777_v37 = vrot.slane %v1749_v57, %v9104_v29  ;;  %v1781_v12 = vrot.slane %v1752_v20, %v9104_v29  ;;  %v13070_v20 = vld [vmem:[#allocation47_spill] sm:$0xff] }
 0x344   : > { %2062 = vbcast.lane.b32.xlu1 %v2060_v17, 256 }
 0x345   : > { %v1758_v35 = vpop.permute.xlu0 %1757 }
 0x346   : > { %v1789_v42 = vrot.slane %v1758_v35, %v9104_v29  ;;  %v13073_v35 = vld [vmem:[#allocation49_spill] sm:$0xff] }
 0x368   : > { %1268 = vmin.xlane.f32.xlu1 %v1267_v3  ;;  %v1795_v3 = vsel %vm874_vm15, %v1773_v34, %v1794_v36 }
 0x369   : > { %v1796_v63 = vsel %vm876_vm0, %v1777_v37, %v1795_v3  ;;  %v13069_v37 = vld [vmem:[#allocation62_spill] sm:$0xff] }
 0x36a   : > { %v1797_v13 = vsel %vm878_vm1, %v1781_v12, %v1796_v63  ;;  %vm1311_vm11 = vcmp.eq.f32.partialorder %v13070_v20, %v13069_v37 }
 0x373   : > { %v1067_v58 = vpop.xlane.xlu1 %1066 }
 0x374   : > { %8163 = vlog2.f32 %v1067_v58 }
 0x377   : > { %v1755_v46 = vpop.permute.xlu1 %1754 }
 0x378   : > { %v1785_v30 = vrot.slane %v1755_v46, %v9104_v29 }
 0x379   : > { %1182 = vperm.xlu1 %8098, %v1158_v25  }
 0x37a   : > { %v1798_v40 = vsel %vm880_vm2, %v1785_v30, %v1797_v13  ;;  %v13072_v30 = vld [vmem:[#allocation64_spill] sm:$0xff] }
 0x37b   : > { %v1799_v8 = vsel %vm882_vm3, %v1789_v42, %v1798_v40  ;;  %vm1341_vm12 = vcmp.eq.f32.partialorder %v13073_v35, %v13072_v30  ;;  %v13074_v13 = vld [vmem:[#allocation48_spill] sm:$0xff]  ;;  %v13075_v40 = vld [vmem:[#allocation21_spill] sm:$0xff] }
 0x37d   : > { %1188 = vperm.xlu1 %8098, %v1160_v0  }
 0x381   : > { %v8164_v55 = vpop.eup %8163  ;;  %1194 = vperm.xlu1 %8098, %v1162_v51  }
 0x382   : > { %v1083_v48 = vmul.f32 0.6931472, %v8164_v55  ;;  %v2018_v55 = vrot.slane %v8635_v33, %v8541_v16 }
 0x384   : > { %v1091_v54 = vadd.f32 %v1083_v48, %v8869_v5  ;;  %v1438_v5 = vrot.slane %v9032_v61, %v9104_v29  ;;  %v2039_v48 = vrot.slane %v8635_v33, %v8562_v26 }
 0x386   : > { %v1164_v9 = vadd.f32 %v8825_v56, %v1091_v54  ;;  %v1442_v56 = vrot.slane %v9052_v44, %v9104_v29  ;;  %v1454_v19 = vsel %vm878_vm1, %v1438_v5, %v1453_v39  ;;  %v2053_v54 = vrot.slane %v8635_v33, %v8574_v31 }
 0x387   : > { %v1277_v5 = vcvt.s32.f32 %v1275_v49 }
 0x388   : > { %1200 = vperm.xlu1 %8098, %v1164_v9   ;;  %v1455_v24 = vsel %vm880_vm2, %v1442_v56, %v1454_v19  ;;  %v13058_v9 = vld [vmem:[#allocation53_spill] sm:$0xff]  ;;  %v13063_v56 = vld [vmem:[#allocation58_spill] sm:$0xff]  ;;  %v13064_v19 = vld [vmem:[#allocation43_spill] sm:$0xff] }
 0x389   : > { %v1456_v2 = vsel %vm882_vm3, %v1446_v47, %v1455_v24  ;;  %8165 = vlog2.f32 %v13058_v9  ;;  %v1282_v39 = vsel %vm1281_vm8, %v1277_v5, inf  ;;  %vm1296_vm9 = vcmp.eq.f32.partialorder %v13064_v19, %v13063_v56  ;;  %v13065_v47 = vld [vmem:[#allocation42_spill] sm:$0xff]  ;;  %v13082_v5 = vld [vmem:[#allocation52_spill] sm:$0xff]  ;;  %v13083_v19 = vld [vmem:[#allocation37_spill] sm:$0xff] }
 0x38a   : > { %v1457_v21 = vsel %vm884_vm5, %v1450_v4, %v1456_v2  ;;  %8167 = vlog2.f32 %v13062_v53  ;;  %v1320_v33 = vand.u32 65535, %v13065_v47  ;;  %v1292_v24 = vcvt.s32.f32 %v1290_v45  ;;  %v13067_v2 = vld [vmem:[#allocation45_spill] sm:$0xff] }
 0x38b   : > { %v9182_v61 = vsel %vm1169_vm7, %v1457_v21, %v8644_v43  ;;  %vm1326_vm10 = vcmp.eq.f32.partialorder %v13067_v2, %v13066_v11  ;;  %v13068_v21 = vld [vmem:[#allocation44_spill] sm:$0xff]  ;;  %v13081_v53 = vld [vmem:[#allocation69_spill] sm:$0xff]  ;;  %v13084_v2 = vld [vmem:[#allocation59_spill] sm:$0xff] }
 0x38c   : > { %13057 = vst [vmem:[#allocation72_spill] sm:$0xff] %v9182_v61  ;;  %v9186_v44 = vrot.slane %v9182_v61, %v8590_v41  ;;  %v1297_v4 = vsel %vm1296_vm9, %v1292_v24, inf  ;;  %v1305_v10 = vand.u32 65535, %v13068_v21  ;;  %v1322_v7 = vcvt.s32.f32 %v1320_v33 }
 0x38d   : > { %vm1371_vm6 = vcmp.eq.f32.partialorder %v13082_v5, %v13081_v53  ;;  %v1367_v33 = vcvt.s32.f32 %v1365_v50  ;;  %v12829_v24 = vmov 3   ;;  %8169 = vlog2.f32 %v13084_v2 }
 0x38e   : > { %v9190_v38 = vrot.slane %v9186_v44, %v8590_v41  ;;  %v1327_v18 = vsel %vm1326_vm10, %v1322_v7, inf  ;;  %v1307_v3 = vcvt.s32.f32 %v1305_v10  ;;  %8101 = vset.pattern.permute.xlu1 %v12829_v24  ;;  %v13085_v10 = vld [vmem:[#allocation61_spill] sm:$0xff]  ;;  %v13086_v7 = vld [vmem:[#allocation63_spill] sm:$0xff] }
 0x390   : > { %v2211_v17 = vrot.slane %v9190_v38, %v8538_v15  ;;  %v1312_v63 = vsel %vm1311_vm11, %v1307_v3, inf }
 0x392   : > { %v9209_v1 = vadd.f32 %v9206_v6, %v2211_v17  ;;  %v13071_v17 = vld [vmem:[#allocation46_spill] sm:$0xff] }
 0x393   : > { %v1335_v46 = vand.u32 65535, %v13071_v17  ;;  %v8420_v17 = vld [vmem:[%s8521_s14] sm:$0xff] }
 0x394   : > { %v2256_v58 = vsel %vm454_vm4, %v9209_v1, -inf  ;;  %vm1812_vm8 = vcmp.gt.f32.partialorder %v8420_v17, 0.0 }
 0x396   : > { %v8166_v34 = vpop.eup %8165 }
 0x397   : > { %v532_v36 = vmul.f32 0.6931472, %v8166_v34  ;;  %v8168_v12 = vpop.eup %8167 }
 0x399   : > { %v545_v42 = vadd.f32 %v532_v36, %v13075_v40 }
 0x39a   : > { %v8170_v34 = vpop.eup %8169 }
 0x39b   : > { %v1069_v36 = vmul.f32 0.6931472, %v8170_v34 }
 0x3a8   : > { %v9211_v57 = vpop.xlane.xlu1 %888 }
 0x3ac   : > { %2257 = vmax.xlane.f32.xlu1 %v2256_v58  ;;  %v1761_v28 = vpop.permute.xlu1 %1760  ;;  %v1350_v58 = vand.u32 65535, %v13074_v13  ;;  %v13089_v13 = vld [vmem:[#allocation34_spill] sm:$0xff] }
 0x3ad   : > { %v1793_v25 = vrot.slane %v1761_v28, %v9104_v29  ;;  %v530_v28 = vmul.f32 0.6931472, %v8168_v12 }
 0x3ae   : > { %v1352_v9 = vcvt.s32.f32 %v1350_v58  ;;  %v1084_v58 = vadd.f32 %v1069_v36, %v13089_v13  ;;  %v890_v36 = vadd.f32 %v9211_v57, %v13083_v19 }
 0x3af   : > { %v1800_v0 = vsel %vm884_vm5, %v1793_v25, %v1799_v8  ;;  %v1337_v25 = vcvt.s32.f32 %v1335_v46 }
 0x3b0   : > { %v1802_v51 = vsel %vm454_vm4, %v1800_v0, 0.0  ;;  %v13076_v0 = vld [vmem:[#allocation66_spill] sm:$0xff] }
 0x3b1   : > { %1803 = vadd.xlane.f32.xlu0 %v1802_v51  ;;  %v1342_v8 = vsel %vm1341_vm12, %v1337_v25, inf  ;;  %v13077_v51 = vld [vmem:[#allocation50_spill] sm:$0xff] }
 0x3b2   : > { %vm1356_vm13 = vcmp.eq.f32.partialorder %v13077_v51, %v13076_v0 }
 0x3b3   : > { %v1357_v45 = vsel %vm1356_vm13, %v1352_v9, inf }
 0x3c7   : > { %2020 = vbcast.lane.b32.xlu0 %v2018_v55, 256  ;;  %v13078_v55 = vld [vmem:[#allocation23_spill] sm:$0xff] }
 0x3cb   : > { %2041 = vbcast.lane.b32.xlu0 %v2039_v48, 256  ;;  %v1513_v48 = vsub.f32 %v13078_v55, %v545_v42 }
 0x3cf   : > { %2055 = vbcast.lane.b32.xlu0 %v2053_v54, 256  ;;  %v13079_v54 = vld [vmem:[#allocation28_spill] sm:$0xff] }
 0x3d0   : > { %v544_v49 = vadd.f32 %v530_v28, %v13079_v54  ;;  %v13091_v54 = vld [vmem:[#allocation30_spill] sm:$0xff] }
 0x3d2   : > { %v590_v47 = vsub.f32 %v13083_v19, %v544_v49  ;;  %v1157_v49 = vadd.f32 %v13091_v54, %v1084_v58 }
 0x3d4   : > { %v591_v21 = vmul.f32 1.442695, %v590_v47  ;;  %v13093_v47 = vld [vmem:[#allocation32_spill] sm:$0xff] }
 0x3ee   : > { %1283 = vmin.xlane.f32.xlu0 %v1282_v39  ;;  %v1514_v39 = vmul.f32 1.442695, %v1513_v48 }
 0x3f0   : > { %8171 = vpow2.f32 %v1514_v39 }
 0x3f1   : > { %8173 = vlog2.f32 %v13085_v10 }
 0x3f2   : > { %1298 = vmin.xlane.f32.xlu0 %v1297_v4  ;;  %v1372_v4 = vsel %vm1371_vm6, %v1367_v33, inf  ;;  %8175 = vpow2.f32 %v591_v21  ;;  %v13094_v21 = vld [vmem:[#allocation39_spill] sm:$0xff] }
 0x3f3   : > { %8177 = vlog2.f32 %v13086_v7  ;;  %v13095_v7 = vld [vmem:[#allocation33_spill] sm:$0xff] }
 0x3f6   : > { %1328 = vmin.xlane.f32.xlu0 %v1327_v18  ;;  %v13087_v18 = vld [vmem:[#allocation65_spill] sm:$0xff] }
 0x3f7   : > { %8179 = vlog2.f32 %v13087_v18 }
 0x3fa   : > { %1313 = vmin.xlane.f32.xlu0 %v1312_v63  ;;  %v13088_v63 = vmov 0  }
 0x3fb   : > { %v2080_v35 = vsel %vm1812_vm8, 1, %v13088_v63 }
 0x3fd   : > { %v8172_v20 = vpop.eup %8171 }
 0x3fe   : > { %1343 = vmin.xlane.f32.xlu0 %v1342_v8  ;;  %v8174_v46 = vpop.eup %8173  ;;  %v1521_v3 = vadd.f32 1e-08, %v8172_v20  ;;  %v1516_v25 = vmax.f32 %v8172_v20, 0.01  ;;  %v13090_v8 = vld [vmem:[#allocation36_spill] sm:$0xff] }
 0x3ff   : > { %v8176_v12 = vpop.eup %8175  ;;  %v1073_v40 = vmul.f32 0.6931472, %v8174_v46 }
 0x400   : > { %8181 = vlog2.f32 %v1521_v3  ;;  %v598_v42 = vadd.f32 1e-08, %v8176_v12  ;;  %v8178_v28 = vpop.eup %8177  ;;  %v1517_v62 = vmin.f32 %v1516_v25, 0.99  ;;  %v593_v50 = vmax.f32 %v8176_v12, 0.01 }
 0x401   : > { %v1086_v51 = vadd.f32 %v1073_v40, %v13090_v8  ;;  %v1077_v48 = vmul.f32 0.6931472, %v8178_v28  ;;  %v13096_v3 = vld [vmem:[#allocation35_spill] sm:$0xff] }
 0x402   : > { %1358 = vmin.xlane.f32.xlu0 %v1357_v45  ;;  %8183 = vlog2.f32 %v598_v42  ;;  %v13092_v45 = vld [vmem:[#allocation38_spill] sm:$0xff]  ;;  %v594_v2 = vmin.f32 %v593_v50, 0.99  ;;  %v891_v42 = vmul.f32 %v8420_v17, %v890_v36 }
 0x403   : > { %v1088_v5 = vadd.f32 %v1077_v48, %v13092_v45  ;;  %v1159_v33 = vadd.f32 %v13093_v47, %v1086_v51 }
 0x404   : > { %v8180_v9 = vpop.eup %8179  ;;  %v595_v46 = vsub.f32 1.0, %v594_v2 }
 0x405   : > { %v1081_v39 = vmul.f32 0.6931472, %v8180_v9  ;;  %v1161_v34 = vadd.f32 %v13095_v7, %v1088_v5  ;;  %v2174_v9 = vcombine.high %v9186_v44, %v9186_v44  ;;  %v2204_v5 = vcombine.high %v9190_v38, %v9190_v38 }
 0x406   : > { %1373 = vmin.xlane.f32.xlu0 %v1372_v4  ;;  %v1518_v4 = vsub.f32 1.0, %v1517_v62  ;;  %v596_v40 = vmul.f32 %v595_v46, %v595_v46  ;;  %v2159_v62 = vcombine.high %v9182_v61, %v9182_v61 }
 0x407   : > { %v1090_v10 = vadd.f32 %v1081_v39, %v13094_v21  ;;  %v2196_v50 = vrot.slane %v2174_v9, %v8590_v41 }
 0x408   : > { %v1519_v20 = vmul.f32 %v1518_v4, %v1518_v4  ;;  %v597_v8 = vsub.f32 0.0, %v596_v40  ;;  %v2173_v39 = vrot.slane %v2159_v62, %v8590_v41 }
 0x409   : > { %v1163_v12 = vadd.f32 %v13096_v3, %v1090_v10  ;;  %v2215_v45 = vrot.slane %v2196_v50, %v8538_v15  ;;  %v2206_v44 = vcombine.high %v2196_v50, %v2196_v50  ;;  %v2539_v50 = vld [vmem:[%s8515_s11] sm:$0xff] }
 0x40a   : > { %v1520_v58 = vsub.f32 0.0, %v1519_v20  ;;  %v2189_v47 = vrot.slane %v2173_v39, %v8590_v41 }
 0x40b   : > { %v2223_v10 = vrot.slane %v2206_v44, %v8538_v15 }
 0x40c   : > { %v2227_v21 = vrot.slane %v2189_v47, %v8538_v15  ;;  %v2205_v38 = vcombine.high %v2189_v47, %v2189_v47  ;;  %v1301_v47 = vcvt.f32.s32 %v13063_v56  ;;  %v1361_v56 = vcvt.f32.s32 %v13076_v0 }
 0x40d   : > { %v8182_v18 = vpop.eup %8181  ;;  %v9307_v46 = vadd.f32 %v9206_v6, %v2223_v10 }
 0x40e   : > { %v2235_v20 = vrot.slane %v2205_v38, %v8538_v15 }
 0x40f   : > { %v8184_v13 = vpop.eup %8183 }
 0x410   : > { %v600_v25 = vmul.f32 0.6931472, %v8184_v13  ;;  %v2265_v13 = vsel %vm454_vm4, %v9307_v46, -inf }
 0x412   : > { %v601_v48 = vmul.f32 %v600_v25, %v597_v8 }
 0x414   : > { %v602_v54 = vmul.f32 %v8420_v17, %v601_v48 }
 0x41c   : > { %2082 = vperm.xlu0 %8099, %v2080_v35   ;;  %v1523_v35 = vmul.f32 0.6931472, %v8182_v18  ;;  %v9303_v18 = vadd.f32 %v9206_v6, %v2227_v21 }
 0x41e   : > { %v1524_v28 = vmul.f32 %v1523_v35, %v1520_v58  ;;  %v9313_v35 = vadd.f32 %v9206_v6, %v2235_v20 }
 0x420   : > { %8100 = vset.pattern.permute.xlu0 %v13088_v63  ;;  %v1525_v51 = vmul.f32 %v8420_v17, %v1524_v28  ;;  %v9323_v28 = vpop.permute.xlu1 %2013 }
 0x421   : > { %1179 = vperm.xlu0 %8100, %v1157_v49   ;;  %13097 = vst [vmem:[#allocation53_spill] sm:$0xff] %v9323_v28 }
 0x425   : > { %1185 = vperm.xlu0 %8100, %v1159_v33   ;;  %v2175_v33 = vcombine.high %v2173_v39, %v2173_v39 }
 0x427   : > { %v2203_v7 = vrot.slane %v2175_v33, %v8590_v41  ;;  %v1271_v33 = vcvt.f32.s32 %v9040_v59 }
 0x429   : > { %1191 = vperm.xlu0 %8100, %v1161_v34   ;;  %v2231_v36 = vrot.slane %v2203_v7, %v8538_v15  ;;  %v2207_v3 = vcombine.high %v2203_v7, %v2203_v7 }
 0x42b   : > { %v9318_v58 = vadd.f32 %v9206_v6, %v2231_v36  ;;  %v2239_v40 = vrot.slane %v2207_v3, %v8538_v15  ;;  %v1302_v36 = vshll.u32 %v1301_v47, 16  ;;  %v1272_v3 = vshll.u32 %v1271_v33, 16 }
 0x42c   : > { %v1362_v47 = vshll.u32 %v1361_v56, 16 }
 0x42d   : > { %1197 = vperm.xlu0 %8100, %v1163_v12   ;;  %v2268_v12 = vsel %vm454_vm4, %v9303_v18, -inf  ;;  %v2271_v25 = vsel %vm454_vm4, %v9318_v58, -inf  ;;  %v9328_v8 = vadd.f32 %v9206_v6, %v2239_v40  ;;  %v1331_v40 = vcvt.f32.s32 %v13066_v11 }
 0x42f   : > { %v2277_v48 = vsel %vm454_vm4, %v9328_v8, -inf }
 0x431   : > { %893 = vrot.lane.b32.xlu0 %v891_v42, %s8439_s15  ;;  %v2274_v42 = vsel %vm454_vm4, %v9313_v35, -inf }
 0x435   : > { %1527 = vrot.lane.b32.xlu0 %v1525_v51, %s8441_s20 }
 0x439   : > { %604 = vrot.lane.b32.xlu0 %v602_v54, %s8439_s15  ;;  %v9334_v54 = vpop.permute.xlu1 %2027 }
 0x43a   : > { %v1804_v57 = vpop.xlane.xlu0 %1803  ;;  %13099 = vst [vmem:[#allocation40_spill] sm:$0xff] %v9334_v54 }
 0x43b   : > { %v1805_v19 = vadd.f32 %v1804_v57, %v13078_v55  ;;  %v9288_v55 = vadd.f32 %v9206_v6, %v2215_v45 }
 0x43d   : > { %v1806_v49 = vmul.f32 %v8420_v17, %v1805_v19  ;;  %v2219_v17 = vrot.slane %v2204_v5, %v8538_v15  ;;  %v2259_v4 = vsel %vm454_vm4, %v9288_v55, -inf  ;;  %v9338_v19 = vpop.permute.xlu1 %2034 }
 0x43e   : > { %v9330_v51 = vpop.permute.xlu0 %2020  ;;  %13101 = vst [vmem:[#allocation70_spill] sm:$0xff] %v9338_v19 }
 0x43f   : > { %1808 = vrot.lane.b32.xlu1 %v1806_v49, %s8441_s20  ;;  %v9295_v2 = vadd.f32 %v9206_v6, %v2219_v17  ;;  %13098 = vst [vmem:[#allocation55_spill] sm:$0xff] %v9330_v51  ;;  %v1286_v17 = vcvt.f32.s32 %v13059_v52  ;;  %v1346_v52 = vcvt.f32.s32 %v13072_v30  ;;  %s8452_s20 = smov 121  }
 0x441   : > { %v2262_v34 = vsel %vm454_vm4, %v9295_v2, -inf  ;;  %v9342_v9 = vpop.permute.xlu1 %2048  ;;  %v1287_v7 = vshll.u32 %v1286_v17, 16  ;;  %v1332_v17 = vshll.u32 %v1331_v40, 16 }
 0x442   : > { %v9336_v57 = vpop.permute.xlu0 %2041  ;;  %13103 = vst [vmem:[#allocation43_spill] sm:$0xff] %v9342_v9 }
 0x443   : > { %13100 = vst [vmem:[#allocation41_spill] sm:$0xff] %v9336_v57 }
 0x445   : > { %v9345_v5 = vpop.permute.xlu1 %2062 }
 0x446   : > { %v9340_v49 = vpop.permute.xlu0 %2055  ;;  %13104 = vst [vmem:[#allocation42_spill] sm:$0xff] %v9345_v5 }
 0x447   : > { %13102 = vst [vmem:[#allocation58_spill] sm:$0xff] %v9340_v49 }
 0x449   : > { %v1269_v44 = vpop.xlane.xlu1 %1268 }
 0x458   : > { %2260 = vmax.xlane.f32.xlu0 %v2259_v4  ;;  %v1316_v4 = vcvt.f32.s32 %v13069_v37 }
 0x45c   : > { %2263 = vmax.xlane.f32.xlu0 %v2262_v34  ;;  %v1270_v34 = vcvt.f32.s32 %v1269_v44  ;;  %v1376_v44 = vcvt.f32.s32 %v13081_v53 }
 0x460   : > { %2269 = vmax.xlane.f32.xlu0 %v2268_v12  ;;  %v1317_v12 = vshll.u32 %v1316_v4, 16 }
 0x463   : > { %2266 = vmax.xlane.f32.xlu1 %v2265_v13 }
 0x464   : > { %2275 = vmax.xlane.f32.xlu0 %v2274_v42 }
 0x467   : > { %2272 = vmax.xlane.f32.xlu1 %v2271_v25  ;;  %v1273_v25 = vadd.s32 %v1272_v3, %v1270_v34 }
 0x469   : > { %v1463_v11 = vrot.slane %v1273_v25, %v9104_v29 }
 0x46b   : > { %2278 = vmax.xlane.f32.xlu1 %v2277_v48 }
 0x477   : > { %v1284_v62 = vpop.xlane.xlu0 %1283 }
 0x478   : > { %v1285_v21 = vcvt.f32.s32 %v1284_v62 }
 0x47a   : > { %v1288_v13 = vadd.s32 %v1287_v7, %v1285_v21 }
 0x47b   : > { %v1299_v45 = vpop.xlane.xlu0 %1298 }
 0x47c   : > { %2542 = vperm.xlu1 %8101, %v2539_v50   ;;  %v1300_v38 = vcvt.f32.s32 %v1299_v45  ;;  %v1347_v50 = vshll.u32 %v1346_v52, 16  ;;  %v1467_v45 = vrot.slane %v1288_v13, %v9104_v29 }
 0x47e   : > { %v1303_v42 = vadd.s32 %v1302_v36, %v1300_v38 }
 0x47f   : > { %v1329_v39 = vpop.xlane.xlu0 %1328 }
 0x480   : > { %8102 = vset.pattern.permute.xlu1 %v13088_v63  ;;  %v1330_v62 = vcvt.f32.s32 %v1329_v39  ;;  %v1471_v30 = vrot.slane %v1303_v42, %v9104_v29 }
 0x482   : > { %v1333_v38 = vadd.s32 %v1332_v17, %v1330_v62 }
 0x483   : > { %v1314_v10 = vpop.xlane.xlu0 %1313 }
 0x484   : > { %v1315_v20 = vcvt.f32.s32 %v1314_v10  ;;  %v1492_v10 = vsel %vm872_vm14, %v1467_v45, %v1463_v11 }
 0x485   : > { %v1493_v7 = vsel %vm874_vm15, %v1471_v30, %v1492_v10  ;;  %v13109_v10 = vld [vmem:[#allocation15_spill] sm:$0xff] }
 0x486   : > { %v1318_v37 = vadd.s32 %v1317_v12, %v1315_v20  ;;  %v1377_v20 = vshll.u32 %v1376_v44, 16  ;;  %v1479_v12 = vrot.slane %v1333_v38, %v9104_v29 }
 0x487   : > { %v1344_v59 = vpop.xlane.xlu0 %1343 }
 0x488   : > { %v1345_v48 = vcvt.f32.s32 %v1344_v59  ;;  %v1475_v0 = vrot.slane %v1318_v37, %v9104_v29 }
 0x48a   : > { %v1348_v4 = vadd.s32 %v1347_v50, %v1345_v48  ;;  %v1494_v36 = vsel %vm876_vm0, %v1475_v0, %v1493_v7  ;;  %v1183_v50 = vpop.permute.xlu1 %1182 }
 0x48b   : > { %v1359_v33 = vpop.xlane.xlu0 %1358  ;;  %v1495_v40 = vsel %vm878_vm1, %v1479_v12, %v1494_v36 }
 0x48c   : > { %v1360_v21 = vcvt.f32.s32 %v1359_v33  ;;  %v1483_v53 = vrot.slane %v1348_v4, %v9104_v29 }
 0x48e   : > { %v1363_v39 = vadd.s32 %v1362_v47, %v1360_v21  ;;  %v1496_v56 = vsel %vm880_vm2, %v1483_v53, %v1495_v40  ;;  %v9377_v17 = vpop.permute.xlu1 %1188 }
 0x48f   : > { %v1374_v34 = vpop.xlane.xlu0 %1373 }
 0x490   : > { %v1375_v3 = vcvt.f32.s32 %v1374_v34  ;;  %v1487_v52 = vrot.slane %v1363_v39, %v9104_v29  ;;  %v9399_v39 = vrot.slane %v13109_v10, %v8590_v41 }
 0x492   : > { %v1378_v13 = vadd.s32 %v1377_v20, %v1375_v3  ;;  %v1497_v59 = vsel %vm882_vm3, %v1487_v52, %v1496_v56  ;;  %v9381_v44 = vpop.permute.xlu1 %1194  ;;  %v2589_v20 = vcombine.high %v9399_v39, %v9399_v39  ;;  %v13111_v56 = vmov 0.0  }
 0x494   : > { %v1491_v42 = vrot.slane %v1378_v13, %v9104_v29  ;;  %v9412_v3 = vrot.slane %v2589_v20, %v8590_v41 }
 0x496   : > { %v1498_v25 = vsel %vm884_vm5, %v1491_v42, %v1497_v59  ;;  %v9385_v33 = vpop.permute.xlu1 %1200  ;;  %v2630_v52 = vrot.slane %v9412_v3, %v8538_v15  ;;  %v13113_v59 = vld [vmem:[#allocation17_spill] sm:$0xff] }
 0x497   : > { %v1499_v37 = vsel %vm1169_vm7, %v1498_v25, %v8535_v14  ;;  %v9375_v48 = vpop.permute.xlu0 %2082 }
 0x498   : > { %1500 = vst.msk [vmem:[#allocation2] sm:$0xff] %vm454_vm4, %v1499_v37  ;;  %13105 = vst [vmem:[#allocation60_spill] sm:$0xff] %v9375_v48  ;;  %v2664_v37 = vmul.f32 %v9206_v6, %v2630_v52 }
 0x49a   : > { %v9387_v11 = vpop.xlane.xlu1 %2257 }
 0x49b   : > { %vm2280_vm9 = vcmp.eq.f32.partialorder %v9209_v1, %v9387_v11 }
 0x49c   : > { %v1180_v62 = vpop.permute.xlu0 %1179  ;;  %v2288_v13 = vsel %vm2280_vm9, %v8535_v14, 2147483647 }
 0x49d   : > { %v9432_v20 = vsel %vm454_vm4, %v2288_v13, 2147483647 }
 0x4a0   : > { %v1186_v45 = vpop.permute.xlu0 %1185 }
 0x4a4   : > { %v9379_v47 = vpop.permute.xlu0 %1191 }
 0x4a8   : > { %v9383_v30 = vpop.permute.xlu0 %1197 }
 0x4ac   : > { %v9389_v0 = vpop.permute.xlu0 %893 }
 0x4ad   : > { %13106 = vst [vmem:[#allocation45_spill] sm:$0xff] %v9389_v0 }
 0x4b0   : > { %v9393_v21 = vpop.permute.xlu0 %1527 }
 0x4b1   : > { %v9391_v4 = vpop.permute.xlu1 %1808  ;;  %13108 = vst [vmem:[#allocation62_spill] sm:$0xff] %v9393_v21 }
 0x4b2   : > { %13107 = vst [vmem:[#allocation44_spill] sm:$0xff] %v9391_v4  ;;  %v2674_v4 = vsel %vm454_vm4, %v2664_v37, 0.0  ;;  %v1205_v37 = vrot.slane %v1180_v62, %v9104_v29 }
 0x4b4   : > { %v9401_v7 = vpop.permute.xlu0 %604 }
 0x4b5   : > { %13110 = vst [vmem:[#allocation47_spill] sm:$0xff] %v9401_v7  ;;  %v1217_v7 = vrot.slane %v9377_v17, %v9104_v29 }
 0x4e1   : > { %v9407_v36 = vpop.xlane.xlu0 %2260 }
 0x4e2   : > { %vm2281_vm11 = vcmp.eq.f32.partialorder %v9288_v55, %v9407_v36  ;;  %v2298_v55 = vshra.s32 %v9432_v20, 16 }
 0x4e4   : > { %v9447_v13 = vcvt.s32.f32 %v2298_v55  ;;  %v1209_v55 = vrot.slane %v1183_v50, %v9104_v29 }
 0x4e5   : > { %v9420_v40 = vpop.xlane.xlu0 %2263 }
 0x4e6   : > { %vm2282_vm12 = vcmp.eq.f32.partialorder %v9295_v2, %v9420_v40  ;;  %v1234_v62 = vsel %vm872_vm14, %v1209_v55, %v1205_v37 }
 0x4e7   : > { %v2290_v52 = vsel %vm2282_vm12, %v8535_v14, 2147483647 }
 0x4e8   : > { %v9451_v2 = vsel %vm454_vm4, %v2290_v52, 2147483647 }
 0x4e9   : > { %v9437_v24 = vpop.xlane.xlu0 %2269 }
 0x4ea   : > { %vm2284_vm13 = vcmp.eq.f32.partialorder %v9303_v18, %v9437_v24  ;;  %v2328_v18 = vshra.s32 %v9451_v2, 16 }
 0x4ec   : > { %v9395_v38 = vpop.xlane.xlu1 %2266  ;;  %v9476_v50 = vcvt.s32.f32 %v2328_v18 }
 0x4ed   : > { %vm2283_vm6 = vcmp.eq.f32.partialorder %v9307_v46, %v9395_v38 }
 0x4ee   : > { %v2291_v21 = vsel %vm2283_vm6, %v8535_v14, 2147483647 }
 0x4f0   : > { %v9403_v34 = vpop.xlane.xlu1 %2272 }
 0x4f1   : > { %vm2285_vm8 = vcmp.eq.f32.partialorder %v9318_v58, %v9403_v34 }
 0x4f2   : > { %v2293_v37 = vsel %vm2285_vm8, %v8535_v14, 2147483647 }
 0x4f3   : > { %v9498_v55 = vsel %vm454_vm4, %v2293_v37, 2147483647 }
 0x4f4   : > { %v9409_v53 = vpop.xlane.xlu1 %2278 }
 0x4f8   : > { %v2543_v12 = vpop.permute.xlu1 %2542 }
 0x4f9   : > { %vm2544_vm10 = vcmp.eq.s32.totalorder %v2543_v12, %v8535_v14  ;;  %v2289_v12 = vsel %vm2281_vm11, %v8535_v14, 2147483647 }
 0x4fa   : > { %v9423_v42 = vsel %vm2544_vm10, 1.0, %v13111_v56  ;;  %v9442_v0 = vsel %vm454_vm4, %v2289_v12, 2147483647  ;;  %v9482_v56 = vsel %vm454_vm4, %v2291_v21, 2147483647  ;;  %v1225_v21 = vrot.slane %v9381_v44, %v9104_v29 }
 0x4fb   : > { %13112 = vst [vmem:[#allocation46_spill] sm:$0xff] %v9423_v42  ;;  %v2547_v25 = vmul.f32 %v9423_v42, %v13113_v59  ;;  %v2343_v17 = vshra.s32 %v9482_v56, 16  ;;  %vm2287_vm10 = vcmp.eq.f32.partialorder %v9328_v8, %v9409_v53  ;;  %v9511_v44 = vrot.slane %v9399_v39, %v8590_v41 }
 0x4fc   : > { %v2295_v37 = vsel %vm2287_vm10, %v8535_v14, 2147483647 }
 0x4fd   : > { %v2548_v1 = vsel %vm454_vm4, %v2547_v25, 0.0  ;;  %v2313_v25 = vshra.s32 %v9442_v0, 16  ;;  %v2619_v39 = vcombine.high %v9511_v44, %v9511_v44 }
 0x4fe   : > { %2549 = vadd.xlane.f32.xlu0 %v2548_v1  ;;  %v2292_v1 = vsel %vm2284_vm13, %v8535_v14, 2147483647 }
 0x4ff   : > { %v9459_v12 = vcvt.s32.f32 %v2313_v25  ;;  %v9464_v52 = vsel %vm454_vm4, %v2292_v1, 2147483647  ;;  %v9474_v25 = vpop.xlane.xlu0 %2275 }
 0x500   : > { %v2358_v1 = vshra.s32 %v9464_v52, 16  ;;  %vm2286_vm9 = vcmp.eq.f32.partialorder %v9313_v35, %v9474_v25 }
 0x502   : > { %2675 = vadd.xlane.f32.xlu0 %v2674_v4  ;;  %v1213_v4 = vrot.slane %v1186_v45, %v9104_v29  ;;  %v1221_v45 = vrot.slane %v9379_v47, %v9104_v29  ;;  %v9492_v18 = vcvt.s32.f32 %v2358_v1 }
 0x504   : > { %v1235_v46 = vsel %vm874_vm15, %v1213_v4, %v1234_v62  ;;  %v1229_v4 = vrot.slane %v9383_v30, %v9104_v29  ;;  %v9506_v62 = vcvt.s32.f32 %v2343_v17 }
 0x505   : > { %v1236_v58 = vsel %vm876_vm0, %v1217_v7, %v1235_v46  ;;  %v2294_v7 = vsel %vm2286_vm9, %v8535_v14, 2147483647  ;;  %v2373_v46 = vshra.s32 %v9498_v55, 16 }
 0x506   : > { %2301 = vmin.xlane.f32.xlu0 %v9447_v13  ;;  %v1237_v47 = vsel %vm878_vm1, %v1221_v45, %v1236_v58  ;;  %v1233_v45 = vrot.slane %v9385_v33, %v9104_v29  ;;  %v9516_v1 = vsel %vm454_vm4, %v2294_v7, 2147483647  ;;  %v9529_v33 = vsel %vm454_vm4, %v2295_v37, 2147483647 }
 0x507   : > { %v1238_v35 = vsel %vm880_vm2, %v1225_v21, %v1237_v47  ;;  %v9521_v58 = vcvt.s32.f32 %v2373_v46  ;;  %v2388_v47 = vshra.s32 %v9516_v1, 16  ;;  %v2403_v7 = vshra.s32 %v9529_v33, 16 }
 0x508   : > { %v1239_v30 = vsel %vm882_vm3, %v1229_v4, %v1238_v35  ;;  %v2574_v4 = vcombine.high %v13109_v10, %v13109_v10  ;;  %v2634_v35 = vrot.slane %v2619_v39, %v8538_v15  ;;  %v2621_v10 = vcombine.high %v9412_v3, %v9412_v3 }
 0x509   : > { %v1240_v8 = vsel %vm884_vm5, %v1233_v45, %v1239_v30  ;;  %v9537_v21 = vcvt.s32.f32 %v2388_v47 }
 0x50a   : > { %2316 = vmin.xlane.f32.xlu0 %v9459_v12  ;;  %v9534_v17 = vsel %vm1169_vm7, %v1240_v8, %v8644_v43  ;;  %v9542_v30 = vrot.slane %v2574_v4, %v8590_v41  ;;  %v9549_v43 = vcvt.s32.f32 %v2403_v7  ;;  %v2665_v60 = vmul.f32 %v9206_v6, %v2634_v35 }
 0x50b   : > { %13114 = vst [vmem:[#allocation64_spill] sm:$0xff] %v9534_v17  ;;  %v1821_v46 = vrot.slane %v9534_v17, %v8590_v41  ;;  %v2638_v37 = vrot.slane %v2621_v10, %v8538_v15  ;;  %v1814_v39 = vcombine.high %v9534_v17, %v9534_v17 }
 0x50c   : > { %v2604_v45 = vrot.slane %v9542_v30, %v8590_v41  ;;  %v2677_v47 = vsel %vm454_vm4, %v2665_v60, 0.0 }
 0x50d   : > { %v1829_v8 = vcombine.high %v1821_v46, %v1821_v46  ;;  %v2666_v4 = vmul.f32 %v9206_v6, %v2638_v37  ;;  %v9563_v35 = vrot.slane %v1821_v46, %v8590_v41  ;;  %v9571_v14 = vrot.slane %v1814_v39, %v8590_v41 }
 0x50e   : > { %2331 = vmin.xlane.f32.xlu0 %v9476_v50  ;;  %v2642_v3 = vrot.slane %v2604_v45, %v8538_v15 }
 0x50f   : > { %v1851_v7 = vrot.slane %v1829_v8, %v8590_v41  ;;  %v2680_v61 = vsel %vm454_vm4, %v2666_v4, 0.0  ;;  %v1859_v60 = vcombine.high %v9563_v35, %v9563_v35 }
 0x510   : > { %v2667_v10 = vmul.f32 %v9206_v6, %v2642_v3  ;;  %v1830_v3 = vcombine.high %v9571_v14, %v9571_v14 }
 0x511   : > { %v1870_v63 = vrot.slane %v1851_v7, %v8538_v15  ;;  %v1874_v46 = vrot.slane %v1859_v60, %v8538_v15 }
 0x512   : > { %2361 = vmin.xlane.f32.xlu0 %v9492_v18  ;;  %v2683_v37 = vsel %vm454_vm4, %v2667_v10, 0.0  ;;  %v1858_v39 = vrot.slane %v1830_v3, %v8590_v41  ;;  %v2620_v3 = vcombine.high %v2604_v45, %v2604_v45  ;;  %v2416_v45 = vadd.f32 %v9387_v11, %v9323_v28 }
 0x513   : > { %v9575_v8 = vadd.f32 %v9206_v6, %v1870_v63  ;;  %v9583_v17 = vadd.f32 %v9206_v6, %v1874_v46  ;;  %v2720_v11 = vrot.slane %v9423_v42, %v8555_v23 }
 0x514   : > { %v1886_v10 = vrot.slane %v1858_v39, %v8538_v15  ;;  %v1862_v60 = vcombine.high %v1858_v39, %v1858_v39 }
 0x515   : > { %13115 = vst [vmem:[#allocation49_spill] sm:$0xff] %v9575_v8  ;;  %v1914_v4 = vsel %vm454_vm4, %v9575_v8, -inf  ;;  %v1917_v63 = vsel %vm454_vm4, %v9583_v17, -inf  ;;  %v2650_v8 = vrot.slane %v2620_v3, %v8538_v15  ;;  %v13119_v3 = vld [vmem:[#allocation67_spill] sm:$0xff] }
 0x516   : > { %2346 = vmin.xlane.f32.xlu0 %v9506_v62  ;;  %v9596_v46 = vadd.f32 %v9206_v6, %v1886_v10  ;;  %8185 = vlog2.f32 %v13119_v3 }
 0x518   : > { %13117 = vst [vmem:[#allocation21_spill] sm:$0xff] %v9596_v46 }
 0x51a   : > { %2376 = vmin.xlane.f32.xlu0 %v9521_v58 }
 0x51e   : > { %2391 = vmin.xlane.f32.xlu0 %v9537_v21 }
 0x522   : > { %2406 = vmin.xlane.f32.xlu0 %v9549_v43 }
 0x526   : > { %2678 = vadd.xlane.f32.xlu0 %v2677_v47  ;;  %v1861_v47 = vcombine.high %v1851_v7, %v1851_v7 }
 0x52a   : > { %2681 = vadd.xlane.f32.xlu0 %v2680_v61  ;;  %v1878_v61 = vrot.slane %v1861_v47, %v8538_v15  ;;  %v1894_v47 = vrot.slane %v1862_v60, %v8538_v15  ;;  %v2419_v60 = vadd.f32 %v9395_v38, %v9338_v19  ;;  %v2734_v38 = vrot.slane %v9423_v42, %v8565_v27 }
 0x52c   : > { %v9590_v7 = vadd.f32 %v9206_v6, %v1878_v61  ;;  %v9602_v61 = vadd.f32 %v9206_v6, %v1894_v47  ;;  %v2423_v47 = vadd.f32 %v9409_v53, %v9345_v5  ;;  %v8186_v53 = vpop.eup %8185 }
 0x52e   : > { %2684 = vadd.xlane.f32.xlu0 %v2683_v37  ;;  %13116 = vst [vmem:[#allocation48_spill] sm:$0xff] %v9590_v7  ;;  %v1920_v37 = vsel %vm454_vm4, %v9590_v7, -inf  ;;  %13118 = vst [vmem:[#allocation66_spill] sm:$0xff] %v9602_v61  ;;  %v1932_v39 = vsel %vm454_vm4, %v9602_v61, -inf }
 0x532   : > { %1915 = vmax.xlane.f32.xlu0 %v1914_v4  ;;  %v1926_v4 = vsel %vm454_vm4, %v9596_v46, -inf }
 0x536   : > { %1918 = vmax.xlane.f32.xlu0 %v1917_v63  ;;  %v2669_v63 = vmul.f32 %v9206_v6, %v2650_v8  ;;  %v2699_v8 = vrot.slane %v9423_v42, %v8538_v15 }
 0x538   : > { %v2689_v10 = vsel %vm454_vm4, %v2669_v63, 0.0 }
 0x53a   : > { %1921 = vmax.xlane.f32.xlu0 %v1920_v37  ;;  %v2421_v37 = vadd.f32 %v9403_v34, %v9342_v9  ;;  %v2748_v34 = vrot.slane %v9423_v42, %v8577_v32 }
 0x53e   : > { %1927 = vmax.xlane.f32.xlu0 %v1926_v4  ;;  %v534_v4 = vmul.f32 0.6931472, %v8186_v53  ;;  %v9631_v53 = vld [vmem:[%s8521_s14] sm:$0xff] }
 0x542   : > { %1933 = vmax.xlane.f32.xlu0 %v1932_v39  ;;  %v13120_v39 = vld [vmem:[#allocation25_spill] sm:$0xff] }
 0x543   : > { %v546_v63 = vadd.f32 %v534_v4, %v13120_v39  ;;  %v2590_v39 = vcombine.high %v9542_v30, %v9542_v30 }
 0x546   : > { %2690 = vadd.xlane.f32.xlu0 %v2689_v10 }
 0x55c   : > { %2433 = vperm.xlu0 %8100, %v2416_v45  }
 0x560   : > { %2442 = vperm.xlu0 %8100, %v2419_v60  }
 0x564   : > { %2448 = vperm.xlu0 %8100, %v2421_v37  }
 0x568   : > { %2454 = vperm.xlu0 %8100, %v2423_v47  }
 0x56c   : > { %2701 = vbcast.lane.b32.xlu0 %v2699_v8, 256 }
 0x570   : > { %2722 = vbcast.lane.b32.xlu0 %v2720_v11, 256 }
 0x574   : > { %2736 = vbcast.lane.b32.xlu0 %v2734_v38, 256 }
 0x578   : > { %2750 = vbcast.lane.b32.xlu0 %v2748_v34, 256 }
 0x587   : > { %v9627_v10 = vpop.xlane.xlu0 %2549 }
 0x588   : > { %13121 = vst [vmem:[#allocation50_spill] sm:$0xff] %v9627_v10  ;;  %v2551_v45 = vsub.f32 %v9627_v10, %v546_v63  ;;  %v2626_v63 = vrot.slane %v9511_v44, %v8538_v15 }
 0x58a   : > { %v2552_v60 = vmul.f32 1.442695, %v2551_v45  ;;  %v2618_v45 = vrot.slane %v2590_v39, %v8590_v41 }
 0x58c   : > { %8187 = vpow2.f32 %v2552_v60 }
 0x599   : > { %v8188_v37 = vpop.eup %8187 }
 0x59a   : > { %v2554_v47 = vmax.f32 %v8188_v37, 0.01  ;;  %v2559_v8 = vadd.f32 1e-08, %v8188_v37  ;;  %v1866_v37 = vrot.slane %v9563_v35, %v8538_v15 }
 0x59c   : > { %8189 = vlog2.f32 %v2559_v8  ;;  %v2555_v11 = vmin.f32 %v2554_v47, 0.99  ;;  %v1844_v47 = vrot.slane %v9571_v14, %v8590_v41  ;;  %v9652_v44 = vadd.f32 %v9206_v6, %v1866_v37 }
 0x59e   : > { %v2556_v3 = vsub.f32 1.0, %v2555_v11  ;;  %v1882_v8 = vrot.slane %v1844_v47, %v8538_v15  ;;  %v1860_v11 = vcombine.high %v1844_v47, %v1844_v47 }
 0x5a0   : > { %v2557_v38 = vmul.f32 %v2556_v3, %v2556_v3  ;;  %v9655_v3 = vpop.xlane.xlu0 %2675  ;;  %v9660_v35 = vadd.f32 %v9206_v6, %v1882_v8  ;;  %v1890_v14 = vrot.slane %v1860_v11, %v8538_v15  ;;  %v2418_v11 = vadd.f32 %v9420_v40, %v9334_v54 }
 0x5a1   : > { %v2713_v40 = vrot.slane %v9423_v42, %v8552_v22 }
 0x5a2   : > { %v2558_v34 = vsub.f32 0.0, %v2557_v38  ;;  %v1911_v38 = vsel %vm454_vm4, %v9652_v44, -inf  ;;  %v9666_v39 = vadd.f32 %v9206_v6, %v1890_v14  ;;  %v2422_v14 = vadd.f32 %v9474_v25, %v9340_v49 }
 0x5a3   : > { %v2741_v25 = vrot.slane %v9423_v42, %v8574_v31 }
 0x5a9   : > { %v8190_v5 = vpop.eup %8189 }
 0x5aa   : > { %v2561_v9 = vmul.f32 0.6931472, %v8190_v5  ;;  %v2663_v5 = vmul.f32 %v9206_v6, %v2626_v63 }
 0x5ac   : > { %v2562_v19 = vmul.f32 %v2561_v9, %v2558_v34  ;;  %v2646_v9 = vrot.slane %v2618_v45, %v8538_v15  ;;  %v2622_v34 = vcombine.high %v2618_v45, %v2618_v45 }
 0x5ae   : > { %v2563_v4 = vmul.f32 %v2562_v19, %v9631_v53  ;;  %v2671_v19 = vsel %vm454_vm4, %v2663_v5, 0.0  ;;  %v2668_v60 = vmul.f32 %v9206_v6, %v2646_v9  ;;  %v2654_v63 = vrot.slane %v2622_v34, %v8538_v15  ;;  %v9669_v5 = vpop.xlane.xlu0 %2301 }
 0x5af   : > { %v1929_v9 = vsel %vm454_vm4, %v9666_v39, -inf  ;;  %vm2303_vm7 = vcmp.eq.f32.partialorder %v9447_v13, %v9669_v5 }
 0x5b0   : > { %2565 = vrot.lane.b32.xlu1 %v2563_v4, %s8445_s28  ;;  %v2686_v30 = vsel %vm454_vm4, %v2668_v60, 0.0  ;;  %v1923_v4 = vsel %vm454_vm4, %v9660_v35, -inf }
 0x5b2   : > { %v9674_v60 = vpop.xlane.xlu0 %2316 }
 0x5b3   : > { %vm2318_vm11 = vcmp.eq.f32.partialorder %v9459_v12, %v9674_v60 }
 0x5b4   : > { %2570 = vrot.lane.b32.xlu1 %v9631_v53, %s8445_s28 }
 0x5b6   : > { %v9677_v37 = vpop.xlane.xlu0 %2331 }
 0x5b7   : > { %vm2333_vm12 = vcmp.eq.f32.partialorder %v9476_v50, %v9677_v37 }
 0x5ba   : > { %v9679_v47 = vpop.xlane.xlu0 %2361 }
 0x5bb   : > { %vm2363_vm13 = vcmp.eq.f32.partialorder %v9492_v18, %v9679_v47 }
 0x5be   : > { %v9683_v8 = vpop.xlane.xlu0 %2346 }
 0x5bf   : > { %vm2348_vm6 = vcmp.eq.f32.partialorder %v9506_v62, %v9683_v8 }
 0x5d8   : > { %2672 = vadd.xlane.f32.xlu1 %v2671_v19  ;;  %v2670_v19 = vmul.f32 %v9206_v6, %v2654_v63  ;;  %v2420_v6 = vadd.f32 %v9437_v24, %v9336_v57  ;;  %v2727_v24 = vrot.slane %v9423_v42, %v8562_v26 }
 0x5da   : > { %v2692_v45 = vsel %vm454_vm4, %v2670_v19, 0.0 }
 0x5dc   : > { %2687 = vadd.xlane.f32.xlu1 %v2686_v30  ;;  %v2417_v30 = vadd.f32 %v9407_v36, %v9330_v51  ;;  %v2706_v36 = vrot.slane %v9423_v42, %v8541_v16 }
 0x5e0   : > { %1912 = vmax.xlane.f32.xlu1 %v1911_v38  ;;  %v9689_v38 = vpop.xlane.xlu0 %2376 }
 0x5e1   : > { %vm2378_vm8 = vcmp.eq.f32.partialorder %v9521_v58, %v9689_v38 }
 0x5e4   : > { %1924 = vmax.xlane.f32.xlu1 %v1923_v4  ;;  %v9693_v34 = vpop.xlane.xlu0 %2391 }
 0x5e5   : > { %vm2393_vm9 = vcmp.eq.f32.partialorder %v9537_v21, %v9693_v34 }
 0x5e8   : > { %1930 = vmax.xlane.f32.xlu1 %v1929_v9  ;;  %v9697_v4 = vpop.xlane.xlu0 %2406 }
 0x5e9   : > { %vm2408_vm10 = vcmp.eq.f32.partialorder %v9549_v43, %v9697_v4 }
 0x5ec   : > { %2693 = vadd.xlane.f32.xlu1 %v2692_v45  ;;  %v2679_v63 = vpop.xlane.xlu0 %2678 }
 0x5f0   : > { %v2682_v9 = vpop.xlane.xlu0 %2681 }
 0x5f4   : > { %v2685_v19 = vpop.xlane.xlu0 %2684 }
 0x5f8   : > { %v9705_v45 = vpop.xlane.xlu0 %1915 }
 0x5f9   : > { %13122 = vst [vmem:[#allocation23_spill] sm:$0xff] %v9705_v45 }
 0x5fd   : > { %2436 = vperm.xlu1 %8102, %v2417_v30   ;;  %v9707_v30 = vpop.xlane.xlu0 %1918 }
 0x601   : > { %2439 = vperm.xlu1 %8102, %v2418_v11   ;;  %v9709_v11 = vpop.xlane.xlu0 %1921 }
 0x602   : > { %13123 = vst [vmem:[#allocation28_spill] sm:$0xff] %v9709_v11 }
 0x605   : > { %2445 = vperm.xlu1 %8102, %v2420_v6   ;;  %v9711_v6 = vpop.xlane.xlu0 %1927 }
 0x606   : > { %13124 = vst [vmem:[#allocation51_spill] sm:$0xff] %v9711_v6 }
 0x609   : > { %2451 = vperm.xlu1 %8102, %v2422_v14   ;;  %v9713_v14 = vpop.xlane.xlu0 %1933 }
 0x60a   : > { %13125 = vst [vmem:[#allocation69_spill] sm:$0xff] %v9713_v14 }
 0x60d   : > { %2708 = vbcast.lane.b32.xlu1 %v2706_v36, 256  ;;  %v2691_v36 = vpop.xlane.xlu0 %2690 }
 0x611   : > { %2715 = vbcast.lane.b32.xlu1 %v2713_v40, 256  ;;  %v9715_v40 = vpop.permute.xlu0 %2433 }
 0x612   : > { %13126 = vst [vmem:[#allocation52_spill] sm:$0xff] %v9715_v40  ;;  %v13134_v40 = vmov 3  }
 0x615   : > { %2729 = vbcast.lane.b32.xlu1 %v2727_v24, 256  ;;  %v9717_v24 = vpop.permute.xlu0 %2442 }
 0x616   : > { %13127 = vst [vmem:[#allocation37_spill] sm:$0xff] %v9717_v24 }
 0x619   : > { %2743 = vbcast.lane.b32.xlu1 %v2741_v25, 256  ;;  %v9719_v54 = vpop.permute.xlu0 %2448 }
 0x61a   : > { %13128 = vst [vmem:[#allocation59_spill] sm:$0xff] %v9719_v54 }
 0x61d   : > { %v9723_v49 = vpop.permute.xlu0 %2454 }
 0x61e   : > { %13130 = vst [vmem:[#allocation63_spill] sm:$0xff] %v9723_v49 }
 0x621   : > { %v2702_v51 = vpop.permute.xlu0 %2701 }
 0x622   : > { %v9721_v25 = vpop.permute.xlu1 %2565 }
 0x623   : > { %13129 = vst [vmem:[#allocation61_spill] sm:$0xff] %v9721_v25 }
 0x626   : > { %v9725_v57 = vpop.permute.xlu1 %2570 }
 0x627   : > { %13131 = vst [vmem:[#allocation65_spill] sm:$0xff] %v9725_v57  ;;  %v2723_v57 = vpop.permute.xlu0 %2722 }
 0x62b   : > { %v2737_v10 = vpop.permute.xlu0 %2736 }
 0x62f   : > { %v2751_v54 = vpop.permute.xlu0 %2750 }
 0x661   : > { %v2673_v28 = vpop.xlane.xlu1 %2672 }
 0x662   : > { %v2760_v42 = vmul.f32 %v2702_v51, %v2673_v28 }
 0x664   : > { %2777 = vperm.xlu1 %8102, %v2760_v42   ;;  %v2763_v42 = vmul.f32 %v2723_v57, %v2682_v9  ;;  %v2312_v57 = vand.u32 65535, %v9442_v0  ;;  %v2402_v9 = vand.u32 65535, %v9529_v33 }
 0x665   : > { %v2688_v61 = vpop.xlane.xlu1 %2687 }
 0x666   : > { %v2765_v41 = vmul.f32 %v2737_v10, %v2688_v61  ;;  %v2372_v10 = vand.u32 65535, %v9498_v55  ;;  %v2404_v55 = vcvt.s32.f32 %v2402_v9 }
 0x669   : > { %v9727_v32 = vpop.xlane.xlu1 %1912 }
 0x66d   : > { %v9729_v14 = vpop.xlane.xlu1 %1924 }
 0x671   : > { %v9731_v27 = vpop.xlane.xlu1 %1930 }
 0x675   : > { %v2694_v46 = vpop.xlane.xlu1 %2693 }
 0x679   : > { %v9733_v6 = vpop.permute.xlu1 %2436 }
 0x67d   : > { %v9735_v7 = vpop.permute.xlu1 %2439 }
 0x681   : > { %v9737_v25 = vpop.permute.xlu1 %2445 }
 0x682   : > { %13132 = vst [vmem:[#allocation34_spill] sm:$0xff] %v9737_v25  ;;  %v2767_v25 = vmul.f32 %v2751_v54, %v2694_v46  ;;  %v2342_v46 = vand.u32 65535, %v9482_v56 }
 0x685   : > { %v9739_v11 = vpop.permute.xlu1 %2451 }
 0x686   : > { %13133 = vst [vmem:[#allocation36_spill] sm:$0xff] %v9739_v11 }
 0x689   : > { %v2709_v45 = vpop.permute.xlu1 %2708 }
 0x68a   : > { %v2761_v28 = vmul.f32 %v2709_v45, %v9655_v3  ;;  %v2297_v3 = vand.u32 65535, %v9432_v20  ;;  %v2357_v20 = vand.u32 65535, %v9464_v52  ;;  %v2374_v52 = vcvt.s32.f32 %v2372_v10 }
 0x68c   : > { %2780 = vperm.xlu0 %8100, %v2761_v28   ;;  %v2359_v0 = vcvt.s32.f32 %v2357_v20  ;;  %v2379_v18 = vsel %vm2378_vm8, %v2374_v52, inf  ;;  %v1939_v52 = vsub.f32 %v9660_v35, %v9729_v14  ;;  %v2308_v35 = vcvt.f32.s32 %v9669_v5 }
 0x68d   : > { %v2716_v51 = vpop.permute.xlu1 %2715  ;;  %v2383_v5 = vcvt.f32.s32 %v9689_v38  ;;  %v2413_v38 = vcvt.f32.s32 %v9697_v4 }
 0x68e   : > { %v2762_v23 = vmul.f32 %v2716_v51, %v2679_v63  ;;  %v2364_v12 = vsel %vm2363_vm13, %v2359_v0, inf  ;;  %v2387_v63 = vand.u32 65535, %v9516_v1  ;;  %v3056_v0 = vrot.slane %v13113_v59, %v8541_v16 }
 0x68f   : > { %v2414_v4 = vshll.u32 %v2413_v38, 16  ;;  %v13143_v38 = vld [vmem:[#allocation72_spill] sm:$0xff] }
 0x690   : > { %2783 = vperm.xlu1 %8102, %v2762_v23   ;;  %2786 = vperm.xlu0 %8100, %v2763_v42   ;;  %v2299_v23 = vcvt.s32.f32 %v2297_v3  ;;  %v2389_v56 = vcvt.s32.f32 %v2387_v63  ;;  %v1951_v63 = vmul.f32 1.442695, %v1939_v52 }
 0x691   : > { %v2730_v15 = vpop.permute.xlu1 %2729 }
 0x692   : > { %v2764_v49 = vmul.f32 %v2730_v15, %v2685_v19  ;;  %v2304_v61 = vsel %vm2303_vm7, %v2299_v23, inf  ;;  %v2314_v15 = vcvt.s32.f32 %v2312_v57  ;;  %v2394_v62 = vsel %vm2393_vm9, %v2389_v56, inf }
 0x693   : > { %v2409_v19 = vsel %vm2408_vm10, %v2404_v55, inf  ;;  %vm2084_vm7 = vcmp.eq.s32.totalorder %v9375_v48, 1 }
 0x694   : > { %2789 = vperm.xlu1 %8102, %v2764_v49   ;;  %2792 = vperm.xlu0 %8100, %v2765_v41   ;;  %v2327_v41 = vand.u32 65535, %v9451_v2  ;;  %v2319_v54 = vsel %vm2318_vm11, %v2314_v15, inf  ;;  %v2344_v2 = vcvt.s32.f32 %v2342_v46  ;;  %v3063_v46 = vrot.slane %v13113_v59, %v8552_v22 }
 0x695   : > { %v2744_v24 = vpop.permute.xlu1 %2743  ;;  %vm2850_vm11 = vcmp.gt.f32.partialorder %v9631_v53, 0.0 }
 0x696   : > { %v2766_v11 = vmul.f32 %v2744_v24, %v2691_v36  ;;  %v2329_v49 = vcvt.s32.f32 %v2327_v41  ;;  %v2349_v50 = vsel %vm2348_vm6, %v2344_v2, inf  ;;  %v1937_v2 = vsub.f32 %v9583_v17, %v9707_v30 }
 0x698   : > { %2795 = vperm.xlu1 %8102, %v2766_v11   ;;  %2798 = vperm.xlu0 %8100, %v2767_v25   ;;  %v2334_v13 = vsel %vm2333_vm12, %v2329_v49, inf }
 0x69c   : > { %8103 = vset.pattern.permute.xlu1 %v13134_v40 }
 0x6bc   : > { %2305 = vmin.xlane.f32.xlu1 %v2304_v61 }
 0x6c0   : > { %2320 = vmin.xlane.f32.xlu1 %v2319_v54 }
 0x6c4   : > { %2335 = vmin.xlane.f32.xlu1 %v2334_v13 }
 0x6c8   : > { %2365 = vmin.xlane.f32.xlu1 %v2364_v12  ;;  %v1935_v12 = vsub.f32 %v9652_v44, %v9727_v32 }
 0x6ca   : > { %v1943_v10 = vmul.f32 1.442695, %v1935_v12 }
 0x6cc   : > { %2350 = vmin.xlane.f32.xlu1 %v2349_v50  ;;  %v1947_v50 = vmul.f32 1.442695, %v1937_v2  ;;  %8191 = vpow2.f32 %v1943_v10 }
 0x6ce   : > { %8193 = vpow2.f32 %v1947_v50 }
 0x6cf   : > { %8195 = vpow2.f32 %v1951_v63 }
 0x6d0   : > { %2380 = vmin.xlane.f32.xlu1 %v2379_v18  ;;  %v1941_v18 = vsub.f32 %v9666_v39, %v9731_v27  ;;  %v2353_v39 = vcvt.f32.s32 %v9683_v8  ;;  %v2398_v8 = vcvt.f32.s32 %v9693_v34 }
 0x6d2   : > { %v1955_v9 = vmul.f32 1.442695, %v1941_v18 }
 0x6d4   : > { %2395 = vmin.xlane.f32.xlu1 %v2394_v62  ;;  %8197 = vpow2.f32 %v1955_v9 }
 0x6d8   : > { %2410 = vmin.xlane.f32.xlu1 %v2409_v19 }
 0x6d9   : > { %v8192_v55 = vpop.eup %8191 }
 0x6da   : > { %v1959_v17 = vsel %vm454_vm4, %v8192_v55, 0.0 }
 0x6df   : > { %v2778_v58 = vpop.permute.xlu1 %2777 }
 0x6e0   : > { %v2803_v11 = vrot.slane %v2778_v58, %v9104_v29  ;;  %v8194_v58 = vpop.eup %8193 }
 0x707   : > { %v2781_v45 = vpop.permute.xlu0 %2780 }
 0x708   : > { %v2807_v1 = vrot.slane %v2781_v45, %v9104_v29  ;;  %v2323_v45 = vcvt.f32.s32 %v9674_v60  ;;  %v2368_v60 = vcvt.f32.s32 %v9679_v47 }
 0x70a   : > { %v2832_v33 = vsel %vm872_vm14, %v2807_v1, %v2803_v11  ;;  %v2338_v1 = vcvt.f32.s32 %v9677_v37 }
 0x70b   : > { %v2784_v36 = vpop.permute.xlu1 %2783  ;;  %v2787_v40 = vpop.permute.xlu0 %2786 }
 0x70c   : > { %v2811_v21 = vrot.slane %v2784_v36, %v9104_v29  ;;  %v2815_v24 = vrot.slane %v2787_v40, %v9104_v29 }
 0x70e   : > { %v2833_v25 = vsel %vm874_vm15, %v2811_v21, %v2832_v33  ;;  %v1965_v21 = vsel %vm454_vm4, %v8194_v58, 0.0  ;;  %v8196_v33 = vpop.eup %8195 }
 0x70f   : > { %v2790_v43 = vpop.permute.xlu1 %2789  ;;  %v2793_v28 = vpop.permute.xlu0 %2792  ;;  %v2834_v42 = vsel %vm876_vm0, %v2815_v24, %v2833_v25  ;;  %v2324_v24 = vshll.u32 %v2323_v45, 16 }
 0x710   : > { %v2819_v51 = vrot.slane %v2790_v43, %v9104_v29  ;;  %v2823_v3 = vrot.slane %v2793_v28, %v9104_v29  ;;  %v2309_v28 = vshll.u32 %v2308_v35, 16 }
 0x712   : > { %v2835_v23 = vsel %vm878_vm1, %v2819_v51, %v2834_v42  ;;  %v2339_v51 = vshll.u32 %v2338_v1, 16  ;;  %v2354_v42 = vshll.u32 %v2353_v39, 16 }
 0x713   : > { %v2796_v57 = vpop.permute.xlu1 %2795  ;;  %v2799_v61 = vpop.permute.xlu0 %2798  ;;  %v2836_v54 = vsel %vm880_vm2, %v2823_v3, %v2835_v23 }
 0x714   : > { %v2827_v15 = vrot.slane %v2796_v57, %v9104_v29  ;;  %v2831_v41 = vrot.slane %v2799_v61, %v9104_v29  ;;  %v1971_v57 = vsel %vm454_vm4, %v8196_v33, 0.0  ;;  %v8198_v61 = vpop.eup %8197  ;;  %v3077_v33 = vrot.slane %v13113_v59, %v8562_v26 }
 0x715   : > { %v1977_v12 = vsel %vm454_vm4, %v8198_v61, 0.0  ;;  %v13140_v61 = vld [vmem:[#allocation36_spill] sm:$0xff] }
 0x716   : > { %v2837_v49 = vsel %vm882_vm3, %v2827_v15, %v2836_v54 }
 0x717   : > { %v2838_v20 = vsel %vm884_vm5, %v2831_v41, %v2837_v49 }
 0x718   : > { %v2840_v13 = vsel %vm454_vm4, %v2838_v20, 0.0  ;;  %v2369_v20 = vshll.u32 %v2368_v60, 16 }
 0x719   : > { %2841 = vadd.xlane.f32.xlu1 %v2840_v13  ;;  %v2384_v13 = vshll.u32 %v2383_v5, 16 }
 0x72a   : > { %3058 = vbcast.lane.b32.xlu1 %v3056_v0, 256  ;;  %v2399_v0 = vshll.u32 %v2398_v8, 16 }
 0x72e   : > { %3065 = vbcast.lane.b32.xlu1 %v3063_v46, 256 }
 0x745   : > { %v2306_v56 = vpop.xlane.xlu1 %2305 }
 0x746   : > { %v2307_v25 = vcvt.f32.s32 %v2306_v56 }
 0x748   : > { %v2310_v15 = vadd.s32 %v2309_v28, %v2307_v25  ;;  %v2467_v25 = vrot.slane %v9735_v7, %v9104_v29  ;;  %v13136_v28 = vld [vmem:[#allocation52_spill] sm:$0xff]  ;;  %v13139_v7 = vld [vmem:[#allocation37_spill] sm:$0xff] }
 0x749   : > { %v2321_v62 = vpop.xlane.xlu1 %2320 }
 0x74a   : > { %v2322_v11 = vcvt.f32.s32 %v2321_v62  ;;  %v2500_v2 = vrot.slane %v2310_v15, %v9104_v29  ;;  %v2483_v15 = vrot.slane %v13140_v61, %v9104_v29 }
 0x74c   : > { %v2325_v37 = vadd.s32 %v2324_v24, %v2322_v11  ;;  %v2463_v24 = vrot.slane %v9733_v6, %v9104_v29  ;;  %v13138_v6 = vld [vmem:[#allocation34_spill] sm:$0xff] }
 0x74d   : > { %v2336_v44 = vpop.xlane.xlu1 %2335  ;;  %v2475_v8 = vrot.slane %v13138_v6, %v9104_v29 }
 0x74e   : > { %v2337_v36 = vcvt.f32.s32 %v2336_v44  ;;  %v2504_v47 = vrot.slane %v2325_v37, %v9104_v29 }
 0x750   : > { %v2340_v3 = vadd.s32 %v2339_v51, %v2337_v36  ;;  %v2529_v18 = vsel %vm872_vm14, %v2504_v47, %v2500_v2  ;;  %v2459_v51 = vrot.slane %v13136_v28, %v9104_v29  ;;  %v13150_v28 = vld [vmem:[#allocation49_spill] sm:$0xff] }
 0x751   : > { %v2366_v19 = vpop.xlane.xlu1 %2365 }
 0x752   : > { %1960 = vadd.xlane.f32.xlu1 %v1959_v17  ;;  %v2367_v49 = vcvt.f32.s32 %v2366_v19  ;;  %v2508_v46 = vrot.slane %v2340_v3, %v9104_v29  ;;  %v2488_v60 = vsel %vm872_vm14, %v2463_v24, %v2459_v51  ;;  %v2471_v3 = vrot.slane %v13139_v7, %v9104_v29  ;;  %v13154_v7 = vld [vmem:[#allocation21_spill] sm:$0xff] }
 0x753   : > { %v2489_v37 = vsel %vm874_vm15, %v2467_v25, %v2488_v60  ;;  %v12864_v25 = vmov 4  }
 0x754   : > { %v2370_v63 = vadd.s32 %v2369_v20, %v2367_v49  ;;  %v2530_v9 = vsel %vm874_vm15, %v2508_v46, %v2529_v18  ;;  %8104 = vset.pattern.permute.xlu0 %v12864_v25 }
 0x755   : > { %v2351_v40 = vpop.xlane.xlu1 %2350 }
 0x756   : > { %v2352_v43 = vcvt.f32.s32 %v2351_v40  ;;  %1966 = vadd.xlane.f32.xlu1 %v1965_v21  ;;  %v2516_v17 = vrot.slane %v2370_v63, %v9104_v29  ;;  %v13135_v40 = vld [vmem:[#allocation3_spill] sm:$0xff]  ;;  %v13146_v63 = vld [vmem:[#allocation4_spill] sm:$0xff] }
 0x758   : > { %v2355_v41 = vadd.s32 %v2354_v42, %v2352_v43  ;;  %v3091_v43 = vrot.slane %v13113_v59, %v8574_v31  ;;  %v13137_v42 = vmov 0  }
 0x759   : > { %v2381_v23 = vpop.xlane.xlu1 %2380  ;;  %v3118_v5 = vsel %vm2850_vm11, 1, %v13137_v42 }
 0x75a   : > { %v2382_v54 = vcvt.f32.s32 %v2381_v23  ;;  %1972 = vadd.xlane.f32.xlu1 %v1971_v57  ;;  %v2512_v10 = vrot.slane %v2355_v41, %v9104_v29  ;;  %v2490_v23 = vsel %vm876_vm0, %v2471_v3, %v2489_v37  ;;  %v13141_v41 = vld [vmem:[#allocation59_spill] sm:$0xff]  ;;  %v13152_v37 = vld [vmem:[#allocation48_spill] sm:$0xff] }
 0x75b   : > { %v2491_v57 = vsel %vm878_vm1, %v2475_v8, %v2490_v23  ;;  %v13153_v8 = vld [vmem:[#allocation51_spill] sm:$0xff] }
 0x75c   : > { %v2385_v50 = vadd.s32 %v2384_v13, %v2382_v54  ;;  %v2531_v44 = vsel %vm876_vm0, %v2512_v10, %v2530_v9  ;;  %v2479_v54 = vrot.slane %v13141_v41, %v9104_v29  ;;  %v13142_v13 = vld [vmem:[#allocation63_spill] sm:$0xff]  ;;  %v9879_v9 = vld [vmem:[%s12770_s5] sm:$0xff]  ;;  %v1940_v3 = vsub.f32 %v13154_v7, %v13153_v8 }
 0x75d   : > { %v2396_v34 = vpop.xlane.xlu1 %2395  ;;  %v2532_v35 = vsel %vm878_vm1, %v2516_v17, %v2531_v44  ;;  %v2487_v47 = vrot.slane %v13142_v13, %v9104_v29  ;;  %v3577_v7 = vld [vmem:[%s8515_s11] sm:$0xff] }
 0x75e   : > { %v2397_v52 = vcvt.f32.s32 %v2396_v34  ;;  %1978 = vadd.xlane.f32.xlu1 %v1977_v12  ;;  %v2520_v55 = vrot.slane %v2385_v50, %v9104_v29  ;;  %v2492_v49 = vsel %vm880_vm2, %v2479_v54, %v2491_v57  ;;  %v13145_v34 = vld [vmem:[#allocation13_spill] sm:$0xff]  ;;  %v1953_v23 = vmul.f32 1.442695, %v1940_v3 }
 0x75f   : > { %v2493_v20 = vsel %vm882_vm3, %v2483_v15, %v2492_v49 }
 0x760   : > { %v2400_v56 = vadd.s32 %v2399_v0, %v2397_v52  ;;  %v2533_v1 = vsel %vm880_vm2, %v2520_v55, %v2532_v35  ;;  %v2494_v0 = vsel %vm884_vm5, %v2487_v47, %v2493_v20  ;;  %v13155_v20 = vld [vmem:[#allocation9_spill] sm:$0xff]  ;;  %v13156_v47 = vld [vmem:[#allocation12_spill] sm:$0xff] }
 0x761   : > { %v2411_v62 = vpop.xlane.xlu1 %2410  ;;  %v9860_v46 = vsel %vm2084_vm7, %v2494_v0, %v13143_v38  ;;  %v3084_v13 = vrot.slane %v13113_v59, %v13155_v20  ;;  %v3098_v0 = vrot.slane %v13113_v59, %v13156_v47  ;;  %v13157_v38 = vld [vmem:[#allocation69_spill] sm:$0xff] }
 0x762   : > { %v2412_v19 = vcvt.f32.s32 %v2411_v62  ;;  %v2524_v58 = vrot.slane %v2400_v56, %v9104_v29  ;;  %13144 = vst [vmem:[#allocation30_spill] sm:$0xff] %v9860_v46  ;;  %v3204_v12 = vrot.slane %v9860_v46, %v13145_v34  ;;  %v3197_v10 = vcombine.high %v9860_v46, %v9860_v46 }
 0x764   : > { %v2415_v45 = vadd.s32 %v2414_v4, %v2412_v19  ;;  %v2534_v11 = vsel %vm882_vm3, %v2524_v58, %v2533_v1  ;;  %v3212_v2 = vcombine.high %v3204_v12, %v3204_v12  ;;  %v9870_v52 = vrot.slane %v3197_v10, %v13145_v34 }
 0x766   : > { %v2528_v39 = vrot.slane %v2415_v45, %v9104_v29  ;;  %v9867_v50 = vrot.slane %v3212_v2, %v13145_v34  ;;  %v3227_v56 = vrot.slane %v9870_v52, %v13145_v34  ;;  %v13158_v2 = vld [vmem:[#allocation66_spill] sm:$0xff] }
 0x767   : > { %v1942_v10 = vsub.f32 %v13158_v2, %v13157_v38 }
 0x768   : > { %v2535_v36 = vsel %vm884_vm5, %v2528_v39, %v2534_v11  ;;  %v3253_v18 = vrot.slane %v9867_v50, %v13146_v63  ;;  %v3265_v4 = vrot.slane %v3227_v56, %v13146_v63  ;;  %v3243_v44 = vcombine.high %v3227_v56, %v3227_v56  ;;  %v13147_v39 = vld [vmem:[#allocation50_spill] sm:$0xff] }
 0x769   : > { %v2536_v21 = vsel %vm2084_vm7, %v2535_v36, %v13135_v40  ;;  %v3220_v56 = vrot.slane %v3204_v12, %v13145_v34 }
 0x76a   : > { %2538 = vst.msk [vmem:[#allocation2 + $0x8] sm:$0xff] %vm454_vm4, %v2536_v21  ;;  %v9882_v62 = vadd.f32 %v9879_v9, %v3253_v18  ;;  %v9888_v19 = vadd.f32 %v9879_v9, %v3265_v4  ;;  %v3273_v17 = vrot.slane %v3243_v44, %v13146_v63  ;;  %v3049_v21 = vrot.slane %v13113_v59, %v13146_v63 }
 0x76b   : > { %v1957_v18 = vmul.f32 1.442695, %v1942_v10  ;;  %v3249_v44 = vrot.slane %v3220_v56, %v13146_v63 }
 0x76c   : > { %v3297_v55 = vsel %vm454_vm4, %v9882_v62, -inf  ;;  %v3306_v58 = vsel %vm454_vm4, %v9888_v19, -inf  ;;  %v9894_v45 = vadd.f32 %v9879_v9, %v3273_v17 }
 0x76e   : > { %v3312_v1 = vsel %vm454_vm4, %v9894_v45, -inf }
 0x76f   : > { %3079 = vbcast.lane.b32.xlu1 %v3077_v33, 256  ;;  %v13148_v33 = vld [vmem:[#allocation7_spill] sm:$0xff] }
 0x770   : > { %v3070_v24 = vrot.slane %v13113_v59, %v13148_v33  ;;  %v3244_v59 = vcombine.high %v9867_v50, %v9867_v50 }
 0x773   : > { %3093 = vbcast.lane.b32.xlu1 %v3091_v43, 256  ;;  %v13149_v43 = vld [vmem:[#allocation23_spill] sm:$0xff] }
 0x774   : > { %v1936_v51 = vsub.f32 %v13150_v28, %v13149_v43 }
 0x776   : > { %v1945_v60 = vmul.f32 1.442695, %v1936_v51 }
 0x777   : > { %3120 = vperm.xlu1 %8103, %v3118_v5   ;;  %v13151_v5 = vld [vmem:[#allocation28_spill] sm:$0xff] }
 0x778   : > { %8199 = vpow2.f32 %v1945_v60 }
 0x77b   : > { %8105 = vset.pattern.permute.xlu1 %v13137_v42 }
 0x785   : > { %v8200_v57 = vpop.eup %8199 }
 0x786   : > { %v1962_v61 = vsel %vm454_vm4, %v8200_v57, 0.0 }
 0x79b   : > { %3298 = vmax.xlane.f32.xlu1 %v3297_v55  ;;  %v3242_v55 = vcombine.high %v3220_v56, %v3220_v56 }
 0x79f   : > { %3307 = vmax.xlane.f32.xlu1 %v3306_v58  ;;  %v3286_v58 = vadd.f32 %v9879_v9, %v3249_v44 }
 0x7a2   : > { %v2842_v35 = vpop.xlane.xlu1 %2841 }
 0x7a3   : > { %v2843_v11 = vadd.f32 %v2842_v35, %v13147_v39  ;;  %3313 = vmax.xlane.f32.xlu1 %v3312_v1  ;;  %v3257_v35 = vrot.slane %v3242_v55, %v13146_v63  ;;  %v3213_v1 = vcombine.high %v9870_v52, %v9870_v52  ;;  %v3294_v39 = vsel %vm454_vm4, %v3286_v58, -inf }
 0x7a5   : > { %v2844_v36 = vmul.f32 %v2843_v11, %v9631_v53  ;;  %v1938_v53 = vsub.f32 %v13152_v37, %v13151_v5  ;;  %v3288_v12 = vadd.f32 %v9879_v9, %v3257_v35  ;;  %v3261_v11 = vrot.slane %v3244_v59, %v13146_v63 }
 0x7a6   : > { %v9948_v3 = vpop.permute.xlu1 %3058 }
 0x7a7   : > { %2846 = vrot.lane.b32.xlu0 %v2844_v36, %s8445_s28  ;;  %v1949_v6 = vmul.f32 1.442695, %v1938_v53  ;;  %v3241_v36 = vrot.slane %v3213_v1, %v13145_v34 }
 0x7a9   : > { %8201 = vpow2.f32 %v1949_v6  ;;  %v3269_v50 = vrot.slane %v3241_v36, %v13146_v63  ;;  %v3245_v28 = vcombine.high %v3241_v36, %v3241_v36 }
 0x7aa   : > { %8203 = vpow2.f32 %v1953_v23  ;;  %v9950_v23 = vpop.permute.xlu1 %3065 }
 0x7ab   : > { %3051 = vbcast.lane.b32.xlu0 %v3049_v21, 256  ;;  %8205 = vpow2.f32 %v1957_v18  ;;  %v3300_v21 = vsel %vm454_vm4, %v3288_v12, -inf  ;;  %v3291_v51 = vadd.f32 %v9879_v9, %v3269_v50  ;;  %v3277_v60 = vrot.slane %v3245_v28, %v13146_v63 }
 0x7ad   : > { %v3309_v37 = vsel %vm454_vm4, %v3291_v51, -inf  ;;  %v9942_v53 = vadd.f32 %v9879_v9, %v3277_v60 }
 0x7af   : > { %3072 = vbcast.lane.b32.xlu0 %v3070_v24, 256  ;;  %v3289_v24 = vadd.f32 %v9879_v9, %v3261_v11  ;;  %v3315_v6 = vsel %vm454_vm4, %v9942_v53, -inf }
 0x7b1   : > { %v3303_v52 = vsel %vm454_vm4, %v3289_v24, -inf }
 0x7b6   : > { %v8202_v15 = vpop.eup %8201 }
 0x7b7   : > { %v1968_v41 = vsel %vm454_vm4, %v8202_v15, 0.0  ;;  %v8204_v54 = vpop.eup %8203 }
 0x7b8   : > { %v1974_v49 = vsel %vm454_vm4, %v8204_v54, 0.0  ;;  %v8206_v4 = vpop.eup %8205 }
 0x7b9   : > { %v1980_v17 = vsel %vm454_vm4, %v8206_v4, 0.0 }
 0x7ce   : > { %1963 = vadd.xlane.f32.xlu0 %v1962_v61 }
 0x7d2   : > { %1969 = vadd.xlane.f32.xlu0 %v1968_v41 }
 0x7d6   : > { %1975 = vadd.xlane.f32.xlu0 %v1974_v49 }
 0x7db   : > { %v9954_v61 = vpop.xlane.xlu1 %1960 }
 0x7dc   : > { %8207 = vlog2.f32 %v9954_v61 }
 0x7df   : > { %v9958_v41 = vpop.xlane.xlu1 %1966 }
 0x7e3   : > { %v9962_v49 = vpop.xlane.xlu1 %1972 }
 0x7e9   : > { %v8208_v61 = vpop.eup %8207 }
 0x7ec   : > { %3086 = vbcast.lane.b32.xlu0 %v3084_v13, 256 }
 0x7f0   : > { %3100 = vbcast.lane.b32.xlu0 %v3098_v0, 256  ;;  %v9966_v0 = vpop.xlane.xlu1 %1978 }
 0x7f4   : > { %v9970_v10 = vpop.permute.xlu1 %3079 }
 0x7f8   : > { %v9974_v56 = vpop.permute.xlu1 %3093 }
 0x7fc   : > { %v9978_v44 = vpop.permute.xlu1 %3120 }
 0x7fd   : > { %13162 = vst [vmem:[#allocation33_spill] sm:$0xff] %v9978_v44 }
 0x80f   : > { %1981 = vadd.xlane.f32.xlu0 %v1980_v17 }
 0x813   : > { %3295 = vmax.xlane.f32.xlu0 %v3294_v39 }
 0x817   : > { %3301 = vmax.xlane.f32.xlu0 %v3300_v21 }
 0x819   : > { %v9952_v57 = vpop.permute.xlu0 %2846 }
 0x81a   : > { %13159 = vst [vmem:[#allocation38_spill] sm:$0xff] %v9952_v57 }
 0x81b   : > { %3304 = vmax.xlane.f32.xlu0 %v3303_v52 }
 0x81d   : > { %v9956_v15 = vpop.permute.xlu0 %3051 }
 0x81f   : > { %3310 = vmax.xlane.f32.xlu0 %v3309_v37 }
 0x821   : > { %v9960_v54 = vpop.permute.xlu0 %3072 }
 0x822   : > { %13160 = vst [vmem:[#allocation32_spill] sm:$0xff] %v9960_v54 }
 0x823   : > { %3316 = vmax.xlane.f32.xlu0 %v3315_v6 }
 0x824   : > { %v9982_v17 = vpop.xlane.xlu1 %3298 }
 0x825   : > { %vm3319_vm12 = vcmp.eq.f32.partialorder %v9882_v62, %v9982_v17 }
 0x826   : > { %v3327_v59 = vsel %vm3319_vm12, %v13135_v40, 2147483647 }
 0x827   : > { %v9999_v21 = vsel %vm454_vm4, %v3327_v59, 2147483647 }
 0x828   : > { %v9992_v39 = vpop.xlane.xlu1 %3307  ;;  %v3351_v52 = vshra.s32 %v9999_v21, 16 }
 0x829   : > { %vm3322_vm6 = vcmp.eq.f32.partialorder %v9888_v19, %v9992_v39 }
 0x82a   : > { %v3330_v37 = vsel %vm3322_vm6, %v13135_v40, 2147483647  ;;  %v10019_v19 = vcvt.s32.f32 %v3351_v52 }
 0x839   : > { %3580 = vperm.xlu0 %8104, %v3577_v7   ;;  %v10023_v7 = vsel %vm454_vm4, %v3330_v37, 2147483647 }
 0x83a   : > { %13164 = vst [vmem:[#allocation15_spill] sm:$0xff] %v10023_v7 }
 0x83d   : > { %8106 = vset.pattern.permute.xlu0 %v13137_v42 }
 0x857   : > { %v9964_v13 = vpop.xlane.xlu0 %1963 }
 0x858   : > { %8209 = vlog2.f32 %v9964_v13 }
 0x859   : > { %8211 = vlog2.f32 %v9962_v49 }
 0x85b   : > { %v9968_v2 = vpop.xlane.xlu0 %1969 }
 0x85c   : > { %8213 = vlog2.f32 %v9968_v2  ;;  %v13179_v2 = vld [vmem:[#allocation55_spill] sm:$0xff] }
 0x85d   : > { %8215 = vlog2.f32 %v9966_v0 }
 0x85f   : > { %v9972_v18 = vpop.xlane.xlu0 %1975 }
 0x863   : > { %v9976_v4 = vpop.permute.xlu0 %3086 }
 0x864   : > { %13161 = vst [vmem:[#allocation39_spill] sm:$0xff] %v9976_v4 }
 0x867   : > { %v9980_v55 = vpop.permute.xlu0 %3100 }
 0x868   : > { %13163 = vst [vmem:[#allocation35_spill] sm:$0xff] %v9980_v55 }
 0x898   : > { %v9984_v35 = vpop.xlane.xlu0 %1981 }
 0x89c   : > { %v9989_v1 = vpop.xlane.xlu0 %3295 }
 0x89d   : > { %vm3318_vm13 = vcmp.eq.f32.partialorder %v3286_v58, %v9989_v1 }
 0x89e   : > { %v3326_v11 = vsel %vm3318_vm13, %v13135_v40, 2147483647 }
 0x89f   : > { %v9996_v36 = vsel %vm454_vm4, %v3326_v11, 2147483647 }
 0x8a0   : > { %v10001_v50 = vpop.xlane.xlu0 %3301  ;;  %v3336_v62 = vshra.s32 %v9996_v36, 16 }
 0x8a1   : > { %vm3320_vm8 = vcmp.eq.f32.partialorder %v3288_v12, %v10001_v50 }
 0x8a2   : > { %v3328_v58 = vsel %vm3320_vm8, %v13135_v40, 2147483647  ;;  %v10008_v28 = vcvt.s32.f32 %v3336_v62  ;;  %v10030_v62 = vpop.xlane.xlu1 %3313 }
 0x8a3   : > { %v10012_v60 = vsel %vm454_vm4, %v3328_v58, 2147483647  ;;  %vm3324_vm11 = vcmp.eq.f32.partialorder %v9894_v45, %v10030_v62 }
 0x8a4   : > { %3339 = vmin.xlane.f32.xlu1 %v10008_v28  ;;  %v10016_v6 = vpop.xlane.xlu0 %3304  ;;  %v3366_v12 = vshra.s32 %v10012_v60, 16  ;;  %v3332_v42 = vsel %vm3324_vm11, %v13135_v40, 2147483647 }
 0x8a5   : > { %vm3321_vm9 = vcmp.eq.f32.partialorder %v3289_v24, %v10016_v6  ;;  %v3396_v24 = vshra.s32 %v10023_v7, 16  ;;  %v10058_v48 = vsel %vm454_vm4, %v3332_v42, 2147483647 }
 0x8a6   : > { %v3329_v59 = vsel %vm3321_vm9, %v13135_v40, 2147483647  ;;  %v10032_v58 = vcvt.s32.f32 %v3366_v12  ;;  %13170 = vst [vmem:[#allocation37_spill] sm:$0xff] %v10058_v48 }
 0x8a7   : > { %v10036_v52 = vsel %vm454_vm4, %v3329_v59, 2147483647  ;;  %v10044_v57 = vcvt.s32.f32 %v3396_v24  ;;  %v13171_v24 = vld [vmem:[#allocation46_spill] sm:$0xff] }
 0x8a8   : > { %v10026_v11 = vpop.xlane.xlu0 %3310  ;;  %3354 = vmin.xlane.f32.xlu1 %v10019_v19  ;;  %13165 = vst [vmem:[#allocation17_spill] sm:$0xff] %v10032_v58  ;;  %13166 = vst [vmem:[#allocation67_spill] sm:$0xff] %v10036_v52  ;;  %v3619_v46 = vrot.slane %v13171_v24, %v13145_v34 }
 0x8a9   : > { %vm3323_vm10 = vcmp.eq.f32.partialorder %v3291_v51, %v10026_v11  ;;  %13167 = vst [vmem:[#allocation25_spill] sm:$0xff] %v10044_v57  ;;  %v3381_v51 = vshra.s32 %v10036_v52, 16 }
 0x8aa   : > { %v3331_v37 = vsel %vm3323_vm10, %v13135_v40, 2147483647 }
 0x8ab   : > { %v10048_v12 = vsel %vm454_vm4, %v3331_v37, 2147483647  ;;  %v10054_v59 = vcvt.s32.f32 %v3381_v51  ;;  %v3627_v51 = vcombine.high %v3619_v46, %v3619_v46 }
 0x8ac   : > { %3369 = vmin.xlane.f32.xlu1 %v10032_v58  ;;  %v10042_v25 = vpop.xlane.xlu0 %3316  ;;  %13168 = vst [vmem:[#allocation52_spill] sm:$0xff] %v10048_v12  ;;  %v3411_v45 = vshra.s32 %v10048_v12, 16 }
 0x8ad   : > { %vm3325_vm12 = vcmp.eq.f32.partialorder %v9942_v53, %v10042_v25  ;;  %13169 = vst [vmem:[#allocation34_spill] sm:$0xff] %v10054_v59  ;;  %v3649_v7 = vrot.slane %v3627_v51, %v13145_v34 }
 0x8ae   : > { %v3333_v37 = vsel %vm3325_vm12, %v13135_v40, 2147483647  ;;  %v10064_v52 = vcvt.s32.f32 %v3411_v45  ;;  %v13174_v45 = vmov 0.0  }
 0x8af   : > { %v10068_v53 = vsel %vm454_vm4, %v3333_v37, 2147483647 }
 0x8b0   : > { %3399 = vmin.xlane.f32.xlu1 %v10044_v57  ;;  %13172 = vst [vmem:[#allocation36_spill] sm:$0xff] %v10064_v52  ;;  %v3426_v57 = vshra.s32 %v10058_v48, 16  ;;  %13173 = vst [vmem:[#allocation59_spill] sm:$0xff] %v10068_v53  ;;  %v3441_v12 = vshra.s32 %v10068_v53, 16  ;;  %v13177_v48 = vld [vmem:[#allocation16_spill] sm:$0xff] }
 0x8b2   : > { %v10072_v42 = vcvt.s32.f32 %v3426_v57  ;;  %v10083_v37 = vcvt.s32.f32 %v3441_v12  ;;  %v3668_v57 = vrot.slane %v3649_v7, %v13146_v63 }
 0x8b4   : > { %3384 = vmin.xlane.f32.xlu1 %v10054_v59  ;;  %v3581_v44 = vpop.permute.xlu0 %3580  ;;  %v10077_v59 = vrot.slane %v3619_v46, %v13145_v34  ;;  %13176 = vst [vmem:[#allocation72_spill] sm:$0xff] %v10083_v37  ;;  %v3702_v51 = vmul.f32 %v9879_v9, %v3668_v57  ;;  %v1984_v57 = vmul.f32 0.6931472, %v8208_v61 }
 0x8b5   : > { %vm3582_vm13 = vcmp.eq.s32.totalorder %v3581_v44, %v13135_v40  ;;  %v3659_v40 = vcombine.high %v3649_v7, %v3649_v7 }
 0x8b6   : > { %v10080_v58 = vsel %vm3582_vm13, 1.0, %v13174_v45  ;;  %v3657_v44 = vcombine.high %v10077_v59, %v10077_v59  ;;  %v3712_v12 = vsel %vm454_vm4, %v3702_v51, 0.0 }
 0x8b7   : > { %13175 = vst [vmem:[#allocation63_spill] sm:$0xff] %v10080_v58  ;;  %v3676_v53 = vrot.slane %v3659_v40, %v13146_v63  ;;  %v8210_v40 = vpop.eup %8209 }
 0x8b8   : > { %3414 = vmin.xlane.f32.xlu1 %v10064_v52  ;;  %v3585_v52 = vmul.f32 %v10080_v58, %v13177_v48  ;;  %v3672_v45 = vrot.slane %v3657_v44, %v13146_v63  ;;  %v1986_v13 = vmul.f32 0.6931472, %v8210_v40  ;;  %v8212_v44 = vpop.eup %8211 }
 0x8b9   : > { %v8214_v49 = vpop.eup %8213 }
 0x8ba   : > { %v3586_v46 = vsel %vm454_vm4, %v3585_v52, 0.0  ;;  %v3703_v48 = vmul.f32 %v9879_v9, %v3672_v45  ;;  %v3704_v52 = vmul.f32 %v9879_v9, %v3676_v53  ;;  %v1999_v45 = vadd.f32 %v1984_v57, %v9727_v32  ;;  %v13180_v32 = vld [vmem:[#allocation41_spill] sm:$0xff] }
 0x8bb   : > { %v2000_v53 = vadd.f32 %v1986_v13, %v13149_v43  ;;  %v13181_v43 = vld [vmem:[#allocation70_spill] sm:$0xff] }
 0x8bc   : > { %3429 = vmin.xlane.f32.xlu1 %v10072_v42  ;;  %v3718_v7 = vsel %vm454_vm4, %v3704_v52, 0.0 }
 0x8bd   : > { %v2073_v52 = vadd.f32 %v13179_v2, %v2000_v53  ;;  %v3454_v2 = vadd.f32 %v9989_v1, %v9956_v15  ;;  %v13183_v1 = vld [vmem:[#allocation57_spill] sm:$0xff] }
 0x8be   : > { %8217 = vlog2.f32 %v13183_v1 }
 0x8c0   : > { %3444 = vmin.xlane.f32.xlu1 %v10083_v37  ;;  %v3715_v37 = vsel %vm454_vm4, %v3703_v48, 0.0  ;;  %v1992_v48 = vmul.f32 0.6931472, %v8212_v44 }
 0x8c2   : > { %v2003_v51 = vadd.f32 %v1992_v48, %v9729_v14  ;;  %v3612_v14 = vcombine.high %v13171_v24, %v13171_v24 }
 0x8c4   : > { %3587 = vadd.xlane.f32.xlu1 %v3586_v46  ;;  %v2076_v57 = vadd.f32 %v13180_v32, %v2003_v51  ;;  %v10118_v48 = vrot.slane %v3612_v14, %v13145_v34  ;;  %v3459_v32 = vadd.f32 %v10026_v11, %v9976_v4  ;;  %v3751_v11 = vrot.slane %v10080_v58, %v8552_v22 }
 0x8c8   : > { %3713 = vadd.xlane.f32.xlu1 %v3712_v12  ;;  %v1990_v12 = vmul.f32 0.6931472, %v8214_v49 }
 0x8ca   : > { %v2002_v61 = vadd.f32 %v1990_v12, %v13151_v5  ;;  %v3628_v5 = vcombine.high %v10118_v48, %v10118_v48 }
 0x8cc   : > { %3716 = vadd.xlane.f32.xlu1 %v3715_v37  ;;  %v13178_v37 = vld [vmem:[#allocation53_spill] sm:$0xff]  ;;  %v2075_v13 = vadd.f32 %v13181_v43, %v2002_v61  ;;  %v3656_v53 = vrot.slane %v3628_v5, %v13145_v34  ;;  %v3779_v5 = vrot.slane %v10080_v58, %v8574_v31 }
 0x8cd   : > { %v2072_v46 = vadd.f32 %v13178_v37, %v1999_v45  ;;  %v13182_v45 = vld [vmem:[#allocation58_spill] sm:$0xff] }
 0x8ce   : > { %v3684_v37 = vrot.slane %v3656_v53, %v13146_v63 }
 0x8d0   : > { %3719 = vadd.xlane.f32.xlu1 %v3718_v7  ;;  %v8216_v7 = vpop.eup %8215 }
 0x8d1   : > { %v1996_v0 = vmul.f32 0.6931472, %v8216_v7 }
 0x8d3   : > { %v2005_v40 = vadd.f32 %v1996_v0, %v9731_v27  ;;  %v3660_v27 = vcombine.high %v3656_v53, %v3656_v53  ;;  %v3457_v0 = vadd.f32 %v10016_v6, %v9960_v54  ;;  %v3744_v6 = vrot.slane %v10080_v58, %v8541_v16 }
 0x8d5   : > { %v2078_v44 = vadd.f32 %v13182_v45, %v2005_v40  ;;  %v3692_v49 = vrot.slane %v3660_v27, %v13146_v63  ;;  %v3765_v45 = vrot.slane %v10080_v58, %v8562_v26 }
 0x8d7   : > { %v3708_v12 = vmul.f32 %v9879_v9, %v3692_v49 }
 0x8d9   : > { %v3730_v24 = vsel %vm454_vm4, %v3708_v12, 0.0 }
 0x8e1   : > { %2094 = vperm.xlu1 %8105, %v2072_v46   ;;  %v3706_v46 = vmul.f32 %v9879_v9, %v3684_v37  ;;  %v13184_v37 = vld [vmem:[#allocation26_spill] sm:$0xff] }
 0x8e3   : > { %v3724_v51 = vsel %vm454_vm4, %v3706_v46, 0.0 }
 0x8e5   : > { %2097 = vperm.xlu1 %8105, %v2073_v52   ;;  %v3456_v52 = vadd.f32 %v10001_v50, %v9950_v23  ;;  %v3461_v50 = vadd.f32 %v10042_v25, %v9980_v55 }
 0x8e9   : > { %2106 = vperm.xlu1 %8105, %v2076_v57  }
 0x8ed   : > { %2103 = vperm.xlu1 %8105, %v2075_v13  }
 0x8f1   : > { %2112 = vperm.xlu1 %8105, %v2078_v44   ;;  %v8218_v44 = vpop.eup %8217 }
 0x8f2   : > { %v536_v14 = vmul.f32 0.6931472, %v8218_v44 }
 0x8f4   : > { %v547_v27 = vadd.f32 %v536_v14, %v13184_v37  ;;  %v3664_v14 = vrot.slane %v10077_v59, %v13146_v63 }
 0x8f6   : > { %v3701_v37 = vmul.f32 %v9879_v9, %v3664_v14 }
 0x915   : > { %3725 = vadd.xlane.f32.xlu1 %v3724_v51 }
 0x919   : > { %3731 = vadd.xlane.f32.xlu1 %v3730_v24 }
 0x92a   : > { %3471 = vperm.xlu1 %8105, %v3454_v2  }
 0x92d   : > { %v10133_v7 = vpop.xlane.xlu1 %3339 }
 0x92e   : > { %3477 = vperm.xlu1 %8105, %v3456_v52   ;;  %vm3341_vm6 = vcmp.eq.f32.partialorder %v10008_v28, %v10133_v7 }
 0x931   : > { %v10137_v61 = vpop.xlane.xlu1 %3354 }
 0x932   : > { %3480 = vperm.xlu1 %8105, %v3457_v0   ;;  %vm3356_vm8 = vcmp.eq.f32.partialorder %v10019_v19, %v10137_v61  ;;  %v13191_v19 = vld [vmem:[#allocation17_spill] sm:$0xff] }
 0x935   : > { %v10141_v57 = vpop.xlane.xlu1 %3369 }
 0x936   : > { %3486 = vperm.xlu1 %8105, %v3459_v32   ;;  %vm3371_vm9 = vcmp.eq.f32.partialorder %v13191_v19, %v10141_v57  ;;  %v13199_v19 = vld [vmem:[#allocation30_spill] sm:$0xff] }
 0x939   : > { %v10146_v40 = vpop.xlane.xlu1 %3399 }
 0x93a   : > { %3492 = vperm.xlu1 %8105, %v3461_v50  }
 0x93d   : > { %v10150_v43 = vpop.xlane.xlu1 %3384 }
 0x93e   : > { %3746 = vbcast.lane.b32.xlu1 %v3744_v6, 256 }
 0x941   : > { %v10154_v13 = vpop.xlane.xlu1 %3414 }
 0x942   : > { %3753 = vbcast.lane.b32.xlu1 %v3751_v11, 256  ;;  %v10169_v11 = vld [vmem:[%s8521_s14] sm:$0xff] }
 0x945   : > { %v10158_v25 = vpop.xlane.xlu1 %3429 }
 0x946   : > { %3767 = vbcast.lane.b32.xlu1 %v3765_v45, 256 }
 0x949   : > { %v10162_v53 = vpop.xlane.xlu1 %3444 }
 0x94a   : > { %3781 = vbcast.lane.b32.xlu1 %v3779_v5, 256  ;;  %v3642_v5 = vrot.slane %v10118_v48, %v13145_v34 }
 0x94d   : > { %v10165_v46 = vpop.xlane.xlu1 %3587 }
 0x94e   : > { %v3589_v49 = vsub.f32 %v10165_v46, %v547_v27  ;;  %v3680_v27 = vrot.slane %v3642_v5, %v13146_v63 }
 0x950   : > { %v3590_v51 = vmul.f32 1.442695, %v3589_v49  ;;  %v3709_v49 = vsel %vm454_vm4, %v3701_v37, 0.0  ;;  %v3658_v37 = vcombine.high %v3642_v5, %v3642_v5 }
 0x952   : > { %8219 = vpow2.f32 %v3590_v51  ;;  %v3705_v51 = vmul.f32 %v9879_v9, %v3680_v27  ;;  %v3688_v27 = vrot.slane %v3658_v37, %v13146_v63 }
 0x95f   : > { %v8220_v12 = vpop.eup %8219 }
 0x960   : > { %v3592_v24 = vmax.f32 %v8220_v12, 0.01  ;;  %v3597_v2 = vadd.f32 1e-08, %v8220_v12  ;;  %v3721_v12 = vsel %vm454_vm4, %v3705_v51, 0.0 }
 0x962   : > { %8221 = vlog2.f32 %v3597_v2  ;;  %v3593_v52 = vmin.f32 %v3592_v24, 0.99 }
 0x963   : > { %8223 = vlog2.f32 %v9958_v41  ;;  %v13186_v41 = vld [vmem:[#allocation43_spill] sm:$0xff] }
 0x964   : > { %v3594_v0 = vsub.f32 1.0, %v3593_v52  ;;  %8225 = vlog2.f32 %v9972_v18 }
 0x965   : > { %8227 = vlog2.f32 %v9984_v35 }
 0x966   : > { %v3595_v32 = vmul.f32 %v3594_v0, %v3594_v0  ;;  %v3714_v0 = vpop.xlane.xlu1 %3713 }
 0x968   : > { %v3596_v50 = vsub.f32 0.0, %v3595_v32 }
 0x96f   : > { %v8222_v1 = vpop.eup %8221 }
 0x970   : > { %v3599_v6 = vmul.f32 0.6931472, %v8222_v1  ;;  %v8224_v59 = vpop.eup %8223  ;;  %v13185_v1 = vld [vmem:[#allocation40_spill] sm:$0xff] }
 0x971   : > { %v1988_v24 = vmul.f32 0.6931472, %v8224_v59  ;;  %v8226_v2 = vpop.eup %8225 }
 0x972   : > { %v3600_v45 = vmul.f32 %v3599_v6, %v3596_v50  ;;  %v1994_v52 = vmul.f32 0.6931472, %v8226_v2  ;;  %v10189_v6 = vpop.xlane.xlu1 %3716  ;;  %v3455_v2 = vadd.f32 %v9982_v17, %v9948_v3  ;;  %v3737_v17 = vrot.slane %v10080_v58, %v13146_v63 }
 0x973   : > { %v2001_v48 = vadd.f32 %v1988_v24, %v9707_v30 }
 0x974   : > { %v3601_v44 = vmul.f32 %v3600_v45, %v10169_v11  ;;  %v2004_v32 = vadd.f32 %v1994_v52, %v13153_v8  ;;  %v3707_v8 = vmul.f32 %v9879_v9, %v3688_v27  ;;  %v8228_v52 = vpop.eup %8227  ;;  %v3758_v27 = vrot.slane %v10080_v58, %v13148_v33 }
 0x975   : > { %v2074_v50 = vadd.f32 %v13185_v1, %v2001_v48  ;;  %v3458_v48 = vadd.f32 %v9992_v39, %v9970_v10  ;;  %v3460_v1 = vadd.f32 %v10030_v62, %v9974_v56 }
 0x976   : > { %3603 = vrot.lane.b32.xlu0 %v3601_v44, %s8447_s9  ;;  %v2077_v45 = vadd.f32 %v13186_v41, %v2004_v32  ;;  %v10192_v44 = vpop.xlane.xlu1 %3719  ;;  %v3727_v51 = vsel %vm454_vm4, %v3707_v8, 0.0  ;;  %v3772_v8 = vrot.slane %v10080_v58, %v13155_v20 }
 0x97a   : > { %3608 = vrot.lane.b32.xlu0 %v10169_v11, %s8447_s9  ;;  %v10194_v18 = vpop.permute.xlu1 %2094 }
 0x97e   : > { %v10196_v14 = vpop.permute.xlu1 %2097 }
 0x982   : > { %v10198_v30 = vpop.permute.xlu1 %2106 }
 0x999   : > { %3710 = vadd.xlane.f32.xlu0 %v3709_v49  ;;  %v10202_v49 = vpop.permute.xlu1 %2103 }
 0x99d   : > { %3722 = vadd.xlane.f32.xlu0 %v3721_v12  ;;  %v10205_v12 = vpop.permute.xlu1 %2112 }
 0x9a1   : > { %v10207_v59 = vpop.xlane.xlu1 %3725 }
 0x9a5   : > { %v10210_v24 = vpop.xlane.xlu1 %3731 }
 0x9a9   : > { %v3472_v5 = vpop.permute.xlu1 %3471 }
 0x9ad   : > { %v10216_v32 = vpop.permute.xlu1 %3477 }
 0x9b1   : > { %v10220_v35 = vpop.permute.xlu1 %3480 }
 0x9b3   : > { %2100 = vperm.xlu0 %8106, %v2074_v50   ;;  %v1998_v50 = vmul.f32 0.6931472, %v8228_v52 }
 0x9b5   : > { %v2006_v41 = vadd.f32 %v1998_v50, %v13157_v38  ;;  %v10226_v39 = vpop.permute.xlu1 %3486  ;;  %v3786_v38 = vrot.slane %v10080_v58, %v13156_v47 }
 0x9b7   : > { %2109 = vperm.xlu0 %8106, %v2077_v45   ;;  %v13187_v45 = vld [vmem:[#allocation42_spill] sm:$0xff] }
 0x9b8   : > { %v2079_v37 = vadd.f32 %v13187_v45, %v2006_v41 }
 0x9b9   : > { %v10230_v62 = vpop.permute.xlu1 %3492 }
 0x9d6   : > { %3728 = vadd.xlane.f32.xlu0 %v3727_v51  ;;  %v3747_v51 = vpop.permute.xlu1 %3746 }
 0x9ec   : > { %3474 = vperm.xlu0 %8106, %v3455_v2   ;;  %v3799_v2 = vmul.f32 %v3747_v51, %v3714_v0  ;;  %v13190_v0 = vmov 4  }
 0x9f0   : > { %3483 = vperm.xlu0 %8106, %v3458_v48   ;;  %v10236_v48 = vpop.permute.xlu0 %3603 }
 0x9f1   : > { %13188 = vst [vmem:[#allocation50_spill] sm:$0xff] %v10236_v48 }
 0x9f4   : > { %3489 = vperm.xlu0 %8106, %v3460_v1   ;;  %v10238_v52 = vpop.permute.xlu0 %3608  ;;  %v3754_v1 = vpop.permute.xlu1 %3753 }
 0x9f5   : > { %13189 = vst [vmem:[#allocation23_spill] sm:$0xff] %v10238_v52 }
 0x9f8   : > { %3739 = vbcast.lane.b32.xlu0 %v3737_v17, 256  ;;  %v3768_v41 = vpop.permute.xlu1 %3767 }
 0x9fc   : > { %2115 = vperm.xlu0 %8106, %v2079_v37  }
 0xa00   : > { %3760 = vbcast.lane.b32.xlu0 %v3758_v27, 256 }
 0xa04   : > { %3774 = vbcast.lane.b32.xlu0 %v3772_v8, 256  ;;  %v3782_v8 = vpop.permute.xlu1 %3781 }
 0xa08   : > { %3788 = vbcast.lane.b32.xlu0 %v3786_v38, 256 }
 0xa0c   : > { %3818 = vperm.xlu0 %8106, %v3799_v2  }
 0xa22   : > { %v3711_v50 = vpop.xlane.xlu0 %3710 }
 0xa26   : > { %v3723_v17 = vpop.xlane.xlu0 %3722 }
 0xa27   : > { %v3802_v45 = vmul.f32 %v3768_v41, %v3723_v17  ;;  %v3800_v41 = vmul.f32 %v3754_v1, %v10189_v6  ;;  %v3335_v17 = vand.u32 65535, %v9996_v36  ;;  %v3505_v36 = vrot.slane %v10216_v32, %v9104_v29 }
 0xa29   : > { %3827 = vperm.xlu0 %8106, %v3802_v45  }
 0xa2e   : > { %v10240_v37 = vpop.permute.xlu0 %2100 }
 0xa32   : > { %v10242_v27 = vpop.permute.xlu0 %2109 }
 0xa5f   : > { %v3729_v58 = vpop.xlane.xlu0 %3728 }
 0xa60   : > { %v3804_v55 = vmul.f32 %v3782_v8, %v3729_v58  ;;  %v3497_v58 = vrot.slane %v3472_v5, %v9104_v29 }
 0xa62   : > { %3833 = vperm.xlu0 %8106, %v3804_v55  }
 0xa66   : > { %8107 = vset.pattern.permute.xlu0 %v13190_v0 }
 0xa67   : > { %v3475_v38 = vpop.permute.xlu0 %3474 }
 0xa68   : > { %v3501_v45 = vrot.slane %v3475_v38, %v9104_v29 }
 0xa6b   : > { %v3484_v51 = vpop.permute.xlu0 %3483 }
 0xa6c   : > { %v3513_v0 = vrot.slane %v3484_v51, %v9104_v29  ;;  %v2124_v51 = vrot.slane %v10196_v14, %v9104_v29 }
 0xa6f   : > { %v3490_v2 = vpop.permute.xlu0 %3489 }
 0xa73   : > { %v3740_v48 = vpop.permute.xlu0 %3739 }
 0xa74   : > { %v3798_v52 = vmul.f32 %v3740_v48, %v3711_v50  ;;  %v3337_v48 = vcvt.s32.f32 %v3335_v17  ;;  %v3526_v50 = vsel %vm872_vm14, %v3501_v45, %v3497_v58  ;;  %v13192_v17 = vld [vmem:[#allocation15_spill] sm:$0xff]  ;;  %v13193_v58 = vld [vmem:[#allocation25_spill] sm:$0xff] }
 0xa75   : > { %v3395_v45 = vand.u32 65535, %v13192_v17  ;;  %vm3401_vm10 = vcmp.eq.f32.partialorder %v13193_v58, %v10146_v40  ;;  %v13200_v17 = vld [vmem:[#allocation37_spill] sm:$0xff] }
 0xa76   : > { %3815 = vperm.xlu1 %8105, %v3798_v52   ;;  %v3350_v52 = vand.u32 65535, %v9999_v21  ;;  %v3342_v8 = vsel %vm3341_vm6, %v3337_v48, inf  ;;  %v3509_v21 = vrot.slane %v10220_v35, %v9104_v29  ;;  %v3521_v35 = vrot.slane %v3490_v2, %v9104_v29 }
 0xa77   : > { %v10245_v4 = vpop.permute.xlu0 %2115  ;;  %v2128_v48 = vrot.slane %v10240_v37, %v9104_v29  ;;  %v2120_v2 = vrot.slane %v10194_v18, %v9104_v29  ;;  %v2132_v18 = vrot.slane %v10202_v49, %v9104_v29  ;;  %vm3431_vm6 = vcmp.eq.f32.partialorder %v10072_v42, %v10158_v25  ;;  %v13202_v42 = vld [vmem:[#allocation72_spill] sm:$0xff] }
 0xa78   : > { %v3352_v28 = vcvt.s32.f32 %v3350_v52  ;;  %v3397_v52 = vcvt.s32.f32 %v3395_v45  ;;  %v3425_v45 = vand.u32 65535, %v13200_v17 }
 0xa7a   : > { %3821 = vperm.xlu1 %8105, %v3800_v41  }
 0xa7b   : > { %v3761_v54 = vpop.permute.xlu0 %3760 }
 0xa7c   : > { %v3801_v55 = vmul.f32 %v3761_v54, %v10192_v44  ;;  %v3527_v54 = vsel %vm874_vm15, %v3505_v36, %v3526_v50  ;;  %v3365_v44 = vand.u32 65535, %v10012_v60  ;;  %v13194_v50 = vld [vmem:[#allocation67_spill] sm:$0xff] }
 0xa7d   : > { %v3528_v38 = vsel %vm876_vm0, %v3509_v21, %v3527_v54  ;;  %v13195_v54 = vld [vmem:[#allocation34_spill] sm:$0xff] }
 0xa7e   : > { %3824 = vperm.xlu1 %8105, %v3801_v55   ;;  %v3367_v41 = vcvt.s32.f32 %v3365_v44  ;;  %v3529_v60 = vsel %vm878_vm1, %v3513_v0, %v3528_v38  ;;  %vm3386_vm11 = vcmp.eq.f32.partialorder %v13195_v54, %v10150_v43  ;;  %v13196_v44 = vld [vmem:[#allocation52_spill] sm:$0xff]  ;;  %v2136_v38 = vrot.slane %v10198_v30, %v9104_v29 }
 0xa7f   : > { %v3775_v6 = vpop.permute.xlu0 %3774  ;;  %v3410_v21 = vand.u32 65535, %v13196_v44  ;;  %v13203_v54 = vld [vmem:[#allocation64_spill] sm:$0xff] }
 0xa80   : > { %v3803_v1 = vmul.f32 %v3775_v6, %v10207_v59  ;;  %v3357_v59 = vsel %vm3356_vm8, %v3352_v28, inf  ;;  %v3372_v55 = vsel %vm3371_vm9, %v3367_v41, inf  ;;  %v3380_v6 = vand.u32 65535, %v13194_v50 }
 0xa81   : > { %3343 = vmin.xlane.f32.xlu0 %v3342_v8  ;;  %v3525_v8 = vrot.slane %v10230_v62, %v9104_v29  ;;  %v13198_v62 = vld [vmem:[#allocation36_spill] sm:$0xff]  ;;  %v3412_v49 = vcvt.s32.f32 %v3410_v21  ;;  %vm3446_vm8 = vcmp.eq.f32.partialorder %v13202_v42, %v10162_v53 }
 0xa82   : > { %3830 = vperm.xlu1 %8105, %v3803_v1   ;;  %v3402_v1 = vsel %vm3401_vm10, %v3397_v52, inf  ;;  %v3382_v28 = vcvt.s32.f32 %v3380_v6  ;;  %vm3416_vm13 = vcmp.eq.f32.partialorder %v13198_v62, %v10154_v13  ;;  %v2148_v52 = vrot.slane %v10245_v4, %v9104_v29 }
 0xa83   : > { %v3789_v5 = vpop.permute.xlu0 %3788 }
 0xa84   : > { %v3805_v32 = vmul.f32 %v3789_v5, %v10210_v24  ;;  %v3517_v24 = vrot.slane %v10226_v39, %v9104_v29  ;;  %v2149_v39 = vsel %vm872_vm14, %v2124_v51, %v2120_v2  ;;  %v3387_v0 = vsel %vm3386_vm11, %v3382_v28, inf }
 0xa85   : > { %3358 = vmin.xlane.f32.xlu0 %v3357_v59  ;;  %v2150_v37 = vsel %vm874_vm15, %v2128_v48, %v2149_v39  ;;  %v3427_v51 = vcvt.s32.f32 %v3425_v45 }
 0xa86   : > { %3836 = vperm.xlu1 %8105, %v3805_v32   ;;  %v3530_v36 = vsel %vm880_vm2, %v3517_v24, %v3529_v60  ;;  %v13197_v32 = vld [vmem:[#allocation33_spill] sm:$0xff]  ;;  %v2151_v59 = vsel %vm876_vm0, %v2132_v18, %v2150_v37  ;;  %v2140_v60 = vrot.slane %v10242_v27, %v9104_v29  ;;  %v13201_v24 = vld [vmem:[#allocation59_spill] sm:$0xff]  ;;  %v2144_v27 = vrot.slane %v10205_v12, %v9104_v29 }
 0xa87   : > { %v3531_v14 = vsel %vm882_vm3, %v3521_v35, %v3530_v36  ;;  %vm3122_vm12 = vcmp.eq.s32.totalorder %v13197_v32, 1  ;;  %v2152_v35 = vsel %vm878_vm1, %v2136_v38, %v2151_v59  ;;  %v3440_v58 = vand.u32 65535, %v13201_v24 }
 0xa88   : > { %v3532_v5 = vsel %vm884_vm5, %v3525_v8, %v3531_v14  ;;  %v2153_v48 = vsel %vm880_vm2, %v2140_v60, %v2152_v35  ;;  %v3432_v6 = vsel %vm3431_vm6, %v3427_v51, inf }
 0xa89   : > { %3373 = vmin.xlane.f32.xlu0 %v3372_v55  ;;  %v10305_v41 = vsel %vm3122_vm12, %v3532_v5, %v13199_v19  ;;  %v3417_v55 = vsel %vm3416_vm13, %v3412_v49, inf  ;;  %v2154_v36 = vsel %vm882_vm3, %v2144_v27, %v2153_v48  ;;  %v3442_v14 = vcvt.s32.f32 %v3440_v58 }
 0xa8a   : > { %v4242_v30 = vrot.slane %v10305_v41, %v13145_v34  ;;  %v4235_v50 = vcombine.high %v10305_v41, %v10305_v41 }
 0xa8b   : > { %v3447_v39 = vsel %vm3446_vm8, %v3442_v14, inf }
 0xa8c   : > { %v4250_v2 = vcombine.high %v4242_v30, %v4242_v30  ;;  %v10328_v4 = vrot.slane %v4235_v50, %v13145_v34  ;;  %v10331_v12 = vrot.slane %v4242_v30, %v13145_v34 }
 0xa8d   : > { %3403 = vmin.xlane.f32.xlu0 %v3402_v1  ;;  %v2155_v1 = vsel %vm884_vm5, %v2148_v52, %v2154_v36 }
 0xa8e   : > { %v10334_v8 = vrot.slane %v4250_v2, %v13145_v34  ;;  %v10339_v28 = vsel %vm2084_vm7, %v2155_v1, %v13203_v54  ;;  %v4251_v44 = vcombine.high %v10328_v4, %v10328_v4  ;;  %v4287_v18 = vrot.slane %v10331_v12, %v13146_v63 }
 0xa8f   : > { %v10345_v21 = vrot.slane %v10339_v28, %v13145_v34  ;;  %v2852_v59 = vcombine.high %v10339_v28, %v10339_v28  ;;  %vm3888_vm7 = vcmp.gt.f32.partialorder %v10169_v11, 0.0 }
 0xa90   : > { %v4282_v5 = vcombine.high %v10334_v8, %v10334_v8  ;;  %v10355_v62 = vadd.f32 %v9879_v9, %v4287_v18 }
 0xa91   : > { %3388 = vmin.xlane.f32.xlu0 %v3387_v0  ;;  %v4279_v0 = vrot.slane %v4251_v44, %v13145_v34  ;;  %v2867_v19 = vcombine.high %v10345_v21, %v10345_v21  ;;  %v10368_v35 = vrot.slane %v2852_v59, %v13145_v34 }
 0xa92   : > { %v4299_v38 = vrot.slane %v4282_v5, %v13146_v63  ;;  %v4332_v17 = vsel %vm454_vm4, %v10355_v62, -inf }
 0xa93   : > { %v4307_v49 = vrot.slane %v4279_v0, %v13146_v63  ;;  %v2889_v60 = vrot.slane %v2867_v19, %v13145_v34  ;;  %v2868_v58 = vcombine.high %v10368_v35, %v10368_v35  ;;  %v4283_v54 = vcombine.high %v4279_v0, %v4279_v0 }
 0xa94   : > { %v10364_v45 = vadd.f32 %v9879_v9, %v4299_v38  ;;  %v13208_v38 = vld [vmem:[#allocation16_spill] sm:$0xff] }
 0xa95   : > { %3418 = vmin.xlane.f32.xlu0 %v3417_v55  ;;  %v10371_v55 = vadd.f32 %v9879_v9, %v4307_v49  ;;  %v2908_v51 = vrot.slane %v2889_v60, %v13146_v63  ;;  %v2899_v24 = vcombine.high %v2889_v60, %v2889_v60  ;;  %v2896_v50 = vrot.slane %v2868_v58, %v13145_v34 }
 0xa96   : > { %13205 = vst [vmem:[#allocation49_spill] sm:$0xff] %v10364_v45  ;;  %v4341_v30 = vsel %vm454_vm4, %v10364_v45, -inf  ;;  %v4315_v18 = vrot.slane %v4283_v54, %v13146_v63  ;;  %v4094_v19 = vrot.slane %v13208_v38, %v8541_v16  ;;  %v4101_v49 = vrot.slane %v13208_v38, %v8552_v22 }
 0xa97   : > { %13206 = vst [vmem:[#allocation28_spill] sm:$0xff] %v10371_v55  ;;  %v4347_v48 = vsel %vm454_vm4, %v10371_v55, -inf  ;;  %v10381_v52 = vadd.f32 %v9879_v9, %v2908_v51  ;;  %v2916_v27 = vrot.slane %v2899_v24, %v13146_v63  ;;  %v2924_v2 = vrot.slane %v2896_v50, %v13146_v63 }
 0xa98   : > { %v2900_v36 = vcombine.high %v2896_v50, %v2896_v50  ;;  %v10406_v59 = vadd.f32 %v9879_v9, %v4315_v18 }
 0xa99   : > { %3433 = vmin.xlane.f32.xlu0 %v3432_v6  ;;  %v2952_v6 = vsel %vm454_vm4, %v10381_v52, -inf  ;;  %v10388_v42 = vadd.f32 %v9879_v9, %v2916_v27  ;;  %v10394_v1 = vadd.f32 %v9879_v9, %v2924_v2 }
 0xa9a   : > { %13207 = vst [vmem:[#allocation48_spill] sm:$0xff] %v10406_v59  ;;  %v4353_v0 = vsel %vm454_vm4, %v10406_v59, -inf }
 0xa9b   : > { %v2958_v14 = vsel %vm454_vm4, %v10388_v42, -inf  ;;  %v2964_v37 = vsel %vm454_vm4, %v10394_v1, -inf }
 0xa9d   : > { %3448 = vmin.xlane.f32.xlu0 %v3447_v39  ;;  %v2932_v39 = vrot.slane %v2900_v36, %v13146_v63 }
 0xa9f   : > { %v10400_v44 = vadd.f32 %v9879_v9, %v2932_v39  ;;  %v4129_v9 = vrot.slane %v13208_v38, %v8574_v31 }
 0xaa1   : > { %v2970_v5 = vsel %vm454_vm4, %v10400_v44, -inf }
 0xaaa   : > { %4333 = vmax.xlane.f32.xlu1 %v4332_v17  ;;  %v4115_v17 = vrot.slane %v13208_v38, %v8562_v26 }
 0xaae   : > { %4342 = vmax.xlane.f32.xlu1 %v4341_v30  ;;  %v3819_v30 = vpop.permute.xlu0 %3818 }
 0xab2   : > { %4348 = vmax.xlane.f32.xlu1 %v4347_v48  ;;  %v3845_v48 = vrot.slane %v3819_v30, %v9104_v29  ;;  %v3828_v50 = vpop.permute.xlu0 %3827 }
 0xab3   : > { %v3857_v39 = vrot.slane %v3828_v50, %v9104_v29 }
 0xab6   : > { %2953 = vmax.xlane.f32.xlu1 %v2952_v6 }
 0xaba   : > { %2959 = vmax.xlane.f32.xlu1 %v2958_v14 }
 0xabe   : > { %2965 = vmax.xlane.f32.xlu1 %v2964_v37 }
 0xac2   : > { %2971 = vmax.xlane.f32.xlu1 %v2970_v5 }
 0xac6   : > { %4354 = vmax.xlane.f32.xlu1 %v4353_v0 }
 0xad7   : > { %4096 = vbcast.lane.b32.xlu1 %v4094_v19, 256 }
 0xadb   : > { %4103 = vbcast.lane.b32.xlu1 %v4101_v49, 256 }
 0xadd   : > { %v3834_v37 = vpop.permute.xlu0 %3833 }
 0xade   : > { %v3865_v19 = vrot.slane %v3834_v37, %v9104_v29 }
 0xadf   : > { %4117 = vbcast.lane.b32.xlu1 %v4115_v17, 256  ;;  %v4291_v17 = vrot.slane %v10334_v8, %v13146_v63 }
 0xae3   : > { %4131 = vbcast.lane.b32.xlu1 %v4129_v9, 256  ;;  %v4280_v9 = vcombine.high %v10331_v12, %v10331_v12  ;;  %v4265_v12 = vrot.slane %v10328_v4, %v13145_v34 }
 0xae5   : > { %v4295_v8 = vrot.slane %v4280_v9, %v13146_v63 }
 0xaf1   : > { %v3816_v60 = vpop.permute.xlu1 %3815 }
 0xaf2   : > { %v3841_v24 = vrot.slane %v3816_v60, %v9104_v29 }
 0xaf4   : > { %v3870_v6 = vsel %vm872_vm14, %v3845_v48, %v3841_v24 }
 0xaf5   : > { %v3822_v51 = vpop.permute.xlu1 %3821 }
 0xaf6   : > { %v3849_v58 = vrot.slane %v3822_v51, %v9104_v29 }
 0xaf8   : > { %v3871_v36 = vsel %vm874_vm15, %v3849_v58, %v3870_v6  ;;  %v10441_v58 = vld [vmem:[%s12770_s5] sm:$0xff]  ;;  %v4303_v6 = vrot.slane %v4265_v12, %v13146_v63 }
 0xaf9   : > { %v3825_v27 = vpop.permute.xlu1 %3824  ;;  %v10444_v48 = vadd.f32 %v10441_v58, %v4291_v17  ;;  %v10452_v50 = vadd.f32 %v10441_v58, %v4295_v8  ;;  %v3391_v8 = vcvt.f32.s32 %v10150_v43  ;;  %v3421_v43 = vcvt.f32.s32 %v10154_v13 }
 0xafa   : > { %v3853_v2 = vrot.slane %v3825_v27, %v9104_v29 }
 0xafb   : > { %v4335_v27 = vsel %vm454_vm4, %v10444_v48, -inf  ;;  %13209 = vst [vmem:[#allocation51_spill] sm:$0xff] %v10452_v50 }
 0xafc   : > { %v3872_v14 = vsel %vm876_vm0, %v3853_v2, %v3871_v36  ;;  %v2875_v2 = vrot.slane %v10345_v21, %v13145_v34 }
 0xafd   : > { %v3831_v54 = vpop.permute.xlu1 %3830  ;;  %v3873_v5 = vsel %vm878_vm1, %v3857_v39, %v3872_v14  ;;  %v4338_v14 = vsel %vm454_vm4, %v10452_v50, -inf  ;;  %v10460_v39 = vadd.f32 %v10441_v58, %v4303_v6 }
 0xafe   : > { %v3861_v18 = vrot.slane %v3831_v54, %v9104_v29  ;;  %v2904_v4 = vrot.slane %v2875_v2, %v13146_v63  ;;  %v2897_v54 = vcombine.high %v2875_v2, %v2875_v2 }
 0xaff   : > { %13210 = vst [vmem:[#allocation21_spill] sm:$0xff] %v10460_v39 }
 0xb00   : > { %v3874_v0 = vsel %vm880_vm2, %v3861_v18, %v3873_v5  ;;  %v2882_v18 = vrot.slane %v10368_v35, %v13145_v34  ;;  %v4344_v5 = vsel %vm454_vm4, %v10460_v39, -inf  ;;  %v10468_v21 = vadd.f32 %v10441_v58, %v2904_v4 }
 0xb01   : > { %v3837_v49 = vpop.permute.xlu1 %3836  ;;  %v3875_v30 = vsel %vm882_vm3, %v3865_v19, %v3874_v0  ;;  %v2912_v0 = vrot.slane %v2897_v54, %v13146_v63  ;;  %v4281_v4 = vcombine.high %v4265_v12, %v4265_v12 }
 0xb02   : > { %v3869_v60 = vrot.slane %v3837_v49, %v9104_v29  ;;  %v2920_v49 = vrot.slane %v2882_v18, %v13146_v63  ;;  %v2949_v17 = vsel %vm454_vm4, %v10468_v21, -inf }
 0xb03   : > { %v10475_v9 = vadd.f32 %v10441_v58, %v2912_v0  ;;  %v4311_v12 = vrot.slane %v4281_v4, %v13146_v63 }
 0xb04   : > { %v3876_v51 = vsel %vm884_vm5, %v3869_v60, %v3875_v30  ;;  %v2898_v60 = vcombine.high %v2882_v18, %v2882_v18  ;;  %v3361_v30 = vcvt.f32.s32 %v10137_v61 }
 0xb05   : > { %v3878_v24 = vsel %vm454_vm4, %v3876_v51, 0.0  ;;  %v3346_v51 = vcvt.f32.s32 %v10133_v7  ;;  %v2955_v2 = vsel %vm454_vm4, %v10475_v9, -inf }
 0xb06   : > { %3879 = vadd.xlane.f32.xlu0 %v3878_v24  ;;  %v3376_v24 = vcvt.f32.s32 %v10141_v57  ;;  %v3362_v61 = vshll.u32 %v3361_v30, 16 }
 0xb07   : > { %v3347_v0 = vshll.u32 %v3346_v51, 16 }
 0xb08   : > { %v3377_v57 = vshll.u32 %v3376_v24, 16 }
 0xb0a   : > { %v3344_v36 = vpop.xlane.xlu0 %3343  ;;  %4336 = vmax.xlane.f32.xlu0 %v4335_v27  ;;  %v10482_v27 = vadd.f32 %v10441_v58, %v2920_v49 }
 0xb0e   : > { %v3359_v37 = vpop.xlane.xlu0 %3358  ;;  %4339 = vmax.xlane.f32.xlu0 %v4338_v14  ;;  %v2928_v14 = vrot.slane %v2898_v60, %v13146_v63  ;;  %v3436_v60 = vcvt.f32.s32 %v10158_v25  ;;  %v3451_v25 = vcvt.f32.s32 %v10162_v53 }
 0xb0f   : > { %v3360_v6 = vcvt.f32.s32 %v3359_v37  ;;  %v2961_v37 = vsel %vm454_vm4, %v10482_v27, -inf }
 0xb10   : > { %v10491_v59 = vadd.f32 %v10441_v58, %v2928_v14 }
 0xb11   : > { %v3363_v49 = vadd.s32 %v3362_v61, %v3360_v6  ;;  %v3422_v6 = vshll.u32 %v3421_v43, 16 }
 0xb12   : > { %v3374_v19 = vpop.xlane.xlu0 %3373  ;;  %4345 = vmax.xlane.f32.xlu0 %v4344_v5  ;;  %v3345_v5 = vcvt.f32.s32 %v3344_v36  ;;  %v2967_v14 = vsel %vm454_vm4, %v10491_v59, -inf }
 0xb13   : > { %v3375_v54 = vcvt.f32.s32 %v3374_v19  ;;  %v3406_v19 = vcvt.f32.s32 %v10146_v40  ;;  %v3437_v40 = vshll.u32 %v3436_v60, 16 }
 0xb14   : > { %v3348_v51 = vadd.s32 %v3347_v0, %v3345_v5 }
 0xb15   : > { %v3378_v36 = vadd.s32 %v3377_v57, %v3375_v54  ;;  %v3407_v4 = vshll.u32 %v3406_v19, 16 }
 0xb16   : > { %v3404_v35 = vpop.xlane.xlu0 %3403  ;;  %2950 = vmax.xlane.f32.xlu0 %v2949_v17  ;;  %v3392_v17 = vshll.u32 %v3391_v8, 16  ;;  %v3538_v5 = vrot.slane %v3348_v51, %v9104_v29 }
 0xb17   : > { %v3405_v13 = vcvt.f32.s32 %v3404_v35  ;;  %v3546_v54 = vrot.slane %v3378_v36, %v9104_v29 }
 0xb19   : > { %v3408_v57 = vadd.s32 %v3407_v4, %v3405_v13  ;;  %v13212_v4 = vld [vmem:[#allocation3_spill] sm:$0xff] }
 0xb1a   : > { %v3389_v18 = vpop.xlane.xlu0 %3388  ;;  %2956 = vmax.xlane.f32.xlu0 %v2955_v2  ;;  %v3542_v2 = vrot.slane %v3363_v49, %v9104_v29 }
 0xb1b   : > { %v3390_v7 = vcvt.f32.s32 %v3389_v18  ;;  %v10500_v18 = vadd.f32 %v10441_v58, %v4311_v12  ;;  %v3452_v12 = vshll.u32 %v3451_v25, 16  ;;  %v4087_v25 = vrot.slane %v13208_v38, %v13146_v63 }
 0xb1d   : > { %v3393_v24 = vadd.s32 %v3392_v17, %v3390_v7  ;;  %13211 = vst [vmem:[#allocation69_spill] sm:$0xff] %v10500_v18  ;;  %v3567_v17 = vsel %vm872_vm14, %v3542_v2, %v3538_v5  ;;  %v4350_v49 = vsel %vm454_vm4, %v10500_v18, -inf  ;;  %v4136_v5 = vrot.slane %v13208_v38, %v13156_v47 }
 0xb1e   : > { %v3419_v30 = vpop.xlane.xlu0 %3418  ;;  %2962 = vmax.xlane.f32.xlu0 %v2961_v37  ;;  %v3568_v37 = vsel %vm874_vm15, %v3546_v54, %v3567_v17  ;;  %v4108_v54 = vrot.slane %v13208_v38, %v13148_v33 }
 0xb1f   : > { %v3420_v8 = vcvt.f32.s32 %v3419_v30  ;;  %v3550_v35 = vrot.slane %v3393_v24, %v9104_v29  ;;  %v3554_v30 = vrot.slane %v3408_v57, %v9104_v29 }
 0xb21   : > { %v3423_v7 = vadd.s32 %v3422_v6, %v3420_v8  ;;  %v3569_v19 = vsel %vm876_vm0, %v3550_v35, %v3568_v37  ;;  %v13213_v35 = vmov 0  }
 0xb22   : > { %v3434_v61 = vpop.xlane.xlu0 %3433  ;;  %2968 = vmax.xlane.f32.xlu0 %v2967_v14  ;;  %v3570_v8 = vsel %vm878_vm1, %v3554_v30, %v3569_v19 }
 0xb23   : > { %v3435_v0 = vcvt.f32.s32 %v3434_v61  ;;  %v3558_v60 = vrot.slane %v3423_v7, %v9104_v29  ;;  %v4122_v61 = vrot.slane %v13208_v38, %v13155_v20  ;;  %v4156_v7 = vsel %vm3888_vm7, 1, %v13213_v35 }
 0xb25   : > { %v3438_v43 = vadd.s32 %v3437_v40, %v3435_v0  ;;  %v3571_v13 = vsel %vm880_vm2, %v3558_v60, %v3570_v8  ;;  %v13214_v0 = vld [vmem:[#allocation19_spill] sm:$0xff] }
 0xb26   : > { %v3449_v53 = vpop.xlane.xlu0 %3448  ;;  %4351 = vmax.xlane.f32.xlu0 %v4350_v49  ;;  %v5125_v57 = vrot.slane %v13214_v0, %v13146_v63  ;;  %v5146_v17 = vrot.slane %v13214_v0, %v13148_v33 }
 0xb27   : > { %v3450_v36 = vcvt.f32.s32 %v3449_v53  ;;  %v3562_v51 = vrot.slane %v3438_v43, %v9104_v29  ;;  %v5160_v43 = vrot.slane %v13214_v0, %v13155_v20 }
 0xb29   : > { %v3453_v24 = vadd.s32 %v3452_v12, %v3450_v36  ;;  %v3572_v2 = vsel %vm882_vm3, %v3562_v51, %v3571_v13 }
 0xb2b   : > { %v3566_v6 = vrot.slane %v3453_v24, %v9104_v29 }
 0xb2d   : > { %v3573_v14 = vsel %vm884_vm5, %v3566_v6, %v3572_v2 }
 0xb2e   : > { %v3574_v40 = vsel %vm3122_vm12, %v3573_v14, %v13212_v4 }
 0xb2f   : > { %3576 = vst.msk [vmem:[#allocation2 + $0x10] sm:$0xff] %vm454_vm4, %v3574_v40 }
 0xb33   : > { %v10540_v38 = vpop.xlane.xlu1 %4333 }
 0xb34   : > { %vm4356_vm11 = vcmp.eq.f32.partialorder %v10355_v62, %v10540_v38 }
 0xb37   : > { %v10542_v49 = vpop.xlane.xlu1 %4342 }
 0xb38   : > { %13215 = vst [vmem:[#allocation66_spill] sm:$0xff] %v10542_v49 }
 0xb3b   : > { %v10544_v37 = vpop.xlane.xlu1 %4348 }
 0xb3c   : > { %4089 = vbcast.lane.b32.xlu0 %v4087_v25, 256  ;;  %13216 = vst [vmem:[#allocation46_spill] sm:$0xff] %v10544_v37 }
 0xb3f   : > { %v10551_v36 = vpop.xlane.xlu1 %2953 }
 0xb40   : > { %4110 = vbcast.lane.b32.xlu0 %v4108_v54, 256 }
 0xb43   : > { %v10555_v51 = vpop.xlane.xlu1 %2959 }
 0xb44   : > { %4124 = vbcast.lane.b32.xlu0 %v4122_v61, 256 }
 0xb48   : > { %4138 = vbcast.lane.b32.xlu0 %v4136_v5, 256 }
 0xb4c   : > { %4158 = vperm.xlu0 %8107, %v4156_v7  }
 0xb50   : > { %5127 = vbcast.lane.b32.xlu0 %v5125_v57, 256 }
 0xb51   : > { %8108 = vset.pattern.permute.xlu0 %v13213_v35 }
 0xb54   : > { %5148 = vbcast.lane.b32.xlu0 %v5146_v17, 256 }
 0xb58   : > { %5162 = vbcast.lane.b32.xlu0 %v5160_v43, 256 }
 0xb8f   : > { %v3880_v53 = vpop.xlane.xlu0 %3879 }
 0xb90   : > { %v3881_v12 = vadd.f32 %v3880_v53, %v10165_v46  ;;  %v10563_v46 = vpop.xlane.xlu1 %2965 }
 0xb92   : > { %v3882_v19 = vmul.f32 %v3881_v12, %v10169_v11 }
 0xb93   : > { %v10548_v60 = vpop.xlane.xlu0 %4336 }
 0xb94   : > { %3884 = vrot.lane.b32.xlu1 %v3882_v19, %s8447_s9  ;;  %v10569_v40 = vpop.xlane.xlu1 %2971 }
 0xb97   : > { %v10553_v30 = vpop.xlane.xlu0 %4339 }
 0xb98   : > { %v10579_v7 = vpop.xlane.xlu1 %4354 }
 0xb99   : > { %13218 = vst [vmem:[#allocation55_spill] sm:$0xff] %v10579_v7 }
 0xb9b   : > { %v10557_v24 = vpop.xlane.xlu0 %4345 }
 0xb9c   : > { %13217 = vst [vmem:[#allocation53_spill] sm:$0xff] %v10557_v24  ;;  %v10584_v53 = vpop.permute.xlu1 %4096 }
 0xb9f   : > { %v10559_v8 = vpop.xlane.xlu0 %2950 }
 0xba0   : > { %v2973_v13 = vsub.f32 %v10468_v21, %v10559_v8 }
 0xba2   : > { %v2981_v11 = vmul.f32 1.442695, %v2973_v13  ;;  %v4493_v13 = vadd.f32 %v10548_v60, %v10584_v53 }
 0xba3   : > { %v10565_v6 = vpop.xlane.xlu0 %2956 }
 0xba4   : > { %8229 = vpow2.f32 %v2981_v11  ;;  %v2975_v2 = vsub.f32 %v10475_v9, %v10565_v6 }
 0xba6   : > { %v2985_v14 = vmul.f32 1.442695, %v2975_v2  ;;  %v10593_v2 = vpop.permute.xlu1 %4103 }
 0xba7   : > { %v10571_v25 = vpop.xlane.xlu0 %2962 }
 0xba8   : > { %8231 = vpow2.f32 %v2985_v14  ;;  %v2977_v54 = vsub.f32 %v10482_v27, %v10571_v25 }
 0xbaa   : > { %v2989_v61 = vmul.f32 1.442695, %v2977_v54  ;;  %v4494_v54 = vadd.f32 %v10553_v30, %v10593_v2 }
 0xbab   : > { %v10575_v21 = vpop.xlane.xlu0 %2968 }
 0xbac   : > { %8233 = vpow2.f32 %v2989_v61  ;;  %v2979_v5 = vsub.f32 %v10491_v59, %v10575_v21 }
 0xbae   : > { %v2993_v57 = vmul.f32 1.442695, %v2979_v5 }
 0xbaf   : > { %v10581_v9 = vpop.xlane.xlu0 %4351 }
 0xbb0   : > { %13219 = vst [vmem:[#allocation41_spill] sm:$0xff] %v10581_v9  ;;  %8235 = vpow2.f32 %v2993_v57  ;;  %v10599_v57 = vpop.permute.xlu1 %4117 }
 0xbb1   : > { %v8230_v17 = vpop.eup %8229 }
 0xbb2   : > { %v2997_v43 = vsel %vm454_vm4, %v8230_v17, 0.0 }
 0xbb3   : > { %2998 = vadd.xlane.f32.xlu0 %v2997_v43  ;;  %v10586_v27 = vpop.permute.xlu0 %4089  ;;  %v4496_v43 = vadd.f32 %v10557_v24, %v10599_v57 }
 0xbb4   : > { %v4492_v12 = vadd.f32 %v10540_v38, %v10586_v27 }
 0xbb5   : > { %v8232_v19 = vpop.eup %8231 }
 0xbb6   : > { %4509 = vperm.xlu1 %8105, %v4492_v12   ;;  %v3003_v59 = vsel %vm454_vm4, %v8232_v19, 0.0 }
 0xbb7   : > { %3004 = vadd.xlane.f32.xlu0 %v3003_v59  ;;  %v10601_v17 = vpop.permute.xlu0 %4110 }
 0xbb8   : > { %v4495_v12 = vadd.f32 %v10542_v49, %v10601_v17 }
 0xbb9   : > { %v8234_v11 = vpop.eup %8233 }
 0xbba   : > { %4512 = vperm.xlu1 %8105, %v4493_v13   ;;  %v3009_v14 = vsel %vm454_vm4, %v8234_v11, 0.0  ;;  %v10611_v13 = vpop.permute.xlu1 %4131 }
 0xbbb   : > { %3010 = vadd.xlane.f32.xlu0 %v3009_v14  ;;  %v10607_v19 = vpop.permute.xlu0 %4124  ;;  %v4498_v11 = vadd.f32 %v10581_v9, %v10611_v13 }
 0xbbc   : > { %v4497_v59 = vadd.f32 %v10544_v37, %v10607_v19 }
 0xbbd   : > { %v8236_v61 = vpop.eup %8235 }
 0xbbe   : > { %4515 = vperm.xlu1 %8105, %v4494_v54   ;;  %v3015_v5 = vsel %vm454_vm4, %v8236_v61, 0.0  ;;  %v5174_v61 = vrot.slane %v13214_v0, %v13156_v47 }
 0xbbf   : > { %3016 = vadd.xlane.f32.xlu0 %v3015_v5  ;;  %v10615_v14 = vpop.permute.xlu0 %4138  ;;  %v5132_v5 = vrot.slane %v13214_v0, %v8541_v16 }
 0xbc0   : > { %v4499_v54 = vadd.f32 %v10579_v7, %v10615_v14 }
 0xbc2   : > { %4521 = vperm.xlu1 %8105, %v4496_v43   ;;  %v5139_v43 = vrot.slane %v13214_v0, %v8552_v22 }
 0xbc6   : > { %4518 = vperm.xlu1 %8105, %v4495_v12   ;;  %v5153_v12 = vrot.slane %v13214_v0, %v8562_v26 }
 0xbca   : > { %4524 = vperm.xlu1 %8105, %v4497_v59   ;;  %v5167_v59 = vrot.slane %v13214_v0, %v8574_v31 }
 0xbce   : > { %4527 = vperm.xlu1 %8105, %v4498_v11   ;;  %v2974_v11 = vsub.f32 %v10381_v52, %v10551_v36 }
 0xbd2   : > { %4530 = vperm.xlu1 %8105, %v4499_v54   ;;  %v2983_v54 = vmul.f32 1.442695, %v2974_v11 }
 0xbd4   : > { %8237 = vpow2.f32 %v2983_v54 }
 0xbd5   : > { %5176 = vbcast.lane.b32.xlu0 %v5174_v61, 256  ;;  %v2976_v61 = vsub.f32 %v10388_v42, %v10555_v51 }
 0xbd6   : > { %5134 = vbcast.lane.b32.xlu1 %v5132_v5, 256 }
 0xbd7   : > { %v2987_v5 = vmul.f32 1.442695, %v2976_v61 }
 0xbd9   : > { %8239 = vpow2.f32 %v2987_v5 }
 0xbda   : > { %5141 = vbcast.lane.b32.xlu1 %v5139_v43, 256  ;;  %v2978_v43 = vsub.f32 %v10394_v1, %v10563_v46 }
 0xbdc   : > { %v2991_v7 = vmul.f32 1.442695, %v2978_v43 }
 0xbde   : > { %5155 = vbcast.lane.b32.xlu1 %v5153_v12, 256  ;;  %v2980_v12 = vsub.f32 %v10400_v44, %v10569_v40  ;;  %8241 = vpow2.f32 %v2991_v7 }
 0xbe0   : > { %v2995_v0 = vmul.f32 1.442695, %v2980_v12 }
 0xbe2   : > { %5169 = vbcast.lane.b32.xlu1 %v5167_v59, 256  ;;  %8243 = vpow2.f32 %v2995_v0  ;;  %v8238_v59 = vpop.eup %8237 }
 0xbe3   : > { %v3000_v52 = vsel %vm454_vm4, %v8238_v59, 0.0  ;;  %v10643_v59 = vpop.permute.xlu0 %4158 }
 0xbe4   : > { %13221 = vst [vmem:[#allocation58_spill] sm:$0xff] %v10643_v59  ;;  %vm4160_vm9 = vcmp.eq.s32.totalorder %v10643_v59, 1 }
 0xbe6   : > { %v8240_v11 = vpop.eup %8239 }
 0xbe7   : > { %v3006_v42 = vsel %vm454_vm4, %v8240_v11, 0.0  ;;  %v10645_v18 = vpop.permute.xlu0 %5127 }
 0xbeb   : > { %v8242_v54 = vpop.eup %8241  ;;  %v10653_v55 = vpop.permute.xlu0 %5148 }
 0xbec   : > { %v3012_v61 = vsel %vm454_vm4, %v8242_v54, 0.0 }
 0xbef   : > { %v8244_v1 = vpop.eup %8243 }
 0xbf0   : > { %v3018_v5 = vsel %vm454_vm4, %v8244_v1, 0.0 }
 0xc06   : > { %3001 = vadd.xlane.f32.xlu1 %v3000_v52  ;;  %v10641_v44 = vpop.permute.xlu1 %3884 }
 0xc07   : > { %13220 = vst [vmem:[#allocation70_spill] sm:$0xff] %v10641_v44 }
 0xc0a   : > { %3007 = vadd.xlane.f32.xlu1 %v3006_v42 }
 0xc0e   : > { %3013 = vadd.xlane.f32.xlu1 %v3012_v61 }
 0xc12   : > { %3019 = vadd.xlane.f32.xlu1 %v3018_v5 }
 0xc31   : > { %v4510_v7 = vpop.permute.xlu1 %4509 }
 0xc32   : > { %v4535_v61 = vrot.slane %v4510_v7, %v9104_v29 }
 0xc35   : > { %v4513_v0 = vpop.permute.xlu1 %4512 }
 0xc36   : > { %v4539_v11 = vrot.slane %v4513_v0, %v9104_v29 }
 0xc38   : > { %v4564_v5 = vsel %vm872_vm14, %v4539_v11, %v4535_v61  ;;  %v10664_v61 = vpop.permute.xlu0 %5162 }
 0xc39   : > { %v4516_v43 = vpop.permute.xlu1 %4515 }
 0xc3a   : > { %v4543_v42 = vrot.slane %v4516_v43, %v9104_v29 }
 0xc3c   : > { %v4565_v44 = vsel %vm874_vm15, %v4543_v42, %v4564_v5 }
 0xc3d   : > { %v4522_v12 = vpop.permute.xlu1 %4521 }
 0xc3e   : > { %v4551_v0 = vrot.slane %v4522_v12, %v9104_v29 }
 0xc41   : > { %v4519_v52 = vpop.permute.xlu1 %4518 }
 0xc42   : > { %v4547_v1 = vrot.slane %v4519_v52, %v9104_v29 }
 0xc44   : > { %v4566_v37 = vsel %vm876_vm0, %v4547_v1, %v4565_v44 }
 0xc45   : > { %v4525_v54 = vpop.permute.xlu1 %4524  ;;  %v4567_v24 = vsel %vm878_vm1, %v4551_v0, %v4566_v37 }
 0xc46   : > { %v4555_v39 = vrot.slane %v4525_v54, %v9104_v29 }
 0xc48   : > { %v4568_v52 = vsel %vm880_vm2, %v4555_v39, %v4567_v24  ;;  %v2999_v39 = vpop.xlane.xlu0 %2998 }
 0xc49   : > { %v4528_v9 = vpop.permute.xlu1 %4527  ;;  %8245 = vlog2.f32 %v2999_v39 }
 0xc4a   : > { %v4559_v43 = vrot.slane %v4528_v9, %v9104_v29 }
 0xc4c   : > { %v4569_v42 = vsel %vm882_vm3, %v4559_v43, %v4568_v52 }
 0xc4d   : > { %v4531_v7 = vpop.permute.xlu1 %4530 }
 0xc4e   : > { %v4563_v11 = vrot.slane %v4531_v7, %v9104_v29 }
 0xc50   : > { %v4570_v44 = vsel %vm884_vm5, %v4563_v11, %v4569_v42 }
 0xc51   : > { %v10670_v12 = vsel %vm4160_vm9, %v4570_v44, %v10305_v41 }
 0xc52   : > { %v5273_v37 = vcombine.high %v10670_v12, %v10670_v12  ;;  %v5280_v9 = vrot.slane %v10670_v12, %v13145_v34 }
 0xc54   : > { %v5296_v24 = vrot.slane %v5280_v9, %v13145_v34  ;;  %v5287_v54 = vrot.slane %v5273_v37, %v13145_v34  ;;  %v5288_v1 = vcombine.high %v5280_v9, %v5280_v9  ;;  %v3005_v9 = vpop.xlane.xlu0 %3004 }
 0xc55   : > { %8247 = vlog2.f32 %v3005_v9 }
 0xc56   : > { %v5325_v5 = vrot.slane %v5296_v24, %v13146_v63  ;;  %v5303_v0 = vrot.slane %v5287_v54, %v13145_v34  ;;  %v5310_v43 = vrot.slane %v5288_v1, %v13145_v34  ;;  %v5318_v41 = vcombine.high %v5296_v24, %v5296_v24 }
 0xc57   : > { %v5289_v37 = vcombine.high %v5287_v54, %v5287_v54 }
 0xc58   : > { %v10682_v7 = vadd.f32 %v10441_v58, %v5325_v5  ;;  %v5341_v52 = vrot.slane %v5303_v0, %v13146_v63  ;;  %v5329_v11 = vrot.slane %v5310_v43, %v13146_v63  ;;  %v5319_v42 = vcombine.high %v5303_v0, %v5303_v0 }
 0xc59   : > { %v5333_v44 = vrot.slane %v5318_v41, %v13146_v63  ;;  %v5320_v45 = vcombine.high %v5310_v43, %v5310_v43 }
 0xc5a   : > { %13222 = vst [vmem:[#allocation57_spill] sm:$0xff] %v10682_v7  ;;  %v5370_v49 = vsel %vm454_vm4, %v10682_v7, -inf  ;;  %v10690_v50 = vadd.f32 %v10441_v58, %v5341_v52  ;;  %v10693_v24 = vadd.f32 %v10441_v58, %v5329_v11  ;;  %v5349_v1 = vrot.slane %v5319_v42, %v13146_v63 }
 0xc5b   : > { %5371 = vmax.xlane.f32.xlu1 %v5370_v49  ;;  %v10704_v43 = vadd.f32 %v10441_v58, %v5333_v44  ;;  %v5337_v41 = vrot.slane %v5320_v45, %v13146_v63  ;;  %v5317_v52 = vrot.slane %v5289_v37, %v13145_v34  ;;  %v3011_v49 = vpop.xlane.xlu0 %3010 }
 0xc5c   : > { %13223 = vst [vmem:[#allocation26_spill] sm:$0xff] %v10690_v50  ;;  %13224 = vst [vmem:[#allocation40_spill] sm:$0xff] %v10693_v24  ;;  %v5382_v5 = vsel %vm454_vm4, %v10690_v50, -inf  ;;  %v10699_v0 = vadd.f32 %v10441_v58, %v5349_v1  ;;  %v5373_v54 = vsel %vm454_vm4, %v10693_v24, -inf  ;;  %8249 = vlog2.f32 %v3011_v49  ;;  %v4616_v24 = vld [vmem:[%s8521_s14] sm:$0xff] }
 0xc5d   : > { %5383 = vmax.xlane.f32.xlu0 %v5382_v5  ;;  %13226 = vst [vmem:[#allocation42_spill] sm:$0xff] %v10704_v43  ;;  %v5376_v39 = vsel %vm454_vm4, %v10704_v43, -inf  ;;  %v10713_v42 = vadd.f32 %v10441_v58, %v5337_v41  ;;  %v5345_v44 = vrot.slane %v5317_v52, %v13146_v63  ;;  %v5321_v1 = vcombine.high %v5317_v52, %v5317_v52 }
 0xc5e   : > { %13225 = vst [vmem:[#allocation43_spill] sm:$0xff] %v10699_v0  ;;  %v5388_v11 = vsel %vm454_vm4, %v10699_v0, -inf  ;;  %vm4926_vm10 = vcmp.gt.f32.partialorder %v4616_v24, 0.0  ;;  %v12913_v24 = vmov 6  }
 0xc5f   : > { %5374 = vmax.xlane.f32.xlu1 %v5373_v54  ;;  %13227 = vst [vmem:[#allocation17_spill] sm:$0xff] %v10713_v42  ;;  %v3017_v45 = vpop.xlane.xlu0 %3016  ;;  %v5379_v37 = vsel %vm454_vm4, %v10713_v42, -inf  ;;  %v10719_v5 = vadd.f32 %v10441_v58, %v5345_v44  ;;  %v5353_v9 = vrot.slane %v5321_v1, %v13146_v63  ;;  %v8246_v54 = vpop.eup %8245 }
 0xc60   : > { %8251 = vlog2.f32 %v3017_v45  ;;  %v3022_v52 = vmul.f32 0.6931472, %v8246_v54  ;;  %v10733_v54 = vpop.permute.xlu1 %5134 }
 0xc61   : > { %5389 = vmax.xlane.f32.xlu0 %v5388_v11  ;;  %13228 = vst [vmem:[#allocation15_spill] sm:$0xff] %v10719_v5  ;;  %v5385_v41 = vsel %vm454_vm4, %v10719_v5, -inf  ;;  %v10725_v11 = vadd.f32 %v10441_v58, %v5353_v9 }
 0xc62   : > { %v8248_v49 = vpop.eup %8247  ;;  %v3037_v44 = vadd.f32 %v3022_v52, %v10559_v8 }
 0xc63   : > { %5377 = vmax.xlane.f32.xlu1 %v5376_v39  ;;  %13229 = vst [vmem:[#allocation25_spill] sm:$0xff] %v10725_v11  ;;  %v5391_v39 = vsel %vm454_vm4, %v10725_v11, -inf  ;;  %v3026_v0 = vmul.f32 0.6931472, %v8248_v49 }
 0xc64   : > { %v3110_v42 = vadd.f32 %v9956_v15, %v3037_v44  ;;  %v10738_v52 = vpop.permute.xlu1 %5141 }
 0xc65   : > { %v3039_v45 = vadd.f32 %v3026_v0, %v10565_v6 }
 0xc67   : > { %5380 = vmax.xlane.f32.xlu1 %v5379_v37  ;;  %v3112_v7 = vadd.f32 %v9950_v23, %v3039_v45 }
 0xc68   : > { %v10741_v15 = vpop.permute.xlu1 %5155 }
 0xc69   : > { %v8250_v1 = vpop.eup %8249  ;;  %13230 = vst [vmem:[#allocation67_spill] sm:$0xff] %v10741_v15 }
 0xc6a   : > { %v3030_v37 = vmul.f32 0.6931472, %v8250_v1 }
 0xc6b   : > { %5386 = vmax.xlane.f32.xlu1 %v5385_v41 }
 0xc6c   : > { %v3041_v9 = vadd.f32 %v3030_v37, %v10571_v25  ;;  %v10743_v0 = vpop.permute.xlu1 %5169 }
 0xc6d   : > { %v8252_v5 = vpop.eup %8251  ;;  %13231 = vst [vmem:[#allocation34_spill] sm:$0xff] %v10743_v0 }
 0xc6e   : > { %v3034_v41 = vmul.f32 0.6931472, %v8252_v5  ;;  %v3114_v8 = vadd.f32 %v9970_v10, %v3041_v9  ;;  %v13232_v9 = vld [vmem:[#allocation32_spill] sm:$0xff] }
 0xc6f   : > { %5392 = vmax.xlane.f32.xlu1 %v5391_v39 }
 0xc70   : > { %v3043_v39 = vadd.f32 %v3034_v41, %v10575_v21 }
 0xc72   : > { %v3116_v6 = vadd.f32 %v9974_v56, %v3043_v39 }
 0xc77   : > { %3132 = vperm.xlu0 %8108, %v3110_v42  }
 0xc7b   : > { %3138 = vperm.xlu0 %8108, %v3112_v7  }
 0xc7f   : > { %3144 = vperm.xlu0 %8108, %v3114_v8  }
 0xc83   : > { %3150 = vperm.xlu0 %8108, %v3116_v6  }
 0xc8f   : > { %v3002_v25 = vpop.xlane.xlu1 %3001 }
 0xc90   : > { %8253 = vlog2.f32 %v3002_v25  ;;  %v13233_v25 = vld [vmem:[#allocation39_spill] sm:$0xff] }
 0xc93   : > { %v3008_v42 = vpop.xlane.xlu1 %3007 }
 0xc94   : > { %8255 = vlog2.f32 %v3008_v42 }
 0xc97   : > { %v3014_v23 = vpop.xlane.xlu1 %3013 }
 0xc98   : > { %8257 = vlog2.f32 %v3014_v23  ;;  %v13234_v23 = vld [vmem:[#allocation35_spill] sm:$0xff] }
 0xc9b   : > { %v3020_v7 = vpop.xlane.xlu1 %3019 }
 0xc9c   : > { %8259 = vlog2.f32 %v3020_v7 }
 0xc9d   : > { %v8254_v21 = vpop.eup %8253 }
 0xc9e   : > { %v3024_v10 = vmul.f32 0.6931472, %v8254_v21  ;;  %v10757_v21 = vpop.permute.xlu0 %5176 }
 0xca0   : > { %v3038_v5 = vadd.f32 %v3024_v10, %v10551_v36 }
 0xca1   : > { %v8256_v49 = vpop.eup %8255 }
 0xca2   : > { %v3028_v44 = vmul.f32 0.6931472, %v8256_v49  ;;  %v3111_v56 = vadd.f32 %v9948_v3, %v3038_v5 }
 0xca4   : > { %v3040_v1 = vadd.f32 %v3028_v44, %v10555_v51  ;;  %3135 = vperm.xlu1 %8105, %v3111_v56  }
 0xca5   : > { %v8258_v45 = vpop.eup %8257 }
 0xca6   : > { %v3032_v37 = vmul.f32 0.6931472, %v8258_v45  ;;  %v3113_v41 = vadd.f32 %v13232_v9, %v3040_v1 }
 0xca8   : > { %v3042_v39 = vadd.f32 %v3032_v37, %v10563_v46  ;;  %3141 = vperm.xlu1 %8105, %v3113_v41  }
 0xca9   : > { %v8260_v8 = vpop.eup %8259 }
 0xcaa   : > { %v3036_v6 = vmul.f32 0.6931472, %v8260_v8  ;;  %v3115_v42 = vadd.f32 %v13233_v25, %v3042_v39 }
 0xcac   : > { %v3044_v36 = vadd.f32 %v3036_v6, %v10569_v40  ;;  %3147 = vperm.xlu1 %8105, %v3115_v42  }
 0xcae   : > { %v3117_v7 = vadd.f32 %v13234_v23, %v3044_v36 }
 0xcb0   : > { %3153 = vperm.xlu1 %8105, %v3117_v7  }
 0xce4   : > { %v10753_v3 = vpop.xlane.xlu1 %5371 }
 0xce5   : > { %13235 = vst [vmem:[#allocation52_spill] sm:$0xff] %v10753_v3 }
 0xce6   : > { %v10761_v46 = vpop.xlane.xlu0 %5383 }
 0xce7   : > { %13238 = vst [vmem:[#allocation30_spill] sm:$0xff] %v10761_v46 }
 0xce8   : > { %v10755_v51 = vpop.xlane.xlu1 %5374 }
 0xce9   : > { %13236 = vst [vmem:[#allocation33_spill] sm:$0xff] %v10755_v51 }
 0xcea   : > { %v10765_v49 = vpop.xlane.xlu0 %5389 }
 0xceb   : > { %13240 = vst [vmem:[#allocation59_spill] sm:$0xff] %v10765_v49 }
 0xcec   : > { %v10759_v10 = vpop.xlane.xlu1 %5377 }
 0xced   : > { %13237 = vst [vmem:[#allocation36_spill] sm:$0xff] %v10759_v10 }
 0xcf0   : > { %v10763_v5 = vpop.xlane.xlu1 %5380 }
 0xcf1   : > { %13239 = vst [vmem:[#allocation37_spill] sm:$0xff] %v10763_v5 }
 0xcf2   : > { %v3133_v40 = vpop.permute.xlu0 %3132 }
 0xcf3   : > { %v3158_v37 = vrot.slane %v3133_v40, %v9104_v29 }
 0xcf4   : > { %v10767_v44 = vpop.xlane.xlu1 %5386 }
 0xcf5   : > { %13241 = vst [vmem:[#allocation72_spill] sm:$0xff] %v10767_v44 }
 0xcf6   : > { %v3139_v1 = vpop.permute.xlu0 %3138 }
 0xcf7   : > { %v3166_v8 = vrot.slane %v3139_v1, %v9104_v29 }
 0xcf8   : > { %v10769_v56 = vpop.xlane.xlu1 %5392 }
 0xcf9   : > { %13242 = vst [vmem:[#allocation64_spill] sm:$0xff] %v10769_v56 }
 0xcfa   : > { %v3145_v41 = vpop.permute.xlu0 %3144 }
 0xcfb   : > { %v3174_v23 = vrot.slane %v3145_v41, %v9104_v29 }
 0xcfe   : > { %v3151_v11 = vpop.permute.xlu0 %3150 }
 0xd1f   : > { %v3136_v45 = vpop.permute.xlu1 %3135 }
 0xd20   : > { %v3162_v9 = vrot.slane %v3136_v45, %v9104_v29 }
 0xd22   : > { %v3187_v39 = vsel %vm872_vm14, %v3162_v9, %v3158_v37  ;;  %v3182_v37 = vrot.slane %v3151_v11, %v9104_v29 }
 0xd23   : > { %v3142_v6 = vpop.permute.xlu1 %3141  ;;  %v3188_v42 = vsel %vm874_vm15, %v3166_v8, %v3187_v39 }
 0xd24   : > { %v3170_v25 = vrot.slane %v3142_v6, %v9104_v29 }
 0xd26   : > { %v3189_v36 = vsel %vm876_vm0, %v3170_v25, %v3188_v42 }
 0xd27   : > { %v3148_v7 = vpop.permute.xlu1 %3147  ;;  %v3190_v45 = vsel %vm878_vm1, %v3174_v23, %v3189_v36 }
 0xd28   : > { %v3178_v40 = vrot.slane %v3148_v7, %v9104_v29 }
 0xd2a   : > { %v3191_v50 = vsel %vm880_vm2, %v3178_v40, %v3190_v45 }
 0xd2b   : > { %v3154_v1 = vpop.permute.xlu1 %3153  ;;  %v3192_v6 = vsel %vm882_vm3, %v3182_v37, %v3191_v50 }
 0xd2c   : > { %v3186_v9 = vrot.slane %v3154_v1, %v9104_v29 }
 0xd2e   : > { %v3193_v39 = vsel %vm884_vm5, %v3186_v9, %v3192_v6 }
 0xd2f   : > { %v10789_v41 = vsel %vm3122_vm12, %v3193_v39, %v10339_v28 }
 0xd30   : > { %v3890_v8 = vcombine.high %v10789_v41, %v10789_v41  ;;  %v3897_v25 = vrot.slane %v10789_v41, %v13145_v34 }
 0xd32   : > { %v3913_v11 = vrot.slane %v3897_v25, %v13145_v34  ;;  %v3905_v42 = vcombine.high %v3897_v25, %v3897_v25  ;;  %v3904_v36 = vrot.slane %v3890_v8, %v13145_v34 }
 0xd34   : > { %v3942_v50 = vrot.slane %v3913_v11, %v13146_v63  ;;  %v3927_v23 = vrot.slane %v3905_v42, %v13145_v34  ;;  %v3920_v7 = vrot.slane %v3904_v36, %v13145_v34  ;;  %v3935_v32 = vcombine.high %v3913_v11, %v3913_v11 }
 0xd35   : > { %v5531_v42 = vadd.f32 %v10755_v51, %v10733_v54 }
 0xd36   : > { %v3979_v28 = vadd.f32 %v10441_v58, %v3942_v50  ;;  %v3946_v40 = vrot.slane %v3927_v23, %v13146_v63  ;;  %v3958_v45 = vrot.slane %v3920_v7, %v13146_v63  ;;  %v3950_v37 = vrot.slane %v3935_v32, %v13146_v63 }
 0xd37   : > { %v5530_v50 = vadd.f32 %v10753_v3, %v10645_v18  ;;  %v5532_v32 = vadd.f32 %v10759_v10, %v10738_v52 }
 0xd38   : > { %v3987_v1 = vsel %vm454_vm4, %v3979_v28, -inf  ;;  %v3980_v9 = vadd.f32 %v10441_v58, %v3946_v40  ;;  %v3983_v6 = vadd.f32 %v10441_v58, %v3958_v45  ;;  %v3981_v8 = vadd.f32 %v10441_v58, %v3950_v37 }
 0xd39   : > { %3988 = vmax.xlane.f32.xlu0 %v3987_v1  ;;  %v5533_v40 = vadd.f32 %v10763_v5, %v10653_v55  ;;  %v5534_v45 = vadd.f32 %v10761_v46, %v10741_v15  ;;  %v5535_v37 = vadd.f32 %v10767_v44, %v10664_v61  ;;  %v5536_v1 = vadd.f32 %v10765_v49, %v10743_v0 }
 0xd3a   : > { %v3990_v39 = vsel %vm454_vm4, %v3980_v9, -inf  ;;  %v3999_v25 = vsel %vm454_vm4, %v3983_v6, -inf  ;;  %v3993_v11 = vsel %vm454_vm4, %v3981_v8, -inf }
 0xd3b   : > { %3991 = vmax.xlane.f32.xlu1 %v3990_v39  ;;  %v5537_v39 = vadd.f32 %v10769_v56, %v10757_v21 }
 0xd3d   : > { %4000 = vmax.xlane.f32.xlu0 %v3999_v25  ;;  %v3937_v25 = vcombine.high %v3927_v23, %v3927_v23 }
 0xd3f   : > { %3994 = vmax.xlane.f32.xlu1 %v3993_v11  ;;  %v3906_v11 = vcombine.high %v3904_v36, %v3904_v36 }
 0xd50   : > { %5550 = vperm.xlu1 %8105, %v5531_v42   ;;  %v3954_v42 = vrot.slane %v3937_v25, %v13146_v63 }
 0xd53   : > { %5547 = vperm.xlu0 %8108, %v5530_v50   ;;  %v3934_v50 = vrot.slane %v3906_v11, %v13145_v34 }
 0xd54   : > { %5553 = vperm.xlu1 %8105, %v5532_v32   ;;  %v3982_v32 = vadd.f32 %v10441_v58, %v3954_v42  ;;  %v12905_v42 = vmov 5  }
 0xd55   : > { %v3938_v44 = vcombine.high %v3934_v50, %v3934_v50 }
 0xd57   : > { %8109 = vset.pattern.permute.xlu0 %v12905_v42 }
 0xd58   : > { %5556 = vperm.xlu1 %8105, %v5533_v40   ;;  %v3962_v40 = vrot.slane %v3934_v50, %v13146_v63 }
 0xd5a   : > { %v3984_v49 = vadd.f32 %v10441_v58, %v3962_v40 }
 0xd5c   : > { %5559 = vperm.xlu1 %8105, %v5534_v45   ;;  %v3936_v45 = vcombine.high %v3920_v7, %v3920_v7  ;;  %v4002_v23 = vsel %vm454_vm4, %v3984_v49, -inf }
 0xd60   : > { %5562 = vperm.xlu1 %8105, %v5535_v37   ;;  %v3996_v37 = vsel %vm454_vm4, %v3982_v32, -inf }
 0xd64   : > { %5565 = vperm.xlu1 %8105, %v5536_v1   ;;  %v3966_v1 = vrot.slane %v3936_v45, %v13146_v63 }
 0xd66   : > { %v3985_v36 = vadd.f32 %v10441_v58, %v3966_v1 }
 0xd68   : > { %5568 = vperm.xlu1 %8105, %v5537_v39   ;;  %v3970_v39 = vrot.slane %v3938_v44, %v13146_v63  ;;  %v4005_v25 = vsel %vm454_vm4, %v3985_v36, -inf }
 0xd6a   : > { %v3986_v11 = vadd.f32 %v10441_v58, %v3970_v39 }
 0xd6c   : > { %v4008_v7 = vsel %vm454_vm4, %v3986_v11, -inf }
 0xd8c   : > { %3997 = vmax.xlane.f32.xlu1 %v3996_v37 }
 0xd90   : > { %4003 = vmax.xlane.f32.xlu1 %v4002_v23 }
 0xd94   : > { %4006 = vmax.xlane.f32.xlu1 %v4005_v25 }
 0xd98   : > { %4009 = vmax.xlane.f32.xlu1 %v4008_v7 }
 0xdc2   : > { %v10841_v50 = vpop.xlane.xlu0 %3988 }
 0xdc3   : > { %v4011_v40 = vsub.f32 %v3979_v28, %v10841_v50 }
 0xdc4   : > { %v10844_v45 = vpop.xlane.xlu1 %3991 }
 0xdc5   : > { %v4019_v37 = vmul.f32 1.442695, %v4011_v40  ;;  %v4012_v44 = vsub.f32 %v3980_v9, %v10844_v45 }
 0xdc6   : > { %v10847_v1 = vpop.xlane.xlu0 %4000 }
 0xdc7   : > { %8261 = vpow2.f32 %v4019_v37  ;;  %v4021_v58 = vmul.f32 1.442695, %v4012_v44  ;;  %v4015_v23 = vsub.f32 %v3983_v6, %v10847_v1 }
 0xdc8   : > { %v10850_v39 = vpop.xlane.xlu1 %3994 }
 0xdc9   : > { %8263 = vpow2.f32 %v4021_v58  ;;  %v4027_v25 = vmul.f32 1.442695, %v4015_v23  ;;  %v4013_v7 = vsub.f32 %v3981_v8, %v10850_v39 }
 0xdcb   : > { %v4023_v42 = vmul.f32 1.442695, %v4013_v7  ;;  %8265 = vpow2.f32 %v4027_v25 }
 0xdcc   : > { %v5551_v8 = vpop.permute.xlu1 %5550 }
 0xdcd   : > { %8267 = vpow2.f32 %v4023_v42  ;;  %v5577_v38 = vrot.slane %v5551_v8, %v9104_v29 }
 0xdd0   : > { %v5554_v23 = vpop.permute.xlu1 %5553 }
 0xdd4   : > { %v8262_v28 = vpop.eup %8261  ;;  %v5557_v25 = vpop.permute.xlu1 %5556 }
 0xdd5   : > { %v4035_v40 = vsel %vm454_vm4, %v8262_v28, 0.0 }
 0xdd6   : > { %v8264_v56 = vpop.eup %8263  ;;  %4036 = vadd.xlane.f32.xlu1 %v4035_v40 }
 0xdd7   : > { %v4038_v37 = vsel %vm454_vm4, %v8264_v56, 0.0 }
 0xdd8   : > { %v8266_v9 = vpop.eup %8265  ;;  %v5560_v42 = vpop.permute.xlu1 %5559 }
 0xdd9   : > { %v4047_v58 = vsel %vm454_vm4, %v8266_v9, 0.0 }
 0xdda   : > { %v8268_v44 = vpop.eup %8267  ;;  %4039 = vadd.xlane.f32.xlu1 %v4038_v37 }
 0xddb   : > { %v4041_v6 = vsel %vm454_vm4, %v8268_v44, 0.0 }
 0xddc   : > { %4042 = vadd.xlane.f32.xlu0 %v4041_v6  ;;  %v5563_v7 = vpop.permute.xlu1 %5562 }
 0xdde   : > { %4048 = vadd.xlane.f32.xlu1 %v4047_v58 }
 0xde0   : > { %v5566_v5 = vpop.permute.xlu1 %5565 }
 0xde1   : > { %v5597_v0 = vrot.slane %v5566_v5, %v9104_v29 }
 0xde4   : > { %v10857_v28 = vpop.permute.xlu1 %5568 }
 0xe15   : > { %v10859_v40 = vpop.xlane.xlu1 %3997 }
 0xe16   : > { %v4014_v56 = vsub.f32 %v3982_v32, %v10859_v40 }
 0xe18   : > { %v4025_v3 = vmul.f32 1.442695, %v4014_v56 }
 0xe19   : > { %v10862_v37 = vpop.xlane.xlu1 %4003 }
 0xe1a   : > { %8269 = vpow2.f32 %v4025_v3  ;;  %v4016_v44 = vsub.f32 %v3984_v49, %v10862_v37 }
 0xe1c   : > { %v4029_v9 = vmul.f32 1.442695, %v4016_v44 }
 0xe1d   : > { %v10865_v6 = vpop.xlane.xlu1 %4006 }
 0xe1e   : > { %8271 = vpow2.f32 %v4029_v9  ;;  %v4017_v58 = vsub.f32 %v3985_v36, %v10865_v6 }
 0xe20   : > { %v4031_v46 = vmul.f32 1.442695, %v4017_v58 }
 0xe21   : > { %v10868_v43 = vpop.xlane.xlu1 %4009 }
 0xe22   : > { %8273 = vpow2.f32 %v4031_v46  ;;  %v4018_v10 = vsub.f32 %v3986_v11, %v10868_v43  ;;  %v4364_v11 = vsel %vm4356_vm11, %v13212_v4, 2147483647 }
 0xe24   : > { %v4033_v32 = vmul.f32 1.442695, %v4018_v10  ;;  %v10877_v10 = vsel %vm4926_vm10, 1, %v13213_v35 }
 0xe26   : > { %8275 = vpow2.f32 %v4033_v32  ;;  %v10884_v32 = vsel %vm454_vm4, %v4364_v11, 2147483647  ;;  %v5585_v11 = vrot.slane %v5557_v25, %v9104_v29 }
 0xe27   : > { %v8270_v56 = vpop.eup %8269 }
 0xe28   : > { %v4044_v3 = vsel %vm454_vm4, %v8270_v56, 0.0  ;;  %v4374_v56 = vshra.s32 %v10884_v32, 16 }
 0xe29   : > { %4045 = vadd.xlane.f32.xlu0 %v4044_v3 }
 0xe2a   : > { %v10887_v3 = vcvt.s32.f32 %v4374_v56  ;;  %v5589_v56 = vrot.slane %v5560_v42, %v9104_v29 }
 0xe2b   : > { %v8272_v49 = vpop.eup %8271 }
 0xe2c   : > { %v4050_v44 = vsel %vm454_vm4, %v8272_v49, 0.0  ;;  %v5548_v49 = vpop.permute.xlu0 %5547 }
 0xe2d   : > { %4051 = vadd.xlane.f32.xlu0 %v4050_v44  ;;  %v5573_v62 = vrot.slane %v5548_v49, %v9104_v29 }
 0xe2f   : > { %v8274_v9 = vpop.eup %8273 }
 0xe30   : > { %v4053_v36 = vsel %vm454_vm4, %v8274_v9, 0.0 }
 0xe31   : > { %4054 = vadd.xlane.f32.xlu1 %v4053_v36  ;;  %v5581_v36 = vrot.slane %v5554_v23, %v9104_v29  ;;  %v5601_v23 = vrot.slane %v10857_v28, %v9104_v29 }
 0xe33   : > { %v8276_v58 = vpop.eup %8275 }
 0xe34   : > { %v4056_v46 = vsel %vm454_vm4, %v8276_v58, 0.0 }
 0xe35   : > { %4057 = vadd.xlane.f32.xlu0 %v4056_v46  ;;  %v5602_v46 = vsel %vm872_vm14, %v5577_v38, %v5573_v62 }
 0xe36   : > { %v5603_v51 = vsel %vm874_vm15, %v5581_v36, %v5602_v46 }
 0xe37   : > { %v5604_v8 = vsel %vm876_vm0, %v5585_v11, %v5603_v51 }
 0xe38   : > { %v5605_v49 = vsel %vm878_vm1, %v5589_v56, %v5604_v8  ;;  %v10935_v8 = vld [vmem:[%s12770_s5] sm:$0xff] }
 0xe4b   : > { %5196 = vperm.xlu0 %8109, %v10877_v10  }
 0xe4f   : > { %8110 = vset.pattern.permute.xlu0 %v12913_v24  ;;  %v5593_v24 = vrot.slane %v5563_v7, %v9104_v29 }
 0xe51   : > { %v5606_v62 = vsel %vm880_vm2, %v5593_v24, %v5605_v49 }
 0xe52   : > { %v5607_v25 = vsel %vm882_vm3, %v5597_v0, %v5606_v62 }
 0xe53   : > { %v5608_v7 = vsel %vm884_vm5, %v5601_v23, %v5607_v25 }
 0xe65   : > { %v10891_v44 = vpop.xlane.xlu0 %4042 }
 0xe6a   : > { %4377 = vmin.xlane.f32.xlu0 %v10887_v3 }
 0xeb2   : > { %v10893_v9 = vpop.xlane.xlu0 %4045 }
 0xeb3   : > { %8277 = vlog2.f32 %v10893_v9 }
 0xeb6   : > { %v10898_v58 = vpop.xlane.xlu0 %4051 }
 0xebe   : > { %v10906_v15 = vpop.xlane.xlu0 %4057 }
 0xec6   : > { %v10914_v42 = vpop.permute.xlu0 %5196 }
 0xec7   : > { %13243 = vst [vmem:[#allocation60_spill] sm:$0xff] %v10914_v42  ;;  %vm5198_vm12 = vcmp.eq.s32.totalorder %v10914_v42, 1 }
 0xec8   : > { %v10921_v5 = vsel %vm5198_vm12, %v5608_v7, %v10670_v12 }
 0xec9   : > { %v6311_v51 = vcombine.high %v10921_v5, %v10921_v5  ;;  %v6318_v28 = vrot.slane %v10921_v5, %v13145_v34 }
 0xecb   : > { %v6325_v24 = vrot.slane %v6311_v51, %v13145_v34  ;;  %v6326_v0 = vcombine.high %v6318_v28, %v6318_v28  ;;  %v6334_v38 = vrot.slane %v6318_v28, %v13145_v34 }
 0xecd   : > { %v6363_v36 = vrot.slane %v6334_v38, %v13146_v63  ;;  %v6348_v46 = vrot.slane %v6326_v0, %v13145_v34  ;;  %v6356_v11 = vcombine.high %v6334_v38, %v6334_v38  ;;  %v6327_v56 = vcombine.high %v6325_v24, %v6325_v24 }
 0xece   : > { %v6341_v12 = vrot.slane %v6325_v24, %v13145_v34 }
 0xecf   : > { %v10938_v23 = vadd.f32 %v10935_v8, %v6363_v36  ;;  %v6367_v49 = vrot.slane %v6348_v46, %v13146_v63  ;;  %v6358_v62 = vcombine.high %v6348_v46, %v6348_v46  ;;  %v6371_v25 = vrot.slane %v6356_v11, %v13146_v63 }
 0xed0   : > { %v6355_v7 = vrot.slane %v6327_v56, %v13145_v34  ;;  %v6379_v38 = vrot.slane %v6341_v12, %v13146_v63  ;;  %v6357_v42 = vcombine.high %v6341_v12, %v6341_v12 }
 0xed1   : > { %v6408_v51 = vsel %vm454_vm4, %v10938_v23, -inf  ;;  %v10946_v28 = vadd.f32 %v10935_v8, %v6367_v49  ;;  %v6375_v24 = vrot.slane %v6358_v62, %v13146_v63  ;;  %v10957_v56 = vadd.f32 %v10935_v8, %v6371_v25 }
 0xed2   : > { %6409 = vmax.xlane.f32.xlu1 %v6408_v51  ;;  %v6383_v0 = vrot.slane %v6355_v7, %v13146_v63  ;;  %v6359_v36 = vcombine.high %v6355_v7, %v6355_v7  ;;  %v6387_v25 = vrot.slane %v6357_v42, %v13146_v63 }
 0xed3   : > { %v6411_v46 = vsel %vm454_vm4, %v10946_v28, -inf  ;;  %v10954_v11 = vadd.f32 %v10935_v8, %v6375_v24  ;;  %13244 = vst [vmem:[#allocation16_spill] sm:$0xff] %v10957_v56  ;;  %v6414_v7 = vsel %vm454_vm4, %v10957_v56, -inf  ;;  %v10968_v24 = vadd.f32 %v10935_v8, %v6379_v38 }
 0xed4   : > { %6412 = vmax.xlane.f32.xlu0 %v6411_v46  ;;  %v10962_v62 = vadd.f32 %v10935_v8, %v6383_v0  ;;  %v6391_v51 = vrot.slane %v6359_v36, %v13146_v63  ;;  %v10979_v36 = vadd.f32 %v10935_v8, %v6387_v25 }
 0xed5   : > { %v6417_v49 = vsel %vm454_vm4, %v10954_v11, -inf  ;;  %13246 = vst [vmem:[#allocation32_spill] sm:$0xff] %v10968_v24  ;;  %v6420_v0 = vsel %vm454_vm4, %v10968_v24, -inf }
 0xed6   : > { %13245 = vst [vmem:[#allocation3_spill] sm:$0xff] %v10962_v62  ;;  %6418 = vmax.xlane.f32.xlu1 %v6417_v49  ;;  %v6423_v12 = vsel %vm454_vm4, %v10962_v62, -inf  ;;  %v10974_v46 = vadd.f32 %v10935_v8, %v6391_v51  ;;  %13248 = vst [vmem:[#allocation35_spill] sm:$0xff] %v10979_v36  ;;  %v6426_v42 = vsel %vm454_vm4, %v10979_v36, -inf  ;;  %v4037_v49 = vpop.xlane.xlu1 %4036  ;;  %v13249_v51 = vld [vmem:[#allocation14_spill] sm:$0xff] }
 0xed7   : > { %v6177_v25 = vrot.slane %v13249_v51, %v8552_v22  ;;  %v6205_v9 = vrot.slane %v13249_v51, %v8574_v31 }
 0xed8   : > { %6415 = vmax.xlane.f32.xlu0 %v6414_v7  ;;  %13247 = vst [vmem:[#allocation39_spill] sm:$0xff] %v10974_v46  ;;  %v6429_v38 = vsel %vm454_vm4, %v10974_v46, -inf  ;;  %v6184_v46 = vrot.slane %v13249_v51, %v13148_v33 }
 0xeda   : > { %6424 = vmax.xlane.f32.xlu1 %v6423_v12  ;;  %v4040_v7 = vpop.xlane.xlu1 %4039  ;;  %v6170_v12 = vrot.slane %v13249_v51, %v8541_v16 }
 0xedc   : > { %6421 = vmax.xlane.f32.xlu0 %v6420_v0 }
 0xede   : > { %6430 = vmax.xlane.f32.xlu1 %v6429_v38  ;;  %v4049_v62 = vpop.xlane.xlu1 %4048  ;;  %v6163_v38 = vrot.slane %v13249_v51, %v13146_v63 }
 0xee0   : > { %6427 = vmax.xlane.f32.xlu0 %v6426_v42  ;;  %v6191_v42 = vrot.slane %v13249_v51, %v8562_v26 }
 0xee2   : > { %v4055_v0 = vpop.xlane.xlu1 %4054 }
 0xee3   : > { %8279 = vlog2.f32 %v4055_v0  ;;  %v6212_v0 = vrot.slane %v13249_v51, %v13156_v47 }
 0xee4   : > { %8281 = vlog2.f32 %v4037_v49 }
 0xee5   : > { %8283 = vlog2.f32 %v4040_v7 }
 0xee6   : > { %8285 = vlog2.f32 %v10891_v44 }
 0xee7   : > { %8287 = vlog2.f32 %v4049_v62 }
 0xee8   : > { %8289 = vlog2.f32 %v10898_v58 }
 0xee9   : > { %8291 = vlog2.f32 %v10906_v15 }
 0xeef   : > { %6172 = vbcast.lane.b32.xlu1 %v6170_v12, 256  ;;  %v6198_v12 = vrot.slane %v13249_v51, %v13155_v20 }
 0xef3   : > { %6179 = vbcast.lane.b32.xlu1 %v6177_v25, 256  ;;  %v8278_v25 = vpop.eup %8277 }
 0xef4   : > { %v4066_v36 = vmul.f32 0.6931472, %v8278_v25  ;;  %v8280_v24 = vpop.eup %8279  ;;  %v4373_v25 = vand.u32 65535, %v10884_v32 }
 0xef6   : > { %6165 = vbcast.lane.b32.xlu0 %v6163_v38, 256  ;;  %v4078_v38 = vadd.f32 %v4066_v36, %v10859_v40  ;;  %v4375_v40 = vcvt.s32.f32 %v4373_v25 }
 0xef7   : > { %6193 = vbcast.lane.b32.xlu1 %v6191_v42, 256  ;;  %v4072_v42 = vmul.f32 0.6931472, %v8280_v24 }
 0xef9   : > { %v4081_v56 = vadd.f32 %v4072_v42, %v10865_v6 }
 0xefa   : > { %6186 = vbcast.lane.b32.xlu0 %v6184_v46, 256  ;;  %v4151_v46 = vadd.f32 %v10601_v17, %v4078_v38  ;;  %v8282_v17 = vpop.eup %8281 }
 0xefb   : > { %6207 = vbcast.lane.b32.xlu1 %v6205_v9, 256  ;;  %v4154_v9 = vadd.f32 %v10611_v13, %v4081_v56  ;;  %v4060_v24 = vmul.f32 0.6931472, %v8282_v17  ;;  %v8284_v13 = vpop.eup %8283 }
 0xefc   : > { %v4062_v36 = vmul.f32 0.6931472, %v8284_v13  ;;  %v8286_v49 = vpop.eup %8285 }
 0xefd   : > { %v4075_v56 = vadd.f32 %v4060_v24, %v10841_v50  ;;  %v4064_v7 = vmul.f32 0.6931472, %v8286_v49 }
 0xefe   : > { %6200 = vbcast.lane.b32.xlu0 %v6198_v12, 256  ;;  %v11008_v12 = vpop.xlane.xlu0 %4377  ;;  %v4076_v32 = vadd.f32 %v4062_v36, %v10844_v45 }
 0xeff   : > { %13250 = vst [vmem:[#allocation73_spill] sm:$0xff] %v11008_v12  ;;  %vm4379_vm13 = vcmp.eq.f32.partialorder %v10887_v3, %v11008_v12  ;;  %v4148_v3 = vadd.f32 %v10586_v27, %v4075_v56  ;;  %v4077_v44 = vadd.f32 %v4064_v7, %v10850_v39 }
 0xf00   : > { %v4380_v6 = vsel %vm4379_vm13, %v4375_v40, inf  ;;  %v4149_v62 = vadd.f32 %v10584_v53, %v4076_v32  ;;  %v13251_v53 = vld [vmem:[#allocation18_spill] sm:$0xff]  ;;  %vm4357_vm13 = vcmp.eq.f32.partialorder %v10444_v48, %v10548_v60 }
 0xf01   : > { %v4150_v50 = vadd.f32 %v10593_v2, %v4077_v44 }
 0xf02   : > { %6214 = vbcast.lane.b32.xlu0 %v6212_v0, 256  ;;  %v8288_v0 = vpop.eup %8287 }
 0xf03   : > { %v4068_v38 = vmul.f32 0.6931472, %v8288_v0  ;;  %v8290_v42 = vpop.eup %8289 }
 0xf04   : > { %v8292_v25 = vpop.eup %8291 }
 0xf05   : > { %v4079_v58 = vadd.f32 %v4068_v38, %v10847_v1  ;;  %v7215_v1 = vrot.slane %v13251_v53, %v8552_v22  ;;  %v4074_v2 = vmul.f32 0.6931472, %v8292_v25 }
 0xf06   : > { %6234 = vperm.xlu0 %8110, %v10877_v10  }
 0xf07   : > { %v4152_v27 = vadd.f32 %v10599_v57, %v4079_v58  ;;  %v4082_v57 = vadd.f32 %v4074_v2, %v10868_v43 }
 0xf09   : > { %v4155_v15 = vadd.f32 %v10615_v14, %v4082_v57 }
 0xf0a   : > { %8111 = vset.pattern.permute.xlu0 %v13213_v35 }
 0xf0b   : > { %4179 = vperm.xlu0 %8111, %v4151_v46   ;;  %v4070_v46 = vmul.f32 0.6931472, %v8290_v42 }
 0xf0d   : > { %v4080_v45 = vadd.f32 %v4070_v46, %v10862_v37  ;;  %v7222_v37 = vrot.slane %v13251_v53, %v13148_v33 }
 0xf0f   : > { %4188 = vperm.xlu0 %8111, %v4154_v9   ;;  %v4153_v39 = vadd.f32 %v10607_v19, %v4080_v45  ;;  %v7201_v9 = vrot.slane %v13251_v53, %v13146_v63  ;;  %v7236_v19 = vrot.slane %v13251_v53, %v13155_v20 }
 0xf1f   : > { %4381 = vmin.xlane.f32.xlu1 %v4380_v6 }
 0xf30   : > { %4170 = vperm.xlu1 %8105, %v4148_v3  }
 0xf34   : > { %4173 = vperm.xlu1 %8105, %v4149_v62  }
 0xf38   : > { %4176 = vperm.xlu1 %8105, %v4150_v50  }
 0xf3c   : > { %4182 = vperm.xlu1 %8105, %v4152_v27  }
 0xf40   : > { %4185 = vperm.xlu1 %8105, %v4153_v39  }
 0xf44   : > { %7203 = vbcast.lane.b32.xlu1 %v7201_v9, 256  ;;  %v7208_v9 = vrot.slane %v13251_v53, %v8541_v16 }
 0xf48   : > { %7217 = vbcast.lane.b32.xlu1 %v7215_v1, 256  ;;  %v7229_v1 = vrot.slane %v13251_v53, %v8562_v26 }
 0xf4c   : > { %7224 = vbcast.lane.b32.xlu1 %v7222_v37, 256 }
 0xf50   : > { %7238 = vbcast.lane.b32.xlu1 %v7236_v19, 256 }
 0xf54   : > { %4191 = vperm.xlu1 %8105, %v4155_v15  }
 0xf5b   : > { %v11036_v40 = vpop.xlane.xlu1 %6409 }
 0xf5d   : > { %v11038_v6 = vpop.xlane.xlu0 %6412 }
 0xf5f   : > { %v11040_v17 = vpop.xlane.xlu1 %6418 }
 0xf61   : > { %v11042_v24 = vpop.xlane.xlu0 %6415 }
 0xf62   : > { %13252 = vst [vmem:[#allocation74_spill] sm:$0xff] %v11042_v24 }
 0xf63   : > { %v11044_v13 = vpop.xlane.xlu1 %6424 }
 0xf64   : > { %13253 = vst [vmem:[#allocation75_spill] sm:$0xff] %v11044_v13 }
 0xf65   : > { %v11046_v56 = vpop.xlane.xlu0 %6421 }
 0xf66   : > { %13254 = vst [vmem:[#allocation76_spill] sm:$0xff] %v11046_v56 }
 0xf67   : > { %v11048_v43 = vpop.xlane.xlu1 %6430 }
 0xf68   : > { %13255 = vst [vmem:[#allocation77_spill] sm:$0xff] %v11048_v43 }
 0xf69   : > { %v11050_v36 = vpop.xlane.xlu0 %6427 }
 0xf6a   : > { %13256 = vst [vmem:[#allocation78_spill] sm:$0xff] %v11050_v36 }
 0xf6b   : > { %v11052_v49 = vpop.permute.xlu1 %6172 }
 0xf6c   : > { %13257 = vst [vmem:[#allocation79_spill] sm:$0xff] %v11052_v49  ;;  %v6569_v7 = vadd.f32 %v11038_v6, %v11052_v49 }
 0xf6d   : > { %v11054_v14 = vpop.permute.xlu0 %6165 }
 0xf6e   : > { %13258 = vst [vmem:[#allocation80_spill] sm:$0xff] %v11054_v14  ;;  %v6568_v32 = vadd.f32 %v11036_v40, %v11054_v14 }
 0xf6f   : > { %v11060_v3 = vpop.permute.xlu1 %6179 }
 0xf70   : > { %6585 = vperm.xlu0 %8111, %v6568_v32   ;;  %13259 = vst [vmem:[#allocation81_spill] sm:$0xff] %v11060_v3  ;;  %v6570_v0 = vadd.f32 %v11042_v24, %v11060_v3 }
 0xf71   : > { %v11064_v44 = vpop.permute.xlu0 %6186 }
 0xf72   : > { %13260 = vst [vmem:[#allocation82_spill] sm:$0xff] %v11064_v44  ;;  %v6571_v38 = vadd.f32 %v11040_v17, %v11064_v44 }
 0xf73   : > { %v11068_v62 = vpop.permute.xlu1 %6193 }
 0xf74   : > { %6588 = vperm.xlu0 %8111, %v6569_v7   ;;  %13261 = vst [vmem:[#allocation83_spill] sm:$0xff] %v11068_v62  ;;  %v6572_v42 = vadd.f32 %v11046_v56, %v11068_v62 }
 0xf75   : > { %v11072_v58 = vpop.permute.xlu0 %6200 }
 0xf76   : > { %13262 = vst [vmem:[#allocation84_spill] sm:$0xff] %v11072_v58  ;;  %v6573_v46 = vadd.f32 %v11044_v13, %v11072_v58 }
 0xf77   : > { %v11076_v50 = vpop.permute.xlu1 %6207 }
 0xf78   : > { %6591 = vperm.xlu0 %8111, %v6570_v0   ;;  %13263 = vst [vmem:[#allocation85_spill] sm:$0xff] %v11076_v50  ;;  %v6574_v45 = vadd.f32 %v11050_v36, %v11076_v50 }
 0xf79   : > { %v11080_v27 = vpop.permute.xlu0 %6214 }
 0xf7a   : > { %13264 = vst [vmem:[#allocation86_spill] sm:$0xff] %v11080_v27  ;;  %v6575_v39 = vadd.f32 %v11048_v43, %v11080_v27 }
 0xf7c   : > { %6594 = vperm.xlu0 %8111, %v6571_v38  }
 0xf80   : > { %6597 = vperm.xlu0 %8111, %v6572_v42  }
 0xf81   : > { %v11090_v19 = vpop.permute.xlu0 %6234 }
 0xf82   : > { %13266 = vst [vmem:[#allocation88_spill] sm:$0xff] %v11090_v19  ;;  %vm6236_vm6 = vcmp.eq.s32.totalorder %v11090_v19, 1 }
 0xf84   : > { %6600 = vperm.xlu0 %8111, %v6573_v46  }
 0xf86   : > { %v4180_v32 = vpop.permute.xlu0 %4179 }
 0xf87   : > { %v4208_v27 = vrot.slane %v4180_v32, %v9104_v29 }
 0xf88   : > { %6603 = vperm.xlu0 %8111, %v6574_v45  }
 0xf8a   : > { %v4189_v0 = vpop.permute.xlu0 %4188 }
 0xf8c   : > { %6606 = vperm.xlu0 %8111, %v6575_v39  }
 0xf90   : > { %7210 = vbcast.lane.b32.xlu0 %v7208_v9, 256 }
 0xf94   : > { %7231 = vbcast.lane.b32.xlu0 %v7229_v1, 256 }
 0xfa8   : > { %v11088_v25 = vpop.xlane.xlu1 %4381 }
 0xfa9   : > { %13265 = vst [vmem:[#allocation87_spill] sm:$0xff] %v11088_v25 }
 0xfac   : > { %v4171_v2 = vpop.permute.xlu1 %4170 }
 0xfad   : > { %v4196_v22 = vrot.slane %v4171_v2, %v9104_v29 }
 0xfb0   : > { %v4174_v37 = vpop.permute.xlu1 %4173 }
 0xfb1   : > { %v4200_v51 = vrot.slane %v4174_v37, %v9104_v29 }
 0xfb3   : > { %v4225_v16 = vsel %vm872_vm14, %v4200_v51, %v4196_v22 }
 0xfb4   : > { %v4177_v57 = vpop.permute.xlu1 %4176 }
 0xfb5   : > { %v4204_v33 = vrot.slane %v4177_v57, %v9104_v29 }
 0xfb7   : > { %v4226_v44 = vsel %vm874_vm15, %v4204_v33, %v4225_v16 }
 0xfb8   : > { %v4183_v15 = vpop.permute.xlu1 %4182  ;;  %v4227_v22 = vsel %vm876_vm0, %v4208_v27, %v4226_v44 }
 0xfb9   : > { %v4212_v3 = vrot.slane %v4183_v15, %v9104_v29 }
 0xfbb   : > { %v4228_v33 = vsel %vm878_vm1, %v4212_v3, %v4227_v22 }
 0xfbc   : > { %v4186_v7 = vpop.permute.xlu1 %4185 }
 0xfbd   : > { %v4216_v37 = vrot.slane %v4186_v7, %v9104_v29 }
 0xfbf   : > { %v4229_v7 = vsel %vm880_vm2, %v4216_v37, %v4228_v33 }
 0xfc0   : > { %v11092_v38 = vpop.permute.xlu1 %7203 }
 0xfc1   : > { %13267 = vst [vmem:[#allocation89_spill] sm:$0xff] %v11092_v38 }
 0xfc4   : > { %v11094_v45 = vpop.permute.xlu1 %7217 }
 0xfc5   : > { %13268 = vst [vmem:[#allocation90_spill] sm:$0xff] %v11094_v45 }
 0xfc8   : > { %v11096_v9 = vpop.permute.xlu1 %7224 }
 0xfc9   : > { %13269 = vst [vmem:[#allocation91_spill] sm:$0xff] %v11096_v9 }
 0xfcc   : > { %v11100_v26 = vpop.permute.xlu1 %7238 }
 0xfcd   : > { %13270 = vst [vmem:[#allocation92_spill] sm:$0xff] %v11100_v26 }
 0xfd0   : > { %v4192_v57 = vpop.permute.xlu1 %4191 }
 0xfeb   : > { %v6586_v42 = vpop.permute.xlu0 %6585 }
 0xfec   : > { %v6611_v62 = vrot.slane %v6586_v42, %v9104_v29 }
 0xfef   : > { %v6589_v46 = vpop.permute.xlu0 %6588 }
 0xff0   : > { %v6615_v14 = vrot.slane %v6589_v46, %v9104_v29  ;;  %v4224_v46 = vrot.slane %v4192_v57, %v9104_v29 }
 0xff2   : > { %v6640_v15 = vsel %vm872_vm14, %v6615_v14, %v6611_v62 }
 0xff3   : > { %v6592_v39 = vpop.permute.xlu0 %6591 }
 0xff4   : > { %v6619_v58 = vrot.slane %v6592_v39, %v9104_v29 }
 0xff6   : > { %v6641_v39 = vsel %vm874_vm15, %v6619_v58, %v6640_v15 }
 0xff7   : > { %v6595_v1 = vpop.permute.xlu0 %6594 }
 0xff8   : > { %v6623_v2 = vrot.slane %v6595_v1, %v9104_v29  ;;  %v4220_v1 = vrot.slane %v4189_v0, %v9104_v29 }
 0xffa   : > { %v6642_v44 = vsel %vm876_vm0, %v6623_v2, %v6641_v39  ;;  %v4230_v3 = vsel %vm882_vm3, %v4220_v1, %v4229_v7 }
 0xffb   : > { %v6598_v20 = vpop.permute.xlu0 %6597 }
 0xffc   : > { %v6627_v51 = vrot.slane %v6598_v20, %v9104_v29 }
 0xffe   : > { %v6643_v20 = vsel %vm878_vm1, %v6627_v51, %v6642_v44 }
 0xfff   : > { %v6601_v50 = vpop.permute.xlu0 %6600 }
0x1000   : > { %v6631_v32 = vrot.slane %v6601_v50, %v9104_v29  ;;  %v4231_v50 = vsel %vm884_vm5, %v4224_v46, %v4230_v3 }
0x1001   : > { %v11139_v57 = vsel %vm4160_vm9, %v4231_v50, %v10789_v41 }
0x1002   : > { %v6644_v14 = vsel %vm880_vm2, %v6631_v32, %v6643_v20  ;;  %13271 = vst [vmem:[#allocation93_spill] sm:$0xff] %v11139_v57 }
0x1003   : > { %v6604_v16 = vpop.permute.xlu0 %6603 }
0x1004   : > { %v6635_v42 = vrot.slane %v6604_v16, %v9104_v29 }
0x1006   : > { %v6645_v37 = vsel %vm882_vm3, %v6635_v42, %v6644_v14 }
0x1007   : > { %v6607_v27 = vpop.permute.xlu0 %6606 }
0x1008   : > { %v6639_v62 = vrot.slane %v6607_v27, %v9104_v29 }
0x100a   : > { %v6646_v58 = vsel %vm884_vm5, %v6639_v62, %v6645_v37 }
0x100b   : > { %v11134_v0 = vsel %vm6236_vm6, %v6646_v58, %v10921_v5  ;;  %v4935_v5 = vrot.slane %v11139_v57, %v13145_v34 }
0x100c   : > { %v7349_v2 = vcombine.high %v11134_v0, %v11134_v0  ;;  %v7356_v22 = vrot.slane %v11134_v0, %v13145_v34 }
0x100d   : > { %v4951_v27 = vrot.slane %v4935_v5, %v13145_v34 }
0x100e   : > { %v7372_v51 = vrot.slane %v7356_v22, %v13145_v34  ;;  %v7364_v16 = vcombine.high %v7356_v22, %v7356_v22  ;;  %v7363_v33 = vrot.slane %v7349_v2, %v13145_v34 }
0x1010   : > { %v7401_v15 = vrot.slane %v7372_v51, %v13146_v63  ;;  %v7386_v32 = vrot.slane %v7364_v16, %v13145_v34  ;;  %v7394_v41 = vcombine.high %v7372_v51, %v7372_v51  ;;  %v7365_v7 = vcombine.high %v7363_v33, %v7363_v33 }
0x1011   : > { %v7379_v20 = vrot.slane %v7363_v33, %v13145_v34  ;;  %v4973_v16 = vcombine.high %v4951_v27, %v4951_v27 }
0x1012   : > { %v11152_v46 = vadd.f32 %v10935_v8, %v7401_v15  ;;  %v7405_v39 = vrot.slane %v7386_v32, %v13146_v63  ;;  %v7396_v42 = vcombine.high %v7386_v32, %v7386_v32  ;;  %v7409_v1 = vrot.slane %v7394_v41, %v13146_v63 }
0x1013   : > { %v7393_v44 = vrot.slane %v7365_v7, %v13145_v34  ;;  %v7417_v22 = vrot.slane %v7379_v20, %v13146_v63  ;;  %v7395_v51 = vcombine.high %v7379_v20, %v7379_v20 }
0x1014   : > { %v7446_v3 = vsel %vm454_vm4, %v11152_v46, -inf  ;;  %v11162_v14 = vadd.f32 %v10935_v8, %v7405_v39  ;;  %v7413_v62 = vrot.slane %v7396_v42, %v13146_v63  ;;  %v11170_v2 = vadd.f32 %v10935_v8, %v7409_v1 }
0x1015   : > { %7447 = vmax.xlane.f32.xlu1 %v7446_v3  ;;  %v7421_v50 = vrot.slane %v7393_v44, %v13146_v63  ;;  %v7397_v37 = vcombine.high %v7393_v44, %v7393_v44  ;;  %v11182_v7 = vadd.f32 %v10935_v8, %v7417_v22  ;;  %v4988_v39 = vrot.slane %v4973_v16, %v13146_v63 }
0x1016   : > { %v11167_v58 = vadd.f32 %v10935_v8, %v7413_v62  ;;  %v7449_v33 = vsel %vm454_vm4, %v11162_v14, -inf  ;;  %v4943_v42 = vcombine.high %v4935_v5, %v4935_v5  ;;  %v7452_v1 = vsel %vm454_vm4, %v11170_v2, -inf }
0x1017   : > { %v11178_v32 = vadd.f32 %v10935_v8, %v7421_v50  ;;  %v7429_v41 = vrot.slane %v7397_v37, %v13146_v63  ;;  %v7425_v3 = vrot.slane %v7395_v51, %v13146_v63  ;;  %v4980_v62 = vrot.slane %v4951_v27, %v13146_v63 }
0x1018   : > { %v7455_v15 = vsel %vm454_vm4, %v11167_v58, -inf  ;;  %v4965_v50 = vrot.slane %v4943_v42, %v13145_v34  ;;  %v7458_v5 = vsel %vm454_vm4, %v11182_v7, -inf  ;;  %v11203_v16 = vadd.f32 %v10935_v8, %v4988_v39 }
0x1019   : > { %7450 = vmax.xlane.f32.xlu1 %v7449_v33  ;;  %7456 = vmax.xlane.f32.xlu0 %v7455_v15  ;;  %v7461_v44 = vsel %vm454_vm4, %v11178_v32, -inf  ;;  %v11190_v20 = vadd.f32 %v10935_v8, %v7429_v41  ;;  %v11200_v22 = vadd.f32 %v10935_v8, %v7425_v3  ;;  %v5017_v33 = vadd.f32 %v10935_v8, %v4980_v62 }
0x101a   : > { %v5031_v27 = vsel %vm454_vm4, %v11203_v16, -inf  ;;  %v4984_v15 = vrot.slane %v4965_v50, %v13146_v63  ;;  %v4928_v3 = vcombine.high %v11139_v57, %v11139_v57 }
0x101b   : > { %v7467_v37 = vsel %vm454_vm4, %v11190_v20, -inf  ;;  %v7464_v51 = vsel %vm454_vm4, %v11200_v22, -inf  ;;  %v5025_v41 = vsel %vm454_vm4, %v5017_v33, -inf }
0x101c   : > { %v5018_v42 = vadd.f32 %v10935_v8, %v4984_v15  ;;  %v4942_v62 = vrot.slane %v4928_v3, %v13145_v34 }
0x101d   : > { %7453 = vmax.xlane.f32.xlu1 %v7452_v1  ;;  %7462 = vmax.xlane.f32.xlu0 %v7461_v44  ;;  %v7243_v1 = vrot.slane %v13251_v53, %v8574_v31  ;;  %v7250_v44 = vrot.slane %v13251_v53, %v13156_v47 }
0x101e   : > { %v5028_v39 = vsel %vm454_vm4, %v5018_v42, -inf }
0x1021   : > { %7459 = vmax.xlane.f32.xlu1 %v7458_v5  ;;  %7468 = vmax.xlane.f32.xlu0 %v7467_v37  ;;  %v4958_v5 = vrot.slane %v4942_v62, %v13145_v34 }
0x1023   : > { %v4996_v37 = vrot.slane %v4958_v5, %v13146_v63  ;;  %v4974_v47 = vcombine.high %v4958_v5, %v4958_v5 }
0x1025   : > { %7465 = vmax.xlane.f32.xlu1 %v7464_v51  ;;  %5032 = vmax.xlane.f32.xlu0 %v5031_v27  ;;  %v4975_v51 = vcombine.high %v4965_v50, %v4965_v50  ;;  %v4944_v27 = vcombine.high %v4942_v62, %v4942_v62  ;;  %v5021_v15 = vadd.f32 %v10935_v8, %v4996_v37 }
0x1026   : > { %v5004_v50 = vrot.slane %v4974_v47, %v13146_v63 }
0x1029   : > { %5026 = vmax.xlane.f32.xlu1 %v5025_v41  ;;  %v4992_v41 = vrot.slane %v4975_v51, %v13146_v63  ;;  %v5023_v51 = vadd.f32 %v10935_v8, %v5004_v50 }
0x102d   : > { %5029 = vmax.xlane.f32.xlu1 %v5028_v39  ;;  %v4972_v39 = vrot.slane %v4944_v27, %v13145_v34 }
0x102f   : > { %v5000_v53 = vrot.slane %v4972_v39, %v13146_v63  ;;  %v4976_v62 = vcombine.high %v4972_v39, %v4972_v39 }
0x1031   : > { %v5022_v31 = vadd.f32 %v10935_v8, %v5000_v53  ;;  %v5008_v27 = vrot.slane %v4976_v62, %v13146_v63  ;;  %v11238_v53 = vpop.permute.xlu0 %7210 }
0x1032   : > { %13272 = vst [vmem:[#allocation94_spill] sm:$0xff] %v11238_v53 }
0x1033   : > { %v5040_v37 = vsel %vm454_vm4, %v5022_v31, -inf  ;;  %v5024_v5 = vadd.f32 %v10935_v8, %v5008_v27 }
0x1035   : > { %v11240_v47 = vpop.permute.xlu0 %7231 }
0x1036   : > { %13273 = vst [vmem:[#allocation95_spill] sm:$0xff] %v11240_v47 }
0x103b   : > { %7245 = vbcast.lane.b32.xlu0 %v7243_v1, 256  ;;  %v5037_v1 = vsel %vm454_vm4, %v5021_v15, -inf }
0x103e   : > { %7252 = vbcast.lane.b32.xlu1 %v7250_v44, 256  ;;  %v5020_v44 = vadd.f32 %v10935_v8, %v4992_v41  ;;  %v5043_v41 = vsel %vm454_vm4, %v5023_v51, -inf }
0x1040   : > { %v5034_v3 = vsel %vm454_vm4, %v5020_v44, -inf }
0x1062   : > { %5038 = vmax.xlane.f32.xlu1 %v5037_v1  ;;  %v5046_v1 = vsel %vm454_vm4, %v5024_v5, -inf }
0x1066   : > { %5035 = vmax.xlane.f32.xlu1 %v5034_v3 }
0x106a   : > { %5041 = vmax.xlane.f32.xlu1 %v5040_v37 }
0x106e   : > { %5044 = vmax.xlane.f32.xlu1 %v5043_v41 }
0x1072   : > { %5047 = vmax.xlane.f32.xlu1 %v5046_v1 }
0x109e   : > { %v11242_v39 = vpop.xlane.xlu1 %7447 }
0x109f   : > { %v7606_v3 = vadd.f32 %v11242_v39, %v11092_v38 }
0x10a1   : > { %7623 = vperm.xlu1 %8105, %v7606_v3  }
0x10a2   : > { %v11246_v50 = vpop.xlane.xlu0 %7456  ;;  %v11248_v62 = vpop.xlane.xlu1 %7450 }
0x10a3   : > { %vm7471_vm8 = vcmp.eq.f32.partialorder %v11162_v14, %v11248_v62  ;;  %vm7473_vm7 = vcmp.eq.f32.partialorder %v11167_v58, %v11246_v50 }
0x10a6   : > { %v11250_v37 = vpop.xlane.xlu0 %7462  ;;  %v11252_v8 = vpop.xlane.xlu1 %7453 }
0x10a7   : > { %vm7475_vm10 = vcmp.eq.f32.partialorder %v11178_v32, %v11250_v37 }
0x10a8   : > { %v7483_v14 = vsel %vm7475_vm10, %v13212_v4, 2147483647  ;;  %vm7470_vm10 = vcmp.eq.f32.partialorder %v11152_v46, %v11242_v39 }
0x10aa   : > { %v11254_v27 = vpop.xlane.xlu1 %7459  ;;  %v11256_v41 = vpop.xlane.xlu0 %7468 }
0x10ab   : > { %vm7477_vm11 = vcmp.eq.f32.partialorder %v11190_v20, %v11256_v41 }
0x10ae   : > { %v11258_v1 = vpop.xlane.xlu1 %7465  ;;  %v11260_v49 = vpop.xlane.xlu0 %5032 }
0x10af   : > { %v5051_v38 = vsub.f32 %v11203_v16, %v11260_v49 }
0x10b1   : > { %v5061_v43 = vmul.f32 1.442695, %v5051_v38 }
0x10b2   : > { %v11262_v19 = vpop.xlane.xlu1 %5026 }
0x10b3   : > { %v5049_v3 = vsub.f32 %v5017_v33, %v11262_v19 }
0x10b5   : > { %v5057_v59 = vmul.f32 1.442695, %v5049_v3 }
0x10b6   : > { %v11267_v25 = vpop.xlane.xlu1 %5029 }
0x10b7   : > { %8293 = vpow2.f32 %v5057_v59  ;;  %v5050_v12 = vsub.f32 %v5018_v42, %v11267_v25 }
0x10b9   : > { %v5059_v13 = vmul.f32 1.442695, %v5050_v12 }
0x10ba   : > { %v11273_v3 = vpop.permute.xlu1 %7252 }
0x10bb   : > { %8295 = vpow2.f32 %v5059_v13  ;;  %13274 = vst [vmem:[#allocation96_spill] sm:$0xff] %v11273_v3 }
0x10bc   : > { %8297 = vpow2.f32 %v5061_v43 }
0x10c4   : > { %v8294_v36 = vpop.eup %8293 }
0x10c5   : > { %v5073_v63 = vsel %vm454_vm4, %v8294_v36, 0.0 }
0x10c6   : > { %5074 = vadd.xlane.f32.xlu0 %v5073_v63 }
0x10c8   : > { %v8296_v34 = vpop.eup %8295 }
0x10c9   : > { %v5076_v33 = vsel %vm454_vm4, %v8296_v34, 0.0  ;;  %v8298_v57 = vpop.eup %8297 }
0x10ca   : > { %5077 = vadd.xlane.f32.xlu1 %v5076_v33  ;;  %v5079_v16 = vsel %vm454_vm4, %v8298_v57, 0.0 }
0x10ce   : > { %5080 = vadd.xlane.f32.xlu1 %v5079_v16 }
0x10eb   : > { %v11275_v59 = vpop.xlane.xlu1 %5038 }
0x10ec   : > { %v5053_v12 = vsub.f32 %v5021_v15, %v11275_v59 }
0x10ee   : > { %v5065_v13 = vmul.f32 1.442695, %v5053_v12 }
0x10ef   : > { %v11278_v43 = vpop.xlane.xlu1 %5035 }
0x10f0   : > { %8299 = vpow2.f32 %v5065_v13  ;;  %v5052_v63 = vsub.f32 %v5020_v44, %v11278_v43 }
0x10f2   : > { %v5063_v36 = vmul.f32 1.442695, %v5052_v63 }
0x10f3   : > { %v11281_v38 = vpop.xlane.xlu1 %5041 }
0x10f4   : > { %8301 = vpow2.f32 %v5063_v36  ;;  %v5054_v34 = vsub.f32 %v5022_v31, %v11281_v38 }
0x10f6   : > { %v5067_v57 = vmul.f32 1.442695, %v5054_v34 }
0x10f7   : > { %v11284_v42 = vpop.xlane.xlu1 %5044 }
0x10f8   : > { %8303 = vpow2.f32 %v5067_v57  ;;  %v5055_v33 = vsub.f32 %v5023_v51, %v11284_v42 }
0x10fa   : > { %v5069_v16 = vmul.f32 1.442695, %v5055_v33 }
0x10fb   : > { %v11287_v15 = vpop.xlane.xlu1 %5047 }
0x10fc   : > { %8305 = vpow2.f32 %v5069_v16  ;;  %v5056_v12 = vsub.f32 %v5024_v5, %v11287_v15  ;;  %v7608_v5 = vadd.f32 %v11252_v8, %v11094_v45 }
0x10fd   : > { %v8300_v13 = vpop.eup %8299 }
0x10fe   : > { %v5071_v44 = vmul.f32 1.442695, %v5056_v12  ;;  %v5085_v63 = vsel %vm454_vm4, %v8300_v13, 0.0  ;;  %v7609_v13 = vadd.f32 %v11246_v50, %v11096_v9  ;;  %v11336_v50 = vsel %vm454_vm4, %v7483_v14, 2147483647 }
0x10ff   : > { %5086 = vadd.xlane.f32.xlu1 %v5085_v63  ;;  %v7611_v63 = vadd.f32 %v11250_v37, %v11100_v26  ;;  %v7563_v37 = vshra.s32 %v11336_v50, 16 }
0x1100   : > { %8307 = vpow2.f32 %v5071_v44  ;;  %v7610_v44 = vadd.f32 %v11254_v27, %v11240_v47 }
0x1101   : > { %v8302_v36 = vpop.eup %8301 }
0x1102   : > { %v5082_v31 = vsel %vm454_vm4, %v8302_v36, 0.0  ;;  %v11303_v36 = vpop.permute.xlu0 %7245 }
0x1103   : > { %5083 = vadd.xlane.f32.xlu0 %v5082_v31  ;;  %13275 = vst [vmem:[#allocation97_spill] sm:$0xff] %v11303_v36  ;;  %v7612_v31 = vadd.f32 %v11258_v1, %v11303_v36 }
0x1105   : > { %v8304_v34 = vpop.eup %8303 }
0x1106   : > { %v5088_v57 = vsel %vm454_vm4, %v8304_v34, 0.0  ;;  %v7613_v34 = vadd.f32 %v11256_v41, %v11273_v3  ;;  %v4365_v41 = vsel %vm4357_vm13, %v13212_v4, 2147483647 }
0x1107   : > { %5089 = vadd.xlane.f32.xlu0 %v5088_v57  ;;  %v7607_v57 = vadd.f32 %v11248_v62, %v11238_v53  ;;  %v11356_v48 = vsel %vm454_vm4, %v4365_v41, 2147483647 }
0x1109   : > { %v8306_v51 = vpop.eup %8305 }
0x110a   : > { %v5091_v33 = vsel %vm454_vm4, %v8306_v51, 0.0  ;;  %v12956_v51 = vmov 7  }
0x110b   : > { %5092 = vadd.xlane.f32.xlu0 %v5091_v33  ;;  %v7479_v33 = vsel %vm7471_vm8, %v13212_v4, 2147483647 }
0x110d   : > { %v8308_v16 = vpop.eup %8307 }
0x110e   : > { %v5094_v12 = vsel %vm454_vm4, %v8308_v16, 0.0  ;;  %v11320_v16 = vsel %vm454_vm4, %v7479_v33, 2147483647 }
0x110f   : > { %5095 = vadd.xlane.f32.xlu0 %v5094_v12 }
0x1110   : > { %7629 = vperm.xlu1 %8105, %v7608_v5   ;;  %v7481_v5 = vsel %vm7473_vm7, %v13212_v4, 2147483647 }
0x1111   : > { %v11327_v12 = vsel %vm454_vm4, %v7481_v5, 2147483647  ;;  %v4389_v5 = vshra.s32 %v11356_v48, 16 }
0x1112   : > { %v7533_v58 = vshra.s32 %v11327_v12, 16 }
0x1114   : > { %7632 = vperm.xlu1 %8105, %v7609_v13   ;;  %v7485_v13 = vsel %vm7477_vm11, %v13212_v4, 2147483647  ;;  %v11342_v32 = vcvt.s32.f32 %v7533_v58  ;;  %v11370_v58 = vcvt.s32.f32 %v4389_v5  ;;  %vm7472_vm11 = vcmp.eq.f32.partialorder %v11170_v2, %v11252_v8 }
0x1115   : > { %v11346_v20 = vsel %vm454_vm4, %v7485_v13, 2147483647  ;;  %v7480_v8 = vsel %vm7472_vm11, %v13212_v4, 2147483647 }
0x1118   : > { %7635 = vperm.xlu1 %8105, %v7610_v44   ;;  %v13276_v44 = vld [vmem:[#allocation51_spill] sm:$0xff] }
0x1119   : > { %vm4358_vm8 = vcmp.eq.f32.partialorder %v13276_v44, %v10553_v30 }
0x111a   : > { %v4366_v60 = vsel %vm4358_vm8, %v13212_v4, 2147483647  ;;  %vm7474_vm8 = vcmp.eq.f32.partialorder %v11182_v7, %v11254_v27 }
0x111b   : > { %v11366_v30 = vsel %vm454_vm4, %v4366_v60, 2147483647  ;;  %v7482_v7 = vsel %vm7474_vm8, %v13212_v4, 2147483647 }
0x111c   : > { %7638 = vperm.xlu1 %8105, %v7611_v63   ;;  %v11352_v63 = vcvt.s32.f32 %v7563_v37  ;;  %v7624_v14 = vpop.permute.xlu1 %7623  ;;  %v4404_v13 = vshra.s32 %v11366_v30, 16 }
0x111d   : > { %v7649_v56 = vrot.slane %v7624_v14, %v9104_v29 }
0x111e   : > { %v11377_v44 = vcvt.s32.f32 %v4404_v13 }
0x1120   : > { %7641 = vperm.xlu1 %8105, %v7612_v31   ;;  %v7593_v31 = vshra.s32 %v11346_v20, 16 }
0x1122   : > { %v11362_v33 = vcvt.s32.f32 %v7593_v31 }
0x1124   : > { %7644 = vperm.xlu1 %8105, %v7613_v34   ;;  %v13277_v34 = vld [vmem:[#allocation66_spill] sm:$0xff] }
0x1125   : > { %7626 = vperm.xlu0 %8111, %v7607_v57   ;;  %v13278_v57 = vld [vmem:[#allocation49_spill] sm:$0xff] }
0x1126   : > { %vm4359_vm7 = vcmp.eq.f32.partialorder %v13278_v57, %v13277_v34 }
0x1128   : > { %8112 = vset.pattern.permute.xlu1 %v12956_v51 }
0x1129   : > { %7272 = vperm.xlu1 %8112, %v10877_v10   ;;  %v7503_v10 = vshra.s32 %v11320_v16, 16 }
0x112b   : > { %v11332_v62 = vcvt.s32.f32 %v7503_v10  ;;  %v4367_v10 = vsel %vm4359_vm7, %v13212_v4, 2147483647  ;;  %vm7476_vm7 = vcmp.eq.f32.partialorder %v11200_v22, %v11258_v1 }
0x112c   : > { %v11374_v37 = vsel %vm454_vm4, %v4367_v10, 2147483647 }
0x112d   : > { %8113 = vset.pattern.permute.xlu1 %v13213_v35  ;;  %v4419_v31 = vshra.s32 %v11374_v37, 16 }
0x112f   : > { %v11381_v60 = vcvt.s32.f32 %v4419_v31 }
0x1144   : > { %7506 = vmin.xlane.f32.xlu0 %v11332_v62 }
0x1148   : > { %7536 = vmin.xlane.f32.xlu0 %v11342_v32 }
0x114c   : > { %7566 = vmin.xlane.f32.xlu0 %v11352_v63 }
0x114f   : > { %v11388_v13 = vpop.xlane.xlu0 %5074 }
0x1150   : > { %7596 = vmin.xlane.f32.xlu0 %v11362_v33 }
0x1153   : > { %v5078_v41 = vpop.xlane.xlu1 %5077 }
0x1154   : > { %4392 = vmin.xlane.f32.xlu0 %v11370_v58  ;;  %8309 = vlog2.f32 %v5078_v41 }
0x1157   : > { %v11386_v51 = vpop.xlane.xlu1 %5080 }
0x1158   : > { %4407 = vmin.xlane.f32.xlu0 %v11377_v44 }
0x115c   : > { %4422 = vmin.xlane.f32.xlu0 %v11381_v60 }
0x1161   : > { %v8310_v34 = vpop.eup %8309 }
0x1162   : > { %v5100_v57 = vmul.f32 0.6931472, %v8310_v34 }
0x1164   : > { %v5114_v5 = vadd.f32 %v5100_v57, %v11267_v25 }
0x1166   : > { %v5187_v10 = vadd.f32 %v10733_v54, %v5114_v5 }
0x1172   : > { %5211 = vperm.xlu0 %8111, %v5187_v10  }
0x1188   : > { %v11390_v3 = vpop.xlane.xlu1 %5086 }
0x118c   : > { %v5084_v41 = vpop.xlane.xlu0 %5083  ;;  %v7630_v36 = vpop.permute.xlu1 %7629 }
0x118d   : > { %8311 = vlog2.f32 %v5084_v41 }
0x1190   : > { %v5090_v31 = vpop.xlane.xlu0 %5089  ;;  %v7633_v26 = vpop.permute.xlu1 %7632 }
0x1191   : > { %8313 = vlog2.f32 %v5090_v31 }
0x1194   : > { %v11392_v9 = vpop.xlane.xlu0 %5092  ;;  %v7636_v34 = vpop.permute.xlu1 %7635 }
0x1195   : > { %v7665_v46 = vrot.slane %v7636_v34, %v9104_v29 }
0x1198   : > { %v5096_v47 = vpop.xlane.xlu0 %5095  ;;  %v7639_v25 = vpop.permute.xlu1 %7638 }
0x1199   : > { %8315 = vlog2.f32 %v5096_v47 }
0x119a   : > { %v8312_v54 = vpop.eup %8311  ;;  %8317 = vlog2.f32 %v11388_v13 }
0x119b   : > { %v5104_v57 = vmul.f32 0.6931472, %v8312_v54  ;;  %v7657_v54 = vrot.slane %v7630_v36, %v9104_v29  ;;  %8319 = vlog2.f32 %v11386_v51 }
0x119c   : > { %v7642_v5 = vpop.permute.xlu1 %7641  ;;  %8321 = vlog2.f32 %v11390_v3 }
0x119d   : > { %v5116_v10 = vadd.f32 %v5104_v57, %v11278_v43  ;;  %v7478_v43 = vsel %vm7470_vm10, %v13212_v4, 2147483647  ;;  %8323 = vlog2.f32 %v11392_v9 }
0x119e   : > { %v8314_v45 = vpop.eup %8313 }
0x119f   : > { %v5108_v53 = vmul.f32 0.6931472, %v8314_v45  ;;  %v5189_v35 = vadd.f32 %v10653_v55, %v5116_v10  ;;  %v7661_v45 = vrot.slane %v7633_v26, %v9104_v29  ;;  %v7673_v26 = vrot.slane %v7642_v5, %v9104_v29 }
0x11a0   : > { %v7627_v41 = vpop.permute.xlu0 %7626  ;;  %v7645_v31 = vpop.permute.xlu1 %7644 }
0x11a1   : > { %v5118_v24 = vadd.f32 %v5108_v53, %v11281_v38  ;;  %v7653_v47 = vrot.slane %v7627_v41, %v9104_v29  ;;  %5217 = vperm.xlu0 %8111, %v5189_v35   ;;  %v7669_v35 = vrot.slane %v7639_v25, %v9104_v29  ;;  %v7677_v36 = vrot.slane %v7645_v31, %v9104_v29 }
0x11a3   : > { %v7678_v55 = vsel %vm872_vm14, %v7653_v47, %v7649_v56  ;;  %v5191_v57 = vadd.f32 %v10664_v61, %v5118_v24  ;;  %v11417_v61 = vsel %vm454_vm4, %v7478_v43, 2147483647  ;;  %v7484_v43 = vsel %vm7476_vm7, %v13212_v4, 2147483647 }
0x11a4   : > { %v7679_v39 = vsel %vm874_vm15, %v7657_v54, %v7678_v55  ;;  %v11408_v14 = vpop.permute.xlu1 %7272  ;;  %v7488_v41 = vshra.s32 %v11417_v61, 16  ;;  %v11438_v54 = vsel %vm454_vm4, %v7480_v8, 2147483647  ;;  %v11455_v55 = vsel %vm454_vm4, %v7484_v43, 2147483647 }
0x11a5   : > { %13279 = vst [vmem:[#allocation51_spill] sm:$0xff] %v11408_v14  ;;  %v7680_v53 = vsel %vm876_vm0, %v7661_v45, %v7679_v39  ;;  %5223 = vperm.xlu0 %8111, %v5191_v57   ;;  %vm7274_vm13 = vcmp.eq.s32.totalorder %v11408_v14, 1  ;;  %v7578_v1 = vshra.s32 %v11455_v55, 16  ;;  %v13281_v39 = vld [vmem:[#allocation21_spill] sm:$0xff] }
0x11a6   : > { %v8316_v38 = vpop.eup %8315  ;;  %v7681_v56 = vsel %vm878_vm1, %v7665_v46, %v7680_v53  ;;  %v11443_v27 = vcvt.s32.f32 %v7488_v41  ;;  %v13280_v46 = vld [vmem:[#allocation53_spill] sm:$0xff]  ;;  %v13282_v53 = vld [vmem:[#allocation46_spill] sm:$0xff] }
0x11a7   : > { %v5112_v24 = vmul.f32 0.6931472, %v8316_v38  ;;  %v7682_v2 = vsel %vm880_vm2, %v7669_v35, %v7681_v56  ;;  %v11462_v57 = vcvt.s32.f32 %v7578_v1  ;;  %vm4360_vm10 = vcmp.eq.f32.partialorder %v13281_v39, %v13280_v46  ;;  %v13283_v38 = vld [vmem:[#allocation28_spill] sm:$0xff]  ;;  %v8318_v51 = vpop.eup %8317 }
0x11a8   : > { %v7683_v34 = vsel %vm882_vm3, %v7673_v26, %v7682_v2  ;;  %v4368_v35 = vsel %vm4360_vm10, %v13212_v4, 2147483647  ;;  %vm4361_vm11 = vcmp.eq.f32.partialorder %v13283_v38, %v13282_v53  ;;  %v7502_v38 = vand.u32 65535, %v11320_v16 }
0x11a9   : > { %v5120_v25 = vadd.f32 %v5112_v24, %v11287_v15  ;;  %v7684_v5 = vsel %vm884_vm5, %v7677_v36, %v7683_v34  ;;  %v11447_v15 = vsel %vm454_vm4, %v7482_v7, 2147483647  ;;  %v11471_v26 = vsel %vm454_vm4, %v4368_v35, 2147483647  ;;  %v13284_v24 = vld [vmem:[#allocation41_spill] sm:$0xff] }
0x11aa   : > { %v11431_v10 = vsel %vm7274_vm13, %v7684_v5, %v11134_v0  ;;  %v7518_v0 = vshra.s32 %v11438_v54, 16  ;;  %v7548_v45 = vshra.s32 %v11447_v15, 16  ;;  %v4369_v56 = vsel %vm4361_vm11, %v13212_v4, 2147483647  ;;  %v13285_v36 = vld [vmem:[#allocation69_spill] sm:$0xff]  ;;  %v13287_v5 = vld [vmem:[#allocation48_spill] sm:$0xff] }
0x11ab   : > { %v7745_v31 = vsel %vm454_vm4, %v11431_v10, -inf  ;;  %v5193_v47 = vadd.f32 %v10757_v21, %v5120_v25  ;;  %vm4362_vm8 = vcmp.eq.f32.partialorder %v13285_v36, %v13284_v24  ;;  %v4434_v2 = vshra.s32 %v11471_v26, 16  ;;  %v13286_v25 = vld [vmem:[#allocation55_spill] sm:$0xff] }
0x11ac   : > { %7746 = vmax.xlane.f32.xlu1 %v7745_v31  ;;  %v11451_v21 = vcvt.s32.f32 %v7518_v0  ;;  %v11458_v22 = vcvt.s32.f32 %v7548_v45  ;;  %v11478_v8 = vsel %vm454_vm4, %v4369_v56, 2147483647  ;;  %v4370_v34 = vsel %vm4362_vm8, %v13212_v4, 2147483647 }
0x11ad   : > { %5229 = vperm.xlu0 %8111, %v5193_v47   ;;  %vm4363_vm7 = vcmp.eq.f32.partialorder %v13287_v5, %v13286_v25  ;;  %v11483_v41 = vcvt.s32.f32 %v4434_v2  ;;  %v4449_v31 = vshra.s32 %v11478_v8, 16  ;;  %v11487_v47 = vsel %vm454_vm4, %v4370_v34, 2147483647 }
0x11ae   : > { %v4371_v7 = vsel %vm4363_vm7, %v13212_v4, 2147483647  ;;  %v4464_v45 = vshra.s32 %v11487_v47, 16  ;;  %v7504_v36 = vcvt.s32.f32 %v7502_v38  ;;  %v7532_v2 = vand.u32 65535, %v11327_v12 }
0x11af   : > { %v11493_v43 = vcvt.s32.f32 %v4449_v31  ;;  %v11497_v1 = vsel %vm454_vm4, %v4371_v7, 2147483647  ;;  %v4388_v34 = vand.u32 65535, %v11356_v48  ;;  %v4403_v7 = vand.u32 65535, %v11366_v30 }
0x11b0   : > { %7491 = vmin.xlane.f32.xlu1 %v11443_v27  ;;  %v11502_v39 = vcvt.s32.f32 %v4464_v45  ;;  %v4479_v35 = vshra.s32 %v11497_v1, 16  ;;  %v7534_v5 = vcvt.s32.f32 %v7532_v2  ;;  %v5098_v3 = vmul.f32 0.6931472, %v8318_v51 }
0x11b1   : > { %v4390_v31 = vcvt.s32.f32 %v4388_v34  ;;  %v4405_v48 = vcvt.s32.f32 %v4403_v7 }
0x11b2   : > { %v11509_v56 = vcvt.s32.f32 %v4479_v35  ;;  %v4418_v35 = vand.u32 65535, %v11374_v37 }
0x11b4   : > { %7521 = vmin.xlane.f32.xlu1 %v11451_v21  ;;  %v4420_v30 = vcvt.s32.f32 %v4418_v35  ;;  %v7592_v35 = vand.u32 65535, %v11346_v20 }
0x11b8   : > { %7551 = vmin.xlane.f32.xlu1 %v11458_v22 }
0x11bc   : > { %7581 = vmin.xlane.f32.xlu1 %v11462_v57 }
0x11cc   : > { %4437 = vmin.xlane.f32.xlu0 %v11483_v41 }
0x11cd   : > { %v11491_v0 = vpop.xlane.xlu0 %7506 }
0x11ce   : > { %vm7508_vm10 = vcmp.eq.f32.partialorder %v11332_v62, %v11491_v0 }
0x11cf   : > { %v7509_v25 = vsel %vm7508_vm10, %v7504_v36, inf }
0x11d0   : > { %4452 = vmin.xlane.f32.xlu0 %v11493_v43 }
0x11d1   : > { %v11500_v46 = vpop.xlane.xlu0 %7536 }
0x11d2   : > { %vm7538_vm11 = vcmp.eq.f32.partialorder %v11342_v32, %v11500_v46 }
0x11d3   : > { %v7539_v62 = vsel %vm7538_vm11, %v7534_v5, inf }
0x11d4   : > { %4467 = vmin.xlane.f32.xlu0 %v11502_v39 }
0x11d5   : > { %v11506_v53 = vpop.xlane.xlu0 %7566 }
0x11d8   : > { %4482 = vmin.xlane.f32.xlu0 %v11509_v56 }
0x11d9   : > { %v11514_v24 = vpop.xlane.xlu0 %7596 }
0x11dc   : > { %7510 = vmin.xlane.f32.xlu0 %v7509_v25 }
0x11dd   : > { %v11520_v16 = vpop.xlane.xlu0 %4392 }
0x11de   : > { %vm4394_vm8 = vcmp.eq.f32.partialorder %v11370_v58, %v11520_v16 }
0x11df   : > { %v4395_v45 = vsel %vm4394_vm8, %v4390_v31, inf  ;;  %v7562_v31 = vand.u32 65535, %v11336_v50 }
0x11e0   : > { %7540 = vmin.xlane.f32.xlu0 %v7539_v62  ;;  %4396 = vmin.xlane.f32.xlu1 %v4395_v45  ;;  %v7577_v45 = vand.u32 65535, %v11455_v55 }
0x11e1   : > { %v11525_v12 = vpop.xlane.xlu0 %4407  ;;  %v7564_v62 = vcvt.s32.f32 %v7562_v31  ;;  %v13290_v31 = vld [vmem:[#allocation67_spill] sm:$0xff] }
0x11e2   : > { %vm4409_vm7 = vcmp.eq.f32.partialorder %v11377_v44, %v11525_v12 }
0x11e3   : > { %v4410_v32 = vsel %vm4409_vm7, %v4405_v48, inf  ;;  %vm6433_vm7 = vcmp.eq.f32.partialorder %v10946_v28, %v11038_v6 }
0x11e4   : > { %4411 = vmin.xlane.f32.xlu1 %v4410_v32  ;;  %v6441_v50 = vsel %vm6433_vm7, %v13212_v4, 2147483647  ;;  %vm7598_vm7 = vcmp.eq.f32.partialorder %v11362_v33, %v11514_v24 }
0x11e5   : > { %v11530_v38 = vpop.xlane.xlu0 %4422 }
0x11e6   : > { %vm4424_vm10 = vcmp.eq.f32.partialorder %v11381_v60, %v11530_v38 }
0x11e7   : > { %v4425_v58 = vsel %vm4424_vm10, %v4420_v30, inf  ;;  %vm7568_vm10 = vcmp.eq.f32.partialorder %v11352_v63, %v11506_v53  ;;  %v7579_v63 = vcvt.s32.f32 %v7577_v45  ;;  %v11576_v30 = vsel %vm454_vm4, %v6441_v50, 2147483647 }
0x11e8   : > { %4426 = vmin.xlane.f32.xlu1 %v4425_v58  ;;  %v7569_v48 = vsel %vm7568_vm10, %v7564_v62, inf  ;;  %v6465_v20 = vshra.s32 %v11576_v30, 16 }
0x11ed   : > { %v5212_v62 = vpop.permute.xlu0 %5211 }
0x121c   : > { %v11599_v45 = vpop.permute.xlu0 %5217 }
0x1220   : > { %v11601_v50 = vpop.permute.xlu0 %5223 }
0x1235   : > { %v11535_v36 = vpop.xlane.xlu1 %7746 }
0x1236   : > { %13288 = vst [vmem:[#allocation66_spill] sm:$0xff] %v11535_v36  ;;  %vm7748_vm11 = vcmp.eq.f32.partialorder %v11431_v10, %v11535_v36  ;;  %v7547_v10 = vand.u32 65535, %v11447_v15  ;;  %v8320_v15 = vpop.eup %8319 }
0x1237   : > { %v7749_v37 = vsel %vm7748_vm11, %v13212_v4, 2147483647  ;;  %vm6435_vm11 = vcmp.eq.f32.partialorder %v10954_v11, %v11040_v17  ;;  %v5102_v28 = vmul.f32 0.6931472, %v8320_v15  ;;  %v8322_v6 = vpop.eup %8321 }
0x1238   : > { %v11542_v44 = vsel %vm454_vm4, %v7749_v37, 2147483647  ;;  %v7549_v5 = vcvt.s32.f32 %v7547_v10  ;;  %v6443_v32 = vsel %vm6435_vm11, %v13212_v4, 2147483647  ;;  %v5106_v11 = vmul.f32 0.6931472, %v8322_v6 }
0x1239   : > { %v11544_v2 = vpop.xlane.xlu1 %7491  ;;  %v7752_v60 = vshra.s32 %v11542_v44, 16  ;;  %v5115_v58 = vadd.f32 %v5102_v28, %v11260_v49 }
0x123a   : > { %v5117_v10 = vadd.f32 %v5106_v11, %v11275_v59  ;;  %v13292_v59 = vld [vmem:[#allocation34_spill] sm:$0xff] }
0x123b   : > { %v11547_v34 = vcvt.s32.f32 %v7752_v60  ;;  %v11584_v60 = vsel %vm454_vm4, %v6443_v32, 2147483647  ;;  %v5188_v49 = vadd.f32 %v10738_v52, %v5115_v58  ;;  %v13293_v52 = vmov 5  }
0x123c   : > { %13289 = vst [vmem:[#allocation49_spill] sm:$0xff] %v11584_v60  ;;  %v6495_v33 = vshra.s32 %v11584_v60, 16  ;;  %v4463_v58 = vand.u32 65535, %v11487_v47  ;;  %v13295_v47 = vld [vmem:[#allocation16_spill] sm:$0xff] }
0x123d   : > { %7755 = vmin.xlane.f32.xlu1 %v11547_v34  ;;  %v11551_v13 = vpop.xlane.xlu1 %7521 }
0x1241   : > { %v11555_v25 = vpop.xlane.xlu1 %7551 }
0x1242   : > { %vm7553_vm8 = vcmp.eq.f32.partialorder %v11458_v22, %v11555_v25  ;;  %v5113_v22 = vadd.f32 %v5098_v3, %v11262_v19  ;;  %v8324_v19 = vpop.eup %8323  ;;  %v11594_v3 = vcvt.s32.f32 %v6495_v33 }
0x1243   : > { %v7554_v7 = vsel %vm7553_vm8, %v7549_v5, inf  ;;  %v5110_v51 = vmul.f32 0.6931472, %v8324_v19 }
0x1244   : > { %7555 = vmin.xlane.f32.xlu0 %v7554_v7  ;;  %v5186_v17 = vadd.f32 %v10645_v18, %v5113_v22  ;;  %v11588_v18 = vcvt.s32.f32 %v6465_v20  ;;  %v5190_v7 = vadd.f32 %v13290_v31, %v5117_v10  ;;  %13291 = vst [vmem:[#allocation53_spill] sm:$0xff] %v11594_v3  ;;  %v4433_v22 = vand.u32 65535, %v11471_v26 }
0x1245   : > { %v11564_v9 = vpop.xlane.xlu1 %7581  ;;  %v5119_v5 = vadd.f32 %v5110_v51, %v11284_v42  ;;  %v11603_v42 = vpop.permute.xlu0 %5229  ;;  %v4465_v26 = vcvt.s32.f32 %v4463_v58 }
0x1246   : > { %vm7583_vm8 = vcmp.eq.f32.partialorder %v11462_v57, %v11564_v9  ;;  %v7594_v57 = vcvt.s32.f32 %v7592_v35  ;;  %v4435_v6 = vcvt.s32.f32 %v4433_v22 }
0x1247   : > { %v7584_v55 = vsel %vm7583_vm8, %v7579_v63, inf  ;;  %v5192_v15 = vadd.f32 %v13292_v59, %v5119_v5  ;;  %v4448_v63 = vand.u32 65535, %v11478_v8  ;;  %v7487_v8 = vand.u32 65535, %v11417_v61  ;;  %v13297_v61 = vld [vmem:[#allocation32_spill] sm:$0xff] }
0x1248   : > { %7570 = vmin.xlane.f32.xlu0 %v7569_v48  ;;  %v7599_v37 = vsel %vm7598_vm7, %v7594_v57, inf  ;;  %vm6432_vm7 = vcmp.eq.f32.partialorder %v10938_v23, %v11036_v40  ;;  %v7517_v57 = vand.u32 65535, %v11438_v54  ;;  %v13296_v40 = vld [vmem:[#allocation76_spill] sm:$0xff] }
0x1249   : > { %v7489_v19 = vcvt.s32.f32 %v7487_v8  ;;  %v5246_v8 = vrot.slane %v11599_v45, %v9104_v29 }
0x124c   : > { %7585 = vmin.xlane.f32.xlu0 %v7584_v55  ;;  %v4450_v55 = vcvt.s32.f32 %v4448_v63 }
0x124e   : > { %5208 = vperm.xlu1 %8113, %v5186_v17   ;;  %v6440_v17 = vsel %vm6432_vm7, %v13212_v4, 2147483647  ;;  %vm6436_vm7 = vcmp.eq.f32.partialorder %v13297_v61, %v13296_v40  ;;  %v13298_v61 = vld [vmem:[#allocation93_spill] sm:$0xff] }
0x124f   : > { %v11630_v20 = vsel %vm454_vm4, %v6440_v17, 2147483647  ;;  %v6444_v54 = vsel %vm6436_vm7, %v13212_v4, 2147483647 }
0x1250   : > { %7600 = vmin.xlane.f32.xlu0 %v7599_v37  ;;  %v6450_v37 = vshra.s32 %v11630_v20, 16  ;;  %v11646_v5 = vsel %vm454_vm4, %v6444_v54, 2147483647 }
0x1251   : > { %v6510_v31 = vshra.s32 %v11646_v5, 16 }
0x1252   : > { %5214 = vperm.xlu1 %8113, %v5188_v49   ;;  %v11642_v49 = vcvt.s32.f32 %v6450_v37 }
0x1254   : > { %6468 = vmin.xlane.f32.xlu0 %v11588_v18 }
0x1255   : > { %v11605_v48 = vpop.xlane.xlu0 %4437 }
0x1256   : > { %5220 = vperm.xlu1 %8113, %v5190_v7   ;;  %vm4439_vm10 = vcmp.eq.f32.partialorder %v11483_v41, %v11605_v48  ;;  %v11653_v7 = vcvt.s32.f32 %v6510_v31 }
0x1257   : > { %v4440_v35 = vsel %vm4439_vm10, %v4435_v6, inf  ;;  %vm7493_vm10 = vcmp.eq.f32.partialorder %v11443_v27, %v11544_v2  ;;  %v7519_v27 = vcvt.s32.f32 %v7517_v57 }
0x1258   : > { %6498 = vmin.xlane.f32.xlu0 %v11594_v3 }
0x1259   : > { %v11608_v28 = vpop.xlane.xlu0 %4452 }
0x125a   : > { %5226 = vperm.xlu1 %8113, %v5192_v15   ;;  %vm4454_vm11 = vcmp.eq.f32.partialorder %v11493_v43, %v11608_v28  ;;  %v13294_v43 = vld [vmem:[#allocation74_spill] sm:$0xff] }
0x125b   : > { %v4455_v11 = vsel %vm4454_vm11, %v4450_v55, inf  ;;  %vm6434_vm11 = vcmp.eq.f32.partialorder %v13295_v47, %v13294_v43 }
0x125c   : > { %v6442_v23 = vsel %vm6434_vm11, %v13212_v4, 2147483647 }
0x125d   : > { %v11615_v32 = vpop.xlane.xlu0 %4467  ;;  %v11639_v51 = vsel %vm454_vm4, %v6442_v23, 2147483647 }
0x125e   : > { %8114 = vset.pattern.permute.xlu1 %v13293_v52  ;;  %vm4469_vm8 = vcmp.eq.f32.partialorder %v11502_v39, %v11615_v32  ;;  %v7494_v39 = vsel %vm7493_vm10, %v7489_v19, inf  ;;  %v6480_v33 = vshra.s32 %v11639_v51, 16 }
0x125f   : > { %v4470_v41 = vsel %vm4469_vm8, %v4465_v26, inf  ;;  %vm7523_vm8 = vcmp.eq.f32.partialorder %v11451_v21, %v11551_v13 }
0x1260   : > { %v7524_v10 = vsel %vm7523_vm8, %v7519_v27, inf  ;;  %v11649_v21 = vcvt.s32.f32 %v6480_v33 }
0x1269   : > { %v11656_v59 = vpop.xlane.xlu1 %4396 }
0x126d   : > { %v11658_v15 = vpop.xlane.xlu1 %4411 }
0x1271   : > { %v11660_v52 = vpop.xlane.xlu1 %4426 }
0x127e   : > { %4441 = vmin.xlane.f32.xlu1 %v4440_v35  ;;  %v5238_v35 = vrot.slane %v5212_v62, %v9104_v29  ;;  %v5254_v62 = vrot.slane %v11601_v50, %v9104_v29 }
0x1282   : > { %4456 = vmin.xlane.f32.xlu1 %v4455_v11 }
0x1286   : > { %4471 = vmin.xlane.f32.xlu1 %v4470_v41 }
0x128a   : > { %7495 = vmin.xlane.f32.xlu1 %v7494_v39  ;;  %v5262_v39 = vrot.slane %v11603_v42, %v9104_v29 }
0x128e   : > { %7525 = vmin.xlane.f32.xlu1 %v7524_v10  ;;  %v13301_v10 = vld [vmem:[#allocation13_spill] sm:$0xff] }
0x1292   : > { %6453 = vmin.xlane.f32.xlu1 %v11642_v49 }
0x1296   : > { %6483 = vmin.xlane.f32.xlu1 %v11649_v21 }
0x129a   : > { %6513 = vmin.xlane.f32.xlu1 %v11653_v7 }
0x12c6   : > { %v11662_v22 = vpop.xlane.xlu1 %7755 }
0x12c7   : > { %vm7757_vm7 = vcmp.eq.f32.partialorder %v11547_v34, %v11662_v22 }
0x12ca   : > { %v5209_v6 = vpop.permute.xlu1 %5208 }
0x12cb   : > { %v5234_v63 = vrot.slane %v5209_v6, %v9104_v29  ;;  %v13302_v6 = vld [vmem:[#allocation4_spill] sm:$0xff] }
0x12cd   : > { %v5263_v11 = vsel %vm872_vm14, %v5238_v35, %v5234_v63 }
0x12ce   : > { %v5215_v55 = vpop.permute.xlu1 %5214 }
0x12cf   : > { %v5242_v58 = vrot.slane %v5215_v55, %v9104_v29 }
0x12d1   : > { %v5264_v26 = vsel %vm874_vm15, %v5242_v58, %v5263_v11 }
0x12d2   : > { %v5221_v41 = vpop.permute.xlu1 %5220  ;;  %v5265_v43 = vsel %vm876_vm0, %v5246_v8, %v5264_v26  ;;  %v11699_v26 = vld [vmem:[%s12770_s5] sm:$0xff] }
0x12d3   : > { %v5250_v17 = vrot.slane %v5221_v41, %v9104_v29  ;;  %13303 = vst [vmem:[#allocation46_spill] sm:$0xff] %v11699_v26 }
0x12d5   : > { %v5266_v47 = vsel %vm878_vm1, %v5250_v17, %v5265_v43  ;;  %v13305_v43 = vld [vmem:[#allocation78_spill] sm:$0xff] }
0x12d6   : > { %v5227_v19 = vpop.permute.xlu1 %5226  ;;  %v5267_v23 = vsel %vm880_vm2, %v5254_v62, %v5266_v47  ;;  %v13306_v47 = vld [vmem:[#allocation35_spill] sm:$0xff] }
0x12d7   : > { %v5258_v57 = vrot.slane %v5227_v19, %v9104_v29  ;;  %vm6438_vm10 = vcmp.eq.f32.partialorder %v13306_v47, %v13305_v43 }
0x12d9   : > { %v5268_v45 = vsel %vm882_vm3, %v5258_v57, %v5267_v23 }
0x12da   : > { %v5269_v40 = vsel %vm884_vm5, %v5262_v39, %v5268_v45 }
0x12db   : > { %v11685_v37 = vsel %vm5198_vm12, %v5269_v40, %v13298_v61 }
0x12dc   : > { %13300 = vst [vmem:[#allocation21_spill] sm:$0xff] %v11685_v37  ;;  %v5973_v50 = vrot.slane %v11685_v37, %v13301_v10  ;;  %v5966_v54 = vcombine.high %v11685_v37, %v11685_v37 }
0x12de   : > { %v5989_v33 = vrot.slane %v5973_v50, %v13301_v10  ;;  %v5981_v42 = vcombine.high %v5973_v50, %v5973_v50  ;;  %v5980_v31 = vrot.slane %v5966_v54, %v13301_v10 }
0x12e0   : > { %v6018_v63 = vrot.slane %v5989_v33, %v13302_v6  ;;  %v6011_v35 = vcombine.high %v5989_v33, %v5989_v33  ;;  %v6003_v55 = vrot.slane %v5981_v42, %v13301_v10  ;;  %v5996_v58 = vrot.slane %v5980_v31, %v13301_v10 }
0x12e1   : > { %v5982_v11 = vcombine.high %v5980_v31, %v5980_v31  ;;  %v6446_v42 = vsel %vm6438_vm10, %v13212_v4, 2147483647 }
0x12e2   : > { %v11702_v8 = vadd.f32 %v11699_v26, %v6018_v63  ;;  %v6026_v41 = vrot.slane %v6011_v35, %v13302_v6  ;;  %v6022_v17 = vrot.slane %v6003_v55, %v13302_v6  ;;  %v6034_v62 = vrot.slane %v5996_v58, %v13302_v6 }
0x12e3   : > { %v6013_v19 = vcombine.high %v6003_v55, %v6003_v55  ;;  %v6012_v57 = vcombine.high %v5996_v58, %v5996_v58  ;;  %v6010_v40 = vrot.slane %v5982_v11, %v13301_v10  ;;  %v13307_v58 = vld [vmem:[#allocation75_spill] sm:$0xff]  ;;  %v11740_v43 = vsel %vm454_vm4, %v6446_v42, 2147483647 }
0x12e4   : > { %13304 = vst [vmem:[#allocation28_spill] sm:$0xff] %v11702_v8  ;;  %v6063_v39 = vsel %vm454_vm4, %v11702_v8, -inf  ;;  %v11712_v23 = vadd.f32 %v11699_v26, %v6026_v41  ;;  %v11715_v45 = vadd.f32 %v11699_v26, %v6022_v17  ;;  %v11722_v54 = vadd.f32 %v11699_v26, %v6034_v62  ;;  %v13308_v11 = vld [vmem:[#allocation3_spill] sm:$0xff]  ;;  %13309 = vst [vmem:[#allocation41_spill] sm:$0xff] %v11740_v43 }
0x12e5   : > { %6064 = vmax.xlane.f32.xlu0 %v6063_v39  ;;  %v6030_v61 = vrot.slane %v6013_v19, %v13302_v6  ;;  %v6042_v33 = vrot.slane %v6012_v57, %v13302_v6  ;;  %v6038_v35 = vrot.slane %v6010_v40, %v13302_v6  ;;  %v6014_v55 = vcombine.high %v6010_v40, %v6010_v40  ;;  %v13310_v40 = vld [vmem:[#allocation77_spill] sm:$0xff] }
0x12e6   : > { %v6069_v50 = vsel %vm454_vm4, %v11712_v23, -inf  ;;  %v6066_v31 = vsel %vm454_vm4, %v11715_v45, -inf  ;;  %vm6437_vm11 = vcmp.eq.f32.partialorder %v13308_v11, %v13307_v58  ;;  %v6075_v41 = vsel %vm454_vm4, %v11722_v54, -inf }
0x12e7   : > { %6070 = vmax.xlane.f32.xlu1 %v6069_v50  ;;  %v11729_v63 = vadd.f32 %v11699_v26, %v6030_v61  ;;  %v11737_v17 = vadd.f32 %v11699_v26, %v6042_v33  ;;  %v11745_v62 = vadd.f32 %v11699_v26, %v6038_v35  ;;  %v6046_v19 = vrot.slane %v6014_v55, %v13302_v6  ;;  %v13311_v61 = vld [vmem:[#allocation39_spill] sm:$0xff] }
0x12e8   : > { %v6445_v57 = vsel %vm6437_vm11, %v13212_v4, 2147483647  ;;  %v6540_v39 = vshra.s32 %v11740_v43, 16  ;;  %vm6439_vm8 = vcmp.eq.f32.partialorder %v13311_v61, %v13310_v40  ;;  %v4478_v61 = vand.u32 65535, %v11497_v1 }
0x12e9   : > { %6067 = vmax.xlane.f32.xlu0 %v6066_v31  ;;  %v6072_v47 = vsel %vm454_vm4, %v11729_v63, -inf  ;;  %v6081_v50 = vsel %vm454_vm4, %v11737_v17, -inf  ;;  %v6078_v33 = vsel %vm454_vm4, %v11745_v62, -inf  ;;  %v11757_v42 = vadd.f32 %v11699_v26, %v6046_v19 }
0x12ea   : > { %v7751_v31 = vand.u32 65535, %v11542_v44  ;;  %v11761_v35 = vsel %vm454_vm4, %v6445_v57, 2147483647  ;;  %v6447_v55 = vsel %vm6439_vm8, %v13212_v4, 2147483647  ;;  %v11764_v58 = vcvt.s32.f32 %v6540_v39 }
0x12eb   : > { %6076 = vmax.xlane.f32.xlu1 %v6075_v41  ;;  %13312 = vst [vmem:[#allocation69_spill] sm:$0xff] %v11757_v42  ;;  %13313 = vst [vmem:[#allocation55_spill] sm:$0xff] %v11761_v35  ;;  %v6525_v11 = vshra.s32 %v11761_v35, 16  ;;  %v11770_v41 = vpop.xlane.xlu0 %4482  ;;  %v6084_v44 = vsel %vm454_vm4, %v11757_v42, -inf  ;;  %v11775_v19 = vsel %vm454_vm4, %v6447_v55, 2147483647  ;;  %v7528_v6 = vcvt.f32.s32 %v11551_v13 }
0x12ec   : > { %13314 = vst [vmem:[#allocation48_spill] sm:$0xff] %v11764_v58  ;;  %13315 = vst [vmem:[#allocation67_spill] sm:$0xff] %v11775_v19  ;;  %v6555_v40 = vshra.s32 %v11775_v19, 16  ;;  %vm4484_vm10 = vcmp.eq.f32.partialorder %v11509_v56, %v11770_v41  ;;  %v7498_v56 = vcvt.f32.s32 %v11544_v2  ;;  %v7558_v10 = vcvt.f32.s32 %v11555_v25 }
0x12ed   : > { %6073 = vmax.xlane.f32.xlu0 %v6072_v47  ;;  %v7753_v47 = vcvt.s32.f32 %v7751_v31  ;;  %v11777_v39 = vcvt.s32.f32 %v6525_v11 }
0x12ee   : > { %v7499_v26 = vshll.u32 %v7498_v56, 16  ;;  %v7559_v13 = vshll.u32 %v7558_v10, 16 }
0x12ef   : > { %6082 = vmax.xlane.f32.xlu1 %v6081_v50  ;;  %v7758_v57 = vsel %vm7757_vm7, %v7753_v47, inf  ;;  %13316 = vst [vmem:[#allocation34_spill] sm:$0xff] %v11777_v39  ;;  %v7511_v34 = vpop.xlane.xlu0 %7510  ;;  %v11782_v50 = vcvt.s32.f32 %v6555_v40  ;;  %v13319_v40 = vmov 6  }
0x12f0   : > { %v7512_v37 = vcvt.f32.s32 %v7511_v34 }
0x12f1   : > { %6079 = vmax.xlane.f32.xlu0 %v6078_v33  ;;  %13317 = vst [vmem:[#allocation74_spill] sm:$0xff] %v11782_v50  ;;  %v4480_v33 = vcvt.s32.f32 %v4478_v61 }
0x12f3   : > { %6543 = vmin.xlane.f32.xlu1 %v11764_v58  ;;  %v7541_v31 = vpop.xlane.xlu0 %7540  ;;  %v4485_v55 = vsel %vm4484_vm10, %v4480_v33, inf  ;;  %v7513_v33 = vcvt.f32.s32 %v11491_v0 }
0x12f4   : > { %v7542_v8 = vcvt.f32.s32 %v7541_v31 }
0x12f5   : > { %6085 = vmax.xlane.f32.xlu0 %v6084_v44  ;;  %v11788_v44 = vld [vmem:[%s8515_s11] sm:$0xff]  ;;  %v7514_v42 = vshll.u32 %v7513_v33, 16 }
0x12f6   : > { %13318 = vst [vmem:[#allocation16_spill] sm:$0xff] %v11788_v44 }
0x12f7   : > { %7759 = vmin.xlane.f32.xlu1 %v7758_v57  ;;  %v7556_v11 = vpop.xlane.xlu0 %7555  ;;  %v7515_v34 = vadd.s32 %v7514_v42, %v7512_v37 }
0x12f8   : > { %v7557_v2 = vcvt.f32.s32 %v7556_v11 }
0x12f9   : > { %6528 = vmin.xlane.f32.xlu0 %v11777_v39  ;;  %v7529_v39 = vshll.u32 %v7528_v6, 16 }
0x12fb   : > { %v7571_v57 = vpop.xlane.xlu0 %7570 }
0x12fc   : > { %v7572_v43 = vcvt.f32.s32 %v7571_v57 }
0x12fd   : > { %6558 = vmin.xlane.f32.xlu0 %v11782_v50  ;;  %v7588_v50 = vcvt.f32.s32 %v11564_v9  ;;  %v7560_v9 = vadd.s32 %v7559_v13, %v7557_v2 }
0x12ff   : > { %v7586_v61 = vpop.xlane.xlu0 %7585  ;;  %v7589_v31 = vshll.u32 %v7588_v50, 16 }
0x1300   : > { %v7587_v35 = vcvt.f32.s32 %v7586_v61  ;;  %v13320_v61 = vld [vmem:[#allocation33_spill] sm:$0xff] }
0x1301   : > { %4486 = vmin.xlane.f32.xlu0 %v4485_v55  ;;  %v7543_v55 = vcvt.f32.s32 %v11500_v46  ;;  %v7603_v46 = vcvt.f32.s32 %v11514_v24 }
0x1302   : > { %v7590_v37 = vadd.s32 %v7589_v31, %v7587_v35  ;;  %v13325_v31 = vld [vmem:[#allocation26_spill] sm:$0xff] }
0x1303   : > { %v7601_v19 = vpop.xlane.xlu0 %7600  ;;  %v7544_v0 = vshll.u32 %v7543_v55, 16  ;;  %v7604_v60 = vshll.u32 %v7603_v46, 16  ;;  %v13321_v55 = vld [vmem:[#allocation40_spill] sm:$0xff] }
0x1304   : > { %v7602_v3 = vcvt.f32.s32 %v7601_v19  ;;  %v7706_v19 = vrot.slane %v7560_v9, %v9104_v29  ;;  %vm5395_vm11 = vcmp.eq.f32.partialorder %v13321_v55, %v13320_v61  ;;  %v13326_v61 = vld [vmem:[#allocation73_spill] sm:$0xff] }
0x1305   : > { %v7545_v33 = vadd.s32 %v7544_v0, %v7542_v8  ;;  %v5403_v0 = vsel %vm5395_vm11, %v13212_v4, 2147483647  ;;  %v4384_v55 = vcvt.f32.s32 %v13326_v61 }
0x1306   : > { %v7605_v42 = vadd.s32 %v7604_v60, %v7602_v3 }
0x1307   : > { %v11790_v47 = vpop.xlane.xlu1 %4441  ;;  %v7702_v10 = vrot.slane %v7545_v33, %v9104_v29 }
0x1308   : > { %4618 = vperm.xlu1 %8114, %v11788_v44   ;;  %v7718_v60 = vrot.slane %v7605_v42, %v9104_v29 }
0x130b   : > { %v11793_v1 = vpop.xlane.xlu1 %4456 }
0x130c   : > { %8115 = vset.pattern.permute.xlu1 %v13319_v40  ;;  %v7573_v40 = vcvt.f32.s32 %v11506_v53 }
0x130f   : > { %v11796_v36 = vpop.xlane.xlu1 %4471 }
0x1313   : > { %v7496_v27 = vpop.xlane.xlu1 %7495 }
0x1314   : > { %v7497_v44 = vcvt.f32.s32 %v7496_v27  ;;  %v7574_v27 = vshll.u32 %v7573_v40, 16 }
0x1316   : > { %v7500_v58 = vadd.s32 %v7499_v26, %v7497_v44  ;;  %v7694_v26 = vrot.slane %v7515_v34, %v9104_v29  ;;  %v7575_v44 = vadd.s32 %v7574_v27, %v7572_v43  ;;  %v7714_v43 = vrot.slane %v7590_v37, %v9104_v29  ;;  %v13322_v34 = vld [vmem:[#allocation36_spill] sm:$0xff] }
0x1317   : > { %v7526_v56 = vpop.xlane.xlu1 %7525  ;;  %v11838_v27 = vsel %vm454_vm4, %v5403_v0, 2147483647 }
0x1318   : > { %v7527_v25 = vcvt.f32.s32 %v7526_v56  ;;  %v7690_v53 = vrot.slane %v7500_v58, %v9104_v29  ;;  %v13323_v56 = vld [vmem:[#allocation42_spill] sm:$0xff] }
0x1319   : > { %vm5396_vm8 = vcmp.eq.f32.partialorder %v13323_v56, %v13322_v34  ;;  %v4385_v34 = vshll.u32 %v4384_v55, 16  ;;  %v4399_v56 = vcvt.f32.s32 %v11520_v16 }
0x131a   : > { %v7530_v11 = vadd.s32 %v7529_v39, %v7527_v25  ;;  %v7719_v8 = vsel %vm872_vm14, %v7694_v26, %v7690_v53  ;;  %v7710_v39 = vrot.slane %v7575_v44, %v9104_v29  ;;  %v6509_v25 = vand.u32 65535, %v11646_v5  ;;  %v13324_v53 = vld [vmem:[#allocation30_spill] sm:$0xff] }
0x131b   : > { %v11808_v24 = vpop.xlane.xlu1 %6453  ;;  %v5404_v33 = vsel %vm5396_vm8, %v13212_v4, 2147483647  ;;  %vm5398_vm10 = vcmp.eq.f32.partialorder %v13325_v31, %v13324_v53 }
0x131c   : > { %v7698_v6 = vrot.slane %v7530_v11, %v9104_v29  ;;  %v6511_v9 = vcvt.s32.f32 %v6509_v25  ;;  %v5427_v11 = vshra.s32 %v11838_v27, 16  ;;  %v11847_v44 = vsel %vm454_vm4, %v5404_v33, 2147483647 }
0x131d   : > { %v5406_v5 = vsel %vm5398_vm10, %v13212_v4, 2147483647  ;;  %v4414_v33 = vcvt.f32.s32 %v11525_v12  ;;  %v4444_v12 = vcvt.f32.s32 %v11605_v48 }
0x131e   : > { %v7720_v58 = vsel %vm874_vm15, %v7698_v6, %v7719_v8  ;;  %v11850_v37 = vcvt.s32.f32 %v5427_v11  ;;  %v5442_v6 = vshra.s32 %v11847_v44, 16  ;;  %v4398_v11 = vcvt.f32.s32 %v11656_v59 }
0x131f   : > { %v7721_v50 = vsel %vm876_vm0, %v7702_v10, %v7720_v58  ;;  %v11817_v57 = vpop.xlane.xlu1 %6483  ;;  %v11854_v10 = vsel %vm454_vm4, %v5406_v5, 2147483647  ;;  %v7762_v5 = vcvt.f32.s32 %v11662_v22  ;;  %v4474_v59 = vcvt.f32.s32 %v11615_v32 }
0x1320   : > { %v7722_v35 = vsel %vm878_vm1, %v7706_v19, %v7721_v50  ;;  %v5472_v42 = vshra.s32 %v11854_v10, 16  ;;  %v11864_v19 = vpop.xlane.xlu0 %6468 }
0x1321   : > { %v7723_v3 = vsel %vm880_vm2, %v7710_v39, %v7722_v35  ;;  %vm6470_vm10 = vcmp.eq.f32.partialorder %v11588_v18, %v11864_v19 }
0x1322   : > { %v7724_v40 = vsel %vm882_vm3, %v7714_v43, %v7723_v3  ;;  %v11861_v8 = vcvt.s32.f32 %v5472_v42  ;;  %v4459_v42 = vcvt.f32.s32 %v11608_v28  ;;  %v4443_v28 = vcvt.f32.s32 %v11790_v47 }
0x1323   : > { %v7725_v2 = vsel %vm884_vm5, %v7718_v60, %v7724_v40  ;;  %v11834_v13 = vpop.xlane.xlu1 %6513  ;;  %v13327_v40 = vld [vmem:[#allocation87_spill] sm:$0xff] }
0x1324   : > { %v7726_v46 = vsel %vm7274_vm13, %v7725_v2, %v13212_v4  ;;  %vm6515_vm7 = vcmp.eq.f32.partialorder %v11653_v7, %v11834_v13  ;;  %v11857_v7 = vcvt.s32.f32 %v5442_v6  ;;  %v11866_v58 = vpop.xlane.xlu0 %6498  ;;  %v4383_v2 = vcvt.f32.s32 %v13327_v40 }
0x1325   : > { %7728 = vst.msk [vmem:[#allocation2 + $0x30] sm:$0xff] %vm454_vm4, %v7726_v46  ;;  %v6516_v26 = vsel %vm6515_vm7, %v6511_v9, inf  ;;  %v6449_v46 = vand.u32 65535, %v11630_v20  ;;  %v4413_v20 = vcvt.f32.s32 %v11658_v15  ;;  %v4400_v6 = vshll.u32 %v4399_v56, 16 }
0x1326   : > { %v4386_v9 = vadd.s32 %v4385_v34, %v4383_v2  ;;  %v4428_v40 = vcvt.f32.s32 %v11660_v52  ;;  %v4460_v56 = vshll.u32 %v4459_v42, 16  ;;  %v4489_v52 = vcvt.f32.s32 %v11770_v41 }
0x1327   : > { %v11897_v16 = vcvt.s32.f32 %v6449_v46  ;;  %v7763_v46 = vshll.u32 %v7762_v5, 16  ;;  %vm6455_vm7 = vcmp.eq.f32.partialorder %v11642_v49, %v11808_v24 }
0x1328   : > { %v4576_v15 = vrot.slane %v4386_v9, %v9104_v29 }
0x132c   : > { %6517 = vmin.xlane.f32.xlu1 %v6516_v26 }
0x1330   : > { %5430 = vmin.xlane.f32.xlu1 %v11850_v37 }
0x1334   : > { %5445 = vmin.xlane.f32.xlu1 %v11857_v7 }
0x1338   : > { %5475 = vmin.xlane.f32.xlu1 %v11861_v8 }
0x136e   : > { %v11868_v39 = vpop.xlane.xlu0 %6064 }
0x1370   : > { %v11870_v50 = vpop.xlane.xlu1 %6070 }
0x1371   : > { %v6089_v53 = vsub.f32 %v11712_v23, %v11870_v50 }
0x1372   : > { %v11872_v43 = vpop.xlane.xlu0 %6067 }
0x1373   : > { %v6088_v3 = vsub.f32 %v11715_v45, %v11872_v43  ;;  %v4429_v45 = vcvt.f32.s32 %v11530_v38  ;;  %v4415_v38 = vshll.u32 %v4414_v33, 16  ;;  %v6099_v55 = vmul.f32 1.442695, %v6089_v53 }
0x1374   : > { %v11874_v35 = vpop.xlane.xlu1 %6076  ;;  %v4458_v33 = vcvt.f32.s32 %v11793_v1  ;;  %v4475_v53 = vshll.u32 %v4474_v59, 16  ;;  %v13329_v59 = vld [vmem:[#allocation19_spill] sm:$0xff] }
0x1375   : > { %v6097_v31 = vmul.f32 1.442695, %v6088_v3  ;;  %v6091_v23 = vsub.f32 %v11722_v54, %v11874_v35  ;;  %v4430_v22 = vshll.u32 %v4429_v45, 16  ;;  %v4401_v3 = vadd.s32 %v4400_v6, %v4398_v11  ;;  %v7767_v6 = vld [vmem:[#allocation2 + $0x30] sm:$0xff] }
0x1376   : > { %v11877_v60 = vpop.xlane.xlu0 %6073  ;;  %v4416_v48 = vadd.s32 %v4415_v38, %v4413_v20  ;;  %v4445_v54 = vshll.u32 %v4444_v12, 16  ;;  %v4473_v11 = vcvt.f32.s32 %v11796_v36  ;;  %v13328_v12 = vmov 0.0  }
0x1377   : > { %8325 = vpow2.f32 %v6097_v31  ;;  %v6103_v14 = vmul.f32 1.442695, %v6091_v23  ;;  %v6090_v31 = vsub.f32 %v11729_v63, %v11877_v60  ;;  %v4580_v45 = vrot.slane %v4401_v3, %v9104_v29 }
0x1378   : > { %v11882_v0 = vpop.xlane.xlu1 %6082  ;;  %8327 = vpow2.f32 %v6099_v55  ;;  %v4431_v47 = vadd.s32 %v4430_v22, %v4428_v40  ;;  %v4584_v1 = vrot.slane %v4416_v48, %v9104_v29  ;;  %v4446_v5 = vadd.s32 %v4445_v54, %v4443_v28 }
0x1379   : > { %v4461_v63 = vadd.s32 %v4460_v56, %v4458_v33  ;;  %8329 = vpow2.f32 %v6103_v14  ;;  %v6101_v38 = vmul.f32 1.442695, %v6090_v31  ;;  %v4476_v40 = vadd.s32 %v4475_v53, %v4473_v11 }
0x137a   : > { %v11886_v25 = vpop.xlane.xlu0 %6079  ;;  %v4588_v3 = vrot.slane %v4431_v47, %v9104_v29  ;;  %v4490_v48 = vshll.u32 %v4489_v52, 16  ;;  %v4592_v28 = vrot.slane %v4446_v5, %v9104_v29 }
0x137b   : > { %v6092_v36 = vsub.f32 %v11745_v62, %v11886_v25  ;;  %v4596_v54 = vrot.slane %v4461_v63, %v9104_v29  ;;  %8331 = vpow2.f32 %v6101_v38 }
0x137c   : > { %v11893_v26 = vpop.xlane.xlu1 %6543 }
0x137d   : > { %v6105_v53 = vmul.f32 1.442695, %v6092_v36 }
0x137e   : > { %v11903_v61 = vpop.xlane.xlu0 %6085 }
0x137f   : > { %8333 = vpow2.f32 %v6105_v53 }
0x1380   : > { %v7760_v2 = vpop.xlane.xlu1 %7759 }
0x1381   : > { %v7761_v34 = vcvt.f32.s32 %v7760_v2  ;;  %v6464_v2 = vand.u32 65535, %v11576_v30  ;;  %v6093_v30 = vsub.f32 %v11737_v17, %v11882_v0  ;;  %v6479_v17 = vand.u32 65535, %v11639_v51 }
0x1382   : > { %v11910_v32 = vpop.xlane.xlu0 %6528 }
0x1383   : > { %v11914_v9 = vadd.s32 %v7763_v46, %v7761_v34  ;;  %v4605_v46 = vsel %vm872_vm14, %v4580_v45, %v4576_v15  ;;  %v4600_v45 = vrot.slane %v4476_v40, %v9104_v29  ;;  %v6466_v49 = vcvt.s32.f32 %v6464_v2  ;;  %v13331_v40 = vld [vmem:[#allocation49_spill] sm:$0xff] }
0x1384   : > { %v4619_v20 = vpop.permute.xlu1 %4618  ;;  %v4606_v34 = vsel %vm874_vm15, %v4584_v1, %v4605_v46  ;;  %v8326_v31 = vpop.eup %8325  ;;  %v6107_v5 = vmul.f32 1.442695, %v6093_v30  ;;  %v13336_v30 = vld [vmem:[#allocation57_spill] sm:$0xff] }
0x1385   : > { %vm7768_vm11 = vcmp.eq.s32.totalorder %v13212_v4, %v11914_v9  ;;  %vm4620_vm8 = vcmp.eq.s32.totalorder %v4619_v20, %v13212_v4  ;;  %v4607_v52 = vsel %vm876_vm0, %v4588_v3, %v4606_v34  ;;  %v6456_v20 = vsel %vm6455_vm7, %v11897_v16, inf }
0x1386   : > { %v11924_v42 = vsel %vm4620_vm8, 1.0, %v13328_v12  ;;  %v11926_v41 = vpop.xlane.xlu0 %6558  ;;  %v7769_v23 = vsel %vm7768_vm11, %v7767_v6, 0  ;;  %v4608_v47 = vsel %vm878_vm1, %v4592_v28, %v4607_v52  ;;  %v6114_v63 = vsel %vm454_vm4, %v8326_v31, 0.0  ;;  %v13337_v31 = vld [vmem:[#allocation41_spill] sm:$0xff] }
0x1387   : > { %v4623_v55 = vmul.f32 %v11924_v42, %v13329_v59  ;;  %v11933_v22 = vsel %vm454_vm4, %v7769_v23, 0  ;;  %v4609_v1 = vsel %vm880_vm2, %v4596_v54, %v4608_v47  ;;  %v8328_v23 = vpop.eup %8327  ;;  %v6471_v36 = vsel %vm6470_vm10, %v6466_v49, inf  ;;  %v13340_v49 = vld [vmem:[#allocation17_spill] sm:$0xff]  ;;  %v13342_v59 = vld [vmem:[#allocation74_spill] sm:$0xff] }
0x1388   : > { %v7772_v14 = vshrl.u32 %v11933_v22, 16  ;;  %v4610_v38 = vsel %vm882_vm3, %v4600_v45, %v4609_v1  ;;  %vm6485_vm11 = vcmp.eq.f32.partialorder %v11649_v21, %v11817_v57  ;;  %v8330_v18 = vpop.eup %8329  ;;  %8335 = vpow2.f32 %v6107_v5  ;;  %v13339_v1 = vld [vmem:[#allocation37_spill] sm:$0xff] }
0x1389   : > { %v4624_v62 = vsel %vm454_vm4, %v4623_v55, 0.0  ;;  %v6117_v51 = vsel %vm454_vm4, %v8328_v23, 0.0  ;;  %v6481_v3 = vcvt.s32.f32 %v6479_v17  ;;  %v6123_v46 = vsel %vm454_vm4, %v8330_v18, 0.0  ;;  %v8332_v34 = vpop.eup %8331  ;;  %v13344_v18 = vld [vmem:[#allocation15_spill] sm:$0xff] }
0x138a   : > { %v4487_v56 = vpop.xlane.xlu0 %4486  ;;  %4625 = vadd.xlane.f32.xlu0 %v4624_v62  ;;  %v7774_v33 = vcvt.s32.f32 %v7772_v14  ;;  %v6494_v14 = vand.u32 65535, %v13331_v40  ;;  %v13333_v62 = vld [vmem:[#allocation55_spill] sm:$0xff]  ;;  %v6120_v53 = vsel %vm454_vm4, %v8332_v34, 0.0  ;;  %v6539_v52 = vand.u32 65535, %v13337_v31 }
0x138b   : > { %v4488_v15 = vcvt.f32.s32 %v4487_v56  ;;  %v6486_v2 = vsel %vm6485_vm11, %v6481_v3, inf  ;;  %v6524_v21 = vand.u32 65535, %v13333_v62  ;;  %v13334_v56 = vld [vmem:[#allocation34_spill] sm:$0xff]  ;;  %vm5397_vm11 = vcmp.eq.f32.partialorder %v13340_v49, %v13339_v1 }
0x138c   : > { %7777 = vadd.xlane.f32.xlu1 %v7774_v33  ;;  %v6496_v28 = vcvt.s32.f32 %v6494_v14  ;;  %v13335_v33 = vld [vmem:[#allocation52_spill] sm:$0xff]  ;;  %v8334_v45 = vpop.eup %8333  ;;  %v6541_v5 = vcvt.s32.f32 %v6539_v52 }
0x138d   : > { %v4491_v11 = vadd.s32 %v4490_v48, %v4488_v15  ;;  %v13332_v48 = vld [vmem:[#allocation53_spill] sm:$0xff]  ;;  %vm5394_vm7 = vcmp.eq.f32.partialorder %v13336_v30, %v13335_v33  ;;  %v6526_v15 = vcvt.s32.f32 %v6524_v21  ;;  %v6126_v17 = vsel %vm454_vm4, %v8334_v45, 0.0 }
0x138e   : > { %6457 = vmin.xlane.f32.xlu0 %v6456_v20  ;;  %vm6500_vm8 = vcmp.eq.f32.partialorder %v13332_v48, %v11866_v58  ;;  %v13338_v20 = vld [vmem:[#allocation48_spill] sm:$0xff]  ;;  %v13348_v33 = vld [vmem:[#allocation25_spill] sm:$0xff] }
0x138f   : > { %v4604_v6 = vrot.slane %v4491_v11, %v9104_v29  ;;  %v6501_v54 = vsel %vm6500_vm8, %v6496_v28, inf  ;;  %v5402_v11 = vsel %vm5394_vm7, %v13212_v4, 2147483647  ;;  %vm6545_vm10 = vcmp.eq.f32.partialorder %v13338_v20, %v11893_v26  ;;  %v13346_v28 = vld [vmem:[#allocation43_spill] sm:$0xff] }
0x1390   : > { %6115 = vadd.xlane.f32.xlu1 %v6114_v63  ;;  %vm6560_vm8 = vcmp.eq.f32.partialorder %v13342_v59, %v11926_v41 }
0x1391   : > { %v4611_v16 = vsel %vm884_vm5, %v4604_v6, %v4610_v38  ;;  %v13341_v6 = vld [vmem:[#allocation67_spill] sm:$0xff]  ;;  %v6546_v38 = vsel %vm6545_vm10, %v6541_v5, inf }
0x1392   : > { %v4612_v55 = vsel %vm4160_vm9, %v4611_v16, %v13212_v4  ;;  %6472 = vmin.xlane.f32.xlu0 %v6471_v36  ;;  %vm6530_vm9 = vcmp.eq.f32.partialorder %v13334_v56, %v11910_v32  ;;  %v6554_v63 = vand.u32 65535, %v13341_v6  ;;  %v11985_v16 = vsel %vm454_vm4, %v5402_v11, 2147483647  ;;  %v13347_v56 = vld [vmem:[#allocation64_spill] sm:$0xff] }
0x1393   : > { %4614 = vst.msk [vmem:[#allocation2 + $0x18] sm:$0xff] %vm454_vm4, %v4612_v55  ;;  %v6531_v47 = vsel %vm6530_vm9, %v6526_v15, inf  ;;  %v5405_v36 = vsel %vm5397_vm11, %v13212_v4, 2147483647  ;;  %v13343_v55 = vld [vmem:[#allocation72_spill] sm:$0xff]  ;;  %v5412_v40 = vshra.s32 %v11985_v16, 16  ;;  %vm5401_vm10 = vcmp.eq.f32.partialorder %v13348_v33, %v13347_v56 }
0x1394   : > { %6118 = vadd.xlane.f32.xlu1 %v6117_v51  ;;  %vm5399_vm9 = vcmp.eq.f32.partialorder %v13344_v18, %v13343_v55  ;;  %v6556_v3 = vcvt.s32.f32 %v6554_v63  ;;  %v5409_v31 = vsel %vm5401_vm10, %v13212_v4, 2147483647  ;;  %v5471_v6 = vand.u32 65535, %v11854_v10 }
0x1395   : > { %v8336_v23 = vpop.eup %8335  ;;  %v5407_v48 = vsel %vm5399_vm9, %v13212_v4, 2147483647  ;;  %v12000_v62 = vcvt.s32.f32 %v5412_v40  ;;  %v6505_v40 = vcvt.f32.s32 %v11866_v58  ;;  %v6460_v10 = vcvt.f32.s32 %v11808_v24 }
0x1396   : > { %6487 = vmin.xlane.f32.xlu0 %v6486_v2  ;;  %v6129_v51 = vsel %vm454_vm4, %v8336_v23, 0.0  ;;  %v6561_v14 = vsel %vm6560_vm8, %v6556_v3, inf  ;;  %v11995_v2 = vsel %vm454_vm4, %v5405_v36, 2147483647  ;;  %v12004_v34 = vsel %vm454_vm4, %v5407_v48, 2147483647 }
0x1397   : > { %v5457_v21 = vshra.s32 %v11995_v2, 16  ;;  %v5473_v23 = vcvt.s32.f32 %v5471_v6  ;;  %v6490_v3 = vcvt.f32.s32 %v11817_v57  ;;  %v6506_v56 = vshll.u32 %v6505_v40, 16 }
0x1398   : > { %6124 = vadd.xlane.f32.xlu1 %v6123_v46  ;;  %v13345_v46 = vld [vmem:[#allocation59_spill] sm:$0xff]  ;;  %v6461_v33 = vshll.u32 %v6460_v10, 16  ;;  %v6550_v57 = vcvt.f32.s32 %v11893_v26 }
0x1399   : > { %vm5400_vm7 = vcmp.eq.f32.partialorder %v13346_v28, %v13345_v46  ;;  %v12010_v30 = vcvt.s32.f32 %v5457_v21 }
0x139a   : > { %6502 = vmin.xlane.f32.xlu0 %v6501_v54  ;;  %v5408_v54 = vsel %vm5400_vm7, %v13212_v4, 2147483647 }
0x139b   : > { %v12014_v15 = vsel %vm454_vm4, %v5408_v54, 2147483647  ;;  %v6491_v54 = vshll.u32 %v6490_v3, 16  ;;  %v6551_v3 = vshll.u32 %v6550_v57, 16 }
0x139c   : > { %6121 = vadd.xlane.f32.xlu1 %v6120_v53  ;;  %v5487_v53 = vshra.s32 %v12004_v34, 16  ;;  %v5502_v45 = vshra.s32 %v12014_v15, 16 }
0x139e   : > { %6532 = vmin.xlane.f32.xlu0 %v6531_v47  ;;  %v12018_v52 = vcvt.s32.f32 %v5487_v53  ;;  %v12022_v47 = vsel %vm454_vm4, %v5409_v31, 2147483647  ;;  %v12025_v11 = vcvt.s32.f32 %v5502_v45  ;;  %v6535_v53 = vcvt.f32.s32 %v11910_v32 }
0x139f   : > { %v5517_v20 = vshra.s32 %v12022_v47, 16  ;;  %v6565_v32 = vcvt.f32.s32 %v11926_v41 }
0x13a0   : > { %6127 = vadd.xlane.f32.xlu1 %v6126_v17 }
0x13a1   : > { %v12029_v49 = vcvt.s32.f32 %v5517_v20  ;;  %v6566_v41 = vshll.u32 %v6565_v32, 16 }
0x13a2   : > { %6547 = vmin.xlane.f32.xlu0 %v6546_v38 }
0x13a4   : > { %6130 = vadd.xlane.f32.xlu1 %v6129_v51  ;;  %v6475_v51 = vcvt.f32.s32 %v11864_v19  ;;  %v6520_v19 = vcvt.f32.s32 %v11834_v13 }
0x13a6   : > { %6562 = vmin.xlane.f32.xlu0 %v6561_v14  ;;  %v6476_v28 = vshll.u32 %v6475_v51, 16  ;;  %v6521_v51 = vshll.u32 %v6520_v19, 16  ;;  %v13351_v19 = vld [vmem:[#allocation69_spill] sm:$0xff] }
0x13a7   : > { %v6094_v57 = vsub.f32 %v13351_v19, %v11903_v61  ;;  %v13353_v19 = vld [vmem:[#allocation16_spill] sm:$0xff] }
0x13aa   : > { %5415 = vmin.xlane.f32.xlu0 %v12000_v62 }
0x13ae   : > { %5460 = vmin.xlane.f32.xlu0 %v12010_v30 }
0x13b2   : > { %5490 = vmin.xlane.f32.xlu0 %v12018_v52 }
0x13b5   : > { %v6518_v1 = vpop.xlane.xlu1 %6517 }
0x13b6   : > { %5505 = vmin.xlane.f32.xlu0 %v12025_v11 }
0x13b9   : > { %v12031_v17 = vpop.xlane.xlu1 %5430 }
0x13ba   : > { %5520 = vmin.xlane.f32.xlu0 %v12029_v49  ;;  %vm5432_vm9 = vcmp.eq.f32.partialorder %v11850_v37, %v12031_v17 }
0x13bd   : > { %v12034_v5 = vpop.xlane.xlu1 %5445 }
0x13be   : > { %vm5447_vm10 = vcmp.eq.f32.partialorder %v11857_v7, %v12034_v5 }
0x13c1   : > { %v12037_v63 = vpop.xlane.xlu1 %5475 }
0x13c2   : > { %vm5477_vm11 = vcmp.eq.f32.partialorder %v11861_v8, %v12037_v63 }
0x13c3   : > { %v5478_v38 = vsel %vm5477_vm11, %v5473_v23, inf  ;;  %v13350_v23 = vld [vmem:[#allocation28_spill] sm:$0xff] }
0x13c4   : > { %5479 = vmin.xlane.f32.xlu1 %v5478_v38  ;;  %v6087_v38 = vsub.f32 %v13350_v23, %v11868_v39  ;;  %v5426_v23 = vand.u32 65535, %v11838_v27 }
0x1413   : > { %v12041_v36 = vpop.xlane.xlu0 %4625 }
0x1414   : > { %13349 = vst [vmem:[#allocation76_spill] sm:$0xff] %v12041_v36 }
0x1417   : > { %v6458_v59 = vpop.xlane.xlu0 %6457 }
0x1418   : > { %v6459_v8 = vcvt.f32.s32 %v6458_v59  ;;  %v6519_v59 = vcvt.f32.s32 %v6518_v1 }
0x141a   : > { %v6462_v20 = vadd.s32 %v6461_v33, %v6459_v8 }
0x141b   : > { %v6473_v55 = vpop.xlane.xlu0 %6472 }
0x141c   : > { %v6474_v14 = vcvt.f32.s32 %v6473_v55  ;;  %v6536_v55 = vshll.u32 %v6535_v53, 16  ;;  %v6652_v26 = vrot.slane %v6462_v20, %v9104_v29 }
0x141e   : > { %v6477_v31 = vadd.s32 %v6476_v28, %v6474_v14  ;;  %v6522_v28 = vadd.s32 %v6521_v51, %v6519_v59 }
0x141f   : > { %v6488_v18 = vpop.xlane.xlu0 %6487 }
0x1420   : > { %v6489_v48 = vcvt.f32.s32 %v6488_v18  ;;  %v6656_v18 = vrot.slane %v6477_v31, %v9104_v29 }
0x1422   : > { %v6492_v45 = vadd.s32 %v6491_v54, %v6489_v48  ;;  %v6681_v1 = vsel %vm872_vm14, %v6656_v18, %v6652_v26 }
0x1423   : > { %v6503_v46 = vpop.xlane.xlu0 %6502 }
0x1424   : > { %v6504_v21 = vcvt.f32.s32 %v6503_v46  ;;  %v6660_v13 = vrot.slane %v6492_v45, %v9104_v29  ;;  %v6095_v46 = vmul.f32 1.442695, %v6087_v38  ;;  %v6668_v45 = vrot.slane %v6522_v28, %v9104_v29 }
0x1426   : > { %v6507_v24 = vadd.s32 %v6506_v56, %v6504_v21  ;;  %v6682_v21 = vsel %vm874_vm15, %v6660_v13, %v6681_v1  ;;  %v5411_v56 = vand.u32 65535, %v11985_v16  ;;  %8337 = vpow2.f32 %v6095_v46 }
0x1427   : > { %v6533_v58 = vpop.xlane.xlu0 %6532  ;;  %v5441_v1 = vand.u32 65535, %v11847_v44 }
0x1428   : > { %v6534_v6 = vcvt.f32.s32 %v6533_v58  ;;  %v6664_v10 = vrot.slane %v6507_v24, %v9104_v29  ;;  %v5413_v16 = vcvt.s32.f32 %v5411_v56  ;;  %v5456_v56 = vand.u32 65535, %v11995_v2 }
0x142a   : > { %v6537_v14 = vadd.s32 %v6536_v55, %v6534_v6  ;;  %v6683_v33 = vsel %vm876_vm0, %v6664_v10, %v6682_v21  ;;  %v6109_v55 = vmul.f32 1.442695, %v6094_v57  ;;  %v5458_v44 = vcvt.s32.f32 %v5456_v56 }
0x142b   : > { %v6548_v40 = vpop.xlane.xlu0 %6547  ;;  %v6684_v24 = vsel %vm878_vm1, %v6668_v45, %v6683_v33  ;;  %v7778_v45 = vpop.xlane.xlu1 %7777 }
0x142c   : > { %v6549_v48 = vcvt.f32.s32 %v6548_v40  ;;  %v6672_v53 = vrot.slane %v6537_v14, %v9104_v29  ;;  %v5428_v40 = vcvt.s32.f32 %v5426_v23  ;;  %8339 = vpow2.f32 %v6109_v55 }
0x142d   : > { %v5501_v14 = vand.u32 65535, %v12014_v15  ;;  %v5443_v15 = vcvt.s32.f32 %v5441_v1 }
0x142e   : > { %v6552_v8 = vadd.s32 %v6551_v3, %v6549_v48  ;;  %v6685_v38 = vsel %vm880_vm2, %v6672_v53, %v6684_v24  ;;  %v5433_v26 = vsel %vm5432_vm9, %v5428_v40, inf }
0x142f   : > { %v6563_v54 = vpop.xlane.xlu0 %6562  ;;  %v5503_v28 = vcvt.s32.f32 %v5501_v14  ;;  %v5448_v21 = vsel %vm5447_vm10, %v5443_v15, inf  ;;  %vm7783_vm10 = vcmp.eq.s32.totalorder %v13212_v4, 6 }
0x1430   : > { %v6564_v31 = vcvt.f32.s32 %v6563_v54  ;;  %v6676_v58 = vrot.slane %v6552_v8, %v9104_v29 }
0x1432   : > { %v6567_v20 = vadd.s32 %v6566_v41, %v6564_v31  ;;  %v6686_v18 = vsel %vm882_vm3, %v6676_v58, %v6685_v38  ;;  %v5516_v31 = vand.u32 65535, %v12022_v47  ;;  %v6116_v58 = vpop.xlane.xlu1 %6115  ;;  %v13357_v38 = vld [vmem:[#allocation4_spill] sm:$0xff] }
0x1433   : > { %v12067_v6 = vpop.xlane.xlu0 %5415  ;;  %v8338_v37 = vpop.eup %8337  ;;  %8341 = vlog2.f32 %v6116_v58 }
0x1434   : > { %v6680_v59 = vrot.slane %v6567_v20, %v9104_v29  ;;  %vm5417_vm8 = vcmp.eq.f32.partialorder %v12000_v62, %v12067_v6  ;;  %v7771_v62 = vand.u32 65535, %v11933_v22  ;;  %v6111_v22 = vsel %vm454_vm4, %v8338_v37, 0.0  ;;  %v13356_v20 = vld [vmem:[#allocation63_spill] sm:$0xff] }
0x1435   : > { %v5418_v51 = vsel %vm5417_vm8, %v5413_v16, inf }
0x1436   : > { %v6687_v3 = vsel %vm884_vm5, %v6680_v59, %v6686_v18  ;;  %5419 = vmin.xlane.f32.xlu0 %v5418_v51  ;;  %v7773_v48 = vcvt.s32.f32 %v7771_v62  ;;  %v12112_v16 = vpop.xlane.xlu1 %6118  ;;  %v13358_v18 = vld [vmem:[#allocation46_spill] sm:$0xff] }
0x1437   : > { %v6688_v27 = vsel %vm6236_vm6, %v6687_v3, %v13212_v4  ;;  %v12081_v13 = vpop.xlane.xlu0 %5460 }
0x1438   : > { %6690 = vst.msk [vmem:[#allocation2 + $0x28] sm:$0xff] %vm454_vm4, %v6688_v27  ;;  %vm5462_vm11 = vcmp.eq.f32.partialorder %v12010_v30, %v12081_v13  ;;  %v5518_v30 = vcvt.s32.f32 %v5516_v31  ;;  %v13360_v31 = vld [vmem:[#allocation83_spill] sm:$0xff] }
0x1439   : > { %v8340_v54 = vpop.eup %8339  ;;  %v5463_v33 = vsel %vm5462_vm11, %v5458_v44, inf }
0x143a   : > { %5434 = vmin.xlane.f32.xlu0 %v5433_v26  ;;  %v6132_v41 = vsel %vm454_vm4, %v8340_v54, 0.0  ;;  %v6125_v55 = vpop.xlane.xlu1 %6124 }
0x143b   : > { %v12085_v10 = vpop.xlane.xlu0 %5490  ;;  %8343 = vlog2.f32 %v6125_v55 }
0x143c   : > { %vm5492_vm8 = vcmp.eq.f32.partialorder %v12018_v52, %v12085_v10  ;;  %v13355_v52 = vld [vmem:[#allocation13_spill] sm:$0xff] }
0x143d   : > { %v4657_v24 = vrot.slane %v13356_v20, %v13355_v52 }
0x143e   : > { %7775 = vadd.xlane.f32.xlu0 %v7773_v48  ;;  %v12122_v40 = vpop.xlane.xlu1 %6121 }
0x143f   : > { %v12088_v46 = vpop.xlane.xlu0 %5505  ;;  %v4673_v47 = vrot.slane %v4657_v24, %v13355_v52  ;;  %v4665_v23 = vcombine.high %v4657_v24, %v4657_v24  ;;  %v7780_v24 = vcvt.f32.s32 %v7778_v45 }
0x1440   : > { %vm5507_vm7 = vcmp.eq.f32.partialorder %v12025_v11, %v12088_v46  ;;  %v5486_v11 = vand.u32 65535, %v12004_v34  ;;  %v13354_v34 = vmov 0  }
0x1441   : > { %v5508_v8 = vsel %vm5507_vm7, %v5503_v28, inf  ;;  %v4702_v59 = vrot.slane %v4673_v47, %v13357_v38  ;;  %v4695_v27 = vcombine.high %v4673_v47, %v4673_v47  ;;  %vm7765_vm7 = vcmp.eq.s32.totalorder %v13212_v4, 7 }
0x1442   : > { %6112 = vadd.xlane.f32.xlu0 %v6111_v22  ;;  %5509 = vmin.xlane.f32.xlu1 %v5508_v8  ;;  %v5488_v53 = vcvt.s32.f32 %v5486_v11  ;;  %v6128_v28 = vpop.xlane.xlu1 %6127  ;;  %v8342_v22 = vpop.eup %8341  ;;  %v13359_v11 = vld [vmem:[#allocation79_spill] sm:$0xff]  ;;  %v7781_v47 = vshll.u32 %v7780_v24, 16 }
0x1443   : > { %v12103_v7 = vpop.xlane.xlu0 %5520  ;;  %v4739_v51 = vmul.f32 %v13358_v18, %v4702_v59  ;;  %v4710_v14 = vrot.slane %v4695_v27, %v13357_v38  ;;  %8345 = vlog2.f32 %v6128_v28  ;;  %v6138_v8 = vmul.f32 0.6931472, %v8342_v22 }
0x1444   : > { %v5493_v2 = vsel %vm5492_vm8, %v5488_v53, inf  ;;  %vm5522_vm9 = vcmp.eq.f32.partialorder %v12029_v49, %v12103_v7  ;;  %v12117_v49 = vrot.slane %v4665_v23, %v13355_v52  ;;  %v7766_v59 = vsel %vm7765_vm7, %v11914_v9, 0 }
0x1445   : > { %v5523_v57 = vsel %vm5522_vm9, %v5518_v30, inf  ;;  %v4747_v62 = vsel %vm454_vm4, %v4739_v51, 0.0  ;;  %v4741_v37 = vmul.f32 %v13358_v18, %v4710_v14  ;;  %v5452_v27 = vcvt.f32.s32 %v12034_v5 }
0x1446   : > { %5449 = vmin.xlane.f32.xlu0 %v5448_v21  ;;  %v4706_v3 = vrot.slane %v12117_v49, %v13357_v38  ;;  %v6152_v21 = vadd.f32 %v6138_v8, %v11872_v43  ;;  %v6131_v14 = vpop.xlane.xlu1 %6130  ;;  %vm7801_vm8 = vcmp.eq.s32.totalorder %v13212_v4, 5  ;;  %vm7819_vm7 = vcmp.eq.s32.totalorder %v13212_v4, 4 }
0x1447   : > { %v4753_v1 = vsel %vm454_vm4, %v4741_v37, 0.0 }
0x1448   : > { %v4740_v26 = vmul.f32 %v13358_v18, %v4706_v3  ;;  %v8344_v15 = vpop.eup %8343  ;;  %v7785_v18 = vld [vmem:[#allocation2 + $0x28] sm:$0xff]  ;;  %v5437_v3 = vcvt.f32.s32 %v12031_v17 }
0x1449   : > { %v6144_v54 = vmul.f32 0.6931472, %v8344_v15  ;;  %v5453_v15 = vshll.u32 %v5452_v27, 16 }
0x144a   : > { %6133 = vadd.xlane.f32.xlu0 %v6132_v41  ;;  %v4750_v48 = vsel %vm454_vm4, %v4740_v26, 0.0  ;;  %v5438_v22 = vshll.u32 %v5437_v3, 16 }
0x144b   : > { %v6155_v41 = vadd.f32 %v6144_v54, %v11874_v35  ;;  %v5467_v54 = vcvt.f32.s32 %v12081_v13 }
0x144e   : > { %5464 = vmin.xlane.f32.xlu0 %v5463_v33  ;;  %v6225_v33 = vadd.f32 %v13359_v11, %v6152_v21 }
0x1450   : > { %v8346_v56 = vpop.eup %8345 }
0x1451   : > { %v6146_v44 = vmul.f32 0.6931472, %v8346_v56  ;;  %v5480_v56 = vpop.xlane.xlu1 %5479 }
0x1452   : > { %5494 = vmin.xlane.f32.xlu0 %v5493_v2  ;;  %v6228_v2 = vadd.f32 %v13360_v31, %v6155_v41  ;;  %v5482_v41 = vcvt.f32.s32 %v12037_v63 }
0x1453   : > { %5656 = vperm.xlu1 %8115, %v13353_v19   ;;  %v6156_v53 = vadd.f32 %v6146_v44, %v11886_v25  ;;  %v13361_v19 = vld [vmem:[#allocation84_spill] sm:$0xff] }
0x1455   : > { %v6229_v30 = vadd.f32 %v13361_v19, %v6156_v53  ;;  %v5481_v53 = vcvt.f32.s32 %v5480_v56 }
0x1456   : > { %5524 = vmin.xlane.f32.xlu0 %v5523_v57 }
0x1457   : > { %8117 = vset.pattern.permute.xlu1 %v13354_v34 }
0x1477   : > { %4748 = vadd.xlane.f32.xlu1 %v4747_v62 }
0x147b   : > { %4751 = vadd.xlane.f32.xlu1 %v4750_v48  ;;  %v5422_v48 = vcvt.f32.s32 %v12067_v6 }
0x147d   : > { %v5423_v17 = vshll.u32 %v5422_v48, 16 }
0x147f   : > { %4754 = vadd.xlane.f32.xlu1 %v4753_v1 }
0x1490   : > { %6249 = vperm.xlu1 %8117, %v6225_v33   ;;  %v5497_v33 = vcvt.f32.s32 %v12085_v10 }
0x1494   : > { %6258 = vperm.xlu1 %8117, %v6228_v2   ;;  %v5468_v2 = vshll.u32 %v5467_v54, 16 }
0x1498   : > { %6261 = vperm.xlu1 %8117, %v6229_v30  }
0x14bf   : > { %v5420_v57 = vpop.xlane.xlu0 %5419 }
0x14c0   : > { %v5421_v8 = vcvt.f32.s32 %v5420_v57  ;;  %v5483_v57 = vshll.u32 %v5482_v41, 16  ;;  %v13362_v41 = vld [vmem:[#allocation86_spill] sm:$0xff] }
0x14c2   : > { %v5424_v11 = vadd.s32 %v5423_v17, %v5421_v8  ;;  %v5484_v10 = vadd.s32 %v5483_v57, %v5481_v53 }
0x14c3   : > { %v5435_v58 = vpop.xlane.xlu0 %5434 }
0x14c4   : > { %v5436_v37 = vcvt.f32.s32 %v5435_v58  ;;  %v5512_v58 = vcvt.f32.s32 %v12088_v46  ;;  %v5614_v24 = vrot.slane %v5424_v11, %v9104_v29 }
0x14c6   : > { %v5439_v5 = vadd.s32 %v5438_v22, %v5436_v37 }
0x14c7   : > { %v7776_v43 = vpop.xlane.xlu0 %7775 }
0x14c8   : > { %v7779_v35 = vcvt.f32.s32 %v7776_v43  ;;  %v5618_v19 = vrot.slane %v5439_v5, %v9104_v29 }
0x14ca   : > { %v7782_v23 = vadd.s32 %v7781_v47, %v7779_v35 }
0x14cb   : > { %v6113_v25 = vpop.xlane.xlu0 %6112  ;;  %v5510_v30 = vpop.xlane.xlu1 %5509 }
0x14cc   : > { %v12139_v55 = vsel %vm7783_vm10, %v7782_v23, %v7766_v59  ;;  %vm7786_vm11 = vcmp.eq.s32.totalorder %v13212_v4, %v7782_v23  ;;  %8347 = vlog2.f32 %v6113_v25  ;;  %v5511_v47 = vcvt.f32.s32 %v5510_v30 }
0x14cd   : > { %v7787_v51 = vsel %vm7786_vm11, %v7785_v18, 0  ;;  %v5527_v23 = vcvt.f32.s32 %v12103_v7  ;;  %v5643_v59 = vsel %vm872_vm14, %v5618_v19, %v5614_v24  ;;  %v13364_v19 = vld [vmem:[#allocation80_spill] sm:$0xff]  ;;  %vm7837_vm11 = vcmp.eq.s32.totalorder %v13212_v4, 3 }
0x14ce   : > { %v7788_v45 = vsel %vm454_vm4, %v7787_v51, 0  ;;  %v5513_v51 = vshll.u32 %v5512_v58, 16 }
0x14cf   : > { %v5450_v62 = vpop.xlane.xlu0 %5449  ;;  %v7790_v26 = vshrl.u32 %v7788_v45, 16  ;;  %v7789_v1 = vand.u32 65535, %v7788_v45  ;;  %v5528_v48 = vshll.u32 %v5527_v23, 16  ;;  %v4697_v23 = vcombine.high %v12117_v49, %v12117_v49 }
0x14d0   : > { %v5451_v9 = vcvt.f32.s32 %v5450_v62  ;;  %v5514_v27 = vadd.s32 %v5513_v51, %v5511_v47  ;;  %v12196_v51 = vld [vmem:[%s12770_s5] sm:$0xff] }
0x14d1   : > { %v7792_v28 = vcvt.s32.f32 %v7790_v26  ;;  %v7791_v6 = vcvt.s32.f32 %v7789_v1 }
0x14d2   : > { %v5454_v44 = vadd.s32 %v5453_v15, %v5451_v9 }
0x14d3   : > { %v6134_v21 = vpop.xlane.xlu0 %6133  ;;  %7795 = vadd.xlane.f32.xlu0 %v7792_v28 }
0x14d4   : > { %8349 = vlog2.f32 %v6134_v21  ;;  %v5622_v63 = vrot.slane %v5454_v44, %v9104_v29  ;;  %v5638_v21 = vrot.slane %v5514_v27, %v9104_v29 }
0x14d5   : > { %8351 = vlog2.f32 %v12112_v16  ;;  %v5498_v16 = vshll.u32 %v5497_v33, 16 }
0x14d6   : > { %8353 = vlog2.f32 %v12122_v40  ;;  %v5644_v46 = vsel %vm874_vm15, %v5622_v63, %v5643_v59  ;;  %v5630_v40 = vrot.slane %v5484_v10, %v9104_v29  ;;  %v13367_v10 = vld [vmem:[#allocation85_spill] sm:$0xff] }
0x14d7   : > { %v5465_v31 = vpop.xlane.xlu0 %5464  ;;  %7793 = vadd.xlane.f32.xlu0 %v7791_v6  ;;  %8355 = vlog2.f32 %v6131_v14 }
0x14d8   : > { %v5466_v13 = vcvt.f32.s32 %v5465_v31 }
0x14d9   : > { %v8348_v26 = vpop.eup %8347 }
0x14da   : > { %v5469_v43 = vadd.s32 %v5468_v2, %v5466_v13  ;;  %v6136_v15 = vmul.f32 0.6931472, %v8348_v26 }
0x14db   : > { %v5495_v35 = vpop.xlane.xlu0 %5494 }
0x14dc   : > { %v5626_v25 = vrot.slane %v5469_v43, %v9104_v29  ;;  %v5496_v18 = vcvt.f32.s32 %v5495_v35  ;;  %v6151_v11 = vadd.f32 %v6136_v15, %v11868_v39  ;;  %v13365_v39 = vld [vmem:[#allocation81_spill] sm:$0xff]  ;;  %v13366_v43 = vld [vmem:[#allocation82_spill] sm:$0xff]  ;;  %v8425_v35 = vld [vmem:[%s8515_s11] sm:$0xff]  ;;  %s8451_s11 = smov 123  }
0x14de   : > { %v5645_v3 = vsel %vm876_vm0, %v5626_v25, %v5644_v46  ;;  %v5499_v45 = vadd.s32 %v5498_v16, %v5496_v18  ;;  %v6224_v30 = vadd.f32 %v13364_v19, %v6151_v11  ;;  %v4650_v18 = vcombine.high %v13356_v20, %v13356_v20 }
0x14df   : > { %v5525_v62 = vpop.xlane.xlu0 %5524  ;;  %v5646_v28 = vsel %vm878_vm1, %v5630_v40, %v5645_v3 }
0x14e0   : > { %v5634_v7 = vrot.slane %v5499_v45, %v9104_v29  ;;  %v5526_v37 = vcvt.f32.s32 %v5525_v62  ;;  %v5657_v45 = vpop.permute.xlu1 %5656 }
0x14e1   : > { %v8350_v9 = vpop.eup %8349 }
0x14e2   : > { %v6150_v1 = vmul.f32 0.6931472, %v8350_v9  ;;  %v5647_v22 = vsel %vm880_vm2, %v5634_v7, %v5646_v28  ;;  %v5529_v8 = vadd.s32 %v5528_v48, %v5526_v37  ;;  %v8352_v14 = vpop.eup %8351 }
0x14e3   : > { %v5648_v56 = vsel %vm882_vm3, %v5638_v21, %v5647_v22  ;;  %v6140_v6 = vmul.f32 0.6931472, %v8352_v14  ;;  %v8354_v31 = vpop.eup %8353 }
0x14e4   : > { %v6158_v17 = vadd.f32 %v6150_v1, %v11903_v61  ;;  %v5642_v54 = vrot.slane %v5529_v8, %v9104_v29  ;;  %v6142_v2 = vmul.f32 0.6931472, %v8354_v31  ;;  %v8356_v13 = vpop.eup %8355 }
0x14e5   : > { %v6153_v61 = vadd.f32 %v6140_v6, %v11870_v50  ;;  %v6148_v58 = vmul.f32 0.6931472, %v8356_v13  ;;  %v13368_v50 = vmov 7  }
0x14e6   : > { %v5649_v5 = vsel %vm884_vm5, %v5642_v54, %v5648_v56  ;;  %v6231_v44 = vadd.f32 %v13362_v41, %v6158_v17  ;;  %v6154_v57 = vadd.f32 %v6142_v2, %v11877_v60  ;;  %v5695_v60 = vrot.slane %v11924_v42, %v13355_v52 }
0x14e7   : > { %v5650_v53 = vsel %vm5198_vm12, %v5649_v5, %v13212_v4  ;;  %v6226_v63 = vadd.f32 %v13365_v39, %v6153_v61  ;;  %v6157_v24 = vadd.f32 %v6148_v58, %v11882_v0  ;;  %v4714_v0 = vrot.slane %v4697_v23, %v13357_v38 }
0x14e8   : > { %5652 = vst.msk [vmem:[#allocation2 + $0x20] sm:$0xff] %vm454_vm4, %v5650_v53  ;;  %6267 = vperm.xlu1 %8117, %v6231_v44   ;;  %v6227_v16 = vadd.f32 %v13366_v43, %v6154_v57  ;;  %v5711_v59 = vrot.slane %v5695_v60, %v13355_v52  ;;  %v5703_v25 = vcombine.high %v5695_v60, %v5695_v60 }
0x14e9   : > { %v6230_v47 = vadd.f32 %v13367_v10, %v6157_v24  ;;  %v4742_v49 = vmul.f32 %v12196_v51, %v4714_v0  ;;  %vm5658_vm12 = vcmp.eq.s32.totalorder %v5657_v45, %v13212_v4  ;;  %v5688_v61 = vcombine.high %v11924_v42, %v11924_v42 }
0x14ea   : > { %v5740_v46 = vrot.slane %v5711_v59, %v13357_v38  ;;  %v5725_v3 = vrot.slane %v5703_v25, %v13355_v52  ;;  %v5733_v9 = vcombine.high %v5711_v59, %v5711_v59  ;;  %v12211_v28 = vsel %vm5658_vm12, 1.0, %v13328_v12 }
0x14eb   : > { %v4756_v40 = vsel %vm454_vm4, %v4742_v49, 0.0  ;;  %v6733_v22 = vrot.slane %v12211_v28, %v13355_v52  ;;  %v12239_v58 = vrot.slane %v5688_v61, %v13355_v52 }
0x14ec   : > { %v5777_v27 = vmul.f32 %v12196_v51, %v5740_v46  ;;  %v5744_v20 = vrot.slane %v5725_v3, %v13357_v38  ;;  %v5748_v21 = vrot.slane %v5733_v9, %v13357_v38  ;;  %v5735_v14 = vcombine.high %v5725_v3, %v5725_v3 }
0x14ed   : > { %6246 = vperm.xlu0 %8111, %v6224_v30   ;;  %v6749_v54 = vrot.slane %v6733_v22, %v13355_v52  ;;  %v6741_v56 = vcombine.high %v6733_v22, %v6733_v22  ;;  %v12246_v43 = vrot.slane %v12239_v58, %v13355_v52 }
0x14ee   : > { %v5785_v48 = vsel %vm454_vm4, %v5777_v27, 0.0  ;;  %v5778_v7 = vmul.f32 %v12196_v51, %v5744_v20  ;;  %v5779_v41 = vmul.f32 %v12196_v51, %v5748_v21  ;;  %v5752_v44 = vrot.slane %v5735_v14, %v13357_v38 }
0x14ef   : > { %v6778_v11 = vrot.slane %v6749_v54, %v13357_v38  ;;  %v12227_v33 = vrot.slane %v6741_v56, %v13355_v52  ;;  %v6771_v10 = vcombine.high %v6749_v54, %v6749_v54 }
0x14f0   : > { %v5788_v8 = vsel %vm454_vm4, %v5778_v7, 0.0  ;;  %v5791_v53 = vsel %vm454_vm4, %v5779_v41, 0.0  ;;  %v5780_v31 = vmul.f32 %v12196_v51, %v5752_v44 }
0x14f1   : > { %6252 = vperm.xlu0 %8111, %v6226_v63   ;;  %v6815_v19 = vmul.f32 %v12196_v51, %v6778_v11  ;;  %v6782_v30 = vrot.slane %v12227_v33, %v13357_v38 }
0x14f2   : > { %v5794_v13 = vsel %vm454_vm4, %v5780_v31, 0.0 }
0x14f3   : > { %v6823_v39 = vsel %vm454_vm4, %v6815_v19, 0.0  ;;  %v6816_v63 = vmul.f32 %v12196_v51, %v6782_v30 }
0x14f5   : > { %6255 = vperm.xlu0 %8111, %v6227_v16   ;;  %v6826_v16 = vsel %vm454_vm4, %v6816_v63, 0.0 }
0x14f9   : > { %6264 = vperm.xlu0 %8111, %v6230_v47  }
0x14fd   : > { %8116 = vset.pattern.permute.xlu0 %v13368_v50  ;;  %v5756_v50 = vrot.slane %v12246_v43, %v13357_v38 }
0x14fe   : > { %6694 = vperm.xlu0 %8116, %v8425_v35   ;;  %v6786_v35 = vrot.slane %v6771_v10, %v13357_v38 }
0x14ff   : > { %v5781_v60 = vmul.f32 %v12196_v51, %v5756_v50  ;;  %v13369_v50 = vld [vmem:[#allocation21_spill] sm:$0xff] }
0x1500   : > { %v6817_v59 = vmul.f32 %v12196_v51, %v6786_v35 }
0x1501   : > { %v5797_v25 = vsel %vm454_vm4, %v5781_v60, 0.0 }
0x1502   : > { %8118 = vset.pattern.permute.xlu0 %v13354_v34  ;;  %v4664_v34 = vrot.slane %v4650_v18, %v13355_v52  ;;  %v6829_v49 = vsel %vm454_vm4, %v6817_v59, 0.0 }
0x1504   : > { %v4680_v62 = vrot.slane %v4664_v34, %v13355_v52  ;;  %v4666_v26 = vcombine.high %v4664_v34, %v4664_v34  ;;  %v12261_v34 = vpop.xlane.xlu1 %4748 }
0x1506   : > { %v4718_v37 = vrot.slane %v4680_v62, %v13357_v38  ;;  %v4694_v1 = vrot.slane %v4666_v26, %v13355_v52  ;;  %v4696_v57 = vcombine.high %v4680_v62, %v4680_v62 }
0x1508   : > { %v4743_v15 = vmul.f32 %v12196_v51, %v4718_v37  ;;  %v4722_v17 = vrot.slane %v4694_v1, %v13357_v38  ;;  %v4726_v24 = vrot.slane %v4696_v57, %v13357_v38  ;;  %v4698_v0 = vcombine.high %v4694_v1, %v4694_v1  ;;  %v12263_v45 = vpop.xlane.xlu1 %4751  ;;  %v7803_v1 = vld [vmem:[#allocation2 + $0x20] sm:$0xff] }
0x150a   : > { %v4759_v5 = vsel %vm454_vm4, %v4743_v15, 0.0  ;;  %v4744_v6 = vmul.f32 %v12196_v51, %v4722_v17  ;;  %v4745_v47 = vmul.f32 %v12196_v51, %v4726_v24  ;;  %v4730_v18 = vrot.slane %v4698_v0, %v13357_v38 }
0x150c   : > { %4757 = vadd.xlane.f32.xlu1 %v4756_v40  ;;  %v4762_v2 = vsel %vm454_vm4, %v4744_v6, 0.0  ;;  %v4765_v23 = vsel %vm454_vm4, %v4745_v47, 0.0  ;;  %v4746_v46 = vmul.f32 %v12196_v51, %v4730_v18  ;;  %v12265_v27 = vpop.xlane.xlu1 %4754 }
0x150e   : > { %v4768_v3 = vsel %vm454_vm4, %v4746_v46, 0.0 }
0x1510   : > { %5786 = vadd.xlane.f32.xlu1 %v5785_v48  ;;  %v6250_v7 = vpop.permute.xlu1 %6249 }
0x1511   : > { %v6276_v44 = vrot.slane %v6250_v7, %v9104_v29 }
0x1514   : > { %5789 = vadd.xlane.f32.xlu1 %v5788_v8  ;;  %v6259_v17 = vpop.permute.xlu1 %6258 }
0x1515   : > { %v6288_v61 = vrot.slane %v6259_v17, %v9104_v29 }
0x1518   : > { %4760 = vadd.xlane.f32.xlu1 %v4759_v5  ;;  %v6262_v6 = vpop.permute.xlu1 %6261 }
0x1519   : > { %v6292_v19 = vrot.slane %v6262_v6, %v9104_v29 }
0x151c   : > { %5792 = vadd.xlane.f32.xlu1 %v5791_v53 }
0x151d   : > { %4763 = vadd.xlane.f32.xlu0 %v4762_v2 }
0x1520   : > { %5795 = vadd.xlane.f32.xlu1 %v5794_v13 }
0x1524   : > { %6824 = vadd.xlane.f32.xlu1 %v6823_v39 }
0x1528   : > { %6827 = vadd.xlane.f32.xlu1 %v6826_v16 }
0x152c   : > { %4766 = vadd.xlane.f32.xlu1 %v4765_v23 }
0x1530   : > { %5798 = vadd.xlane.f32.xlu1 %v5797_v25 }
0x1534   : > { %6830 = vadd.xlane.f32.xlu1 %v6829_v49 }
0x1538   : > { %4769 = vadd.xlane.f32.xlu1 %v4768_v3 }
0x155c   : > { %v7796_v40 = vpop.xlane.xlu0 %7795 }
0x155d   : > { %v7798_v20 = vcvt.f32.s32 %v7796_v40  ;;  %v6726_v40 = vcombine.high %v12211_v28, %v12211_v28 }
0x155f   : > { %v7799_v26 = vshll.u32 %v7798_v20, 16 }
0x1560   : > { %v7794_v62 = vpop.xlane.xlu0 %7793 }
0x1561   : > { %v7797_v48 = vcvt.f32.s32 %v7794_v62 }
0x1563   : > { %v7800_v37 = vadd.s32 %v7799_v26, %v7797_v48  ;;  %v6268_v30 = vpop.permute.xlu1 %6267 }
0x1564   : > { %v6300_v16 = vrot.slane %v6268_v30, %v9104_v29 }
0x1565   : > { %v12269_v9 = vsel %vm7801_vm8, %v7800_v37, %v12139_v55  ;;  %vm7804_vm9 = vcmp.eq.s32.totalorder %v13212_v4, %v7800_v37 }
0x1566   : > { %v7805_v22 = vsel %vm7804_vm9, %v7803_v1, 0 }
0x1567   : > { %v7806_v8 = vsel %vm454_vm4, %v7805_v22, 0 }
0x1568   : > { %v6247_v15 = vpop.permute.xlu0 %6246  ;;  %v7808_v21 = vshrl.u32 %v7806_v8, 16  ;;  %v7807_v14 = vand.u32 65535, %v7806_v8 }
0x1569   : > { %v6272_v41 = vrot.slane %v6247_v15, %v9104_v29 }
0x156a   : > { %v7810_v54 = vcvt.s32.f32 %v7808_v21  ;;  %v7809_v56 = vcvt.s32.f32 %v7807_v14  ;;  %v6740_v14 = vrot.slane %v6726_v40, %v13355_v52 }
0x156b   : > { %v6301_v53 = vsel %vm872_vm14, %v6276_v44, %v6272_v41  ;;  %v5704_v41 = vcombine.high %v12239_v58, %v12239_v58 }
0x156c   : > { %v6253_v5 = vpop.permute.xlu0 %6252  ;;  %7813 = vadd.xlane.f32.xlu0 %v7810_v54  ;;  %7811 = vadd.xlane.f32.xlu1 %v7809_v56 }
0x156d   : > { %v6280_v55 = vrot.slane %v6253_v5, %v9104_v29  ;;  %v6773_v5 = vcombine.high %v12227_v33, %v12227_v33 }
0x156f   : > { %v6302_v2 = vsel %vm874_vm15, %v6280_v55, %v6301_v53  ;;  %v6756_v53 = vrot.slane %v6740_v14, %v13355_v52  ;;  %v6790_v58 = vrot.slane %v6773_v5, %v13357_v38 }
0x1570   : > { %v6256_v11 = vpop.permute.xlu0 %6255 }
0x1571   : > { %v6284_v31 = vrot.slane %v6256_v11, %v9104_v29 }
0x1573   : > { %v6303_v13 = vsel %vm876_vm0, %v6284_v31, %v6302_v2 }
0x1574   : > { %v6304_v57 = vsel %vm878_vm1, %v6288_v61, %v6303_v13  ;;  %v6265_v39 = vpop.permute.xlu0 %6264  ;;  %v6742_v61 = vcombine.high %v6740_v14, %v6740_v14  ;;  %v5732_v13 = vrot.slane %v5704_v41, %v13355_v52  ;;  %v13370_v41 = vld [vmem:[#allocation5_spill] sm:$0xff] }
0x1575   : > { %v6296_v63 = vrot.slane %v6265_v39, %v9104_v29  ;;  %v6305_v24 = vsel %vm880_vm2, %v6292_v19, %v6304_v57  ;;  %v6818_v39 = vmul.f32 %v12196_v51, %v6790_v58 }
0x1577   : > { %v6306_v10 = vsel %vm882_vm3, %v6296_v63, %v6305_v24  ;;  %v6794_v63 = vrot.slane %v6756_v53, %v13357_v38  ;;  %v6770_v24 = vrot.slane %v6742_v61, %v13355_v52  ;;  %v13372_v61 = vld [vmem:[#allocation8_spill] sm:$0xff] }
0x1578   : > { %v6307_v47 = vsel %vm884_vm5, %v6300_v16, %v6306_v10 }
0x1579   : > { %v12291_v35 = vsel %vm6236_vm6, %v6307_v47, %v13369_v50  ;;  %v5760_v47 = vrot.slane %v5732_v13, %v13357_v38  ;;  %v5734_v50 = vcombine.high %v12246_v43, %v12246_v43  ;;  %v6695_v58 = vpop.permute.xlu0 %6694 }
0x157a   : > { %v7011_v23 = vrot.slane %v12291_v35, %v13355_v52  ;;  %v7004_v60 = vcombine.high %v12291_v35, %v12291_v35  ;;  %vm6696_vm6 = vcmp.eq.s32.totalorder %v6695_v58, %v13212_v4 }
0x157c   : > { %v7027_v0 = vrot.slane %v7011_v23, %v13355_v52  ;;  %v7019_v59 = vcombine.high %v7011_v23, %v7011_v23  ;;  %v7018_v25 = vrot.slane %v7004_v60, %v13355_v52  ;;  %v6832_v23 = vsel %vm454_vm4, %v6818_v39, 0.0  ;;  %v13374_v39 = vld [vmem:[#allocation9_spill] sm:$0xff] }
0x157d   : > { %v6819_v60 = vmul.f32 %v12196_v51, %v6794_v63  ;;  %v4810_v63 = vrot.slane %v11924_v42, %v13374_v39 }
0x157e   : > { %v7056_v18 = vrot.slane %v7027_v0, %v13357_v38  ;;  %v7041_v49 = vrot.slane %v7019_v59, %v13355_v52  ;;  %v7049_v46 = vcombine.high %v7027_v0, %v7027_v0  ;;  %v7034_v32 = vrot.slane %v7018_v25, %v13355_v52 }
0x157f   : > { %v7020_v3 = vcombine.high %v7018_v25, %v7018_v25  ;;  %v6798_v0 = vrot.slane %v6770_v24, %v13357_v38  ;;  %v5782_v25 = vmul.f32 %v12196_v51, %v5760_v47  ;;  %v6835_v43 = vsel %vm454_vm4, %v6819_v60, 0.0  ;;  %v13376_v60 = vld [vmem:[#allocation11_spill] sm:$0xff] }
0x1580   : > { %v12305_v20 = vadd.f32 %v12196_v51, %v7056_v18  ;;  %v7060_v62 = vrot.slane %v7041_v49, %v13357_v38  ;;  %v7064_v26 = vrot.slane %v7049_v46, %v13357_v38  ;;  %v7051_v48 = vcombine.high %v7041_v49, %v7041_v49 }
0x1581   : > { %v7072_v7 = vrot.slane %v7034_v32, %v13357_v38  ;;  %v7048_v37 = vrot.slane %v7020_v3, %v13355_v52  ;;  %v7050_v1 = vcombine.high %v7034_v32, %v7034_v32  ;;  %v6774_v52 = vcombine.high %v6770_v24, %v6770_v24 }
0x1582   : > { %v7101_v22 = vsel %vm454_vm4, %v12305_v20, -inf  ;;  %v12314_v8 = vadd.f32 %v12196_v51, %v7060_v62  ;;  %v12317_v15 = vadd.f32 %v12196_v51, %v7064_v26  ;;  %v7068_v21 = vrot.slane %v7051_v48, %v13357_v38 }
0x1583   : > { %7102 = vmax.xlane.f32.xlu1 %v7101_v22  ;;  %v7076_v56 = vrot.slane %v7048_v37, %v13357_v38  ;;  %v12334_v44 = vadd.f32 %v12196_v51, %v7072_v7  ;;  %v7080_v6 = vrot.slane %v7050_v1, %v13357_v38  ;;  %v7052_v11 = vcombine.high %v7048_v37, %v7048_v37 }
0x1584   : > { %v7104_v17 = vsel %vm454_vm4, %v12314_v8, -inf  ;;  %v12324_v54 = vadd.f32 %v12196_v51, %v7068_v21  ;;  %v7107_v55 = vsel %vm454_vm4, %v12317_v15, -inf  ;;  %v5764_v18 = vrot.slane %v5734_v50, %v13357_v38 }
0x1585   : > { %7105 = vmax.xlane.f32.xlu0 %v7104_v17  ;;  %v12341_v33 = vadd.f32 %v12196_v51, %v7076_v56  ;;  %v7113_v2 = vsel %vm454_vm4, %v12334_v44, -inf  ;;  %v12347_v19 = vadd.f32 %v12196_v51, %v7080_v6  ;;  %v7084_v30 = vrot.slane %v7052_v11, %v13357_v38 }
0x1586   : > { %v7110_v31 = vsel %vm454_vm4, %v12324_v54, -inf  ;;  %v5736_v49 = vcombine.high %v5732_v13, %v5732_v13  ;;  %v6820_v46 = vmul.f32 %v12196_v51, %v6798_v0  ;;  %v6806_v32 = vrot.slane %v6774_v52, %v13357_v38 }
0x1587   : > { %7108 = vmax.xlane.f32.xlu1 %v7107_v55  ;;  %v7116_v57 = vsel %vm454_vm4, %v12341_v33, -inf  ;;  %v7119_v16 = vsel %vm454_vm4, %v12347_v19, -inf  ;;  %v12359_v10 = vadd.f32 %v12196_v51, %v7084_v30  ;;  %v5800_v3 = vsel %vm454_vm4, %v5782_v25, 0.0  ;;  %v13373_v30 = vld [vmem:[#allocation7_spill] sm:$0xff] }
0x1588   : > { %v5783_v40 = vmul.f32 %v12196_v51, %v5764_v18  ;;  %v5768_v62 = vrot.slane %v5736_v49, %v13357_v38  ;;  %v6772_v26 = vcombine.high %v6756_v53, %v6756_v53  ;;  %v6838_v48 = vsel %vm454_vm4, %v6820_v46, 0.0  ;;  %v13377_v46 = vld [vmem:[#allocation12_spill] sm:$0xff] }
0x1589   : > { %7111 = vmax.xlane.f32.xlu0 %v7110_v31  ;;  %v7122_v59 = vsel %vm454_vm4, %v12359_v10, -inf  ;;  %v6822_v7 = vmul.f32 %v12196_v51, %v6806_v32  ;;  %v4782_v55 = vrot.slane %v11924_v42, %v13370_v41  ;;  %v4775_v6 = vrot.slane %v11924_v42, %v13357_v38 }
0x158a   : > { %v5803_v37 = vsel %vm454_vm4, %v5783_v40, 0.0  ;;  %v5784_v1 = vmul.f32 %v12196_v51, %v5768_v62  ;;  %v6802_v22 = vrot.slane %v6772_v26, %v13357_v38  ;;  %v5813_v53 = vrot.slane %v12211_v28, %v13357_v38 }
0x158b   : > { %7114 = vmax.xlane.f32.xlu1 %v7113_v2  ;;  %v6844_v21 = vsel %vm454_vm4, %v6822_v7, 0.0  ;;  %v4803_v2 = vrot.slane %v11924_v42, %v13372_v61  ;;  %v4796_v13 = vrot.slane %v11924_v42, %v13373_v30  ;;  %v12408_v24 = vsel %vm6696_vm6, 1.0, %v13328_v12 }
0x158c   : > { %v5806_v14 = vsel %vm454_vm4, %v5784_v1, 0.0  ;;  %v6821_v17 = vmul.f32 %v12196_v51, %v6802_v22  ;;  %v13371_v51 = vld [vmem:[#allocation6_spill] sm:$0xff]  ;;  %13375 = vst [vmem:[#allocation32_spill] sm:$0xff] %v12408_v24  ;;  %v6851_v47 = vrot.slane %v12408_v24, %v13357_v38  ;;  %v4817_v0 = vrot.slane %v11924_v42, %v13376_v60 }
0x158d   : > { %7117 = vmax.xlane.f32.xlu0 %v7116_v57  ;;  %v4789_v31 = vrot.slane %v11924_v42, %v13371_v51  ;;  %v5834_v12 = vrot.slane %v12211_v28, %v13373_v30  ;;  %v6865_v38 = vrot.slane %v12408_v24, %v13371_v51  ;;  %v5848_v18 = vrot.slane %v12211_v28, %v13374_v39 }
0x158e   : > { %v6841_v56 = vsel %vm454_vm4, %v6821_v17, 0.0  ;;  %v5841_v49 = vrot.slane %v12211_v28, %v13372_v61  ;;  %v4824_v32 = vrot.slane %v11924_v42, %v13377_v46  ;;  %v6872_v40 = vrot.slane %v12408_v24, %v13373_v30 }
0x158f   : > { %7120 = vmax.xlane.f32.xlu1 %v7119_v16  ;;  %v5820_v16 = vrot.slane %v12211_v28, %v13370_v41  ;;  %v5862_v62 = vrot.slane %v12211_v28, %v13377_v46  ;;  %v6879_v26 = vrot.slane %v12408_v24, %v13372_v61  ;;  %v6886_v42 = vrot.slane %v12408_v24, %v13374_v39 }
0x1591   : > { %6833 = vadd.xlane.f32.xlu0 %v6832_v23  ;;  %v5827_v23 = vrot.slane %v12211_v28, %v13371_v51 }
0x1593   : > { %7123 = vmax.xlane.f32.xlu1 %v7122_v59  ;;  %v6858_v59 = vrot.slane %v12408_v24, %v13370_v41 }
0x1595   : > { %6836 = vadd.xlane.f32.xlu0 %v6835_v43  ;;  %v12386_v5 = vpop.xlane.xlu1 %4757  ;;  %v5855_v43 = vrot.slane %v12211_v28, %v13376_v60 }
0x1597   : > { %5801 = vadd.xlane.f32.xlu1 %v5800_v3 }
0x1599   : > { %6839 = vadd.xlane.f32.xlu0 %v6838_v48  ;;  %v12392_v11 = vpop.xlane.xlu1 %5786 }
0x159b   : > { %5804 = vadd.xlane.f32.xlu1 %v5803_v37  ;;  %v6900_v37 = vrot.slane %v12408_v24, %v13377_v46 }
0x159d   : > { %6845 = vadd.xlane.f32.xlu0 %v6844_v21  ;;  %v12403_v57 = vpop.xlane.xlu1 %5789 }
0x159f   : > { %5807 = vadd.xlane.f32.xlu1 %v5806_v14 }
0x15a1   : > { %v12414_v50 = vpop.xlane.xlu1 %4760 }
0x15a3   : > { %6842 = vadd.xlane.f32.xlu1 %v6841_v56 }
0x15a5   : > { %v12422_v52 = vpop.xlane.xlu1 %5792 }
0x15a6   : > { %v12458_v21 = vpop.xlane.xlu0 %4763 }
0x15a9   : > { %v12428_v25 = vpop.xlane.xlu1 %5795 }
0x15ad   : > { %v12438_v3 = vpop.xlane.xlu1 %6824 }
0x15b1   : > { %v12446_v48 = vpop.xlane.xlu1 %6827 }
0x15b3   : > { %4784 = vbcast.lane.b32.xlu0 %v4782_v55, 256 }
0x15b4   : > { %4777 = vbcast.lane.b32.xlu1 %v4775_v6, 256 }
0x15b5   : > { %v12450_v7 = vpop.xlane.xlu1 %4766 }
0x15b7   : > { %5815 = vbcast.lane.b32.xlu0 %v5813_v53, 256 }
0x15b8   : > { %4791 = vbcast.lane.b32.xlu1 %v4789_v31, 256  ;;  %v7821_v31 = vld [vmem:[#allocation2 + $0x18] sm:$0xff] }
0x15b9   : > { %v12454_v1 = vpop.xlane.xlu1 %5798 }
0x15bb   : > { %4805 = vbcast.lane.b32.xlu0 %v4803_v2, 256 }
0x15bc   : > { %4798 = vbcast.lane.b32.xlu1 %v4796_v13, 256 }
0x15bd   : > { %v12456_v22 = vpop.xlane.xlu1 %6830 }
0x15bf   : > { %4812 = vbcast.lane.b32.xlu0 %v4810_v63, 256 }
0x15c0   : > { %5822 = vbcast.lane.b32.xlu1 %v5820_v16, 256 }
0x15c1   : > { %v12460_v14 = vpop.xlane.xlu1 %4769 }
0x15c3   : > { %6853 = vbcast.lane.b32.xlu0 %v6851_v47, 256 }
0x15c4   : > { %5829 = vbcast.lane.b32.xlu1 %v5827_v23, 256 }
0x15c7   : > { %4819 = vbcast.lane.b32.xlu0 %v4817_v0, 256 }
0x15c8   : > { %5836 = vbcast.lane.b32.xlu1 %v5834_v12, 256 }
0x15cb   : > { %6867 = vbcast.lane.b32.xlu0 %v6865_v38, 256 }
0x15cc   : > { %6860 = vbcast.lane.b32.xlu1 %v6858_v59, 256 }
0x15cf   : > { %5850 = vbcast.lane.b32.xlu0 %v5848_v18, 256 }
0x15d0   : > { %5843 = vbcast.lane.b32.xlu1 %v5841_v49, 256 }
0x15d3   : > { %5857 = vbcast.lane.b32.xlu0 %v5855_v43, 256 }
0x15d4   : > { %4826 = vbcast.lane.b32.xlu1 %v4824_v32, 256 }
0x15d7   : > { %5864 = vbcast.lane.b32.xlu0 %v5862_v62, 256 }
0x15d8   : > { %6874 = vbcast.lane.b32.xlu1 %v6872_v40, 256 }
0x15dc   : > { %6881 = vbcast.lane.b32.xlu1 %v6879_v26, 256 }
0x15e0   : > { %6888 = vbcast.lane.b32.xlu1 %v6886_v42, 256 }
0x15e4   : > { %6902 = vbcast.lane.b32.xlu1 %v6900_v37, 256 }
0x15f5   : > { %v7814_v17 = vpop.xlane.xlu0 %7813  ;;  %v7812_v56 = vpop.xlane.xlu1 %7811 }
0x15f6   : > { %v7816_v41 = vcvt.f32.s32 %v7814_v17  ;;  %v7815_v6 = vcvt.f32.s32 %v7812_v56 }
0x15f8   : > { %v7817_v55 = vshll.u32 %v7816_v41, 16 }
0x15fa   : > { %v7818_v53 = vadd.s32 %v7817_v55, %v7815_v6 }
0x15fc   : > { %v12464_v51 = vsel %vm7819_vm7, %v7818_v53, %v12269_v9  ;;  %vm7822_vm10 = vcmp.eq.s32.totalorder %v13212_v4, %v7818_v53 }
0x15fd   : > { %v7823_v58 = vsel %vm7822_vm10, %v7821_v31, 0 }
0x15fe   : > { %v12468_v61 = vsel %vm454_vm4, %v7823_v58, 0 }
0x15ff   : > { %v7825_v2 = vand.u32 65535, %v12468_v61 }
0x1601   : > { %v7827_v30 = vcvt.s32.f32 %v7825_v2 }
0x1608   : > { %7829 = vadd.xlane.f32.xlu1 %v7827_v30 }
0x160c   : > { %v12471_v13 = vpop.xlane.xlu1 %7102 }
0x160d   : > { %v7125_v39 = vsub.f32 %v12305_v20, %v12471_v13 }
0x160e   : > { %v12475_v63 = vpop.xlane.xlu0 %7105 }
0x160f   : > { %v7133_v9 = vmul.f32 1.442695, %v7125_v39  ;;  %v7126_v16 = vsub.f32 %v12314_v8, %v12475_v63 }
0x1610   : > { %v12479_v47 = vpop.xlane.xlu1 %7108 }
0x1611   : > { %8357 = vpow2.f32 %v7133_v9  ;;  %v7135_v23 = vmul.f32 1.442695, %v7126_v16  ;;  %v7127_v0 = vsub.f32 %v12317_v15, %v12479_v47 }
0x1612   : > { %v12483_v12 = vpop.xlane.xlu0 %7111 }
0x1613   : > { %8359 = vpow2.f32 %v7135_v23  ;;  %v7137_v38 = vmul.f32 1.442695, %v7127_v0  ;;  %v7128_v8 = vsub.f32 %v12324_v54, %v12483_v12 }
0x1614   : > { %v12485_v59 = vpop.xlane.xlu1 %7114 }
0x1615   : > { %v7129_v20 = vsub.f32 %v12334_v44, %v12485_v59  ;;  %8361 = vpow2.f32 %v7137_v38  ;;  %v7139_v15 = vmul.f32 1.442695, %v7128_v8  ;;  %v7826_v8 = vshrl.u32 %v12468_v61, 16 }
0x1616   : > { %v12489_v18 = vpop.xlane.xlu0 %7117 }
0x1617   : > { %v7141_v49 = vmul.f32 1.442695, %v7129_v20  ;;  %v7130_v32 = vsub.f32 %v12341_v33, %v12489_v18 }
0x1618   : > { %v12493_v43 = vpop.xlane.xlu1 %7120 }
0x1619   : > { %8363 = vpow2.f32 %v7141_v49  ;;  %v7143_v44 = vmul.f32 1.442695, %v7130_v32  ;;  %v7131_v26 = vsub.f32 %v12347_v19, %v12493_v43  ;;  %v7828_v49 = vcvt.s32.f32 %v7826_v8 }
0x161a   : > { %v12495_v46 = vpop.xlane.xlu0 %6833  ;;  %8365 = vpow2.f32 %v7139_v15 }
0x161b   : > { %8367 = vpow2.f32 %v7143_v44  ;;  %v7145_v56 = vmul.f32 1.442695, %v7131_v26 }
0x161c   : > { %v12504_v37 = vpop.xlane.xlu1 %7123 }
0x161d   : > { %v7132_v33 = vsub.f32 %v12359_v10, %v12504_v37  ;;  %8369 = vpow2.f32 %v7145_v56 }
0x161e   : > { %v8358_v40 = vpop.eup %8357  ;;  %v12499_v62 = vpop.xlane.xlu0 %6836 }
0x161f   : > { %v7149_v54 = vsel %vm454_vm4, %v8358_v40, 0.0  ;;  %v7147_v19 = vmul.f32 1.442695, %v7132_v33 }
0x1620   : > { %v8360_v42 = vpop.eup %8359  ;;  %7150 = vadd.xlane.f32.xlu0 %v7149_v54 }
0x1621   : > { %v7152_v41 = vsel %vm454_vm4, %v8360_v42, 0.0  ;;  %8371 = vpow2.f32 %v7147_v19  ;;  %v12533_v42 = vpop.xlane.xlu1 %5801 }
0x1622   : > { %v12506_v17 = vpop.xlane.xlu0 %6839  ;;  %v8362_v55 = vpop.eup %8361 }
0x1623   : > { %v7155_v53 = vsel %vm454_vm4, %v8362_v55, 0.0 }
0x1624   : > { %7153 = vadd.xlane.f32.xlu0 %v7152_v41 }
0x1626   : > { %v12511_v6 = vpop.xlane.xlu0 %6845  ;;  %v8364_v31 = vpop.eup %8363 }
0x1627   : > { %v7161_v30 = vsel %vm454_vm4, %v8364_v31, 0.0  ;;  %v8366_v39 = vpop.eup %8365 }
0x1628   : > { %7156 = vadd.xlane.f32.xlu0 %v7155_v53  ;;  %v7158_v10 = vsel %vm454_vm4, %v8366_v39, 0.0  ;;  %v8368_v9 = vpop.eup %8367 }
0x1629   : > { %v7164_v16 = vsel %vm454_vm4, %v8368_v9, 0.0 }
0x162a   : > { %v4785_v58 = vpop.permute.xlu0 %4784  ;;  %v8370_v23 = vpop.eup %8369 }
0x162b   : > { %v4837_v2 = vmul.f32 %v4785_v58, %v12263_v45  ;;  %v7167_v0 = vsel %vm454_vm4, %v8370_v23, 0.0  ;;  %v6893_v45 = vrot.slane %v12408_v24, %v13376_v60  ;;  %v12537_v60 = vpop.xlane.xlu1 %5804 }
0x162c   : > { %7162 = vadd.xlane.f32.xlu0 %v7161_v30 }
0x162d   : > { %4856 = vperm.xlu1 %8117, %v4837_v2  }
0x162e   : > { %v8372_v38 = vpop.eup %8371  ;;  %v5816_v15 = vpop.permute.xlu0 %5815 }
0x162f   : > { %v7170_v20 = vsel %vm454_vm4, %v8372_v38, 0.0  ;;  %v12541_v33 = vpop.xlane.xlu1 %5807 }
0x1630   : > { %7159 = vadd.xlane.f32.xlu0 %v7158_v10 }
0x1632   : > { %v12523_v32 = vpop.permute.xlu0 %4805 }
0x1633   : > { %v12545_v55 = vpop.xlane.xlu1 %6842 }
0x1634   : > { %7165 = vadd.xlane.f32.xlu0 %v7164_v16 }
0x1636   : > { %v12525_v40 = vpop.permute.xlu0 %4812 }
0x1637   : > { %v4778_v31 = vpop.permute.xlu1 %4777 }
0x1638   : > { %7168 = vadd.xlane.f32.xlu0 %v7167_v0 }
0x163a   : > { %v12527_v44 = vpop.permute.xlu0 %6853 }
0x163b   : > { %v4792_v2 = vpop.permute.xlu1 %4791 }
0x163c   : > { %7171 = vadd.xlane.f32.xlu0 %v7170_v20  ;;  %v13378_v20 = vld [vmem:[#allocation89_spill] sm:$0xff] }
0x163e   : > { %v12529_v26 = vpop.permute.xlu0 %4819 }
0x163f   : > { %v12547_v16 = vpop.permute.xlu1 %4798 }
0x1642   : > { %v12531_v54 = vpop.permute.xlu0 %6867 }
0x1646   : > { %v12535_v56 = vpop.permute.xlu0 %5850 }
0x164a   : > { %v12539_v61 = vpop.permute.xlu0 %5857 }
0x164e   : > { %v12543_v41 = vpop.permute.xlu0 %5864 }
0x1652   : > { %6895 = vbcast.lane.b32.xlu0 %v6893_v45, 256 }
0x1671   : > { %7831 = vadd.xlane.f32.xlu0 %v7828_v49 }
0x16a9   : > { %v7151_v19 = vpop.xlane.xlu0 %7150 }
0x16aa   : > { %8373 = vlog2.f32 %v7151_v19 }
0x16ad   : > { %v7154_v53 = vpop.xlane.xlu0 %7153 }
0x16ae   : > { %8375 = vlog2.f32 %v7154_v53  ;;  %v4836_v53 = vmul.f32 %v4778_v31, %v12261_v34 }
0x16b1   : > { %v7157_v58 = vpop.xlane.xlu0 %7156 }
0x16b2   : > { %8377 = vlog2.f32 %v7157_v58  ;;  %v5823_v58 = vpop.permute.xlu1 %5822 }
0x16b5   : > { %v7163_v30 = vpop.xlane.xlu0 %7162 }
0x16b6   : > { %8379 = vlog2.f32 %v7163_v30 }
0x16b7   : > { %v8374_v39 = vpop.eup %8373 }
0x16b8   : > { %v7174_v10 = vmul.f32 0.6931472, %v8374_v39  ;;  %v13379_v39 = vld [vmem:[#allocation94_spill] sm:$0xff] }
0x16b9   : > { %v7160_v9 = vpop.xlane.xlu0 %7159 }
0x16ba   : > { %v7189_v23 = vadd.f32 %v7174_v10, %v12471_v13  ;;  %8381 = vlog2.f32 %v7160_v9  ;;  %v4838_v9 = vmul.f32 %v4792_v2, %v12265_v27  ;;  %v4840_v2 = vmul.f32 %v12523_v32, %v12414_v50 }
0x16bb   : > { %v8376_v0 = vpop.eup %8375  ;;  %v6912_v32 = vmul.f32 %v12527_v44, %v12438_v3  ;;  %v6914_v3 = vmul.f32 %v12531_v54, %v12456_v22  ;;  %v5881_v22 = vmul.f32 %v12543_v41, %v12541_v33 }
0x16bc   : > { %v7176_v38 = vmul.f32 0.6931472, %v8376_v0  ;;  %v7262_v45 = vadd.f32 %v13378_v20, %v7189_v23  ;;  %v5830_v20 = vpop.permute.xlu1 %5829 }
0x16bd   : > { %v7166_v8 = vpop.xlane.xlu0 %7165 }
0x16be   : > { %v7190_v49 = vadd.f32 %v7176_v38, %v12475_v63  ;;  %8383 = vlog2.f32 %v7166_v8  ;;  %7284 = vperm.xlu0 %8118, %v7262_v45   ;;  %v13380_v63 = vld [vmem:[#allocation90_spill] sm:$0xff]  ;;  %v5874_v45 = vmul.f32 %v5816_v15, %v12392_v11  ;;  %v4841_v15 = vmul.f32 %v12525_v40, %v12458_v21 }
0x16bf   : > { %v8378_v19 = vpop.eup %8377  ;;  %v4842_v21 = vmul.f32 %v12529_v26, %v12450_v7  ;;  %v5876_v7 = vmul.f32 %v5830_v20, %v12422_v52  ;;  %v5880_v26 = vmul.f32 %v12539_v61, %v12537_v60 }
0x16c0   : > { %v7178_v30 = vmul.f32 0.6931472, %v8378_v19  ;;  %v7263_v36 = vadd.f32 %v13379_v39, %v7190_v49  ;;  %v5837_v49 = vpop.permute.xlu1 %5836 }
0x16c1   : > { %v7169_v24 = vpop.xlane.xlu0 %7168 }
0x16c2   : > { %v7191_v13 = vadd.f32 %v7178_v30, %v12479_v47  ;;  %8385 = vlog2.f32 %v7169_v24  ;;  %7287 = vperm.xlu1 %8117, %v7263_v36   ;;  %4853 = vperm.xlu0 %8118, %v4836_v53   ;;  %v13381_v24 = vld [vmem:[#allocation95_spill] sm:$0xff] }
0x16c3   : > { %v8380_v10 = vpop.eup %8379 }
0x16c4   : > { %v7182_v23 = vmul.f32 0.6931472, %v8380_v10  ;;  %v7264_v0 = vadd.f32 %v13380_v63, %v7191_v13  ;;  %v6861_v10 = vpop.permute.xlu1 %6860 }
0x16c5   : > { %v7172_v38 = vpop.xlane.xlu0 %7171 }
0x16c6   : > { %v7193_v34 = vadd.f32 %v7182_v23, %v12485_v59  ;;  %8387 = vlog2.f32 %v7172_v38  ;;  %7290 = vperm.xlu1 %8117, %v7264_v0   ;;  %4859 = vperm.xlu0 %8118, %v4838_v9   ;;  %v13382_v59 = vld [vmem:[#allocation91_spill] sm:$0xff]  ;;  %v13385_v38 = vld [vmem:[#allocation96_spill] sm:$0xff] }
0x16c7   : > { %v8382_v31 = vpop.eup %8381 }
0x16c8   : > { %v7180_v47 = vmul.f32 0.6931472, %v8382_v31  ;;  %v7266_v36 = vadd.f32 %v13381_v24, %v7193_v34  ;;  %v5844_v40 = vpop.permute.xlu1 %5843  ;;  %v5879_v31 = vmul.f32 %v12535_v56, %v12533_v42  ;;  %v6913_v42 = vmul.f32 %v6861_v10, %v12446_v48  ;;  %v7839_v24 = vld [vmem:[#allocation2 + $0x10] sm:$0xff] }
0x16c9   : > { %v6896_v54 = vpop.permute.xlu0 %6895  ;;  %v5878_v52 = vmul.f32 %v5844_v40, %v12454_v1 }
0x16ca   : > { %v7192_v8 = vadd.f32 %v7180_v47, %v12483_v12  ;;  %7296 = vperm.xlu1 %8117, %v7266_v36   ;;  %5891 = vperm.xlu0 %8118, %v5874_v45   ;;  %v13383_v12 = vld [vmem:[#allocation92_spill] sm:$0xff]  ;;  %v6918_v56 = vmul.f32 %v6896_v54, %v12545_v55 }
0x16cb   : > { %v8384_v27 = vpop.eup %8383 }
0x16cc   : > { %v7184_v19 = vmul.f32 0.6931472, %v8384_v27  ;;  %v7265_v53 = vadd.f32 %v13382_v59, %v7192_v8  ;;  %v4827_v44 = vpop.permute.xlu1 %4826 }
0x16cd   : > { %v4843_v61 = vmul.f32 %v4827_v44, %v12460_v14 }
0x16ce   : > { %v7194_v30 = vadd.f32 %v7184_v19, %v12489_v18  ;;  %7293 = vperm.xlu1 %8117, %v7265_v53   ;;  %4865 = vperm.xlu0 %8118, %v4840_v2   ;;  %v13384_v18 = vld [vmem:[#allocation97_spill] sm:$0xff] }
0x16cf   : > { %v8386_v11 = vpop.eup %8385 }
0x16d0   : > { %v7186_v39 = vmul.f32 0.6931472, %v8386_v11  ;;  %v7267_v13 = vadd.f32 %v13383_v12, %v7194_v30  ;;  %v6875_v45 = vpop.permute.xlu1 %6874 }
0x16d1   : > { %v6915_v33 = vmul.f32 %v6875_v45, %v12495_v46 }
0x16d2   : > { %v7195_v9 = vadd.f32 %v7186_v39, %v12493_v43  ;;  %7299 = vperm.xlu1 %8117, %v7267_v13   ;;  %4868 = vperm.xlu0 %8118, %v4841_v15   ;;  %v4839_v43 = vmul.f32 %v12547_v16, %v12386_v5  ;;  %v5877_v5 = vmul.f32 %v5837_v49, %v12428_v25 }
0x16d3   : > { %v8388_v50 = vpop.eup %8387 }
0x16d4   : > { %v7188_v23 = vmul.f32 0.6931472, %v8388_v50  ;;  %v7268_v63 = vadd.f32 %v13384_v18, %v7195_v9 }
0x16d6   : > { %v7196_v0 = vadd.f32 %v7188_v23, %v12504_v37  ;;  %7302 = vperm.xlu1 %8117, %v7268_v63   ;;  %6929 = vperm.xlu0 %8118, %v6912_v32   ;;  %v5875_v37 = vmul.f32 %v5823_v58, %v12403_v57  ;;  %v6882_v57 = vpop.permute.xlu1 %6881 }
0x16d7   : > { %v6916_v48 = vmul.f32 %v6882_v57, %v12499_v62  ;;  %v13387_v57 = vld [vmem:[#allocation14_spill] sm:$0xff] }
0x16d8   : > { %v7269_v34 = vadd.f32 %v13385_v38, %v7196_v0 }
0x16da   : > { %7305 = vperm.xlu1 %8117, %v7269_v34   ;;  %4871 = vperm.xlu0 %8118, %v4842_v21   ;;  %v6889_v60 = vpop.permute.xlu1 %6888 }
0x16db   : > { %v6917_v47 = vmul.f32 %v6889_v60, %v12506_v17 }
0x16de   : > { %6935 = vperm.xlu0 %8118, %v6914_v3   ;;  %4862 = vperm.xlu1 %8117, %v4839_v43   ;;  %v6903_v25 = vpop.permute.xlu1 %6902 }
0x16df   : > { %v6919_v36 = vmul.f32 %v6903_v25, %v12511_v6  ;;  %v13389_v25 = vld [vmem:[#allocation32_spill] sm:$0xff] }
0x16e2   : > { %5906 = vperm.xlu0 %8118, %v5879_v31   ;;  %5894 = vperm.xlu1 %8117, %v5875_v37   ;;  %v7830_v41 = vpop.xlane.xlu1 %7829 }
0x16e3   : > { %v7833_v20 = vcvt.f32.s32 %v7830_v41 }
0x16e6   : > { %5909 = vperm.xlu0 %8118, %v5880_v26   ;;  %5897 = vperm.xlu1 %8117, %v5876_v7   ;;  %v4857_v17 = vpop.permute.xlu1 %4856 }
0x16ea   : > { %5912 = vperm.xlu0 %8118, %v5881_v22   ;;  %5900 = vperm.xlu1 %8117, %v5877_v5  }
0x16ee   : > { %6947 = vperm.xlu0 %8118, %v6918_v56   ;;  %6932 = vperm.xlu1 %8117, %v6913_v42   ;;  %v5661_v42 = vmul.f32 %v12211_v28, %v13387_v57  ;;  %v4883_v28 = vrot.slane %v4857_v17, %v9104_v29 }
0x16f0   : > { %v5662_v60 = vsel %vm454_vm4, %v5661_v42, 0.0 }
0x16f2   : > { %5903 = vperm.xlu1 %8117, %v5878_v52  }
0x16f6   : > { %4874 = vperm.xlu1 %8117, %v4843_v61   ;;  %v13388_v61 = vld [vmem:[#allocation18_spill] sm:$0xff] }
0x16fa   : > { %v7832_v16 = vpop.xlane.xlu0 %7831  ;;  %6938 = vperm.xlu1 %8117, %v6915_v33   ;;  %v6699_v33 = vmul.f32 %v13389_v25, %v13388_v61 }
0x16fb   : > { %v7834_v58 = vcvt.f32.s32 %v7832_v16 }
0x16fd   : > { %v7835_v55 = vshll.u32 %v7834_v58, 16 }
0x16fe   : > { %6941 = vperm.xlu1 %8117, %v6916_v48  }
0x16ff   : > { %v7836_v1 = vadd.s32 %v7835_v55, %v7833_v20 }
0x1701   : > { %v12598_v14 = vsel %vm7837_vm11, %v7836_v1, %v12464_v51  ;;  %vm7840_vm12 = vcmp.eq.s32.totalorder %v13212_v4, %v7836_v1 }
0x1702   : > { %v7841_v46 = vsel %vm7840_vm12, %v7839_v24, 0  ;;  %6944 = vperm.xlu1 %8117, %v6917_v47  }
0x1703   : > { %v7842_v62 = vsel %vm454_vm4, %v7841_v46, 0 }
0x1704   : > { %v7843_v8 = vand.u32 65535, %v7842_v62  ;;  %v7844_v2 = vshrl.u32 %v7842_v62, 16 }
0x1706   : > { %6950 = vperm.xlu1 %8117, %v6919_v36   ;;  %v7845_v27 = vcvt.s32.f32 %v7843_v8  ;;  %v7846_v49 = vcvt.s32.f32 %v7844_v2 }
0x170d   : > { %7847 = vadd.xlane.f32.xlu0 %v7845_v27 }
0x172a   : > { %7849 = vadd.xlane.f32.xlu1 %v7846_v49 }
0x1739   : > { %v7285_v19 = vpop.permute.xlu0 %7284 }
0x173a   : > { %v7310_v50 = vrot.slane %v7285_v19, %v9104_v29 }
0x173d   : > { %v4854_v59 = vpop.permute.xlu0 %4853  ;;  %v7288_v51 = vpop.permute.xlu1 %7287 }
0x173e   : > { %v7314_v6 = vrot.slane %v7288_v51, %v9104_v29  ;;  %v4879_v58 = vrot.slane %v4854_v59, %v9104_v29 }
0x1740   : > { %v7339_v23 = vsel %vm872_vm14, %v7314_v6, %v7310_v50  ;;  %v4908_v1 = vsel %vm872_vm14, %v4883_v28, %v4879_v58 }
0x1741   : > { %v4860_v53 = vpop.permute.xlu0 %4859  ;;  %v7291_v30 = vpop.permute.xlu1 %7290 }
0x1742   : > { %v7318_v13 = vrot.slane %v7291_v30, %v9104_v29  ;;  %v4887_v48 = vrot.slane %v4860_v53, %v9104_v29 }
0x1744   : > { %v7340_v18 = vsel %vm874_vm15, %v7318_v13, %v7339_v23  ;;  %v4909_v24 = vsel %vm874_vm15, %v4887_v48, %v4908_v1  ;;  %v7857_v1 = vld [vmem:[#allocation2 + $0x8] sm:$0xff] }
0x1745   : > { %v5892_v11 = vpop.permute.xlu0 %5891  ;;  %v7297_v15 = vpop.permute.xlu1 %7296 }
0x1746   : > { %v7326_v38 = vrot.slane %v7297_v15, %v9104_v29  ;;  %v5917_v27 = vrot.slane %v5892_v11, %v9104_v29 }
0x1749   : > { %v4866_v39 = vpop.permute.xlu0 %4865  ;;  %v7294_v12 = vpop.permute.xlu1 %7293 }
0x174a   : > { %v7322_v32 = vrot.slane %v7294_v12, %v9104_v29  ;;  %v4895_v2 = vrot.slane %v4866_v39, %v9104_v29 }
0x174c   : > { %v7341_v21 = vsel %vm876_vm0, %v7322_v32, %v7340_v18 }
0x174d   : > { %v4869_v10 = vpop.permute.xlu0 %4868  ;;  %v7300_v9 = vpop.permute.xlu1 %7299  ;;  %v7342_v43 = vsel %vm878_vm1, %v7326_v38, %v7341_v21 }
0x174e   : > { %v7330_v40 = vrot.slane %v7300_v9, %v9104_v29  ;;  %v4899_v51 = vrot.slane %v4869_v10, %v9104_v29 }
0x1750   : > { %v7343_v44 = vsel %vm880_vm2, %v7330_v40, %v7342_v43 }
0x1751   : > { %v12609_v63 = vpop.permute.xlu0 %6929  ;;  %v7303_v0 = vpop.permute.xlu1 %7302 }
0x1752   : > { %v7334_v34 = vrot.slane %v7303_v0, %v9104_v29 }
0x1754   : > { %v7344_v7 = vsel %vm882_vm3, %v7334_v34, %v7343_v44  ;;  %v6955_v44 = vrot.slane %v12609_v63, %v9104_v29 }
0x1755   : > { %v7306_v3 = vpop.permute.xlu1 %7305  ;;  %v4872_v37 = vpop.permute.xlu0 %4871 }
0x1756   : > { %v7338_v31 = vrot.slane %v7306_v3, %v9104_v29  ;;  %v4903_v9 = vrot.slane %v4872_v37, %v9104_v29 }
0x1758   : > { %v7345_v26 = vsel %vm884_vm5, %v7338_v31, %v7344_v7 }
0x1759   : > { %v4863_v45 = vpop.permute.xlu1 %4862  ;;  %v12623_v22 = vsel %vm7274_vm13, %v7345_v26, %v12291_v35  ;;  %v6936_v56 = vpop.permute.xlu0 %6935  ;;  %v6700_v35 = vsel %vm454_vm4, %v6699_v33, 0.0 }
0x175a   : > { %v7729_v54 = vsel %vm454_vm4, %v12623_v22, -inf  ;;  %v4891_v55 = vrot.slane %v4863_v45, %v9104_v29  ;;  %v6963_v26 = vrot.slane %v6936_v56, %v9104_v29 }
0x175b   : > { %7730 = vmax.xlane.f32.xlu0 %v7729_v54 }
0x175c   : > { %v4910_v62 = vsel %vm876_vm0, %v4891_v55, %v4909_v24  ;;  %v13390_v24 = vld [vmem:[#allocation71_spill] sm:$0xff] }
0x175d   : > { %v5895_v52 = vpop.permute.xlu1 %5894  ;;  %v5907_v16 = vpop.permute.xlu0 %5906  ;;  %v4911_v17 = vsel %vm878_vm1, %v4895_v2, %v4910_v62  ;;  %8389 = vlog2.f32 %v13390_v24 }
0x175e   : > { %v5921_v46 = vrot.slane %v5895_v52, %v9104_v29  ;;  %v5937_v12 = vrot.slane %v5907_v16, %v9104_v29  ;;  %v4912_v13 = vsel %vm880_vm2, %v4899_v51, %v4911_v17  ;;  %v13391_v17 = vld [vmem:[#allocation31_spill] sm:$0xff]  ;;  %v12692_v51 = vld [vmem:[%s8521_s14] sm:$0xff] }
0x175f   : > { %5663 = vadd.xlane.f32.xlu0 %v5662_v60  ;;  %v4913_v21 = vsel %vm882_vm3, %v4903_v9, %v4912_v13 }
0x1760   : > { %v5946_v19 = vsel %vm872_vm14, %v5921_v46, %v5917_v27 }
0x1761   : > { %v5898_v41 = vpop.permute.xlu1 %5897  ;;  %v5910_v47 = vpop.permute.xlu0 %5909 }
0x1762   : > { %v5925_v8 = vrot.slane %v5898_v41, %v9104_v29  ;;  %v5941_v39 = vrot.slane %v5910_v47, %v9104_v29 }
0x1763   : > { %6701 = vadd.xlane.f32.xlu0 %v6700_v35 }
0x1764   : > { %v5947_v53 = vsel %vm874_vm15, %v5925_v8, %v5946_v19 }
0x1765   : > { %v5901_v20 = vpop.permute.xlu1 %5900  ;;  %v5913_v30 = vpop.permute.xlu0 %5912 }
0x1766   : > { %v5929_v49 = vrot.slane %v5901_v20, %v9104_v29  ;;  %v5945_v50 = vrot.slane %v5913_v30, %v9104_v29 }
0x1768   : > { %v5948_v11 = vsel %vm876_vm0, %v5929_v49, %v5947_v53  ;;  %v13393_v53 = vld [vmem:[#allocation54_spill] sm:$0xff] }
0x1769   : > { %v6933_v36 = vpop.permute.xlu1 %6932  ;;  %v6948_v57 = vpop.permute.xlu0 %6947  ;;  %8391 = vlog2.f32 %v13393_v53  ;;  %v13397_v53 = vld [vmem:[#allocation56_spill] sm:$0xff] }
0x176a   : > { %v6959_v3 = vrot.slane %v6933_v36, %v9104_v29  ;;  %v6979_v61 = vrot.slane %v6948_v57, %v9104_v29  ;;  %v8390_v2 = vpop.eup %8389 }
0x176b   : > { %v538_v49 = vmul.f32 0.6931472, %v8390_v2 }
0x176c   : > { %v6984_v31 = vsel %vm872_vm14, %v6959_v3, %v6955_v44  ;;  %vm7855_vm14 = vcmp.eq.s32.totalorder %v13212_v4, 2 }
0x176d   : > { %v5904_v59 = vpop.permute.xlu1 %5903  ;;  %v6985_v5 = vsel %vm874_vm15, %v6963_v26, %v6984_v31  ;;  %v548_v19 = vadd.f32 %v538_v49, %v13391_v17 }
0x176e   : > { %v5933_v15 = vrot.slane %v5904_v59, %v9104_v29  ;;  %v13392_v59 = vld [vmem:[#allocation76_spill] sm:$0xff] }
0x1770   : > { %v5949_v6 = vsel %vm878_vm1, %v5933_v15, %v5948_v11  ;;  %v13394_v15 = vld [vmem:[#allocation68_spill] sm:$0xff] }
0x1771   : > { %v4875_v10 = vpop.permute.xlu1 %4874  ;;  %v5950_v32 = vsel %vm880_vm2, %v5937_v12, %v5949_v6  ;;  %8393 = vlog2.f32 %v13394_v15 }
0x1772   : > { %v4907_v23 = vrot.slane %v4875_v10, %v9104_v29  ;;  %v5951_v18 = vsel %vm882_vm3, %v5941_v39, %v5950_v32 }
0x1773   : > { %v5952_v0 = vsel %vm884_vm5, %v5945_v50, %v5951_v18  ;;  %v13395_v50 = vld [vmem:[#allocation22_spill] sm:$0xff] }
0x1774   : > { %v5954_v40 = vsel %vm454_vm4, %v5952_v0, 0.0  ;;  %v4914_v38 = vsel %vm884_vm5, %v4907_v23, %v4913_v21  ;;  %v13396_v21 = vld [vmem:[#allocation27_spill] sm:$0xff] }
0x1775   : > { %5955 = vadd.xlane.f32.xlu0 %v5954_v40  ;;  %v6939_v34 = vpop.permute.xlu1 %6938  ;;  %v4916_v43 = vsel %vm454_vm4, %v4914_v38, 0.0 }
0x1776   : > { %4917 = vadd.xlane.f32.xlu1 %v4916_v43  ;;  %v6967_v7 = vrot.slane %v6939_v34, %v9104_v29  ;;  %v8392_v12 = vpop.eup %8391 }
0x1777   : > { %v540_v11 = vmul.f32 0.6931472, %v8392_v12 }
0x1778   : > { %v6986_v42 = vsel %vm876_vm0, %v6967_v7, %v6985_v5  ;;  %vm7873_vm0 = vcmp.eq.s32.totalorder %v13212_v4, 1 }
0x1779   : > { %v6942_v37 = vpop.permute.xlu1 %6941  ;;  %v549_v10 = vadd.f32 %v540_v11, %v13395_v50  ;;  %v13399_v50 = vld [vmem:[#allocation29_spill] sm:$0xff] }
0x177a   : > { %v6971_v45 = vrot.slane %v6942_v37, %v9104_v29 }
0x177c   : > { %v6987_v60 = vsel %vm878_vm1, %v6971_v45, %v6986_v42 }
0x177d   : > { %v6945_v54 = vpop.permute.xlu1 %6944 }
0x177e   : > { %v6975_v52 = vrot.slane %v6945_v54, %v9104_v29  ;;  %v8394_v39 = vpop.eup %8393 }
0x177f   : > { %v542_v9 = vmul.f32 0.6931472, %v8394_v39 }
0x1780   : > { %v6988_v63 = vsel %vm880_vm2, %v6975_v52, %v6987_v60  ;;  %vm7891_vm2 = vcmp.eq.s32.totalorder %v13212_v4, 0 }
0x1781   : > { %v6951_v25 = vpop.permute.xlu1 %6950  ;;  %v6989_v56 = vsel %vm882_vm3, %v6979_v61, %v6988_v63  ;;  %v550_v40 = vadd.f32 %v542_v9, %v13396_v21  ;;  %vm7906_vm3 = vcmask 23552  }
0x1782   : > { %v6983_v33 = vrot.slane %v6951_v25, %v9104_v29 }
0x1784   : > { %v6990_v41 = vsel %vm884_vm5, %v6983_v33, %v6989_v56 }
0x1785   : > { %v6992_v16 = vsel %vm454_vm4, %v6990_v41, 0.0 }
0x1786   : > { %6993 = vadd.xlane.f32.xlu1 %v6992_v16 }
0x1796   : > { %v7848_v35 = vpop.xlane.xlu0 %7847 }
0x1797   : > { %v7851_v20 = vcvt.f32.s32 %v7848_v35 }
0x17b3   : > { %v7850_v58 = vpop.xlane.xlu1 %7849 }
0x17b4   : > { %v7852_v48 = vcvt.f32.s32 %v7850_v58 }
0x17b6   : > { %v7853_v28 = vshll.u32 %v7852_v48, 16 }
0x17b8   : > { %v7854_v55 = vadd.s32 %v7853_v28, %v7851_v20 }
0x17ba   : > { %v12684_v47 = vsel %vm7855_vm14, %v7854_v55, %v12598_v14  ;;  %vm7858_vm15 = vcmp.eq.s32.totalorder %v13212_v4, %v7854_v55  ;;  %v4627_v14 = vsub.f32 %v13392_v59, %v548_v19 }
0x17bb   : > { %v7859_v29 = vsel %vm7858_vm15, %v7857_v1, 0 }
0x17bc   : > { %v7860_v46 = vsel %vm454_vm4, %v7859_v29, 0  ;;  %v4628_v30 = vmul.f32 1.442695, %v4627_v14 }
0x17bd   : > { %v7862_v36 = vshrl.u32 %v7860_v46, 16  ;;  %v7861_v62 = vand.u32 65535, %v7860_v46 }
0x17be   : > { %8395 = vpow2.f32 %v4628_v30 }
0x17bf   : > { %v7864_v8 = vcvt.s32.f32 %v7862_v36  ;;  %v7863_v27 = vcvt.s32.f32 %v7861_v62 }
0x17c1   : > { %7867 = vadd.xlane.f32.xlu0 %v7864_v8  ;;  %7865 = vadd.xlane.f32.xlu1 %v7863_v27 }
0x17cb   : > { %v8396_v13 = vpop.eup %8395 }
0x17cc   : > { %v4635_v18 = vadd.f32 1e-08, %v8396_v13  ;;  %v4630_v3 = vmax.f32 %v8396_v13, 0.01  ;;  %v13398_v13 = vld [vmem:[#allocation24_spill] sm:$0xff] }
0x17ce   : > { %v4631_v44 = vmin.f32 %v4630_v3, 0.99 }
0x17d0   : > { %v4632_v37 = vsub.f32 1.0, %v4631_v44 }
0x17d2   : > { %4646 = vrot.lane.b32.xlu1 %v12692_v51, %s8451_s11  ;;  %v4633_v5 = vmul.f32 %v4632_v37, %v4632_v37 }
0x17d4   : > { %v4634_v56 = vsub.f32 0.0, %v4633_v5  ;;  %v8428_v5 = vld [vmem:[%s8521_s14] sm:$0xff] }
0x17d6   : > { %6722 = vrot.lane.b32.xlu1 %v12692_v51, %s8452_s20 }
0x17d7   : > { %5684 = vrot.lane.b32.xlu0 %v12692_v51, %s8453_s21 }
0x17e4   : > { %v12702_v6 = vpop.xlane.xlu0 %7730 }
0x17e5   : > { %v7732_v1 = vsub.f32 %v12623_v22, %v12702_v6 }
0x17e7   : > { %v7733_v62 = vmul.f32 1.442695, %v7732_v1 }
0x17e8   : > { %v5664_v32 = vpop.xlane.xlu0 %5663 }
0x17e9   : > { %v5665_v23 = vsub.f32 %v5664_v32, %v549_v10 }
0x17eb   : > { %v5666_v0 = vmul.f32 1.442695, %v5665_v23 }
0x17ec   : > { %v6702_v38 = vpop.xlane.xlu0 %6701 }
0x17ed   : > { %8397 = vpow2.f32 %v5666_v0  ;;  %v6703_v34 = vsub.f32 %v6702_v38, %v550_v40 }
0x17ee   : > { %8399 = vlog2.f32 %v4635_v18 }
0x17ef   : > { %v6704_v43 = vmul.f32 1.442695, %v6703_v34 }
0x17f1   : > { %8401 = vpow2.f32 %v6704_v43 }
0x17fa   : > { %v8398_v31 = vpop.eup %8397 }
0x17fb   : > { %v8400_v7 = vpop.eup %8399  ;;  %v5668_v26 = vmax.f32 %v8398_v31, 0.01  ;;  %v5673_v45 = vadd.f32 1e-08, %v8398_v31 }
0x17fc   : > { %v4637_v42 = vmul.f32 0.6931472, %v8400_v7 }
0x17fd   : > { %8403 = vlog2.f32 %v5673_v45  ;;  %v5669_v63 = vmin.f32 %v5668_v26, 0.99 }
0x17fe   : > { %v8402_v54 = vpop.eup %8401  ;;  %v5956_v57 = vpop.xlane.xlu0 %5955  ;;  %v4638_v35 = vmul.f32 %v4637_v42, %v4634_v56  ;;  %v13403_v56 = vld [vmem:[#allocation23_spill] sm:$0xff] }
0x17ff   : > { %v5957_v52 = vadd.f32 %v5956_v57, %v5664_v32  ;;  %v4918_v60 = vpop.xlane.xlu1 %4917  ;;  %v6706_v61 = vmax.f32 %v8402_v54, 0.01  ;;  %v6711_v25 = vadd.f32 1e-08, %v8402_v54  ;;  %v5670_v58 = vsub.f32 1.0, %v5669_v63  ;;  %v13400_v54 = vld [vmem:[#allocation10_spill] sm:$0xff] }
0x1800   : > { %v4919_v33 = vadd.f32 %v4918_v60, %v13392_v59  ;;  %v4639_v20 = vmul.f32 %v12692_v51, %v4638_v35  ;;  %v612_v57 = vadd.f32 %v8428_v5, %v13400_v54  ;;  %v13402_v63 = vld [vmem:[#allocation65_spill] sm:$0xff] }
0x1801   : > { %v5958_v41 = vmul.f32 %v12692_v51, %v5957_v52  ;;  %8405 = vlog2.f32 %v6711_v25  ;;  %v6707_v48 = vmin.f32 %v6706_v61, 0.99  ;;  %v5671_v28 = vmul.f32 %v5670_v58, %v5670_v58  ;;  %v13401_v52 = vld [vmem:[#allocation20_spill] sm:$0xff] }
0x1802   : > { %v4920_v16 = vmul.f32 %v12692_v51, %v4919_v33  ;;  %8407 = vpow2.f32 %v7733_v62  ;;  %v1535_v60 = vadd.f32 %v13401_v52, %v612_v57 }
0x1803   : > { %5960 = vrot.lane.b32.xlu0 %v5958_v41, %s8453_s21  ;;  %v6708_v55 = vsub.f32 1.0, %v6707_v48  ;;  %v5672_v24 = vsub.f32 0.0, %v5671_v28  ;;  %8409 = vlog2.f32 %v13397_v53 }
0x1804   : > { %4922 = vrot.lane.b32.xlu1 %v4920_v16, %s8451_s11  ;;  %v2573_v61 = vadd.f32 %v13402_v63, %v1535_v60 }
0x1805   : > { %v6709_v36 = vmul.f32 %v6708_v55, %v6708_v55 }
0x1806   : > { %v3611_v41 = vadd.f32 %v13403_v56, %v2573_v61  ;;  %v13412_v61 = vld [vmem:[#allocation66_spill] sm:$0xff] }
0x1807   : > { %v6710_v49 = vsub.f32 0.0, %v6709_v36 }
0x1808   : > { %4641 = vrot.lane.b32.xlu1 %v4639_v20, %s8451_s11 }
0x180a   : > { %v8404_v29 = vpop.eup %8403 }
0x180b   : > { %v5675_v46 = vmul.f32 0.6931472, %v8404_v29 }
0x180d   : > { %v5676_v8 = vmul.f32 %v5675_v46, %v5672_v24 }
0x180e   : > { %v8406_v27 = vpop.eup %8405 }
0x180f   : > { %v5677_v2 = vmul.f32 %v12692_v51, %v5676_v8  ;;  %v6713_v17 = vmul.f32 0.6931472, %v8406_v27  ;;  %v8408_v22 = vpop.eup %8407  ;;  %v6994_v30 = vpop.xlane.xlu1 %6993  ;;  %v13404_v8 = vld [vmem:[#allocation47_spill] sm:$0xff] }
0x1810   : > { %v7735_v14 = vsel %vm454_vm4, %v8408_v22, 0.0  ;;  %v6995_v15 = vadd.f32 %v6994_v30, %v6702_v38  ;;  %v8410_v11 = vpop.eup %8409  ;;  %v13407_v22 = vld [vmem:[#allocation50_spill] sm:$0xff] }
0x1811   : > { %5679 = vrot.lane.b32.xlu1 %v5677_v2, %s8453_s21  ;;  %v6714_v19 = vmul.f32 %v6713_v17, %v6710_v49  ;;  %v528_v39 = vmul.f32 0.6931472, %v8410_v11  ;;  %v13405_v2 = vld [vmem:[#allocation62_spill] sm:$0xff] }
0x1812   : > { %v6996_v12 = vmul.f32 %v12692_v51, %v6995_v15 }
0x1813   : > { %v6715_v59 = vmul.f32 %v12692_v51, %v6714_v19  ;;  %v543_v9 = vadd.f32 %v528_v39, %v13398_v13  ;;  %v7875_v51 = vld [vmem:[#allocation2] sm:$0xff]  ;;  %v13406_v19 = vld [vmem:[#allocation61_spill] sm:$0xff] }
0x1815   : > { %6717 = vrot.lane.b32.xlu1 %v6715_v59, %s8452_s20  ;;  %v566_v10 = vsub.f32 %v13399_v50, %v543_v9 }
0x1817   : > { %v567_v32 = vmul.f32 1.442695, %v566_v10 }
0x1819   : > { %8411 = vpow2.f32 %v567_v32  ;;  %v579_v32 = vmul.f32 %v8428_v5, %v13399_v50 }
0x1822   : > { %7736 = vadd.xlane.f32.xlu0 %v7735_v14 }
0x1826   : > { %v8412_v26 = vpop.eup %8411 }
0x1827   : > { %v574_v45 = vadd.f32 1e-08, %v8412_v26  ;;  %v569_v42 = vmax.f32 %v8412_v26, 0.01 }
0x1829   : > { %8413 = vlog2.f32 %v574_v45 }
0x1836   : > { %v8414_v35 = vpop.eup %8413 }
0x1837   : > { %v576_v20 = vmul.f32 0.6931472, %v8414_v35 }
0x1838   : > { %6998 = vrot.lane.b32.xlu0 %v6996_v12, %s8452_s20 }
0x184a   : > { %v7868_v23 = vpop.xlane.xlu0 %7867  ;;  %v7866_v18 = vpop.xlane.xlu1 %7865 }
0x184b   : > { %v7870_v0 = vcvt.f32.s32 %v7868_v23  ;;  %v7869_v40 = vcvt.f32.s32 %v7866_v18  ;;  %v13408_v23 = vld [vmem:[#allocation45_spill] sm:$0xff] }
0x184c   : > { %v896_v18 = vadd.f32 %v13408_v23, %v579_v32 }
0x184d   : > { %v7871_v21 = vshll.u32 %v7870_v0, 16  ;;  %v13409_v0 = vld [vmem:[#allocation44_spill] sm:$0xff] }
0x184e   : > { %v4647_v25 = vpop.permute.xlu1 %4646  ;;  %v5685_v58 = vpop.permute.xlu0 %5684 }
0x184f   : > { %v7872_v38 = vadd.s32 %v7871_v21, %v7869_v40  ;;  %v4649_v16 = vadd.f32 %v4647_v25, %v3611_v41  ;;  %v1811_v21 = vadd.f32 %v13409_v0, %v896_v18  ;;  %v13410_v40 = vld [vmem:[#allocation38_spill] sm:$0xff] }
0x1851   : > { %vm7876_vm1 = vcmp.eq.s32.totalorder %v13212_v4, %v7872_v38  ;;  %v12730_v34 = vsel %vm7873_vm0, %v7872_v38, %v12684_v47  ;;  %v570_v47 = vmin.f32 %v569_v42, 0.99  ;;  %v5687_v28 = vadd.f32 %v5685_v58, %v4649_v16 }
0x1852   : > { %v7877_v43 = vsel %vm7876_vm1, %v7875_v51, 0  ;;  %v6723_v55 = vpop.permute.xlu1 %6722  ;;  %v2849_v38 = vadd.f32 %v13410_v40, %v1811_v21  ;;  %v13411_v51 = vld [vmem:[#allocation70_spill] sm:$0xff] }
0x1853   : > { %v7878_v3 = vsel %vm454_vm4, %v7877_v43, 0  ;;  %v571_v33 = vsub.f32 1.0, %v570_v47  ;;  %v6725_v24 = vadd.f32 %v6723_v55, %v5687_v28 }
0x1854   : > { %v7880_v44 = vshrl.u32 %v7878_v3, 16  ;;  %v7879_v37 = vand.u32 65535, %v7878_v3  ;;  %v3887_v43 = vadd.f32 %v13411_v51, %v2849_v38 }
0x1855   : > { %v572_v48 = vmul.f32 %v571_v33, %v571_v33  ;;  %v7742_v36 = vmax.f32 %v6725_v24, 1e-09 }
0x1856   : > { %v7882_v31 = vcvt.s32.f32 %v7880_v44  ;;  %v7881_v7 = vcvt.s32.f32 %v7879_v37 }
0x1857   : > { %v573_v1 = vsub.f32 0.0, %v572_v48  ;;  %8415 = vrcp.f32 %v7742_v36 }
0x1858   : > { %7885 = vadd.xlane.f32.xlu0 %v7882_v31  ;;  %7883 = vadd.xlane.f32.xlu1 %v7881_v7 }
0x1859   : > { %v577_v29 = vmul.f32 %v576_v20, %v573_v1 }
0x185b   : > { %v578_v46 = vmul.f32 %v8428_v5, %v577_v29 }
0x185d   : > { %v607_v27 = vadd.f32 %v13404_v8, %v578_v46 }
0x185f   : > { %v1530_v49 = vadd.f32 %v13405_v2, %v607_v27 }
0x1861   : > { %v2568_v59 = vadd.f32 %v13406_v19, %v1530_v49 }
0x1863   : > { %v3606_v14 = vadd.f32 %v13407_v22, %v2568_v59 }
0x1864   : > { %v8416_v39 = vpop.eup %8415 }
0x1875   : > { %v5961_v9 = vpop.permute.xlu0 %5960 }
0x1876   : > { %v4923_v62 = vpop.permute.xlu1 %4922 }
0x1877   : > { %v4925_v3 = vadd.f32 %v4923_v62, %v3887_v43 }
0x1879   : > { %v5963_v7 = vadd.f32 %v5961_v9, %v4925_v3 }
0x187a   : > { %v4642_v17 = vpop.permute.xlu1 %4641 }
0x187b   : > { %v4644_v30 = vadd.f32 %v4642_v17, %v3606_v14 }
0x1883   : > { %v5680_v53 = vpop.permute.xlu1 %5679 }
0x1884   : > { %v5682_v15 = vadd.f32 %v5680_v53, %v4644_v30 }
0x1887   : > { %v6718_v12 = vpop.permute.xlu1 %6717 }
0x1888   : > { %v6720_v11 = vadd.f32 %v6718_v12, %v5682_v15 }
0x188a   : > { %v7744_v13 = vmul.f32 %v8416_v39, %v6720_v11 }
0x188c   : > { %7902 = vperm.xlu1 %8117, %v7744_v13  }
0x18ab   : > { %v7737_v10 = vpop.xlane.xlu0 %7736 }
0x18ac   : > { %8417 = vlog2.f32 %v7737_v10 }
0x18af   : > { %v6999_v37 = vpop.permute.xlu0 %6998 }
0x18b0   : > { %v7001_v45 = vadd.f32 %v6999_v37, %v5963_v7 }
0x18b9   : > { %v8418_v44 = vpop.eup %8417 }
0x18ba   : > { %v7739_v31 = vmul.f32 0.6931472, %v8418_v44 }
0x18bc   : > { %v7740_v26 = vadd.f32 %v7739_v31, %v12702_v6 }
0x18be   : > { %v7741_v50 = vsub.f32 %v7001_v45, %v7740_v26 }
0x18c0   : > { %7896 = vperm.xlu0 %8118, %v7741_v50  }
0x18e1   : > { %v7886_v5 = vpop.xlane.xlu0 %7885  ;;  %v7884_v54 = vpop.xlane.xlu1 %7883 }
0x18e2   : > { %v7888_v57 = vcvt.f32.s32 %v7886_v5  ;;  %v7887_v52 = vcvt.f32.s32 %v7884_v54 }
0x18e4   : > { %v7889_v42 = vshll.u32 %v7888_v57, 16 }
0x18e6   : > { %v7890_v60 = vadd.s32 %v7889_v42, %v7887_v52 }
0x18e8   : > { %v7892_v47 = vsel %vm7891_vm2, %v7890_v60, %v12730_v34 }
0x18e9   : > { %7893 = vst.msk [vmem:[%s323_s23] sm:$0xff] %vm454_vm4, %v7892_v47 }
0x1907   : > { %v7903_v63 = vpop.permute.xlu1 %7902 }
0x193b   : > { %v7897_v6 = vpop.permute.xlu0 %7896 }
0x193c   : > { %v7899_v25 = vsel %vm7873_vm0, %v7897_v6, %v13412_v61 }
0x193d   : > { %v7905_v33 = vsel %vm7891_vm2, %v7903_v63, %v7899_v25 }
0x193e   : > { %7907 = vst.msk [vmem:[%s319_s27] sm:$0xff] %vm7906_vm3, %v7905_v33 }
0x193f PF: > { %s18_s24 = sadd.s32 1, %s8435_s24  }
0x1940   : > { %p15_p5 = scmp.ge.s32.totalorder %s18_s24, 4  }
0x1942   :  { %17 = sbr.rel (!%p15_p5) target bundleno = 1 (0x1), region = 98 }

</bundles_post_ra>
